<compile_context>
chip_gen: v5e
topology: v5e:2x2
jax: 0.10.0
libtpu: 0.0.40
codegen_flags: <defaults>
</compile_context>

<pallas_src>
import numpy as np

import jax
import jax.numpy as jnp
from jax import lax
from jax.experimental import pallas as pl
from jax.experimental.pallas import tpu as pltpu

C = 128  # lane padding for every channel / feature axis


# --------------------- host-side constant gather matrices ------------------- #

def _pool_phase_mats(h, w):
    """(4, (h//2)*(w//2), h*w) 0/1 matrices: phase k of a 2x2/stride-2 max pool."""
    ph, pw = h // 2, w // 2
    m = np.zeros((4, ph * pw, h * w), np.float32)
    for dy in range(2):
        for dx in range(2):
            k = dy * 2 + dx
            for a in range(ph):
                for b in range(pw):
                    m[k, a * pw + b, (2 * a + dy) * w + (2 * b + dx)] = 1.0
    return m


def _conv_gather_mats(hin, win, ksize):
    """(k*k, hout*wout, hin*win) 0/1 matrices: row gather for tap (i,j) of a VALID conv."""
    ho, wo = hin - ksize + 1, win - ksize + 1
    g = np.zeros((ksize * ksize, ho * wo, hin * win), np.float32)
    for i in range(ksize):
        for j in range(ksize):
            k = i * ksize + j
            for a in range(ho):
                for b in range(wo):
                    g[k, a * wo + b, (a + i) * win + (b + j)] = 1.0
    return g


# ------------------------------ fused kernel -------------------------------- #

def _net_kernel(cols1_ref, w1_ref, b1_ref, p1m_ref, g2_ref, w2_ref, b2_ref,
                p2m_ref, wfc1_ref, bfc1_ref, wfc2_ref, bfc2_ref, out_ref):
    f32, bf16 = jnp.float32, jnp.bfloat16

    # ---- conv1: (576, 32) @ (32, 128) + bias  (K padded 25->32, Cout padded 10->128)
    y1 = jnp.dot(cols1_ref[0], w1_ref[...], preferred_element_type=f32) + b1_ref[...]

    # ---- maxpool 2x2 + relu on the 24x24 spatial rows (selection matmuls + max)
    y1b = y1.astype(bf16)
    ph1 = [jnp.dot(p1m_ref[k], y1b, preferred_element_type=f32) for k in range(4)]
    p1 = jnp.maximum(jnp.maximum(ph1[0], ph1[1]), jnp.maximum(ph1[2], ph1[3]))
    p1 = jnp.maximum(p1, 0.0).astype(bf16)                      # (144, 128)

    # ---- conv2: in-kernel im2col via 25 row-gather matmuls, accumulated in f32
    acc = jnp.zeros((64, C), f32) + b2_ref[...]
    for k in range(25):
        gk = jnp.dot(g2_ref[k], p1, preferred_element_type=f32).astype(bf16)   # (64, 128)
        acc = acc + jnp.dot(gk, w2_ref[k], preferred_element_type=f32)
    # TODO(synk): nn.Dropout2d after conv2 is a training-mode RNG op; identity at inference.

    # ---- maxpool 2x2 + relu on the 8x8 spatial rows
    y2b = acc.astype(bf16)
    ph2 = [jnp.dot(p2m_ref[k], y2b, preferred_element_type=f32) for k in range(4)]
    p2 = jnp.maximum(jnp.maximum(ph2[0], ph2[1]), jnp.maximum(ph2[2], ph2[3]))
    p2 = jnp.maximum(p2, 0.0).astype(bf16)                      # (16, 128)

    # ---- fc1 (+relu): contraction over 16 spatial rows x 128 channel lanes; the
    #      weight was pre-permuted so torch's view(-1, 320) order is respected.
    h1 = jnp.zeros((1, C), f32) + bfc1_ref[...]
    for r in range(16):
        h1 = h1 + jnp.dot(p2[r:r + 1, :], wfc1_ref[r], preferred_element_type=f32)
    h1 = jnp.maximum(h1, 0.0)
    # TODO(synk): F.dropout before fc2 is a training-mode RNG op; identity at inference.

    # ---- fc2 + numerically stable log_softmax over the 10 real classes
    logits = jnp.dot(h1.astype(bf16), wfc2_ref[...],
                     preferred_element_type=f32) + bfc2_ref[...]
    lane = lax.broadcasted_iota(jnp.int32, (1, C), 1)
    logits = jnp.where(lane < 10, logits, -1e30)                # mask padded lanes
    m = jnp.max(logits, axis=-1, keepdims=True)
    z = logits - m
    lse = jnp.log(jnp.sum(jnp.exp(z), axis=-1, keepdims=True))
    out_ref[0] = z - lse                                        # lane-dense (1, 128) store


# ------------------------------ wrapper / packing --------------------------- #

def init_params(key):
    """PyTorch-convention params with uniform(-1/sqrt(fan_in), 1/sqrt(fan_in)) init."""
    ks = jax.random.split(key, 8)

    def u(k, shape, fan_in):
        b = 1.0 / jnp.sqrt(jnp.float32(fan_in))
        return jax.random.uniform(k, shape, jnp.float32, -b, b)

    return {
        "w_conv1": u(ks[0], (10, 1, 5, 5), 25), "b_conv1": u(ks[1], (10,), 25),
        "w_conv2": u(ks[2], (20, 10, 5, 5), 250), "b_conv2": u(ks[3], (20,), 250),
        "w_fc1": u(ks[4], (50, 320), 320), "b_fc1": u(ks[5], (50,), 320),
        "w_fc2": u(ks[6], (10, 50), 50), "b_fc2": u(ks[7], (10,), 50),
    }


def pack_params(params):
    """One-time repacking of weights into lane-dense (128-padded) kernel operands."""
    f32, bf16 = jnp.float32, jnp.bfloat16

    w1 = jnp.zeros((32, C), f32).at[:25, :10].set(
        params["w_conv1"][:, 0].transpose(1, 2, 0).reshape(25, 10))       # [k, cout]
    b1 = jnp.zeros((1, C), f32).at[0, :10].set(params["b_conv1"])

    w2 = jnp.zeros((25, C, C), f32).at[:, :10, :20].set(
        params["w_conv2"].transpose(2, 3, 1, 0).reshape(25, 10, 20))      # [k, cin, cout]
    b2 = jnp.zeros((1, C), f32).at[0, :20].set(params["b_conv2"])

    # fc1: torch flatten index = c*16 + (h*4 + w); kernel layout is row r = h*4+w, lane c.
    wf1 = params["w_fc1"].reshape(50, 20, 16).transpose(2, 1, 0)          # [r, c, f]
    wfc1 = jnp.zeros((16, C, C), f32).at[:, :20, :50].set(wf1)
    bfc1 = jnp.zeros((1, C), f32).at[0, :50].set(params["b_fc1"])

    wfc2 = jnp.zeros((C, C), f32).at[:50, :10].set(params["w_fc2"].T)     # [f, o]
    bfc2 = jnp.zeros((1, C), f32).at[0, :10].set(params["b_fc2"])

    return {
        "w1": w1.astype(bf16), "b1": b1,
        "p1m": jnp.asarray(_pool_phase_mats(24, 24), bf16),
        "g2": jnp.asarray(_conv_gather_mats(12, 12, 5), bf16),
        "w2": w2.astype(bf16), "b2": b2,
        "p2m": jnp.asarray(_pool_phase_mats(8, 8), bf16),
        "wfc1": wfc1.astype(bf16), "bfc1": bfc1,
        "wfc2": wfc2.astype(bf16), "bfc2": bfc2,
    }


def net_forward(packed, x_nchw):
    n = x_nchw.shape[0]

    # conv1 im2col (Cin=1) stays in the wrapper: (N, 576, 32) bf16, ~36 KB / image.
    x2d = x_nchw[:, 0]                                           # (N, 28, 28)
    patches = [x2d[:, i:i + 24, j:j + 24] for i in range(5) for j in range(5)]
    cols1 = jnp.stack(patches, axis=-1).reshape(n, 576, 25)
    cols1 = jnp.pad(cols1, ((0, 0), (0, 0), (0, 7))).astype(jnp.bfloat16)

    const3 = lambda b: (0, 0, 0)
    const2 = lambda b: (0, 0)
    out = pl.pallas_call(
        _net_kernel,
        out_shape=jax.ShapeDtypeStruct((n, 1, C), jnp.float32),
        grid=(n,),
        in_specs=[
            pl.BlockSpec((1, 576, 32), lambda b: (b, 0, 0)),     # cols1 (per image)
            pl.BlockSpec((32, C), const2),                       # w1
            pl.BlockSpec((1, C), const2),                        # b1
            pl.BlockSpec((4, 144, 576), const3),                 # pool1 phase mats
            pl.BlockSpec((25, 64, 144), const3),                 # conv2 gather mats
            pl.BlockSpec((25, C, C), const3),                    # w2
            pl.BlockSpec((1, C), const2),                        # b2
            pl.BlockSpec((4, 16, 64), const3),                   # pool2 phase mats
            pl.BlockSpec((16, C, C), const3),                    # wfc1 (pre-permuted)
            pl.BlockSpec((1, C), const2),                        # bfc1
            pl.BlockSpec((C, C), const2),                        # wfc2
            pl.BlockSpec((1, C), const2),                        # bfc2
        ],
        out_specs=pl.BlockSpec((1, 1, C), lambda b: (b, 0, 0)),
        compiler_params=pltpu.CompilerParams(
            dimension_semantics=("parallel",),                   # megacore over batch
            vmem_limit_bytes=32 * 1024 * 1024),
    )(cols1, packed["w1"], packed["b1"], packed["p1m"], packed["g2"],
      packed["w2"], packed["b2"], packed["p2m"], packed["wfc1"],
      packed["bfc1"], packed["wfc2"], packed["bfc2"])

    return out.reshape(n, C)[:, :10]


# ------------------------------ pure-JAX reference -------------------------- #

def reference_forward(params, x):
    dn = ("NCHW", "OIHW", "NCHW")
    n = x.shape[0]
    y = lax.conv_general_dilated(x, params["w_conv1"], (1, 1), "VALID",
                                 dimension_numbers=dn)
    y = y + params["b_conv1"][None, :, None, None]
    y = jnp.maximum(jnp.max(y.reshape(n, 10, 12, 2, 12, 2), axis=(3, 5)), 0.0)
    y = lax.conv_general_dilated(y, params["w_conv2"], (1, 1), "VALID",
                                 dimension_numbers=dn)
    y = y + params["b_conv2"][None, :, None, None]
    y = jnp.maximum(jnp.max(y.reshape(n, 20, 4, 2, 4, 2), axis=(3, 5)), 0.0)
    y = y.reshape(n, 320)
    y = jnp.maximum(y @ params["w_fc1"].T + params["b_fc1"], 0.0)
    y = y @ params["w_fc2"].T + params["b_fc2"]
    return jax.nn.log_softmax(y, axis=-1)


if __name__ == "__main__":
    key = jax.random.PRNGKey(0)
    k_param, k_x = jax.random.split(key)
    params = init_params(k_param)
    x = jax.random.normal(k_x, (2, 1, 28, 28), dtype=jnp.float32)   # MNIST-shaped input

    packed = pack_params(params)
    out = jax.block_until_ready(jax.jit(net_forward)(packed, x))

    assert out.shape == (2, 10)
    # log_softmax rows should exponentiate-sum to ~1
    assert bool(jnp.all(jnp.abs(jnp.sum(jnp.exp(out), axis=-1) - 1.0) < 1e-3))
    # agreement with a pure-JAX f32 reference (bf16 MXU operands -> loose tolerance)
    ref = reference_forward(params, x)
    err = float(jnp.max(jnp.abs(out - ref)))
    assert err < 0.2, f"max |pallas - reference| = {err}"
    print("KERNEL_OK")
</pallas_src>

<mosaic_0001>
module attributes {stable_mosaic.version = 11 : i64} {
  func.func @_net_kernel(%arg0: i32, %arg1: memref<1x576x32xbf16, #tpu.memory_space<vmem>>, %arg2: memref<32x128xbf16, #tpu.memory_space<vmem>>, %arg3: memref<1x128xf32, #tpu.memory_space<vmem>>, %arg4: memref<4x144x576xbf16, #tpu.memory_space<vmem>>, %arg5: memref<25x64x144xbf16, #tpu.memory_space<vmem>>, %arg6: memref<25x128x128xbf16, #tpu.memory_space<vmem>>, %arg7: memref<1x128xf32, #tpu.memory_space<vmem>>, %arg8: memref<4x16x64xbf16, #tpu.memory_space<vmem>>, %arg9: memref<16x128x128xbf16, #tpu.memory_space<vmem>>, %arg10: memref<1x128xf32, #tpu.memory_space<vmem>>, %arg11: memref<128x128xbf16, #tpu.memory_space<vmem>>, %arg12: memref<1x128xf32, #tpu.memory_space<vmem>>, %arg13: memref<1x1x128xf32, #tpu.memory_space<vmem>>) attributes {dimension_semantics = [#tpu.dimension_semantics<parallel>], iteration_bounds = array<i64: 2>, scalar_prefetch = 0 : i64, scratch_operands = 0 : i64, tpu.core_type = #tpu.core_type<tc>, window_params = [{transform_indices = @transform_0, window_bounds = array<i64: 1, 576, 32>}, {pipeline_mode = #tpu.pipeline_mode<synchronous>, transform_indices = @transform_1, window_bounds = array<i64: 32, 128>}, {pipeline_mode = #tpu.pipeline_mode<synchronous>, transform_indices = @transform_2, window_bounds = array<i64: 1, 128>}, {pipeline_mode = #tpu.pipeline_mode<synchronous>, transform_indices = @transform_3, window_bounds = array<i64: 4, 144, 576>}, {pipeline_mode = #tpu.pipeline_mode<synchronous>, transform_indices = @transform_4, window_bounds = array<i64: 25, 64, 144>}, {pipeline_mode = #tpu.pipeline_mode<synchronous>, transform_indices = @transform_5, window_bounds = array<i64: 25, 128, 128>}, {pipeline_mode = #tpu.pipeline_mode<synchronous>, transform_indices = @transform_6, window_bounds = array<i64: 1, 128>}, {pipeline_mode = #tpu.pipeline_mode<synchronous>, transform_indices = @transform_7, window_bounds = array<i64: 4, 16, 64>}, {pipeline_mode = #tpu.pipeline_mode<synchronous>, transform_indices = @transform_8, window_bounds = array<i64: 16, 128, 128>}, {pipeline_mode = #tpu.pipeline_mode<synchronous>, transform_indices = @transform_9, window_bounds = array<i64: 1, 128>}, {pipeline_mode = #tpu.pipeline_mode<synchronous>, transform_indices = @transform_10, window_bounds = array<i64: 128, 128>}, {pipeline_mode = #tpu.pipeline_mode<synchronous>, transform_indices = @transform_11, window_bounds = array<i64: 1, 128>}, {transform_indices = @transform_12, window_bounds = array<i64: 1, 1, 128>}]} {
    %c0 = arith.constant 0 : index
    %c0_0 = arith.constant 0 : index
    %c0_1 = arith.constant 0 : index
    %0 = vector.load %arg1[%c0, %c0_0, %c0_1] : memref<1x576x32xbf16, #tpu.memory_space<vmem>>, vector<1x576x32xbf16>
    %1 = vector.shape_cast %0 : vector<1x576x32xbf16> to vector<576x32xbf16>
    %c0_2 = arith.constant 0 : index
    %c0_3 = arith.constant 0 : index
    %2 = vector.load %arg2[%c0_2, %c0_3] : memref<32x128xbf16, #tpu.memory_space<vmem>>, vector<32x128xbf16>
    %cst = arith.constant dense<0.000000e+00> : vector<576x128xf32>
    %3 = tpu.matmul %1, %2, %cst {dimension_numbers = #tpu.dot_dimension_numbers<[1], [0], [0], [1], [0, 0, 1, 1], [], []>} : vector<576x32xbf16>, vector<32x128xbf16>, vector<576x128xf32> -> vector<576x128xf32>
    %c0_4 = arith.constant 0 : index
    %c0_5 = arith.constant 0 : index
    %4 = vector.load %arg3[%c0_4, %c0_5] : memref<1x128xf32, #tpu.memory_space<vmem>>, vector<1x128xf32>
    %5 = vector.broadcast %4 : vector<1x128xf32> to vector<576x128xf32>
    %6 = arith.addf %3, %5 : vector<576x128xf32>
    %7 = arith.truncf %6 : vector<576x128xf32> to vector<576x128xbf16>
    %c0_6 = arith.constant 0 : index
    %c0_7 = arith.constant 0 : index
    %c0_8 = arith.constant 0 : index
    %8 = vector.load %arg4[%c0_6, %c0_7, %c0_8] : memref<4x144x576xbf16, #tpu.memory_space<vmem>>, vector<1x144x576xbf16>
    %9 = vector.shape_cast %8 : vector<1x144x576xbf16> to vector<144x576xbf16>
    %cst_9 = arith.constant dense<0.000000e+00> : vector<144x128xf32>
    %10 = tpu.matmul %9, %7, %cst_9 {dimension_numbers = #tpu.dot_dimension_numbers<[1], [0], [0], [1], [0, 0, 1, 1], [], []>} : vector<144x576xbf16>, vector<576x128xbf16>, vector<144x128xf32> -> vector<144x128xf32>
    %c1 = arith.constant 1 : index
    %c0_10 = arith.constant 0 : index
    %c0_11 = arith.constant 0 : index
    %11 = vector.load %arg4[%c1, %c0_10, %c0_11] : memref<4x144x576xbf16, #tpu.memory_space<vmem>>, vector<1x144x576xbf16>
    %12 = vector.shape_cast %11 : vector<1x144x576xbf16> to vector<144x576xbf16>
    %cst_12 = arith.constant dense<0.000000e+00> : vector<144x128xf32>
    %13 = tpu.matmul %12, %7, %cst_12 {dimension_numbers = #tpu.dot_dimension_numbers<[1], [0], [0], [1], [0, 0, 1, 1], [], []>} : vector<144x576xbf16>, vector<576x128xbf16>, vector<144x128xf32> -> vector<144x128xf32>
    %c2 = arith.constant 2 : index
    %c0_13 = arith.constant 0 : index
    %c0_14 = arith.constant 0 : index
    %14 = vector.load %arg4[%c2, %c0_13, %c0_14] : memref<4x144x576xbf16, #tpu.memory_space<vmem>>, vector<1x144x576xbf16>
    %15 = vector.shape_cast %14 : vector<1x144x576xbf16> to vector<144x576xbf16>
    %cst_15 = arith.constant dense<0.000000e+00> : vector<144x128xf32>
    %16 = tpu.matmul %15, %7, %cst_15 {dimension_numbers = #tpu.dot_dimension_numbers<[1], [0], [0], [1], [0, 0, 1, 1], [], []>} : vector<144x576xbf16>, vector<576x128xbf16>, vector<144x128xf32> -> vector<144x128xf32>
    %c3 = arith.constant 3 : index
    %c0_16 = arith.constant 0 : index
    %c0_17 = arith.constant 0 : index
    %17 = vector.load %arg4[%c3, %c0_16, %c0_17] : memref<4x144x576xbf16, #tpu.memory_space<vmem>>, vector<1x144x576xbf16>
    %18 = vector.shape_cast %17 : vector<1x144x576xbf16> to vector<144x576xbf16>
    %cst_18 = arith.constant dense<0.000000e+00> : vector<144x128xf32>
    %19 = tpu.matmul %18, %7, %cst_18 {dimension_numbers = #tpu.dot_dimension_numbers<[1], [0], [0], [1], [0, 0, 1, 1], [], []>} : vector<144x576xbf16>, vector<576x128xbf16>, vector<144x128xf32> -> vector<144x128xf32>
    %20 = arith.maximumf %10, %13 : vector<144x128xf32>
    %21 = arith.maximumf %16, %19 : vector<144x128xf32>
    %22 = arith.maximumf %20, %21 : vector<144x128xf32>
    %cst_19 = arith.constant 0.000000e+00 : f32
    %23 = vector.broadcast %cst_19 : f32 to vector<144x128xf32>
    %24 = arith.maximumf %22, %23 : vector<144x128xf32>
    %25 = arith.truncf %24 : vector<144x128xf32> to vector<144x128xbf16>
    %cst_20 = arith.constant 0.000000e+00 : f32
    %26 = vector.broadcast %cst_20 : f32 to vector<64x128xf32>
    %c0_21 = arith.constant 0 : index
    %c0_22 = arith.constant 0 : index
    %27 = vector.load %arg7[%c0_21, %c0_22] : memref<1x128xf32, #tpu.memory_space<vmem>>, vector<1x128xf32>
    %28 = vector.broadcast %27 : vector<1x128xf32> to vector<64x128xf32>
    %29 = arith.addf %26, %28 : vector<64x128xf32>
    %c0_23 = arith.constant 0 : index
    %c0_24 = arith.constant 0 : index
    %c0_25 = arith.constant 0 : index
    %30 = vector.load %arg5[%c0_23, %c0_24, %c0_25] : memref<25x64x144xbf16, #tpu.memory_space<vmem>>, vector<1x64x144xbf16>
    %31 = vector.shape_cast %30 : vector<1x64x144xbf16> to vector<64x144xbf16>
    %cst_26 = arith.constant dense<0.000000e+00> : vector<64x128xf32>
    %32 = tpu.matmul %31, %25, %cst_26 {dimension_numbers = #tpu.dot_dimension_numbers<[1], [0], [0], [1], [0, 0, 1, 1], [], []>} : vector<64x144xbf16>, vector<144x128xbf16>, vector<64x128xf32> -> vector<64x128xf32>
    %33 = arith.truncf %32 : vector<64x128xf32> to vector<64x128xbf16>
    %c0_27 = arith.constant 0 : index
    %c0_28 = arith.constant 0 : index
    %c0_29 = arith.constant 0 : index
    %34 = vector.load %arg6[%c0_27, %c0_28, %c0_29] : memref<25x128x128xbf16, #tpu.memory_space<vmem>>, vector<1x128x128xbf16>
    %35 = vector.shape_cast %34 : vector<1x128x128xbf16> to vector<128x128xbf16>
    %cst_30 = arith.constant dense<0.000000e+00> : vector<64x128xf32>
    %36 = tpu.matmul %33, %35, %cst_30 {dimension_numbers = #tpu.dot_dimension_numbers<[1], [0], [0], [1], [0, 0, 1, 1], [], []>} : vector<64x128xbf16>, vector<128x128xbf16>, vector<64x128xf32> -> vector<64x128xf32>
    %37 = arith.addf %29, %36 : vector<64x128xf32>
    %c1_31 = arith.constant 1 : index
    %c0_32 = arith.constant 0 : index
    %c0_33 = arith.constant 0 : index
    %38 = vector.load %arg5[%c1_31, %c0_32, %c0_33] : memref<25x64x144xbf16, #tpu.memory_space<vmem>>, vector<1x64x144xbf16>
    %39 = vector.shape_cast %38 : vector<1x64x144xbf16> to vector<64x144xbf16>
    %cst_34 = arith.constant dense<0.000000e+00> : vector<64x128xf32>
    %40 = tpu.matmul %39, %25, %cst_34 {dimension_numbers = #tpu.dot_dimension_numbers<[1], [0], [0], [1], [0, 0, 1, 1], [], []>} : vector<64x144xbf16>, vector<144x128xbf16>, vector<64x128xf32> -> vector<64x128xf32>
    %41 = arith.truncf %40 : vector<64x128xf32> to vector<64x128xbf16>
    %c1_35 = arith.constant 1 : index
    %c0_36 = arith.constant 0 : index
    %c0_37 = arith.constant 0 : index
    %42 = vector.load %arg6[%c1_35, %c0_36, %c0_37] : memref<25x128x128xbf16, #tpu.memory_space<vmem>>, vector<1x128x128xbf16>
    %43 = vector.shape_cast %42 : vector<1x128x128xbf16> to vector<128x128xbf16>
    %cst_38 = arith.constant dense<0.000000e+00> : vector<64x128xf32>
    %44 = tpu.matmul %41, %43, %cst_38 {dimension_numbers = #tpu.dot_dimension_numbers<[1], [0], [0], [1], [0, 0, 1, 1], [], []>} : vector<64x128xbf16>, vector<128x128xbf16>, vector<64x128xf32> -> vector<64x128xf32>
    %45 = arith.addf %37, %44 : vector<64x128xf32>
    %c2_39 = arith.constant 2 : index
    %c0_40 = arith.constant 0 : index
    %c0_41 = arith.constant 0 : index
    %46 = vector.load %arg5[%c2_39, %c0_40, %c0_41] : memref<25x64x144xbf16, #tpu.memory_space<vmem>>, vector<1x64x144xbf16>
    %47 = vector.shape_cast %46 : vector<1x64x144xbf16> to vector<64x144xbf16>
    %cst_42 = arith.constant dense<0.000000e+00> : vector<64x128xf32>
    %48 = tpu.matmul %47, %25, %cst_42 {dimension_numbers = #tpu.dot_dimension_numbers<[1], [0], [0], [1], [0, 0, 1, 1], [], []>} : vector<64x144xbf16>, vector<144x128xbf16>, vector<64x128xf32> -> vector<64x128xf32>
    %49 = arith.truncf %48 : vector<64x128xf32> to vector<64x128xbf16>
    %c2_43 = arith.constant 2 : index
    %c0_44 = arith.constant 0 : index
    %c0_45 = arith.constant 0 : index
    %50 = vector.load %arg6[%c2_43, %c0_44, %c0_45] : memref<25x128x128xbf16, #tpu.memory_space<vmem>>, vector<1x128x128xbf16>
    %51 = vector.shape_cast %50 : vector<1x128x128xbf16> to vector<128x128xbf16>
    %cst_46 = arith.constant dense<0.000000e+00> : vector<64x128xf32>
    %52 = tpu.matmul %49, %51, %cst_46 {dimension_numbers = #tpu.dot_dimension_numbers<[1], [0], [0], [1], [0, 0, 1, 1], [], []>} : vector<64x128xbf16>, vector<128x128xbf16>, vector<64x128xf32> -> vector<64x128xf32>
    %53 = arith.addf %45, %52 : vector<64x128xf32>
    %c3_47 = arith.constant 3 : index
    %c0_48 = arith.constant 0 : index
    %c0_49 = arith.constant 0 : index
    %54 = vector.load %arg5[%c3_47, %c0_48, %c0_49] : memref<25x64x144xbf16, #tpu.memory_space<vmem>>, vector<1x64x144xbf16>
    %55 = vector.shape_cast %54 : vector<1x64x144xbf16> to vector<64x144xbf16>
    %cst_50 = arith.constant dense<0.000000e+00> : vector<64x128xf32>
    %56 = tpu.matmul %55, %25, %cst_50 {dimension_numbers = #tpu.dot_dimension_numbers<[1], [0], [0], [1], [0, 0, 1, 1], [], []>} : vector<64x144xbf16>, vector<144x128xbf16>, vector<64x128xf32> -> vector<64x128xf32>
    %57 = arith.truncf %56 : vector<64x128xf32> to vector<64x128xbf16>
    %c3_51 = arith.constant 3 : index
    %c0_52 = arith.constant 0 : index
    %c0_53 = arith.constant 0 : index
    %58 = vector.load %arg6[%c3_51, %c0_52, %c0_53] : memref<25x128x128xbf16, #tpu.memory_space<vmem>>, vector<1x128x128xbf16>
    %59 = vector.shape_cast %58 : vector<1x128x128xbf16> to vector<128x128xbf16>
    %cst_54 = arith.constant dense<0.000000e+00> : vector<64x128xf32>
    %60 = tpu.matmul %57, %59, %cst_54 {dimension_numbers = #tpu.dot_dimension_numbers<[1], [0], [0], [1], [0, 0, 1, 1], [], []>} : vector<64x128xbf16>, vector<128x128xbf16>, vector<64x128xf32> -> vector<64x128xf32>
    %61 = arith.addf %53, %60 : vector<64x128xf32>
    %c4 = arith.constant 4 : index
    %c0_55 = arith.constant 0 : index
    %c0_56 = arith.constant 0 : index
    %62 = vector.load %arg5[%c4, %c0_55, %c0_56] : memref<25x64x144xbf16, #tpu.memory_space<vmem>>, vector<1x64x144xbf16>
    %63 = vector.shape_cast %62 : vector<1x64x144xbf16> to vector<64x144xbf16>
    %cst_57 = arith.constant dense<0.000000e+00> : vector<64x128xf32>
    %64 = tpu.matmul %63, %25, %cst_57 {dimension_numbers = #tpu.dot_dimension_numbers<[1], [0], [0], [1], [0, 0, 1, 1], [], []>} : vector<64x144xbf16>, vector<144x128xbf16>, vector<64x128xf32> -> vector<64x128xf32>
    %65 = arith.truncf %64 : vector<64x128xf32> to vector<64x128xbf16>
    %c4_58 = arith.constant 4 : index
    %c0_59 = arith.constant 0 : index
    %c0_60 = arith.constant 0 : index
    %66 = vector.load %arg6[%c4_58, %c0_59, %c0_60] : memref<25x128x128xbf16, #tpu.memory_space<vmem>>, vector<1x128x128xbf16>
    %67 = vector.shape_cast %66 : vector<1x128x128xbf16> to vector<128x128xbf16>
    %cst_61 = arith.constant dense<0.000000e+00> : vector<64x128xf32>
    %68 = tpu.matmul %65, %67, %cst_61 {dimension_numbers = #tpu.dot_dimension_numbers<[1], [0], [0], [1], [0, 0, 1, 1], [], []>} : vector<64x128xbf16>, vector<128x128xbf16>, vector<64x128xf32> -> vector<64x128xf32>
    %69 = arith.addf %61, %68 : vector<64x128xf32>
    %c5 = arith.constant 5 : index
    %c0_62 = arith.constant 0 : index
    %c0_63 = arith.constant 0 : index
    %70 = vector.load %arg5[%c5, %c0_62, %c0_63] : memref<25x64x144xbf16, #tpu.memory_space<vmem>>, vector<1x64x144xbf16>
    %71 = vector.shape_cast %70 : vector<1x64x144xbf16> to vector<64x144xbf16>
    %cst_64 = arith.constant dense<0.000000e+00> : vector<64x128xf32>
    %72 = tpu.matmul %71, %25, %cst_64 {dimension_numbers = #tpu.dot_dimension_numbers<[1], [0], [0], [1], [0, 0, 1, 1], [], []>} : vector<64x144xbf16>, vector<144x128xbf16>, vector<64x128xf32> -> vector<64x128xf32>
    %73 = arith.truncf %72 : vector<64x128xf32> to vector<64x128xbf16>
    %c5_65 = arith.constant 5 : index
    %c0_66 = arith.constant 0 : index
    %c0_67 = arith.constant 0 : index
    %74 = vector.load %arg6[%c5_65, %c0_66, %c0_67] : memref<25x128x128xbf16, #tpu.memory_space<vmem>>, vector<1x128x128xbf16>
    %75 = vector.shape_cast %74 : vector<1x128x128xbf16> to vector<128x128xbf16>
    %cst_68 = arith.constant dense<0.000000e+00> : vector<64x128xf32>
    %76 = tpu.matmul %73, %75, %cst_68 {dimension_numbers = #tpu.dot_dimension_numbers<[1], [0], [0], [1], [0, 0, 1, 1], [], []>} : vector<64x128xbf16>, vector<128x128xbf16>, vector<64x128xf32> -> vector<64x128xf32>
    %77 = arith.addf %69, %76 : vector<64x128xf32>
    %c6 = arith.constant 6 : index
    %c0_69 = arith.constant 0 : index
    %c0_70 = arith.constant 0 : index
    %78 = vector.load %arg5[%c6, %c0_69, %c0_70] : memref<25x64x144xbf16, #tpu.memory_space<vmem>>, vector<1x64x144xbf16>
    %79 = vector.shape_cast %78 : vector<1x64x144xbf16> to vector<64x144xbf16>
    %cst_71 = arith.constant dense<0.000000e+00> : vector<64x128xf32>
    %80 = tpu.matmul %79, %25, %cst_71 {dimension_numbers = #tpu.dot_dimension_numbers<[1], [0], [0], [1], [0, 0, 1, 1], [], []>} : vector<64x144xbf16>, vector<144x128xbf16>, vector<64x128xf32> -> vector<64x128xf32>
    %81 = arith.truncf %80 : vector<64x128xf32> to vector<64x128xbf16>
    %c6_72 = arith.constant 6 : index
    %c0_73 = arith.constant 0 : index
    %c0_74 = arith.constant 0 : index
    %82 = vector.load %arg6[%c6_72, %c0_73, %c0_74] : memref<25x128x128xbf16, #tpu.memory_space<vmem>>, vector<1x128x128xbf16>
    %83 = vector.shape_cast %82 : vector<1x128x128xbf16> to vector<128x128xbf16>
    %cst_75 = arith.constant dense<0.000000e+00> : vector<64x128xf32>
    %84 = tpu.matmul %81, %83, %cst_75 {dimension_numbers = #tpu.dot_dimension_numbers<[1], [0], [0], [1], [0, 0, 1, 1], [], []>} : vector<64x128xbf16>, vector<128x128xbf16>, vector<64x128xf32> -> vector<64x128xf32>
    %85 = arith.addf %77, %84 : vector<64x128xf32>
    %c7 = arith.constant 7 : index
    %c0_76 = arith.constant 0 : index
    %c0_77 = arith.constant 0 : index
    %86 = vector.load %arg5[%c7, %c0_76, %c0_77] : memref<25x64x144xbf16, #tpu.memory_space<vmem>>, vector<1x64x144xbf16>
    %87 = vector.shape_cast %86 : vector<1x64x144xbf16> to vector<64x144xbf16>
    %cst_78 = arith.constant dense<0.000000e+00> : vector<64x128xf32>
    %88 = tpu.matmul %87, %25, %cst_78 {dimension_numbers = #tpu.dot_dimension_numbers<[1], [0], [0], [1], [0, 0, 1, 1], [], []>} : vector<64x144xbf16>, vector<144x128xbf16>, vector<64x128xf32> -> vector<64x128xf32>
    %89 = arith.truncf %88 : vector<64x128xf32> to vector<64x128xbf16>
    %c7_79 = arith.constant 7 : index
    %c0_80 = arith.constant 0 : index
    %c0_81 = arith.constant 0 : index
    %90 = vector.load %arg6[%c7_79, %c0_80, %c0_81] : memref<25x128x128xbf16, #tpu.memory_space<vmem>>, vector<1x128x128xbf16>
    %91 = vector.shape_cast %90 : vector<1x128x128xbf16> to vector<128x128xbf16>
    %cst_82 = arith.constant dense<0.000000e+00> : vector<64x128xf32>
    %92 = tpu.matmul %89, %91, %cst_82 {dimension_numbers = #tpu.dot_dimension_numbers<[1], [0], [0], [1], [0, 0, 1, 1], [], []>} : vector<64x128xbf16>, vector<128x128xbf16>, vector<64x128xf32> -> vector<64x128xf32>
    %93 = arith.addf %85, %92 : vector<64x128xf32>
    %c8 = arith.constant 8 : index
    %c0_83 = arith.constant 0 : index
    %c0_84 = arith.constant 0 : index
    %94 = vector.load %arg5[%c8, %c0_83, %c0_84] : memref<25x64x144xbf16, #tpu.memory_space<vmem>>, vector<1x64x144xbf16>
    %95 = vector.shape_cast %94 : vector<1x64x144xbf16> to vector<64x144xbf16>
    %cst_85 = arith.constant dense<0.000000e+00> : vector<64x128xf32>
    %96 = tpu.matmul %95, %25, %cst_85 {dimension_numbers = #tpu.dot_dimension_numbers<[1], [0], [0], [1], [0, 0, 1, 1], [], []>} : vector<64x144xbf16>, vector<144x128xbf16>, vector<64x128xf32> -> vector<64x128xf32>
    %97 = arith.truncf %96 : vector<64x128xf32> to vector<64x128xbf16>
    %c8_86 = arith.constant 8 : index
    %c0_87 = arith.constant 0 : index
    %c0_88 = arith.constant 0 : index
    %98 = vector.load %arg6[%c8_86, %c0_87, %c0_88] : memref<25x128x128xbf16, #tpu.memory_space<vmem>>, vector<1x128x128xbf16>
    %99 = vector.shape_cast %98 : vector<1x128x128xbf16> to vector<128x128xbf16>
    %cst_89 = arith.constant dense<0.000000e+00> : vector<64x128xf32>
    %100 = tpu.matmul %97, %99, %cst_89 {dimension_numbers = #tpu.dot_dimension_numbers<[1], [0], [0], [1], [0, 0, 1, 1], [], []>} : vector<64x128xbf16>, vector<128x128xbf16>, vector<64x128xf32> -> vector<64x128xf32>
    %101 = arith.addf %93, %100 : vector<64x128xf32>
    %c9 = arith.constant 9 : index
    %c0_90 = arith.constant 0 : index
    %c0_91 = arith.constant 0 : index
    %102 = vector.load %arg5[%c9, %c0_90, %c0_91] : memref<25x64x144xbf16, #tpu.memory_space<vmem>>, vector<1x64x144xbf16>
    %103 = vector.shape_cast %102 : vector<1x64x144xbf16> to vector<64x144xbf16>
    %cst_92 = arith.constant dense<0.000000e+00> : vector<64x128xf32>
    %104 = tpu.matmul %103, %25, %cst_92 {dimension_numbers = #tpu.dot_dimension_numbers<[1], [0], [0], [1], [0, 0, 1, 1], [], []>} : vector<64x144xbf16>, vector<144x128xbf16>, vector<64x128xf32> -> vector<64x128xf32>
    %105 = arith.truncf %104 : vector<64x128xf32> to vector<64x128xbf16>
    %c9_93 = arith.constant 9 : index
    %c0_94 = arith.constant 0 : index
    %c0_95 = arith.constant 0 : index
    %106 = vector.load %arg6[%c9_93, %c0_94, %c0_95] : memref<25x128x128xbf16, #tpu.memory_space<vmem>>, vector<1x128x128xbf16>
    %107 = vector.shape_cast %106 : vector<1x128x128xbf16> to vector<128x128xbf16>
    %cst_96 = arith.constant dense<0.000000e+00> : vector<64x128xf32>
    %108 = tpu.matmul %105, %107, %cst_96 {dimension_numbers = #tpu.dot_dimension_numbers<[1], [0], [0], [1], [0, 0, 1, 1], [], []>} : vector<64x128xbf16>, vector<128x128xbf16>, vector<64x128xf32> -> vector<64x128xf32>
    %109 = arith.addf %101, %108 : vector<64x128xf32>
    %c10 = arith.constant 10 : index
    %c0_97 = arith.constant 0 : index
    %c0_98 = arith.constant 0 : index
    %110 = vector.load %arg5[%c10, %c0_97, %c0_98] : memref<25x64x144xbf16, #tpu.memory_space<vmem>>, vector<1x64x144xbf16>
    %111 = vector.shape_cast %110 : vector<1x64x144xbf16> to vector<64x144xbf16>
    %cst_99 = arith.constant dense<0.000000e+00> : vector<64x128xf32>
    %112 = tpu.matmul %111, %25, %cst_99 {dimension_numbers = #tpu.dot_dimension_numbers<[1], [0], [0], [1], [0, 0, 1, 1], [], []>} : vector<64x144xbf16>, vector<144x128xbf16>, vector<64x128xf32> -> vector<64x128xf32>
    %113 = arith.truncf %112 : vector<64x128xf32> to vector<64x128xbf16>
    %c10_100 = arith.constant 10 : index
    %c0_101 = arith.constant 0 : index
    %c0_102 = arith.constant 0 : index
    %114 = vector.load %arg6[%c10_100, %c0_101, %c0_102] : memref<25x128x128xbf16, #tpu.memory_space<vmem>>, vector<1x128x128xbf16>
    %115 = vector.shape_cast %114 : vector<1x128x128xbf16> to vector<128x128xbf16>
    %cst_103 = arith.constant dense<0.000000e+00> : vector<64x128xf32>
    %116 = tpu.matmul %113, %115, %cst_103 {dimension_numbers = #tpu.dot_dimension_numbers<[1], [0], [0], [1], [0, 0, 1, 1], [], []>} : vector<64x128xbf16>, vector<128x128xbf16>, vector<64x128xf32> -> vector<64x128xf32>
    %117 = arith.addf %109, %116 : vector<64x128xf32>
    %c11 = arith.constant 11 : index
    %c0_104 = arith.constant 0 : index
    %c0_105 = arith.constant 0 : index
    %118 = vector.load %arg5[%c11, %c0_104, %c0_105] : memref<25x64x144xbf16, #tpu.memory_space<vmem>>, vector<1x64x144xbf16>
    %119 = vector.shape_cast %118 : vector<1x64x144xbf16> to vector<64x144xbf16>
    %cst_106 = arith.constant dense<0.000000e+00> : vector<64x128xf32>
    %120 = tpu.matmul %119, %25, %cst_106 {dimension_numbers = #tpu.dot_dimension_numbers<[1], [0], [0], [1], [0, 0, 1, 1], [], []>} : vector<64x144xbf16>, vector<144x128xbf16>, vector<64x128xf32> -> vector<64x128xf32>
    %121 = arith.truncf %120 : vector<64x128xf32> to vector<64x128xbf16>
    %c11_107 = arith.constant 11 : index
    %c0_108 = arith.constant 0 : index
    %c0_109 = arith.constant 0 : index
    %122 = vector.load %arg6[%c11_107, %c0_108, %c0_109] : memref<25x128x128xbf16, #tpu.memory_space<vmem>>, vector<1x128x128xbf16>
    %123 = vector.shape_cast %122 : vector<1x128x128xbf16> to vector<128x128xbf16>
    %cst_110 = arith.constant dense<0.000000e+00> : vector<64x128xf32>
    %124 = tpu.matmul %121, %123, %cst_110 {dimension_numbers = #tpu.dot_dimension_numbers<[1], [0], [0], [1], [0, 0, 1, 1], [], []>} : vector<64x128xbf16>, vector<128x128xbf16>, vector<64x128xf32> -> vector<64x128xf32>
    %125 = arith.addf %117, %124 : vector<64x128xf32>
    %c12 = arith.constant 12 : index
    %c0_111 = arith.constant 0 : index
    %c0_112 = arith.constant 0 : index
    %126 = vector.load %arg5[%c12, %c0_111, %c0_112] : memref<25x64x144xbf16, #tpu.memory_space<vmem>>, vector<1x64x144xbf16>
    %127 = vector.shape_cast %126 : vector<1x64x144xbf16> to vector<64x144xbf16>
    %cst_113 = arith.constant dense<0.000000e+00> : vector<64x128xf32>
    %128 = tpu.matmul %127, %25, %cst_113 {dimension_numbers = #tpu.dot_dimension_numbers<[1], [0], [0], [1], [0, 0, 1, 1], [], []>} : vector<64x144xbf16>, vector<144x128xbf16>, vector<64x128xf32> -> vector<64x128xf32>
    %129 = arith.truncf %128 : vector<64x128xf32> to vector<64x128xbf16>
    %c12_114 = arith.constant 12 : index
    %c0_115 = arith.constant 0 : index
    %c0_116 = arith.constant 0 : index
    %130 = vector.load %arg6[%c12_114, %c0_115, %c0_116] : memref<25x128x128xbf16, #tpu.memory_space<vmem>>, vector<1x128x128xbf16>
    %131 = vector.shape_cast %130 : vector<1x128x128xbf16> to vector<128x128xbf16>
    %cst_117 = arith.constant dense<0.000000e+00> : vector<64x128xf32>
    %132 = tpu.matmul %129, %131, %cst_117 {dimension_numbers = #tpu.dot_dimension_numbers<[1], [0], [0], [1], [0, 0, 1, 1], [], []>} : vector<64x128xbf16>, vector<128x128xbf16>, vector<64x128xf32> -> vector<64x128xf32>
    %133 = arith.addf %125, %132 : vector<64x128xf32>
    %c13 = arith.constant 13 : index
    %c0_118 = arith.constant 0 : index
    %c0_119 = arith.constant 0 : index
    %134 = vector.load %arg5[%c13, %c0_118, %c0_119] : memref<25x64x144xbf16, #tpu.memory_space<vmem>>, vector<1x64x144xbf16>
    %135 = vector.shape_cast %134 : vector<1x64x144xbf16> to vector<64x144xbf16>
    %cst_120 = arith.constant dense<0.000000e+00> : vector<64x128xf32>
    %136 = tpu.matmul %135, %25, %cst_120 {dimension_numbers = #tpu.dot_dimension_numbers<[1], [0], [0], [1], [0, 0, 1, 1], [], []>} : vector<64x144xbf16>, vector<144x128xbf16>, vector<64x128xf32> -> vector<64x128xf32>
    %137 = arith.truncf %136 : vector<64x128xf32> to vector<64x128xbf16>
    %c13_121 = arith.constant 13 : index
    %c0_122 = arith.constant 0 : index
    %c0_123 = arith.constant 0 : index
    %138 = vector.load %arg6[%c13_121, %c0_122, %c0_123] : memref<25x128x128xbf16, #tpu.memory_space<vmem>>, vector<1x128x128xbf16>
    %139 = vector.shape_cast %138 : vector<1x128x128xbf16> to vector<128x128xbf16>
    %cst_124 = arith.constant dense<0.000000e+00> : vector<64x128xf32>
    %140 = tpu.matmul %137, %139, %cst_124 {dimension_numbers = #tpu.dot_dimension_numbers<[1], [0], [0], [1], [0, 0, 1, 1], [], []>} : vector<64x128xbf16>, vector<128x128xbf16>, vector<64x128xf32> -> vector<64x128xf32>
    %141 = arith.addf %133, %140 : vector<64x128xf32>
    %c14 = arith.constant 14 : index
    %c0_125 = arith.constant 0 : index
    %c0_126 = arith.constant 0 : index
    %142 = vector.load %arg5[%c14, %c0_125, %c0_126] : memref<25x64x144xbf16, #tpu.memory_space<vmem>>, vector<1x64x144xbf16>
    %143 = vector.shape_cast %142 : vector<1x64x144xbf16> to vector<64x144xbf16>
    %cst_127 = arith.constant dense<0.000000e+00> : vector<64x128xf32>
    %144 = tpu.matmul %143, %25, %cst_127 {dimension_numbers = #tpu.dot_dimension_numbers<[1], [0], [0], [1], [0, 0, 1, 1], [], []>} : vector<64x144xbf16>, vector<144x128xbf16>, vector<64x128xf32> -> vector<64x128xf32>
    %145 = arith.truncf %144 : vector<64x128xf32> to vector<64x128xbf16>
    %c14_128 = arith.constant 14 : index
    %c0_129 = arith.constant 0 : index
    %c0_130 = arith.constant 0 : index
    %146 = vector.load %arg6[%c14_128, %c0_129, %c0_130] : memref<25x128x128xbf16, #tpu.memory_space<vmem>>, vector<1x128x128xbf16>
    %147 = vector.shape_cast %146 : vector<1x128x128xbf16> to vector<128x128xbf16>
    %cst_131 = arith.constant dense<0.000000e+00> : vector<64x128xf32>
    %148 = tpu.matmul %145, %147, %cst_131 {dimension_numbers = #tpu.dot_dimension_numbers<[1], [0], [0], [1], [0, 0, 1, 1], [], []>} : vector<64x128xbf16>, vector<128x128xbf16>, vector<64x128xf32> -> vector<64x128xf32>
    %149 = arith.addf %141, %148 : vector<64x128xf32>
    %c15 = arith.constant 15 : index
    %c0_132 = arith.constant 0 : index
    %c0_133 = arith.constant 0 : index
    %150 = vector.load %arg5[%c15, %c0_132, %c0_133] : memref<25x64x144xbf16, #tpu.memory_space<vmem>>, vector<1x64x144xbf16>
    %151 = vector.shape_cast %150 : vector<1x64x144xbf16> to vector<64x144xbf16>
    %cst_134 = arith.constant dense<0.000000e+00> : vector<64x128xf32>
    %152 = tpu.matmul %151, %25, %cst_134 {dimension_numbers = #tpu.dot_dimension_numbers<[1], [0], [0], [1], [0, 0, 1, 1], [], []>} : vector<64x144xbf16>, vector<144x128xbf16>, vector<64x128xf32> -> vector<64x128xf32>
    %153 = arith.truncf %152 : vector<64x128xf32> to vector<64x128xbf16>
    %c15_135 = arith.constant 15 : index
    %c0_136 = arith.constant 0 : index
    %c0_137 = arith.constant 0 : index
    %154 = vector.load %arg6[%c15_135, %c0_136, %c0_137] : memref<25x128x128xbf16, #tpu.memory_space<vmem>>, vector<1x128x128xbf16>
    %155 = vector.shape_cast %154 : vector<1x128x128xbf16> to vector<128x128xbf16>
    %cst_138 = arith.constant dense<0.000000e+00> : vector<64x128xf32>
    %156 = tpu.matmul %153, %155, %cst_138 {dimension_numbers = #tpu.dot_dimension_numbers<[1], [0], [0], [1], [0, 0, 1, 1], [], []>} : vector<64x128xbf16>, vector<128x128xbf16>, vector<64x128xf32> -> vector<64x128xf32>
    %157 = arith.addf %149, %156 : vector<64x128xf32>
    %c16 = arith.constant 16 : index
    %c0_139 = arith.constant 0 : index
    %c0_140 = arith.constant 0 : index
    %158 = vector.load %arg5[%c16, %c0_139, %c0_140] : memref<25x64x144xbf16, #tpu.memory_space<vmem>>, vector<1x64x144xbf16>
    %159 = vector.shape_cast %158 : vector<1x64x144xbf16> to vector<64x144xbf16>
    %cst_141 = arith.constant dense<0.000000e+00> : vector<64x128xf32>
    %160 = tpu.matmul %159, %25, %cst_141 {dimension_numbers = #tpu.dot_dimension_numbers<[1], [0], [0], [1], [0, 0, 1, 1], [], []>} : vector<64x144xbf16>, vector<144x128xbf16>, vector<64x128xf32> -> vector<64x128xf32>
    %161 = arith.truncf %160 : vector<64x128xf32> to vector<64x128xbf16>
    %c16_142 = arith.constant 16 : index
    %c0_143 = arith.constant 0 : index
    %c0_144 = arith.constant 0 : index
    %162 = vector.load %arg6[%c16_142, %c0_143, %c0_144] : memref<25x128x128xbf16, #tpu.memory_space<vmem>>, vector<1x128x128xbf16>
    %163 = vector.shape_cast %162 : vector<1x128x128xbf16> to vector<128x128xbf16>
    %cst_145 = arith.constant dense<0.000000e+00> : vector<64x128xf32>
    %164 = tpu.matmul %161, %163, %cst_145 {dimension_numbers = #tpu.dot_dimension_numbers<[1], [0], [0], [1], [0, 0, 1, 1], [], []>} : vector<64x128xbf16>, vector<128x128xbf16>, vector<64x128xf32> -> vector<64x128xf32>
    %165 = arith.addf %157, %164 : vector<64x128xf32>
    %c17 = arith.constant 17 : index
    %c0_146 = arith.constant 0 : index
    %c0_147 = arith.constant 0 : index
    %166 = vector.load %arg5[%c17, %c0_146, %c0_147] : memref<25x64x144xbf16, #tpu.memory_space<vmem>>, vector<1x64x144xbf16>
    %167 = vector.shape_cast %166 : vector<1x64x144xbf16> to vector<64x144xbf16>
    %cst_148 = arith.constant dense<0.000000e+00> : vector<64x128xf32>
    %168 = tpu.matmul %167, %25, %cst_148 {dimension_numbers = #tpu.dot_dimension_numbers<[1], [0], [0], [1], [0, 0, 1, 1], [], []>} : vector<64x144xbf16>, vector<144x128xbf16>, vector<64x128xf32> -> vector<64x128xf32>
    %169 = arith.truncf %168 : vector<64x128xf32> to vector<64x128xbf16>
    %c17_149 = arith.constant 17 : index
    %c0_150 = arith.constant 0 : index
    %c0_151 = arith.constant 0 : index
    %170 = vector.load %arg6[%c17_149, %c0_150, %c0_151] : memref<25x128x128xbf16, #tpu.memory_space<vmem>>, vector<1x128x128xbf16>
    %171 = vector.shape_cast %170 : vector<1x128x128xbf16> to vector<128x128xbf16>
    %cst_152 = arith.constant dense<0.000000e+00> : vector<64x128xf32>
    %172 = tpu.matmul %169, %171, %cst_152 {dimension_numbers = #tpu.dot_dimension_numbers<[1], [0], [0], [1], [0, 0, 1, 1], [], []>} : vector<64x128xbf16>, vector<128x128xbf16>, vector<64x128xf32> -> vector<64x128xf32>
    %173 = arith.addf %165, %172 : vector<64x128xf32>
    %c18 = arith.constant 18 : index
    %c0_153 = arith.constant 0 : index
    %c0_154 = arith.constant 0 : index
    %174 = vector.load %arg5[%c18, %c0_153, %c0_154] : memref<25x64x144xbf16, #tpu.memory_space<vmem>>, vector<1x64x144xbf16>
    %175 = vector.shape_cast %174 : vector<1x64x144xbf16> to vector<64x144xbf16>
    %cst_155 = arith.constant dense<0.000000e+00> : vector<64x128xf32>
    %176 = tpu.matmul %175, %25, %cst_155 {dimension_numbers = #tpu.dot_dimension_numbers<[1], [0], [0], [1], [0, 0, 1, 1], [], []>} : vector<64x144xbf16>, vector<144x128xbf16>, vector<64x128xf32> -> vector<64x128xf32>
    %177 = arith.truncf %176 : vector<64x128xf32> to vector<64x128xbf16>
    %c18_156 = arith.constant 18 : index
    %c0_157 = arith.constant 0 : index
    %c0_158 = arith.constant 0 : index
    %178 = vector.load %arg6[%c18_156, %c0_157, %c0_158] : memref<25x128x128xbf16, #tpu.memory_space<vmem>>, vector<1x128x128xbf16>
    %179 = vector.shape_cast %178 : vector<1x128x128xbf16> to vector<128x128xbf16>
    %cst_159 = arith.constant dense<0.000000e+00> : vector<64x128xf32>
    %180 = tpu.matmul %177, %179, %cst_159 {dimension_numbers = #tpu.dot_dimension_numbers<[1], [0], [0], [1], [0, 0, 1, 1], [], []>} : vector<64x128xbf16>, vector<128x128xbf16>, vector<64x128xf32> -> vector<64x128xf32>
    %181 = arith.addf %173, %180 : vector<64x128xf32>
    %c19 = arith.constant 19 : index
    %c0_160 = arith.constant 0 : index
    %c0_161 = arith.constant 0 : index
    %182 = vector.load %arg5[%c19, %c0_160, %c0_161] : memref<25x64x144xbf16, #tpu.memory_space<vmem>>, vector<1x64x144xbf16>
    %183 = vector.shape_cast %182 : vector<1x64x144xbf16> to vector<64x144xbf16>
    %cst_162 = arith.constant dense<0.000000e+00> : vector<64x128xf32>
    %184 = tpu.matmul %183, %25, %cst_162 {dimension_numbers = #tpu.dot_dimension_numbers<[1], [0], [0], [1], [0, 0, 1, 1], [], []>} : vector<64x144xbf16>, vector<144x128xbf16>, vector<64x128xf32> -> vector<64x128xf32>
    %185 = arith.truncf %184 : vector<64x128xf32> to vector<64x128xbf16>
    %c19_163 = arith.constant 19 : index
    %c0_164 = arith.constant 0 : index
    %c0_165 = arith.constant 0 : index
    %186 = vector.load %arg6[%c19_163, %c0_164, %c0_165] : memref<25x128x128xbf16, #tpu.memory_space<vmem>>, vector<1x128x128xbf16>
    %187 = vector.shape_cast %186 : vector<1x128x128xbf16> to vector<128x128xbf16>
    %cst_166 = arith.constant dense<0.000000e+00> : vector<64x128xf32>
    %188 = tpu.matmul %185, %187, %cst_166 {dimension_numbers = #tpu.dot_dimension_numbers<[1], [0], [0], [1], [0, 0, 1, 1], [], []>} : vector<64x128xbf16>, vector<128x128xbf16>, vector<64x128xf32> -> vector<64x128xf32>
    %189 = arith.addf %181, %188 : vector<64x128xf32>
    %c20 = arith.constant 20 : index
    %c0_167 = arith.constant 0 : index
    %c0_168 = arith.constant 0 : index
    %190 = vector.load %arg5[%c20, %c0_167, %c0_168] : memref<25x64x144xbf16, #tpu.memory_space<vmem>>, vector<1x64x144xbf16>
    %191 = vector.shape_cast %190 : vector<1x64x144xbf16> to vector<64x144xbf16>
    %cst_169 = arith.constant dense<0.000000e+00> : vector<64x128xf32>
    %192 = tpu.matmul %191, %25, %cst_169 {dimension_numbers = #tpu.dot_dimension_numbers<[1], [0], [0], [1], [0, 0, 1, 1], [], []>} : vector<64x144xbf16>, vector<144x128xbf16>, vector<64x128xf32> -> vector<64x128xf32>
    %193 = arith.truncf %192 : vector<64x128xf32> to vector<64x128xbf16>
    %c20_170 = arith.constant 20 : index
    %c0_171 = arith.constant 0 : index
    %c0_172 = arith.constant 0 : index
    %194 = vector.load %arg6[%c20_170, %c0_171, %c0_172] : memref<25x128x128xbf16, #tpu.memory_space<vmem>>, vector<1x128x128xbf16>
    %195 = vector.shape_cast %194 : vector<1x128x128xbf16> to vector<128x128xbf16>
    %cst_173 = arith.constant dense<0.000000e+00> : vector<64x128xf32>
    %196 = tpu.matmul %193, %195, %cst_173 {dimension_numbers = #tpu.dot_dimension_numbers<[1], [0], [0], [1], [0, 0, 1, 1], [], []>} : vector<64x128xbf16>, vector<128x128xbf16>, vector<64x128xf32> -> vector<64x128xf32>
    %197 = arith.addf %189, %196 : vector<64x128xf32>
    %c21 = arith.constant 21 : index
    %c0_174 = arith.constant 0 : index
    %c0_175 = arith.constant 0 : index
    %198 = vector.load %arg5[%c21, %c0_174, %c0_175] : memref<25x64x144xbf16, #tpu.memory_space<vmem>>, vector<1x64x144xbf16>
    %199 = vector.shape_cast %198 : vector<1x64x144xbf16> to vector<64x144xbf16>
    %cst_176 = arith.constant dense<0.000000e+00> : vector<64x128xf32>
    %200 = tpu.matmul %199, %25, %cst_176 {dimension_numbers = #tpu.dot_dimension_numbers<[1], [0], [0], [1], [0, 0, 1, 1], [], []>} : vector<64x144xbf16>, vector<144x128xbf16>, vector<64x128xf32> -> vector<64x128xf32>
    %201 = arith.truncf %200 : vector<64x128xf32> to vector<64x128xbf16>
    %c21_177 = arith.constant 21 : index
    %c0_178 = arith.constant 0 : index
    %c0_179 = arith.constant 0 : index
    %202 = vector.load %arg6[%c21_177, %c0_178, %c0_179] : memref<25x128x128xbf16, #tpu.memory_space<vmem>>, vector<1x128x128xbf16>
    %203 = vector.shape_cast %202 : vector<1x128x128xbf16> to vector<128x128xbf16>
    %cst_180 = arith.constant dense<0.000000e+00> : vector<64x128xf32>
    %204 = tpu.matmul %201, %203, %cst_180 {dimension_numbers = #tpu.dot_dimension_numbers<[1], [0], [0], [1], [0, 0, 1, 1], [], []>} : vector<64x128xbf16>, vector<128x128xbf16>, vector<64x128xf32> -> vector<64x128xf32>
    %205 = arith.addf %197, %204 : vector<64x128xf32>
    %c22 = arith.constant 22 : index
    %c0_181 = arith.constant 0 : index
    %c0_182 = arith.constant 0 : index
    %206 = vector.load %arg5[%c22, %c0_181, %c0_182] : memref<25x64x144xbf16, #tpu.memory_space<vmem>>, vector<1x64x144xbf16>
    %207 = vector.shape_cast %206 : vector<1x64x144xbf16> to vector<64x144xbf16>
    %cst_183 = arith.constant dense<0.000000e+00> : vector<64x128xf32>
    %208 = tpu.matmul %207, %25, %cst_183 {dimension_numbers = #tpu.dot_dimension_numbers<[1], [0], [0], [1], [0, 0, 1, 1], [], []>} : vector<64x144xbf16>, vector<144x128xbf16>, vector<64x128xf32> -> vector<64x128xf32>
    %209 = arith.truncf %208 : vector<64x128xf32> to vector<64x128xbf16>
    %c22_184 = arith.constant 22 : index
    %c0_185 = arith.constant 0 : index
    %c0_186 = arith.constant 0 : index
    %210 = vector.load %arg6[%c22_184, %c0_185, %c0_186] : memref<25x128x128xbf16, #tpu.memory_space<vmem>>, vector<1x128x128xbf16>
    %211 = vector.shape_cast %210 : vector<1x128x128xbf16> to vector<128x128xbf16>
    %cst_187 = arith.constant dense<0.000000e+00> : vector<64x128xf32>
    %212 = tpu.matmul %209, %211, %cst_187 {dimension_numbers = #tpu.dot_dimension_numbers<[1], [0], [0], [1], [0, 0, 1, 1], [], []>} : vector<64x128xbf16>, vector<128x128xbf16>, vector<64x128xf32> -> vector<64x128xf32>
    %213 = arith.addf %205, %212 : vector<64x128xf32>
    %c23 = arith.constant 23 : index
    %c0_188 = arith.constant 0 : index
    %c0_189 = arith.constant 0 : index
    %214 = vector.load %arg5[%c23, %c0_188, %c0_189] : memref<25x64x144xbf16, #tpu.memory_space<vmem>>, vector<1x64x144xbf16>
    %215 = vector.shape_cast %214 : vector<1x64x144xbf16> to vector<64x144xbf16>
    %cst_190 = arith.constant dense<0.000000e+00> : vector<64x128xf32>
    %216 = tpu.matmul %215, %25, %cst_190 {dimension_numbers = #tpu.dot_dimension_numbers<[1], [0], [0], [1], [0, 0, 1, 1], [], []>} : vector<64x144xbf16>, vector<144x128xbf16>, vector<64x128xf32> -> vector<64x128xf32>
    %217 = arith.truncf %216 : vector<64x128xf32> to vector<64x128xbf16>
    %c23_191 = arith.constant 23 : index
    %c0_192 = arith.constant 0 : index
    %c0_193 = arith.constant 0 : index
    %218 = vector.load %arg6[%c23_191, %c0_192, %c0_193] : memref<25x128x128xbf16, #tpu.memory_space<vmem>>, vector<1x128x128xbf16>
    %219 = vector.shape_cast %218 : vector<1x128x128xbf16> to vector<128x128xbf16>
    %cst_194 = arith.constant dense<0.000000e+00> : vector<64x128xf32>
    %220 = tpu.matmul %217, %219, %cst_194 {dimension_numbers = #tpu.dot_dimension_numbers<[1], [0], [0], [1], [0, 0, 1, 1], [], []>} : vector<64x128xbf16>, vector<128x128xbf16>, vector<64x128xf32> -> vector<64x128xf32>
    %221 = arith.addf %213, %220 : vector<64x128xf32>
    %c24 = arith.constant 24 : index
    %c0_195 = arith.constant 0 : index
    %c0_196 = arith.constant 0 : index
    %222 = vector.load %arg5[%c24, %c0_195, %c0_196] : memref<25x64x144xbf16, #tpu.memory_space<vmem>>, vector<1x64x144xbf16>
    %223 = vector.shape_cast %222 : vector<1x64x144xbf16> to vector<64x144xbf16>
    %cst_197 = arith.constant dense<0.000000e+00> : vector<64x128xf32>
    %224 = tpu.matmul %223, %25, %cst_197 {dimension_numbers = #tpu.dot_dimension_numbers<[1], [0], [0], [1], [0, 0, 1, 1], [], []>} : vector<64x144xbf16>, vector<144x128xbf16>, vector<64x128xf32> -> vector<64x128xf32>
    %225 = arith.truncf %224 : vector<64x128xf32> to vector<64x128xbf16>
    %c24_198 = arith.constant 24 : index
    %c0_199 = arith.constant 0 : index
    %c0_200 = arith.constant 0 : index
    %226 = vector.load %arg6[%c24_198, %c0_199, %c0_200] : memref<25x128x128xbf16, #tpu.memory_space<vmem>>, vector<1x128x128xbf16>
    %227 = vector.shape_cast %226 : vector<1x128x128xbf16> to vector<128x128xbf16>
    %cst_201 = arith.constant dense<0.000000e+00> : vector<64x128xf32>
    %228 = tpu.matmul %225, %227, %cst_201 {dimension_numbers = #tpu.dot_dimension_numbers<[1], [0], [0], [1], [0, 0, 1, 1], [], []>} : vector<64x128xbf16>, vector<128x128xbf16>, vector<64x128xf32> -> vector<64x128xf32>
    %229 = arith.addf %221, %228 : vector<64x128xf32>
    %230 = arith.truncf %229 : vector<64x128xf32> to vector<64x128xbf16>
    %c0_202 = arith.constant 0 : index
    %c0_203 = arith.constant 0 : index
    %c0_204 = arith.constant 0 : index
    %231 = vector.load %arg8[%c0_202, %c0_203, %c0_204] : memref<4x16x64xbf16, #tpu.memory_space<vmem>>, vector<1x16x64xbf16>
    %232 = vector.shape_cast %231 : vector<1x16x64xbf16> to vector<16x64xbf16>
    %cst_205 = arith.constant dense<0.000000e+00> : vector<16x128xf32>
    %233 = tpu.matmul %232, %230, %cst_205 {dimension_numbers = #tpu.dot_dimension_numbers<[1], [0], [0], [1], [0, 0, 1, 1], [], []>} : vector<16x64xbf16>, vector<64x128xbf16>, vector<16x128xf32> -> vector<16x128xf32>
    %c1_206 = arith.constant 1 : index
    %c0_207 = arith.constant 0 : index
    %c0_208 = arith.constant 0 : index
    %234 = vector.load %arg8[%c1_206, %c0_207, %c0_208] : memref<4x16x64xbf16, #tpu.memory_space<vmem>>, vector<1x16x64xbf16>
    %235 = vector.shape_cast %234 : vector<1x16x64xbf16> to vector<16x64xbf16>
    %cst_209 = arith.constant dense<0.000000e+00> : vector<16x128xf32>
    %236 = tpu.matmul %235, %230, %cst_209 {dimension_numbers = #tpu.dot_dimension_numbers<[1], [0], [0], [1], [0, 0, 1, 1], [], []>} : vector<16x64xbf16>, vector<64x128xbf16>, vector<16x128xf32> -> vector<16x128xf32>
    %c2_210 = arith.constant 2 : index
    %c0_211 = arith.constant 0 : index
    %c0_212 = arith.constant 0 : index
    %237 = vector.load %arg8[%c2_210, %c0_211, %c0_212] : memref<4x16x64xbf16, #tpu.memory_space<vmem>>, vector<1x16x64xbf16>
    %238 = vector.shape_cast %237 : vector<1x16x64xbf16> to vector<16x64xbf16>
    %cst_213 = arith.constant dense<0.000000e+00> : vector<16x128xf32>
    %239 = tpu.matmul %238, %230, %cst_213 {dimension_numbers = #tpu.dot_dimension_numbers<[1], [0], [0], [1], [0, 0, 1, 1], [], []>} : vector<16x64xbf16>, vector<64x128xbf16>, vector<16x128xf32> -> vector<16x128xf32>
    %c3_214 = arith.constant 3 : index
    %c0_215 = arith.constant 0 : index
    %c0_216 = arith.constant 0 : index
    %240 = vector.load %arg8[%c3_214, %c0_215, %c0_216] : memref<4x16x64xbf16, #tpu.memory_space<vmem>>, vector<1x16x64xbf16>
    %241 = vector.shape_cast %240 : vector<1x16x64xbf16> to vector<16x64xbf16>
    %cst_217 = arith.constant dense<0.000000e+00> : vector<16x128xf32>
    %242 = tpu.matmul %241, %230, %cst_217 {dimension_numbers = #tpu.dot_dimension_numbers<[1], [0], [0], [1], [0, 0, 1, 1], [], []>} : vector<16x64xbf16>, vector<64x128xbf16>, vector<16x128xf32> -> vector<16x128xf32>
    %243 = arith.maximumf %233, %236 : vector<16x128xf32>
    %244 = arith.maximumf %239, %242 : vector<16x128xf32>
    %245 = arith.maximumf %243, %244 : vector<16x128xf32>
    %cst_218 = arith.constant 0.000000e+00 : f32
    %246 = vector.broadcast %cst_218 : f32 to vector<16x128xf32>
    %247 = arith.maximumf %245, %246 : vector<16x128xf32>
    %248 = arith.truncf %247 : vector<16x128xf32> to vector<16x128xbf16>
    %cst_219 = arith.constant 0.000000e+00 : f32
    %249 = vector.broadcast %cst_219 : f32 to vector<1x128xf32>
    %c0_220 = arith.constant 0 : index
    %c0_221 = arith.constant 0 : index
    %250 = vector.load %arg10[%c0_220, %c0_221] : memref<1x128xf32, #tpu.memory_space<vmem>>, vector<1x128xf32>
    %251 = arith.addf %249, %250 : vector<1x128xf32>
    %252 = vector.extract_strided_slice %248 {offsets = [0, 0], sizes = [1, 128], strides = [1, 1]} : vector<16x128xbf16> to vector<1x128xbf16>
    %c0_222 = arith.constant 0 : index
    %c0_223 = arith.constant 0 : index
    %c0_224 = arith.constant 0 : index
    %253 = vector.load %arg9[%c0_222, %c0_223, %c0_224] : memref<16x128x128xbf16, #tpu.memory_space<vmem>>, vector<1x128x128xbf16>
    %254 = vector.shape_cast %253 : vector<1x128x128xbf16> to vector<128x128xbf16>
    %cst_225 = arith.constant dense<0.000000e+00> : vector<1x128xf32>
    %255 = tpu.matmul %252, %254, %cst_225 {dimension_numbers = #tpu.dot_dimension_numbers<[1], [0], [0], [1], [0, 0, 1, 1], [], []>} : vector<1x128xbf16>, vector<128x128xbf16>, vector<1x128xf32> -> vector<1x128xf32>
    %256 = arith.addf %251, %255 : vector<1x128xf32>
    %257 = vector.extract_strided_slice %248 {offsets = [1, 0], sizes = [1, 128], strides = [1, 1]} : vector<16x128xbf16> to vector<1x128xbf16>
    %c1_226 = arith.constant 1 : index
    %c0_227 = arith.constant 0 : index
    %c0_228 = arith.constant 0 : index
    %258 = vector.load %arg9[%c1_226, %c0_227, %c0_228] : memref<16x128x128xbf16, #tpu.memory_space<vmem>>, vector<1x128x128xbf16>
    %259 = vector.shape_cast %258 : vector<1x128x128xbf16> to vector<128x128xbf16>
    %cst_229 = arith.constant dense<0.000000e+00> : vector<1x128xf32>
    %260 = tpu.matmul %257, %259, %cst_229 {dimension_numbers = #tpu.dot_dimension_numbers<[1], [0], [0], [1], [0, 0, 1, 1], [], []>} : vector<1x128xbf16>, vector<128x128xbf16>, vector<1x128xf32> -> vector<1x128xf32>
    %261 = arith.addf %256, %260 : vector<1x128xf32>
    %262 = vector.extract_strided_slice %248 {offsets = [2, 0], sizes = [1, 128], strides = [1, 1]} : vector<16x128xbf16> to vector<1x128xbf16>
    %c2_230 = arith.constant 2 : index
    %c0_231 = arith.constant 0 : index
    %c0_232 = arith.constant 0 : index
    %263 = vector.load %arg9[%c2_230, %c0_231, %c0_232] : memref<16x128x128xbf16, #tpu.memory_space<vmem>>, vector<1x128x128xbf16>
    %264 = vector.shape_cast %263 : vector<1x128x128xbf16> to vector<128x128xbf16>
    %cst_233 = arith.constant dense<0.000000e+00> : vector<1x128xf32>
    %265 = tpu.matmul %262, %264, %cst_233 {dimension_numbers = #tpu.dot_dimension_numbers<[1], [0], [0], [1], [0, 0, 1, 1], [], []>} : vector<1x128xbf16>, vector<128x128xbf16>, vector<1x128xf32> -> vector<1x128xf32>
    %266 = arith.addf %261, %265 : vector<1x128xf32>
    %267 = vector.extract_strided_slice %248 {offsets = [3, 0], sizes = [1, 128], strides = [1, 1]} : vector<16x128xbf16> to vector<1x128xbf16>
    %c3_234 = arith.constant 3 : index
    %c0_235 = arith.constant 0 : index
    %c0_236 = arith.constant 0 : index
    %268 = vector.load %arg9[%c3_234, %c0_235, %c0_236] : memref<16x128x128xbf16, #tpu.memory_space<vmem>>, vector<1x128x128xbf16>
    %269 = vector.shape_cast %268 : vector<1x128x128xbf16> to vector<128x128xbf16>
    %cst_237 = arith.constant dense<0.000000e+00> : vector<1x128xf32>
    %270 = tpu.matmul %267, %269, %cst_237 {dimension_numbers = #tpu.dot_dimension_numbers<[1], [0], [0], [1], [0, 0, 1, 1], [], []>} : vector<1x128xbf16>, vector<128x128xbf16>, vector<1x128xf32> -> vector<1x128xf32>
    %271 = arith.addf %266, %270 : vector<1x128xf32>
    %272 = vector.extract_strided_slice %248 {offsets = [4, 0], sizes = [1, 128], strides = [1, 1]} : vector<16x128xbf16> to vector<1x128xbf16>
    %c4_238 = arith.constant 4 : index
    %c0_239 = arith.constant 0 : index
    %c0_240 = arith.constant 0 : index
    %273 = vector.load %arg9[%c4_238, %c0_239, %c0_240] : memref<16x128x128xbf16, #tpu.memory_space<vmem>>, vector<1x128x128xbf16>
    %274 = vector.shape_cast %273 : vector<1x128x128xbf16> to vector<128x128xbf16>
    %cst_241 = arith.constant dense<0.000000e+00> : vector<1x128xf32>
    %275 = tpu.matmul %272, %274, %cst_241 {dimension_numbers = #tpu.dot_dimension_numbers<[1], [0], [0], [1], [0, 0, 1, 1], [], []>} : vector<1x128xbf16>, vector<128x128xbf16>, vector<1x128xf32> -> vector<1x128xf32>
    %276 = arith.addf %271, %275 : vector<1x128xf32>
    %277 = vector.extract_strided_slice %248 {offsets = [5, 0], sizes = [1, 128], strides = [1, 1]} : vector<16x128xbf16> to vector<1x128xbf16>
    %c5_242 = arith.constant 5 : index
    %c0_243 = arith.constant 0 : index
    %c0_244 = arith.constant 0 : index
    %278 = vector.load %arg9[%c5_242, %c0_243, %c0_244] : memref<16x128x128xbf16, #tpu.memory_space<vmem>>, vector<1x128x128xbf16>
    %279 = vector.shape_cast %278 : vector<1x128x128xbf16> to vector<128x128xbf16>
    %cst_245 = arith.constant dense<0.000000e+00> : vector<1x128xf32>
    %280 = tpu.matmul %277, %279, %cst_245 {dimension_numbers = #tpu.dot_dimension_numbers<[1], [0], [0], [1], [0, 0, 1, 1], [], []>} : vector<1x128xbf16>, vector<128x128xbf16>, vector<1x128xf32> -> vector<1x128xf32>
    %281 = arith.addf %276, %280 : vector<1x128xf32>
    %282 = vector.extract_strided_slice %248 {offsets = [6, 0], sizes = [1, 128], strides = [1, 1]} : vector<16x128xbf16> to vector<1x128xbf16>
    %c6_246 = arith.constant 6 : index
    %c0_247 = arith.constant 0 : index
    %c0_248 = arith.constant 0 : index
    %283 = vector.load %arg9[%c6_246, %c0_247, %c0_248] : memref<16x128x128xbf16, #tpu.memory_space<vmem>>, vector<1x128x128xbf16>
    %284 = vector.shape_cast %283 : vector<1x128x128xbf16> to vector<128x128xbf16>
    %cst_249 = arith.constant dense<0.000000e+00> : vector<1x128xf32>
    %285 = tpu.matmul %282, %284, %cst_249 {dimension_numbers = #tpu.dot_dimension_numbers<[1], [0], [0], [1], [0, 0, 1, 1], [], []>} : vector<1x128xbf16>, vector<128x128xbf16>, vector<1x128xf32> -> vector<1x128xf32>
    %286 = arith.addf %281, %285 : vector<1x128xf32>
    %287 = vector.extract_strided_slice %248 {offsets = [7, 0], sizes = [1, 128], strides = [1, 1]} : vector<16x128xbf16> to vector<1x128xbf16>
    %c7_250 = arith.constant 7 : index
    %c0_251 = arith.constant 0 : index
    %c0_252 = arith.constant 0 : index
    %288 = vector.load %arg9[%c7_250, %c0_251, %c0_252] : memref<16x128x128xbf16, #tpu.memory_space<vmem>>, vector<1x128x128xbf16>
    %289 = vector.shape_cast %288 : vector<1x128x128xbf16> to vector<128x128xbf16>
    %cst_253 = arith.constant dense<0.000000e+00> : vector<1x128xf32>
    %290 = tpu.matmul %287, %289, %cst_253 {dimension_numbers = #tpu.dot_dimension_numbers<[1], [0], [0], [1], [0, 0, 1, 1], [], []>} : vector<1x128xbf16>, vector<128x128xbf16>, vector<1x128xf32> -> vector<1x128xf32>
    %291 = arith.addf %286, %290 : vector<1x128xf32>
    %292 = vector.extract_strided_slice %248 {offsets = [8, 0], sizes = [1, 128], strides = [1, 1]} : vector<16x128xbf16> to vector<1x128xbf16>
    %c8_254 = arith.constant 8 : index
    %c0_255 = arith.constant 0 : index
    %c0_256 = arith.constant 0 : index
    %293 = vector.load %arg9[%c8_254, %c0_255, %c0_256] : memref<16x128x128xbf16, #tpu.memory_space<vmem>>, vector<1x128x128xbf16>
    %294 = vector.shape_cast %293 : vector<1x128x128xbf16> to vector<128x128xbf16>
    %cst_257 = arith.constant dense<0.000000e+00> : vector<1x128xf32>
    %295 = tpu.matmul %292, %294, %cst_257 {dimension_numbers = #tpu.dot_dimension_numbers<[1], [0], [0], [1], [0, 0, 1, 1], [], []>} : vector<1x128xbf16>, vector<128x128xbf16>, vector<1x128xf32> -> vector<1x128xf32>
    %296 = arith.addf %291, %295 : vector<1x128xf32>
    %297 = vector.extract_strided_slice %248 {offsets = [9, 0], sizes = [1, 128], strides = [1, 1]} : vector<16x128xbf16> to vector<1x128xbf16>
    %c9_258 = arith.constant 9 : index
    %c0_259 = arith.constant 0 : index
    %c0_260 = arith.constant 0 : index
    %298 = vector.load %arg9[%c9_258, %c0_259, %c0_260] : memref<16x128x128xbf16, #tpu.memory_space<vmem>>, vector<1x128x128xbf16>
    %299 = vector.shape_cast %298 : vector<1x128x128xbf16> to vector<128x128xbf16>
    %cst_261 = arith.constant dense<0.000000e+00> : vector<1x128xf32>
    %300 = tpu.matmul %297, %299, %cst_261 {dimension_numbers = #tpu.dot_dimension_numbers<[1], [0], [0], [1], [0, 0, 1, 1], [], []>} : vector<1x128xbf16>, vector<128x128xbf16>, vector<1x128xf32> -> vector<1x128xf32>
    %301 = arith.addf %296, %300 : vector<1x128xf32>
    %302 = vector.extract_strided_slice %248 {offsets = [10, 0], sizes = [1, 128], strides = [1, 1]} : vector<16x128xbf16> to vector<1x128xbf16>
    %c10_262 = arith.constant 10 : index
    %c0_263 = arith.constant 0 : index
    %c0_264 = arith.constant 0 : index
    %303 = vector.load %arg9[%c10_262, %c0_263, %c0_264] : memref<16x128x128xbf16, #tpu.memory_space<vmem>>, vector<1x128x128xbf16>
    %304 = vector.shape_cast %303 : vector<1x128x128xbf16> to vector<128x128xbf16>
    %cst_265 = arith.constant dense<0.000000e+00> : vector<1x128xf32>
    %305 = tpu.matmul %302, %304, %cst_265 {dimension_numbers = #tpu.dot_dimension_numbers<[1], [0], [0], [1], [0, 0, 1, 1], [], []>} : vector<1x128xbf16>, vector<128x128xbf16>, vector<1x128xf32> -> vector<1x128xf32>
    %306 = arith.addf %301, %305 : vector<1x128xf32>
    %307 = vector.extract_strided_slice %248 {offsets = [11, 0], sizes = [1, 128], strides = [1, 1]} : vector<16x128xbf16> to vector<1x128xbf16>
    %c11_266 = arith.constant 11 : index
    %c0_267 = arith.constant 0 : index
    %c0_268 = arith.constant 0 : index
    %308 = vector.load %arg9[%c11_266, %c0_267, %c0_268] : memref<16x128x128xbf16, #tpu.memory_space<vmem>>, vector<1x128x128xbf16>
    %309 = vector.shape_cast %308 : vector<1x128x128xbf16> to vector<128x128xbf16>
    %cst_269 = arith.constant dense<0.000000e+00> : vector<1x128xf32>
    %310 = tpu.matmul %307, %309, %cst_269 {dimension_numbers = #tpu.dot_dimension_numbers<[1], [0], [0], [1], [0, 0, 1, 1], [], []>} : vector<1x128xbf16>, vector<128x128xbf16>, vector<1x128xf32> -> vector<1x128xf32>
    %311 = arith.addf %306, %310 : vector<1x128xf32>
    %312 = vector.extract_strided_slice %248 {offsets = [12, 0], sizes = [1, 128], strides = [1, 1]} : vector<16x128xbf16> to vector<1x128xbf16>
    %c12_270 = arith.constant 12 : index
    %c0_271 = arith.constant 0 : index
    %c0_272 = arith.constant 0 : index
    %313 = vector.load %arg9[%c12_270, %c0_271, %c0_272] : memref<16x128x128xbf16, #tpu.memory_space<vmem>>, vector<1x128x128xbf16>
    %314 = vector.shape_cast %313 : vector<1x128x128xbf16> to vector<128x128xbf16>
    %cst_273 = arith.constant dense<0.000000e+00> : vector<1x128xf32>
    %315 = tpu.matmul %312, %314, %cst_273 {dimension_numbers = #tpu.dot_dimension_numbers<[1], [0], [0], [1], [0, 0, 1, 1], [], []>} : vector<1x128xbf16>, vector<128x128xbf16>, vector<1x128xf32> -> vector<1x128xf32>
    %316 = arith.addf %311, %315 : vector<1x128xf32>
    %317 = vector.extract_strided_slice %248 {offsets = [13, 0], sizes = [1, 128], strides = [1, 1]} : vector<16x128xbf16> to vector<1x128xbf16>
    %c13_274 = arith.constant 13 : index
    %c0_275 = arith.constant 0 : index
    %c0_276 = arith.constant 0 : index
    %318 = vector.load %arg9[%c13_274, %c0_275, %c0_276] : memref<16x128x128xbf16, #tpu.memory_space<vmem>>, vector<1x128x128xbf16>
    %319 = vector.shape_cast %318 : vector<1x128x128xbf16> to vector<128x128xbf16>
    %cst_277 = arith.constant dense<0.000000e+00> : vector<1x128xf32>
    %320 = tpu.matmul %317, %319, %cst_277 {dimension_numbers = #tpu.dot_dimension_numbers<[1], [0], [0], [1], [0, 0, 1, 1], [], []>} : vector<1x128xbf16>, vector<128x128xbf16>, vector<1x128xf32> -> vector<1x128xf32>
    %321 = arith.addf %316, %320 : vector<1x128xf32>
    %322 = vector.extract_strided_slice %248 {offsets = [14, 0], sizes = [1, 128], strides = [1, 1]} : vector<16x128xbf16> to vector<1x128xbf16>
    %c14_278 = arith.constant 14 : index
    %c0_279 = arith.constant 0 : index
    %c0_280 = arith.constant 0 : index
    %323 = vector.load %arg9[%c14_278, %c0_279, %c0_280] : memref<16x128x128xbf16, #tpu.memory_space<vmem>>, vector<1x128x128xbf16>
    %324 = vector.shape_cast %323 : vector<1x128x128xbf16> to vector<128x128xbf16>
    %cst_281 = arith.constant dense<0.000000e+00> : vector<1x128xf32>
    %325 = tpu.matmul %322, %324, %cst_281 {dimension_numbers = #tpu.dot_dimension_numbers<[1], [0], [0], [1], [0, 0, 1, 1], [], []>} : vector<1x128xbf16>, vector<128x128xbf16>, vector<1x128xf32> -> vector<1x128xf32>
    %326 = arith.addf %321, %325 : vector<1x128xf32>
    %327 = vector.extract_strided_slice %248 {offsets = [15, 0], sizes = [1, 128], strides = [1, 1]} : vector<16x128xbf16> to vector<1x128xbf16>
    %c15_282 = arith.constant 15 : index
    %c0_283 = arith.constant 0 : index
    %c0_284 = arith.constant 0 : index
    %328 = vector.load %arg9[%c15_282, %c0_283, %c0_284] : memref<16x128x128xbf16, #tpu.memory_space<vmem>>, vector<1x128x128xbf16>
    %329 = vector.shape_cast %328 : vector<1x128x128xbf16> to vector<128x128xbf16>
    %cst_285 = arith.constant dense<0.000000e+00> : vector<1x128xf32>
    %330 = tpu.matmul %327, %329, %cst_285 {dimension_numbers = #tpu.dot_dimension_numbers<[1], [0], [0], [1], [0, 0, 1, 1], [], []>} : vector<1x128xbf16>, vector<128x128xbf16>, vector<1x128xf32> -> vector<1x128xf32>
    %331 = arith.addf %326, %330 : vector<1x128xf32>
    %cst_286 = arith.constant 0.000000e+00 : f32
    %332 = vector.broadcast %cst_286 : f32 to vector<1x128xf32>
    %333 = arith.maximumf %331, %332 : vector<1x128xf32>
    %334 = arith.truncf %333 : vector<1x128xf32> to vector<1x128xbf16>
    %c0_287 = arith.constant 0 : index
    %c0_288 = arith.constant 0 : index
    %335 = vector.load %arg11[%c0_287, %c0_288] : memref<128x128xbf16, #tpu.memory_space<vmem>>, vector<128x128xbf16>
    %cst_289 = arith.constant dense<0.000000e+00> : vector<1x128xf32>
    %336 = tpu.matmul %334, %335, %cst_289 {dimension_numbers = #tpu.dot_dimension_numbers<[1], [0], [0], [1], [0, 0, 1, 1], [], []>} : vector<1x128xbf16>, vector<128x128xbf16>, vector<1x128xf32> -> vector<1x128xf32>
    %c0_290 = arith.constant 0 : index
    %c0_291 = arith.constant 0 : index
    %337 = vector.load %arg12[%c0_290, %c0_291] : memref<1x128xf32, #tpu.memory_space<vmem>>, vector<1x128xf32>
    %338 = arith.addf %336, %337 : vector<1x128xf32>
    %339 = tpu.iota {dimensions = array<i32: 1>} : vector<1x128xi32>
    %c10_i32 = arith.constant 10 : i32
    %340 = vector.broadcast %c10_i32 : i32 to vector<1x128xi32>
    %341 = arith.cmpi slt, %339, %340 : vector<1x128xi32>
    %cst_292 = arith.constant -1.000000e+30 : f32
    %342 = vector.broadcast %cst_292 : f32 to vector<1x128xf32>
    %343 = arith.select %341, %338, %342 : vector<1x128xi1>, vector<1x128xf32>
    %cst_293 = arith.constant dense<0xFF800000> : vector<1xf32>
    %344 = vector.multi_reduction <maximumf>, %343, %cst_293 [1] : vector<1x128xf32> to vector<1xf32>
    %345 = vector.shape_cast %344 : vector<1xf32> to vector<1x1xf32>
    %346 = vector.broadcast %345 : vector<1x1xf32> to vector<1x128xf32>
    %347 = arith.subf %343, %346 : vector<1x128xf32>
    %348 = math.exp %347 : vector<1x128xf32>
    %cst_294 = arith.constant dense<0.000000e+00> : vector<1xf32>
    %349 = vector.multi_reduction <add>, %348, %cst_294 [1] : vector<1x128xf32> to vector<1xf32>
    %350 = vector.shape_cast %349 : vector<1xf32> to vector<1x1xf32>
    %351 = math.log %350 : vector<1x1xf32>
    %352 = vector.broadcast %351 : vector<1x1xf32> to vector<1x128xf32>
    %353 = arith.subf %347, %352 : vector<1x128xf32>
    %c0_295 = arith.constant 0 : index
    %c0_296 = arith.constant 0 : index
    %c0_297 = arith.constant 0 : index
    %354 = vector.load %arg13[%c0_295, %c0_296, %c0_297] : memref<1x1x128xf32, #tpu.memory_space<vmem>>, vector<1x1x128xf32>
    %355 = vector.shape_cast %354 : vector<1x1x128xf32> to vector<1x128xf32>
    %356 = vector.shape_cast %353 : vector<1x128xf32> to vector<1x1x128xf32>
    tpu.vector_store %arg13[%c0_295, %c0_296, %c0_297], %356 {strides = array<i32>} : memref<1x1x128xf32, #tpu.memory_space<vmem>>, vector<1x1x128xf32>,
    return
  }
  func.func @transform_0(%arg0: i32) -> (i32, i32, i32) {
    %c0_i32 = arith.constant 0 : i32
    %c0_i32_0 = arith.constant 0 : i32
    %c0_i32_1 = arith.constant 0 : i32
    return %arg0, %c0_i32, %c0_i32_0 : i32, i32, i32
  }
  func.func @transform_1(%arg0: i32) -> (i32, i32) {
    %c0_i32 = arith.constant 0 : i32
    %c0_i32_0 = arith.constant 0 : i32
    %c0_i32_1 = arith.constant 0 : i32
    return %c0_i32, %c0_i32_0 : i32, i32
  }
  func.func @transform_2(%arg0: i32) -> (i32, i32) {
    %c0_i32 = arith.constant 0 : i32
    %c0_i32_0 = arith.constant 0 : i32
    %c0_i32_1 = arith.constant 0 : i32
    return %c0_i32, %c0_i32_0 : i32, i32
  }
  func.func @transform_3(%arg0: i32) -> (i32, i32, i32) {
    %c0_i32 = arith.constant 0 : i32
    %c0_i32_0 = arith.constant 0 : i32
    %c0_i32_1 = arith.constant 0 : i32
    %c0_i32_2 = arith.constant 0 : i32
    return %c0_i32, %c0_i32_0, %c0_i32_1 : i32, i32, i32
  }
  func.func @transform_4(%arg0: i32) -> (i32, i32, i32) {
    %c0_i32 = arith.constant 0 : i32
    %c0_i32_0 = arith.constant 0 : i32
    %c0_i32_1 = arith.constant 0 : i32
    %c0_i32_2 = arith.constant 0 : i32
    return %c0_i32, %c0_i32_0, %c0_i32_1 : i32, i32, i32
  }
  func.func @transform_5(%arg0: i32) -> (i32, i32, i32) {
    %c0_i32 = arith.constant 0 : i32
    %c0_i32_0 = arith.constant 0 : i32
    %c0_i32_1 = arith.constant 0 : i32
    %c0_i32_2 = arith.constant 0 : i32
    return %c0_i32, %c0_i32_0, %c0_i32_1 : i32, i32, i32
  }
  func.func @transform_6(%arg0: i32) -> (i32, i32) {
    %c0_i32 = arith.constant 0 : i32
    %c0_i32_0 = arith.constant 0 : i32
    %c0_i32_1 = arith.constant 0 : i32
    return %c0_i32, %c0_i32_0 : i32, i32
  }
  func.func @transform_7(%arg0: i32) -> (i32, i32, i32) {
    %c0_i32 = arith.constant 0 : i32
    %c0_i32_0 = arith.constant 0 : i32
    %c0_i32_1 = arith.constant 0 : i32
    %c0_i32_2 = arith.constant 0 : i32
    return %c0_i32, %c0_i32_0, %c0_i32_1 : i32, i32, i32
  }
  func.func @transform_8(%arg0: i32) -> (i32, i32, i32) {
    %c0_i32 = arith.constant 0 : i32
    %c0_i32_0 = arith.constant 0 : i32
    %c0_i32_1 = arith.constant 0 : i32
    %c0_i32_2 = arith.constant 0 : i32
    return %c0_i32, %c0_i32_0, %c0_i32_1 : i32, i32, i32
  }
  func.func @transform_9(%arg0: i32) -> (i32, i32) {
    %c0_i32 = arith.constant 0 : i32
    %c0_i32_0 = arith.constant 0 : i32
    %c0_i32_1 = arith.constant 0 : i32
    return %c0_i32, %c0_i32_0 : i32, i32
  }
  func.func @transform_10(%arg0: i32) -> (i32, i32) {
    %c0_i32 = arith.constant 0 : i32
    %c0_i32_0 = arith.constant 0 : i32
    %c0_i32_1 = arith.constant 0 : i32
    return %c0_i32, %c0_i32_0 : i32, i32
  }
  func.func @transform_11(%arg0: i32) -> (i32, i32) {
    %c0_i32 = arith.constant 0 : i32
    %c0_i32_0 = arith.constant 0 : i32
    %c0_i32_1 = arith.constant 0 : i32
    return %c0_i32, %c0_i32_0 : i32, i32
  }
  func.func @transform_12(%arg0: i32) -> (i32, i32, i32) {
    %c0_i32 = arith.constant 0 : i32
    %c0_i32_0 = arith.constant 0 : i32
    %c0_i32_1 = arith.constant 0 : i32
    return %arg0, %c0_i32, %c0_i32_0 : i32, i32, i32
  }
}

</mosaic_0001>

<bundles_post_ra>
// kernel: net_forward.1
= control target key start
LH: loop header
LB: loop body
LE: loop exit
PB: predicated region body
PF: predicated region fallthrough
CT: control target
= control target key end

     0   :  { %s20652_s0 = inlined_call_operand.vmem [shape: bf16[2,576,32], index: 0, kind: input, shape index: {}]   ;;  %s20653_s1 = inlined_call_operand.vmem [shape: bf16[32,128], index: 1, kind: input, shape index: {}]   ;;  %s20654_s2 = inlined_call_operand.vmem [shape: f32[1,128], index: 2, kind: input, shape index: {}]   ;;  %s20655_s3 = inlined_call_operand.vmem [shape: bf16[4,144,576], index: 3, kind: input, shape index: {}]   ;;  %s20656_s4 = inlined_call_operand.vmem [shape: bf16[25,64,144], index: 4, kind: input, shape index: {}]   ;;  %s20657_s5 = inlined_call_operand.vmem [shape: bf16[25,128,128], index: 5, kind: input, shape index: {}]   ;;  %s20658_s6 = inlined_call_operand.vmem [shape: f32[1,128], index: 6, kind: input, shape index: {}]   ;;  %s20659_s7 = inlined_call_operand.vmem [shape: bf16[4,16,64], index: 7, kind: input, shape index: {}]   ;;  %s20660_s8 = inlined_call_operand.hbm [shape: bf16[16,128,128], index: 8, kind: input, shape index: {}]   ;;  %s20661_s9 = inlined_call_operand.vmem [shape: f32[1,128], index: 9, kind: input, shape index: {}]   ;;  %s20662_s10 = inlined_call_operand.vmem [shape: bf16[128,128], index: 10, kind: input, shape index: {}]   ;;  %s20663_s11 = inlined_call_operand.vmem [shape: f32[1,128], index: 11, kind: input, shape index: {}]   ;;  %s20664_s12 = inlined_call_operand.hbm [shape: f32[2,1,128], index: 12, kind: output, shape index: {}]  }
   0x1   :  { %20692 = sst [smem:[#allocation63_spill]] %s20652_s0 }
   0x2   :  { %20693 = sst [smem:[#allocation64_spill]] %s20653_s1 }
   0x3   :  { %20694 = sst [smem:[#allocation65_spill]] %s20660_s8 }
   0x4   :  { %17 = vsyncpa [#allocation3], 0 }
   0x5   :  { %18 = vsyncpa [#allocation4], 0 }
   0x6   :  { %20 = vsyncpa [#allocation4 + $0x1], 0  ;;  %s15500_s21 = smov 0   ;;  %s15502_s22 = smov 0  }
   0x7   :  { %s15504_s23 = smov 0   ;;  %s15506_s24 = smov 0  }
   0x8 LB: > { %s15521_s25 = sadd.s32 4294967295, %s15430_s24   ;;  %s10547_s26 = sadd.s32 4294967294, %s15430_s24   ;;  %s15430_s24 = sphi %s15506_s24, %s20954_s24   ;;  %s15426_s23 = sphi %s15504_s23, %s20953_s23   ;;  %s15422_s22 = sphi %s15502_s22, %s20952_s22   ;;  %s15418_s21 = sphi %s15500_s21, %s20951_s21  }
   0x9   : > { %s15525_s27 = sadd.s32 1, %s15430_s24   ;;  %s290_s28 = sadd.s32 1, %s15426_s23 }
   0xa   : > { %s287_s29 = ssub.s32 %s15430_s24, %s15525_s27  ;;  %p300_p0 = scmp.ne.s32.totalorder %s15426_s23, %s15422_s22 }
   0xb   : > { %p288_p1 = scmp.eq.s32.totalorder %s287_s29, 0  ;;  %p301_p2 = scmp.eq.s32.totalorder %s15521_s25, 1 }
   0xc   : > { %p306_p3 = scmp.ne.s32.totalorder %s15422_s22, %s15418_s21  ;;  %p307_p4 = scmp.eq.s32.totalorder %s10547_s26, 1 }
   0xd   : > { %s15536_s30 = scalar_select %p288_p1, %s15426_s23, %s290_s28  }
   0xe   : > { %p15538_p5 = por %p301_p2, %p300_p0  ;;  %p15542_p6 = por %p307_p4, %p306_p3 }
   0xf   : > { %p10548_p7 = scmp.ge.s32.totalorder %s15430_s24, 1  ;;  %p314_p8 = scmp.lt.s32.totalorder %s15430_s24, 3 }
  0x10   : > { %p15289_p9 = scmp.eq.s32.totalorder %s15521_s25, 0  ;;  %s20697_s8 = sld [smem:[#allocation65_spill]] }
  0x11   : > { %p315_p10 = pnand %p10548_p7, %p314_p8  ;;  %s15432_s18 = smov [#allocation2]  }
  0x12   : > { %s348_s19 = sshll.u32 %s15432_s18, 4  ;;  %s15433_s20 = smov 64   ;;  %s349_s19 = int_to_ptr.vmem [resolvable:$true] %s348_s19 }
  0x13   : > { %p15281_p11 = pneg %p315_p10  ;;  %s15434_s26 = smov 4  }
  0x14   : > { %381 = sbr.rel (%p315_p10) target bundleno = 5201 (0x1451), region = 68 }
  0x15   : > { %p15282_p12 = pnand %p15289_p9, %p15281_p11 }
  0x16   : > { %s346_s17 = sshll.u32 %s20697_s8, 4  ;;  %s347_s17 = int_to_ptr.hbm [resolvable:$true] %s346_s17 }
  0x17   : > { %15284 = dma.hbm_to_vmem [thread:$0]  (!%p15282_p12), %s347_s17, 16384, %s349_s19, [#allocation3], %s15433_s20, %s15433_s20, %s15434_s26  }
  0x19   : > { %15409 = dma.done.wait (%p15289_p9), [#allocation3], 16384  }
  0x1a   : > { %15411 = vsyncadd (%p15289_p9), [#allocation3], 4294950912  ;;  %p423_p13 = scmp.lt.s32.totalorder %s15521_s25, 1  ;;  %s20698_s1 = sld [smem:[#allocation64_spill]]  ;;  %vm701_vm0 = vcmask 261120   ;;  %vm1314_vm1 = vcmask 523264  }
  0x1b   : > { %s20699_s0 = sld [smem:[#allocation63_spill]]  ;;  %v15592_v12 = vld [vmem:[%s20654_s2] ss:$0 sm:$0xff]  ;;  %vm3473_vm2 = vcmask 130048   ;;  %vm10453_vm4 = vcmask 1040384   ;;  %s10476_s18 = scalar_lea.hbm %s20664_s12, %s15521_s25 }
  0x1c   : > { %s424_s28 = scalar_select %p423_p13, %s15521_s25, 1 }
  0x1d   : > { %s15384_s25 = scalar_lea.hbm %s20664_s12, 2 }
  0x1e   : > { %s15274_s29 = smul.u32 288, %s424_s28 }
  0x20   : > { %v14545_v0 = vld [vmem:[%s20698_s1 + $0x8] sm:$0xff]  ;;  %v14544_v1 = vld [vmem:[%s20698_s1] sm:$0xff] }
  0x21   : > { %816 = vmatpush.bf16.msra.mxu0 %v14545_v0  ;;  %s15569_s20 = scalar_lea.vmem %s20699_s0, %s15274_s29  ;;  %s421_s29 = sand.u32 1, %s15422_s22  }
  0x22   : > { %v14508_v2 = vld [vmem:[%s15569_s20] sm:$0xff]  ;;  %v14509_v3 = vld [vmem:[%s15569_s20 + $0x8] sm:$0xff]  ;;  %v14510_v4 = vld [vmem:[%s15569_s20 + $0x10] sm:$0xff]  ;;  %s10480_s0 = sshll.u32 %s10476_s18, 4  ;;  %s10468_s1 = scalar_lea.sflag [#allocation4], %s421_s29  ;;  %s10481_s0 = int_to_ptr.hbm [resolvable:$true] %s10480_s0 }
  0x23   : > { %v14511_v5 = vld [vmem:[%s15569_s20 + $0x18] sm:$0xff]  ;;  %v14512_v6 = vld [vmem:[%s15569_s20 + $0x20] sm:$0xff]  ;;  %v14513_v7 = vld [vmem:[%s15569_s20 + $0x28] sm:$0xff]  ;;  %s15378_s19 = sshra.s32 %s10481_s0, 4  ;;  %s15379_s19 = int_to_ptr.hbm [resolvable:$true] %s15378_s19 }
  0x24   : > { %v14514_v8 = vld [vmem:[%s15569_s20 + $0x30] sm:$0xff]  ;;  %v14515_v9 = vld [vmem:[%s15569_s20 + $0x38] sm:$0xff]  ;;  %v14516_v10 = vld [vmem:[%s15569_s20 + $0x40] sm:$0xff]  ;;  %s15380_s8 = scalar_lea.hbm %s15379_s19, 1  ;;  %p15385_p3 = scmp.lt.s32.totalorder %s15379_s19, %s20664_s12 }
  0x25   : > { %817 = vmatpush.bf16.msra.mxu0 %v14544_v1  ;;  %v14517_v17 = vld [vmem:[%s15569_s20 + $0x48] sm:$0xff]  ;;  %v14518_v23 = vld [vmem:[%s15569_s20 + $0x50] sm:$0xff]  ;;  %v14519_v29 = vld [vmem:[%s15569_s20 + $0x58] sm:$0xff]  ;;  %p15381_p0 = scmp.ne.s32.totalorder %s15379_s19, %s15380_s8  ;;  %p15386_p4 = scmp.lt.s32.totalorder %s15384_s25, %s15380_s8 }
  0x26   : > { %v14520_v35 = vld [vmem:[%s15569_s20 + $0x60] sm:$0xff]  ;;  %v14521_v38 = vld [vmem:[%s15569_s20 + $0x68] sm:$0xff]  ;;  %v14522_v41 = vld [vmem:[%s15569_s20 + $0x70] sm:$0xff] }
  0x27   : > { %v14523_v44 = vld [vmem:[%s15569_s20 + $0x78] sm:$0xff]  ;;  %v14524_v54 = vld [vmem:[%s15569_s20 + $0x80] sm:$0xff]  ;;  %v14525_v1 = vld [vmem:[%s15569_s20 + $0x88] sm:$0xff]  ;;  %p15382_p1 = pnand %p15381_p0, %p15538_p5  ;;  %p15387_p7 = por %p15386_p4, %p15385_p3 }
  0x28   : > { %10706 = vmatmul.msk.bf16.vlgmr.msra.gmra.mxu0 %vm701_vm0, %v14508_v2 }
  0x29   : > { %p15383_p2 = pneg %p15382_p1 }
  0x2b   : > { %p15388_p8 = pnand %p15387_p7, %p15383_p2 }
  0x38   : > { %10707 = vmatmul.msk.bf16.gmra.mxu0 %vm701_vm0, %v14509_v3 }
  0x48   : > { %10708 = vmatmul.msk.bf16.gmra.mxu0 %vm701_vm0, %v14510_v4 }
  0x58   : > { %10709 = vmatmul.msk.bf16.gmra.mxu0 %vm701_vm0, %v14511_v5 }
  0x68   : > { %10710 = vmatmul.msk.bf16.gmra.mxu0 %vm701_vm0, %v14512_v6 }
  0x78   : > { %10711 = vmatmul.msk.bf16.gmra.mxu0 %vm701_vm0, %v14513_v7  ;;  %v14526_v7 = vld [vmem:[%s15569_s20 + $0x90] sm:$0xff] }
  0x88   : > { %10712 = vmatmul.msk.bf16.gmra.mxu0 %vm701_vm0, %v14514_v8 }
  0x98   : > { %10713 = vmatmul.msk.bf16.gmra.mxu0 %vm701_vm0, %v14515_v9 }
  0xa5   : > { %v819_v11 = vpop.f32.mrf.mxu0 }
  0xa6   : > { %v820_v14 = vadd.f32 %v15592_v12, %v819_v11 }
  0xa8   : > { %10714 = vmatmul.msk.bf16.gmra.mxu0 %vm701_vm0, %v14516_v10 }
  0xad   : > { %v821_v13 = vpop.f32.mrf.mxu0 }
  0xae   : > { %v822_v15 = vadd.f32 %v15592_v12, %v821_v13 }
  0xb0   : > { %v15596_v16 = vpack.c.bf16 %v822_v15, %v820_v14  ;;  %v14527_v14 = vld [vmem:[%s15569_s20 + $0x98] sm:$0xff] }
  0xb5   : > { %v824_v18 = vpop.f32.mrf.mxu0 }
  0xb6   : > { %v825_v20 = vadd.f32 %v15592_v12, %v824_v18 }
  0xb8   : > { %10715 = vmatmul.msk.bf16.gmra.mxu0 %vm701_vm0, %v14517_v17 }
  0xbd   : > { %v826_v19 = vpop.f32.mrf.mxu0 }
  0xbe   : > { %v827_v21 = vadd.f32 %v15592_v12, %v826_v19 }
  0xc0   : > { %v15602_v22 = vpack.c.bf16 %v827_v21, %v825_v20  ;;  %v14528_v21 = vld [vmem:[%s15569_s20 + $0xa0] sm:$0xff] }
  0xc5   : > { %v829_v24 = vpop.f32.mrf.mxu0 }
  0xc6   : > { %v830_v26 = vadd.f32 %v15592_v12, %v829_v24 }
  0xc8   : > { %10716 = vmatmul.msk.bf16.gmra.mxu0 %vm701_vm0, %v14518_v23 }
  0xcd   : > { %v831_v25 = vpop.f32.mrf.mxu0 }
  0xce   : > { %v832_v27 = vadd.f32 %v15592_v12, %v831_v25  ;;  %v14529_v25 = vld [vmem:[%s15569_s20 + $0xa8] sm:$0xff] }
  0xd0   : > { %v15608_v28 = vpack.c.bf16 %v832_v27, %v830_v26 }
  0xd5   : > { %v834_v30 = vpop.f32.mrf.mxu0 }
  0xd6   : > { %v835_v32 = vadd.f32 %v15592_v12, %v834_v30 }
  0xd8   : > { %10717 = vmatmul.msk.bf16.gmra.mxu0 %vm701_vm0, %v14519_v29  ;;  %v14530_v29 = vld [vmem:[%s15569_s20 + $0xb0] sm:$0xff] }
  0xdd   : > { %v836_v31 = vpop.f32.mrf.mxu0 }
  0xde   : > { %v837_v33 = vadd.f32 %v15592_v12, %v836_v31 }
  0xe0   : > { %v15614_v34 = vpack.c.bf16 %v837_v33, %v835_v32  ;;  %v14531_v32 = vld [vmem:[%s15569_s20 + $0xb8] sm:$0xff] }
  0xe5   : > { %v839_v36 = vpop.f32.mrf.mxu0 }
  0xe6   : > { %v840_v59 = vadd.f32 %v15592_v12, %v839_v36 }
  0xe8   : > { %10718 = vmatmul.msk.bf16.gmra.mxu0 %vm701_vm0, %v14520_v35 }
  0xed   : > { %v841_v37 = vpop.f32.mrf.mxu0 }
  0xee   : > { %v842_v57 = vadd.f32 %v15592_v12, %v841_v37 }
  0xf0   : > { %v15643_v60 = vpack.c.bf16 %v842_v57, %v840_v59 }
  0xf5   : > { %v844_v39 = vpop.f32.mrf.mxu0 }
  0xf6   : > { %v845_v56 = vadd.f32 %v15592_v12, %v844_v39 }
  0xf8   : > { %10719 = vmatmul.msk.bf16.gmra.mxu0 %vm701_vm0, %v14521_v38 }
  0xfd   : > { %v846_v40 = vpop.f32.mrf.mxu0 }
  0xfe   : > { %v847_v52 = vadd.f32 %v15592_v12, %v846_v40 }
 0x100   : > { %v15638_v58 = vpack.c.bf16 %v847_v52, %v845_v56  ;;  %v14533_v56 = vld [vmem:[%s15569_s20 + $0xc8] sm:$0xff] }
 0x105   : > { %v849_v42 = vpop.f32.mrf.mxu0 }
 0x106   : > { %v850_v51 = vadd.f32 %v15592_v12, %v849_v42 }
 0x108   : > { %10720 = vmatmul.msk.bf16.gmra.mxu0 %vm701_vm0, %v14522_v41 }
 0x10d   : > { %v851_v43 = vpop.f32.mrf.mxu0 }
 0x10e   : > { %v852_v49 = vadd.f32 %v15592_v12, %v851_v43  ;;  %v14532_v43 = vld [vmem:[%s15569_s20 + $0xc0] sm:$0xff] }
 0x110   : > { %v15632_v53 = vpack.c.bf16 %v852_v49, %v850_v51 }
 0x115   : > { %v854_v45 = vpop.f32.mrf.mxu0 }
 0x116   : > { %v855_v47 = vadd.f32 %v15592_v12, %v854_v45 }
 0x118   : > { %10721 = vmatmul.msk.bf16.gmra.mxu0 %vm701_vm0, %v14523_v44 }
 0x11d   : > { %v856_v46 = vpop.f32.mrf.mxu0 }
 0x11e   : > { %v857_v48 = vadd.f32 %v15592_v12, %v856_v46 }
 0x120   : > { %v15627_v50 = vpack.c.bf16 %v857_v48, %v855_v47 }
 0x122   : > { %1342 = vmatpush.bf16.msra.mxu1 %v15627_v50 }
 0x125   : > { %v859_v55 = vpop.f32.mrf.mxu0 }
 0x126   : > { %1343 = vmatpush.bf16.msra.mxu1 %v15632_v53  ;;  %v860_v62 = vadd.f32 %v15592_v12, %v859_v55 }
 0x128   : > { %10722 = vmatmul.msk.bf16.gmra.mxu0 %vm701_vm0, %v14524_v54 }
 0x12a   : > { %1344 = vmatpush.bf16.msra.mxu1 %v15638_v58 }
 0x12d   : > { %v861_v61 = vpop.f32.mrf.mxu0 }
 0x12e   : > { %v862_v63 = vadd.f32 %v15592_v12, %v861_v61  ;;  %1345 = vmatpush.bf16.msra.mxu1 %v15643_v60 }
 0x130   : > { %v15648_v0 = vpack.c.bf16 %v862_v63, %v860_v62 }
 0x132   : > { %1346 = vmatpush.bf16.msra.mxu1 %v15614_v34 }
 0x135   : > { %v864_v2 = vpop.f32.mrf.mxu0 }
 0x136   : > { %1347 = vmatpush.bf16.msra.mxu1 %v15608_v28  ;;  %v865_v4 = vadd.f32 %v15592_v12, %v864_v2 }
 0x138   : > { %10723 = vmatmul.msk.bf16.gmra.mxu0 %vm701_vm0, %v14525_v1  ;;  %v14534_v1 = vld [vmem:[%s15569_s20 + $0xd0] sm:$0xff] }
 0x13a   : > { %1348 = vmatpush.bf16.msra.mxu1 %v15602_v22 }
 0x13d   : > { %v866_v3 = vpop.f32.mrf.mxu0 }
 0x13e   : > { %v867_v5 = vadd.f32 %v15592_v12, %v866_v3  ;;  %1349 = vmatpush.bf16.msra.mxu1 %v15596_v16 }
 0x140   : > { %v15658_v6 = vpack.c.bf16 %v867_v5, %v865_v4 }
 0x145   : > { %v869_v8 = vpop.f32.mrf.mxu0 }
 0x146   : > { %v870_v10 = vadd.f32 %v15592_v12, %v869_v8  ;;  %v14535_v8 = vld [vmem:[%s15569_s20 + $0xd8] sm:$0xff] }
 0x148   : > { %10724 = vmatmul.msk.bf16.gmra.mxu0 %vm701_vm0, %v14526_v7 }
 0x14d   : > { %v871_v9 = vpop.f32.mrf.mxu0 }
 0x14e   : > { %v872_v11 = vadd.f32 %v15592_v12, %v871_v9 }
 0x150   : > { %v15664_v13 = vpack.c.bf16 %v872_v11, %v870_v10 }
 0x155   : > { %v874_v15 = vpop.f32.mrf.mxu0 }
 0x156   : > { %v875_v18 = vadd.f32 %v15592_v12, %v874_v15 }
 0x158   : > { %10725 = vmatmul.msk.bf16.gmra.mxu0 %vm701_vm0, %v14527_v14 }
 0x15d   : > { %v876_v17 = vpop.f32.mrf.mxu0 }
 0x15e   : > { %v877_v19 = vadd.f32 %v15592_v12, %v876_v17  ;;  %v14536_v17 = vld [vmem:[%s15569_s20 + $0xe0] sm:$0xff] }
 0x160   : > { %v15670_v20 = vpack.c.bf16 %v877_v19, %v875_v18 }
 0x165   : > { %v879_v23 = vpop.f32.mrf.mxu0 }
 0x166   : > { %v880_v48 = vadd.f32 %v15592_v12, %v879_v23 }
 0x168   : > { %10726 = vmatmul.msk.bf16.gmra.mxu0 %vm701_vm0, %v14528_v21  ;;  %v14537_v21 = vld [vmem:[%s15569_s20 + $0xe8] sm:$0xff] }
 0x16d   : > { %v881_v24 = vpop.f32.mrf.mxu0 }
 0x16e   : > { %v882_v46 = vadd.f32 %v15592_v12, %v881_v24 }
 0x170   : > { %v15699_v49 = vpack.c.bf16 %v882_v46, %v880_v48 }
 0x175   : > { %v884_v26 = vpop.f32.mrf.mxu0 }
 0x176   : > { %v885_v45 = vadd.f32 %v15592_v12, %v884_v26 }
 0x178   : > { %10727 = vmatmul.msk.bf16.gmra.mxu0 %vm701_vm0, %v14529_v25  ;;  %v14538_v25 = vld [vmem:[%s15569_s20 + $0xf0] sm:$0xff] }
 0x17d   : > { %v886_v27 = vpop.f32.mrf.mxu0 }
 0x17e   : > { %v887_v41 = vadd.f32 %v15592_v12, %v886_v27 }
 0x180   : > { %v15694_v47 = vpack.c.bf16 %v887_v41, %v885_v45 }
 0x185   : > { %v889_v30 = vpop.f32.mrf.mxu0 }
 0x186   : > { %v890_v40 = vadd.f32 %v15592_v12, %v889_v30  ;;  %v14548_v30 = vld [vmem:[%s20655_s3 + $0x10] sm:$0xf0] }
 0x188   : > { %10728 = vmatmul.msk.bf16.gmra.mxu0 %vm701_vm0, %v14530_v29  ;;  %v10744_v29 = vld [vmem:[%s20655_s3] sm:$0xf] }
 0x18d   : > { %v891_v31 = vpop.f32.mrf.mxu0 }
 0x18e   : > { %v892_v38 = vadd.f32 %v15592_v12, %v891_v31  ;;  %v10745_v31 = vor.u32 %v14548_v30, %v10744_v29  ;;  %v14563_v29 = vld [vmem:[%s20655_s3 + $0x88] sm:$0xf0] }
 0x190   : > { %v15688_v42 = vpack.c.bf16 %v892_v38, %v890_v40  ;;  %1350 = vmatmul.bf16.vlgmr.msra.gmra.mxu1 %v10745_v31  ;;  %v14542_v31 = vld [vmem:[%s15569_s20 + $0x110] sm:$0xff] }
 0x195   : > { %v894_v33 = vpop.f32.mrf.mxu0 }
 0x196   : > { %v895_v36 = vadd.f32 %v15592_v12, %v894_v33 }
 0x198   : > { %10729 = vmatmul.msk.bf16.gmra.mxu0 %vm701_vm0, %v14531_v32  ;;  %v14539_v32 = vld [vmem:[%s15569_s20 + $0xf8] sm:$0xff] }
 0x19d   : > { %v896_v35 = vpop.f32.mrf.mxu0 }
 0x19e   : > { %v897_v37 = vadd.f32 %v15592_v12, %v896_v35  ;;  %v14546_v35 = vld [vmem:[%s20655_s3 + $0x4] sm:$0xf] }
 0x1a0   : > { %v15683_v39 = vpack.c.bf16 %v897_v37, %v895_v36  ;;  %v10746_v36 = vld [vmem:[%s20655_s3 + $0x14] sm:$0xf0] }
 0x1a1   : > { %v10749_v37 = vor.u32 %v14546_v35, %v10746_v36  ;;  %v14554_v35 = vld [vmem:[%s20655_s3 + $0x40] sm:$0xf0]  ;;  %v14561_v36 = vld [vmem:[%s20655_s3 + $0x7c] sm:$0xf] }
 0x1a2   : > { %1396 = vmatpush.bf16.msra.mxu2 %v15683_v39 }
 0x1a5   : > { %v899_v44 = vpop.f32.mrf.mxu0 }
 0x1a6   : > { %1397 = vmatpush.bf16.msra.mxu2 %v15688_v42  ;;  %v900_v52 = vadd.f32 %v15592_v12, %v899_v44  ;;  %v14553_v44 = vld [vmem:[%s20655_s3 + $0x38] sm:$0xf0] }
 0x1a8   : > { %10730 = vmatmul.msk.bf16.gmra.mxu0 %vm701_vm0, %v14532_v43  ;;  %v10764_v43 = vld [vmem:[%s20655_s3 + $0x28] sm:$0xf] }
 0x1a9   : > { %v10765_v45 = vor.u32 %v14553_v44, %v10764_v43  ;;  %v10824_v43 = vld [vmem:[%s20655_s3 + $0xa0] sm:$0xf]  ;;  %v14568_v44 = vld [vmem:[%s20655_s3 + $0xb0] sm:$0xf0] }
 0x1aa   : > { %1398 = vmatpush.bf16.msra.mxu2 %v15694_v47 }
 0x1ab   : > { %1355 = vmatmul.bf16.gmra.mxu1 %v10765_v45  ;;  %v10825_v45 = vor.u32 %v14568_v44, %v10824_v43  ;;  %v10884_v44 = vld [vmem:[%s20655_s3 + $0x118] sm:$0xf] }
 0x1ad   : > { %v901_v51 = vpop.f32.mrf.mxu0 }
 0x1ae   : > { %v902_v54 = vadd.f32 %v15592_v12, %v901_v51  ;;  %1399 = vmatpush.bf16.msra.mxu2 %v15699_v49 }
 0x1b0   : > { %v15704_v55 = vpack.c.bf16 %v902_v54, %v900_v52 }
 0x1b2   : > { %20700 = vst [vmem:[#allocation8_spill] sm:$0xff] %v15704_v55  ;;  %1400 = vmatpush.bf16.msra.mxu2 %v15670_v20 }
 0x1b5   : > { %v904_v57 = vpop.f32.mrf.mxu0 }
 0x1b6   : > { %1401 = vmatpush.bf16.msra.mxu2 %v15664_v13  ;;  %v905_v61 = vadd.f32 %v15592_v12, %v904_v57 }
 0x1b8   : > { %10731 = vmatmul.msk.bf16.gmra.mxu0 %vm701_vm0, %v14533_v56  ;;  %v14540_v56 = vld [vmem:[%s15569_s20 + $0x100] sm:$0xff] }
 0x1ba   : > { %1402 = vmatpush.bf16.msra.mxu2 %v15658_v6 }
 0x1bd   : > { %v906_v59 = vpop.f32.mrf.mxu0 }
 0x1be   : > { %v907_v62 = vadd.f32 %v15592_v12, %v906_v59  ;;  %1403 = vmatpush.bf16.msra.mxu2 %v15648_v0 }
 0x1c0   : > { %v15714_v63 = vpack.c.bf16 %v907_v62, %v905_v61 }
 0x1c1   : > { %1404 = vmatmul.bf16.vlgmr.msra.gmra.mxu2 %v10749_v37  ;;  %v10806_v37 = vld [vmem:[%s20655_s3 + $0x8c] sm:$0xf0] }
 0x1c2   : > { %20701 = vst [vmem:[#allocation9_spill] sm:$0xff] %v15714_v63 }
 0x1c5   : > { %v909_v2 = vpop.f32.mrf.mxu0 }
 0x1c6   : > { %v910_v4 = vadd.f32 %v15592_v12, %v909_v2  ;;  %v14551_v2 = vld [vmem:[%s20655_s3 + $0x2c] sm:$0xf] }
 0x1c8   : > { %10732 = vmatmul.msk.bf16.gmra.mxu0 %vm701_vm0, %v14534_v1 }
 0x1cd   : > { %v911_v3 = vpop.f32.mrf.mxu0 }
 0x1ce   : > { %v912_v5 = vadd.f32 %v15592_v12, %v911_v3  ;;  %v10766_v3 = vld [vmem:[%s20655_s3 + $0x3c] sm:$0xf0] }
 0x1d0   : > { %v15720_v7 = vpack.c.bf16 %v912_v5, %v910_v4  ;;  %v10769_v4 = vor.u32 %v14551_v2, %v10766_v3 }
 0x1d2   : > { %20702 = vst [vmem:[#allocation10_spill] sm:$0xff] %v15720_v7  ;;  %1409 = vmatmul.bf16.gmra.mxu2 %v10769_v4  ;;  %v10844_v4 = vld [vmem:[%s20655_s3 + $0xc8] sm:$0xf] }
 0x1d5   : > { %v914_v9 = vpop.f32.mrf.mxu0 }
 0x1d6   : > { %v915_v11 = vadd.f32 %v15592_v12, %v914_v9  ;;  %v10784_v9 = vld [vmem:[%s20655_s3 + $0x50] sm:$0xf] }
 0x1d8   : > { %10733 = vmatmul.msk.bf16.gmra.mxu0 %vm701_vm0, %v14535_v8 }
 0x1dd   : > { %v916_v10 = vpop.f32.mrf.mxu0 }
 0x1de   : > { %v917_v14 = vadd.f32 %v15592_v12, %v916_v10  ;;  %v14558_v10 = vld [vmem:[%s20655_s3 + $0x60] sm:$0xf0] }
 0x1e0   : > { %v15726_v15 = vpack.c.bf16 %v917_v14, %v915_v11  ;;  %v10785_v11 = vor.u32 %v14558_v10, %v10784_v9  ;;  %v14541_v14 = vld [vmem:[%s15569_s20 + $0x108] sm:$0xff]  ;;  %v14573_v9 = vld [vmem:[%s20655_s3 + $0xd8] sm:$0xf0] }
 0x1e1   : > { %v10845_v10 = vor.u32 %v14573_v9, %v10844_v4 }
 0x1e2   : > { %20703 = vst [vmem:[#allocation11_spill] sm:$0xff] %v15726_v15  ;;  %1360 = vmatmul.bf16.gmra.mxu1 %v10785_v11 }
 0x1e5   : > { %v919_v18 = vpop.f32.mrf.mxu0 }
 0x1e6   : > { %v920_v1 = vadd.f32 %v15592_v12, %v919_v18  ;;  %v10752_v18 = vld [vmem:[%s20655_s3 + $0x8] sm:$0xf] }
 0x1e8   : > { %10734 = vmatmul.msk.bf16.gmra.mxu0 %vm701_vm0, %v14536_v17 }
 0x1ed   : > { %v921_v19 = vpop.f32.mrf.mxu0 }
 0x1ee   : > { %v922_v61 = vadd.f32 %v15592_v12, %v921_v19  ;;  %v14549_v19 = vld [vmem:[%s20655_s3 + $0x18] sm:$0xf0] }
 0x1f0   : > { %v15784_v5 = vpack.c.bf16 %v922_v61, %v920_v1  ;;  %v10826_v61 = vld [vmem:[%s20655_s3 + $0xb4] sm:$0xf0] }
 0x1f2   : > { %20707 = vst [vmem:[#allocation15_spill] sm:$0xff] %v15784_v5 }
 0x1f5   : > { %v924_v23 = vpop.f32.mrf.mxu0 }
 0x1f6   : > { %v925_v59 = vadd.f32 %v15592_v12, %v924_v23  ;;  %v10786_v23 = vld [vmem:[%s20655_s3 + $0x64] sm:$0xf0] }
 0x1f8   : > { %10735 = vmatmul.msk.bf16.gmra.mxu0 %vm701_vm0, %v14537_v21  ;;  %v14556_v21 = vld [vmem:[%s20655_s3 + $0x54] sm:$0xf] }
 0x1fd   : > { %v926_v24 = vpop.f32.mrf.mxu0 }
 0x1fe   : > { %v927_v52 = vadd.f32 %v15592_v12, %v926_v24  ;;  %v10789_v24 = vor.u32 %v14556_v21, %v10786_v23  ;;  %v10846_v21 = vld [vmem:[%s20655_s3 + $0xdc] sm:$0xf0] }
 0x200   : > { %v15772_v62 = vpack.c.bf16 %v927_v52, %v925_v59  ;;  %1414 = vmatmul.bf16.gmra.mxu2 %v10789_v24  ;;  %v10792_v52 = vld [vmem:[%s20655_s3 + $0x58] sm:$0xf]  ;;  %v14566_v59 = vld [vmem:[%s20655_s3 + $0xa4] sm:$0xf] }
 0x201   : > { %v10829_v1 = vor.u32 %v14566_v59, %v10826_v61  ;;  %v14574_v59 = vld [vmem:[%s20655_s3 + $0xe0] sm:$0xf0]  ;;  %v14581_v61 = vld [vmem:[%s20655_s3 + $0x11c] sm:$0xf] }
 0x202   : > { %20706 = vst [vmem:[#allocation14_spill] sm:$0xff] %v15772_v62 }
 0x205   : > { %v929_v26 = vpop.f32.mrf.mxu0 }
 0x206   : > { %v930_v51 = vadd.f32 %v15592_v12, %v929_v26  ;;  %v10753_v26 = vor.u32 %v14549_v19, %v10752_v18  ;;  %v14564_v18 = vld [vmem:[%s20655_s3 + $0x90] sm:$0xf0]  ;;  %v14571_v19 = vld [vmem:[%s20655_s3 + $0xcc] sm:$0xf] }
 0x207   : > { %v10849_v23 = vor.u32 %v14571_v19, %v10846_v21 }
 0x208   : > { %10736 = vmatmul.msk.bf16.gmra.mxu0 %vm701_vm0, %v14538_v25 }
 0x20d   : > { %v931_v27 = vpop.f32.mrf.mxu0 }
 0x20e   : > { %v932_v46 = vadd.f32 %v15592_v12, %v931_v27  ;;  %v10804_v27 = vld [vmem:[%s20655_s3 + $0x78] sm:$0xf] }
 0x20f   : > { %v10805_v30 = vor.u32 %v14563_v29, %v10804_v27  ;;  %v10864_v27 = vld [vmem:[%s20655_s3 + $0xf0] sm:$0xf]  ;;  %v14578_v29 = vld [vmem:[%s20655_s3 + $0x100] sm:$0xf0] }
 0x210   : > { %v15763_v54 = vpack.c.bf16 %v932_v46, %v930_v51  ;;  %v14543_v46 = vld [vmem:[%s15569_s20 + $0x118] sm:$0xff]  ;;  %s422_s20 = scalar_lea.vmem [#allocation5], %s421_s29 }
 0x211   : > { %1365 = vmatmul.bf16.gmra.mxu1 %v10805_v30  ;;  %v10865_v30 = vor.u32 %v14578_v29, %v10864_v27  ;;  %v14579_v27 = vld [vmem:[%s20655_s3 + $0x108] sm:$0xf0]  ;;  %v14586_v29 = vld [vmem:[%s20655_s3 + $0x144] sm:$0xf]  ;;  %s10478_s17 = sshll.u32 %s422_s20, 4  ;;  %s10479_s17 = int_to_ptr.vmem [resolvable:$true] %s10478_s17 }
 0x212   : > { %20705 = vst [vmem:[#allocation13_spill] sm:$0xff] %v15763_v54 }
 0x215   : > { %v934_v33 = vpop.f32.mrf.mxu0 }
 0x216   : > { %v935_v40 = vadd.f32 %v15592_v12, %v934_v33  ;;  %v10772_v33 = vld [vmem:[%s20655_s3 + $0x30] sm:$0xf] }
 0x218   : > { %10737 = vmatmul.msk.bf16.gmra.mxu0 %vm701_vm0, %v14539_v32 }
 0x21d   : > { %v936_v38 = vpop.f32.mrf.mxu0 }
 0x21e   : > { %v937_v41 = vadd.f32 %v15592_v12, %v936_v38  ;;  %v10809_v38 = vor.u32 %v14561_v36, %v10806_v37  ;;  %v14576_v36 = vld [vmem:[%s20655_s3 + $0xf4] sm:$0xf]  ;;  %v10866_v37 = vld [vmem:[%s20655_s3 + $0x104] sm:$0xf0] }
 0x220   : > { %v15757_v48 = vpack.c.bf16 %v937_v41, %v935_v40  ;;  %v10773_v41 = vor.u32 %v14554_v35, %v10772_v33  ;;  %1419 = vmatmul.bf16.gmra.mxu2 %v10809_v38  ;;  %v10832_v33 = vld [vmem:[%s20655_s3 + $0xa8] sm:$0xf]  ;;  %v14569_v35 = vld [vmem:[%s20655_s3 + $0xb8] sm:$0xf0]  ;;  %v10869_v38 = vor.u32 %v14576_v36, %v10866_v37 }
 0x221   : > { %1370 = vmatmul.bf16.gmra.mxu1 %v10825_v45  ;;  %v10833_v43 = vor.u32 %v14569_v35, %v10832_v33  ;;  %v14583_v45 = vld [vmem:[%s20655_s3 + $0x128] sm:$0xf0] }
 0x222   : > { %20704 = vst [vmem:[#allocation12_spill] sm:$0xff] %v15757_v48  ;;  %1450 = vmatpush.bf16.msra.mxu3 %v15757_v48  ;;  %2604 = vmatpush.bf16.msrb.mxu0 %v15757_v48 }
 0x225   : > { %v15766_v57 = vpop.f32.mrf.mxu0 }
 0x226   : > { %1451 = vmatpush.bf16.msra.mxu3 %v15763_v54  ;;  %2605 = vmatpush.bf16.msrb.mxu0 %v15763_v54 }
 0x228   : > { %10738 = vmatmul.msk.bf16.gmra.mxu0 %vm701_vm0, %v14540_v56  ;;  %v14559_v56 = vld [vmem:[%s20655_s3 + $0x68] sm:$0xf0] }
 0x229   : > { %v10793_v3 = vor.u32 %v14559_v56, %v10792_v52  ;;  %v10852_v56 = vld [vmem:[%s20655_s3 + $0xd0] sm:$0xf] }
 0x22a   : > { %1452 = vmatpush.bf16.msra.mxu3 %v15772_v62  ;;  %2606 = vmatpush.bf16.msrb.mxu0 %v15772_v62  ;;  %v10853_v9 = vor.u32 %v14574_v59, %v10852_v56 }
 0x22d   : > { %v15786_v8 = vpop.f32.mrf.mxu0 }
 0x22e   : > { %1453 = vmatpush.bf16.msra.mxu3 %v15784_v5  ;;  %2607 = vmatpush.bf16.msrb.mxu0 %v15784_v5 }
 0x230   : > { %1424 = vmatmul.bf16.gmra.mxu2 %v10829_v1  ;;  %v10886_v1 = vld [vmem:[%s20655_s3 + $0x12c] sm:$0xf0] }
 0x231   : > { %1375 = vmatmul.bf16.gmra.mxu1 %v10845_v10  ;;  %v1351_v10 = vpop.f32.mrf.mxu1 }
 0x232   : > { %1454 = vmatpush.bf16.msra.mxu3 %v15726_v15  ;;  %2608 = vmatpush.bf16.msrb.mxu0 %v15726_v15 }
 0x235   : > { %v15799_v17 = vpop.f32.mrf.mxu0 }
 0x236   : > { %1455 = vmatpush.bf16.msra.mxu3 %v15720_v7  ;;  %2609 = vmatpush.bf16.msrb.mxu0 %v15720_v7 }
 0x238   : > { %10739 = vmatmul.msk.bf16.gmra.mxu0 %vm701_vm0, %v14541_v14  ;;  %v10812_v14 = vld [vmem:[%s20655_s3 + $0x80] sm:$0xf] }
 0x23a   : > { %1456 = vmatpush.bf16.msra.mxu3 %v15714_v63  ;;  %2610 = vmatpush.bf16.msrb.mxu0 %v15714_v63 }
 0x23d   : > { %v15818_v25 = vpop.f32.mrf.mxu0 }
 0x23e   : > { %1457 = vmatpush.bf16.msra.mxu3 %v15704_v55  ;;  %2611 = vmatpush.bf16.msrb.mxu0 %v15704_v55 }
 0x240   : > { %1429 = vmatmul.bf16.gmra.mxu2 %v10849_v23  ;;  %v15950_v23 = vpop.f32.mrf.mxu1 }
 0x241   : > { %1458 = vmatmul.bf16.vlgmr.msra.gmra.mxu3 %v10753_v26  ;;  %v10813_v26 = vor.u32 %v14564_v18, %v10812_v14  ;;  %1380 = vmatmul.bf16.gmra.mxu1 %v10865_v30  ;;  %v10904_v14 = vld [vmem:[%s20655_s3 + $0x140] sm:$0xf]  ;;  %v14588_v18 = vld [vmem:[%s20655_s3 + $0x150] sm:$0xf0]  ;;  %v10906_v30 = vld [vmem:[%s20655_s3 + $0x154] sm:$0xf0] }
 0x242   : > { %1919 = vmatpush.bf16.msrb.mxu3 %v15627_v50  ;;  %3127 = vmatpush.bf16.msra.mxu0 %v15683_v39  ;;  %v10905_v19 = vor.u32 %v14588_v18, %v10904_v14  ;;  %v10909_v33 = vor.u32 %v14586_v29, %v10906_v30  ;;  %v14584_v18 = vld [vmem:[%s20655_s3 + $0x130] sm:$0xf0] }
 0x245   : > { %v15833_v32 = vpop.f32.mrf.mxu0 }
 0x246   : > { %1920 = vmatpush.bf16.msrb.mxu3 %v15632_v53  ;;  %3128 = vmatpush.bf16.msra.mxu0 %v15688_v42 }
 0x248   : > { %10740 = vmatmul.msk.bf16.gmra.mxu0 %vm701_vm0, %v14542_v31 }
 0x24a   : > { %1921 = vmatpush.bf16.msrb.mxu3 %v15638_v58  ;;  %3129 = vmatpush.bf16.msra.mxu0 %v15694_v47 }
 0x24d   : > { %v15852_v40 = vpop.f32.mrf.mxu0 }
 0x24e   : > { %1922 = vmatpush.bf16.msrb.mxu3 %v15643_v60  ;;  %3130 = vmatpush.bf16.msra.mxu0 %v15699_v49  ;;  %v952_v29 = vadd.f32 %v15592_v12, %v15852_v40 }
 0x250   : > { %1434 = vmatmul.bf16.gmra.mxu2 %v10869_v38 }
 0x251   : > { %1463 = vmatmul.bf16.gmra.mxu3 %v10773_v41 }
 0x252   : > { %1923 = vmatpush.bf16.msrb.mxu3 %v15614_v34  ;;  %3131 = vmatpush.bf16.msra.mxu0 %v15670_v20 }
 0x255   : > { %v15865_v51 = vpop.f32.mrf.mxu0 }
 0x256   : > { %1924 = vmatpush.bf16.msrb.mxu3 %v15608_v28  ;;  %3132 = vmatpush.bf16.msra.mxu0 %v15664_v13 }
 0x258   : > { %10741 = vmatmul.msk.bf16.gmra.mxu0 %vm701_vm0, %v14543_v46  ;;  %v10885_v46 = vor.u32 %v14583_v45, %v10884_v44 }
 0x25a   : > { %1925 = vmatpush.bf16.msrb.mxu3 %v15602_v22  ;;  %3133 = vmatpush.bf16.msra.mxu0 %v15658_v6 }
 0x25b   : > { %1385 = vmatmul.bf16.gmra.mxu1 %v10885_v46  ;;  %v1405_v46 = vpop.f32.mrf.mxu2 }
 0x25c   : > { %v15969_v56 = vadd.f32 %v1405_v46, %v1351_v10  ;;  %v14589_v46 = vld [vmem:[%s20655_s3 + $0x158] sm:$0xf0] }
 0x25d   : > { %v15884_v2 = vpop.f32.mrf.mxu0 }
 0x25e   : > { %1926 = vmatpush.bf16.msrb.mxu3 %v15596_v16  ;;  %3134 = vmatpush.bf16.msra.mxu0 %v15648_v0 }
 0x261   : > { %1468 = vmatmul.bf16.gmra.mxu3 %v10793_v3  ;;  %v10889_v3 = vor.u32 %v14581_v61, %v10886_v1 }
 0x263   : > { %1439 = vmatmul.bf16.gmra.mxu2 %v10889_v3 }
 0x265   : > { %v15892_v11 = vpop.f32.mrf.mxu0 }
 0x266   : > { %v960_v14 = vadd.f32 %v15592_v12, %v15892_v11 }
 0x26b   : > { %1390 = vmatmul.bf16.gmra.mxu1 %v10905_v19 }
 0x26d   : > { %v15906_v24 = vpop.f32.mrf.mxu0 }
 0x271   : > { %1473 = vmatmul.bf16.gmra.mxu3 %v10813_v26  ;;  %v10872_v26 = vld [vmem:[%s20655_s3 + $0xf8] sm:$0xf] }
 0x272   : > { %v10873_v36 = vor.u32 %v14579_v27, %v10872_v26  ;;  %v955_v26 = vadd.f32 %v15592_v12, %v15865_v51  ;;  %v947_v51 = vadd.f32 %v15592_v12, %v15818_v25 }
 0x273   : > { %1444 = vmatmul.bf16.gmra.mxu2 %v10909_v33 }
 0x275   : > { %v964_v31 = vpop.f32.mrf.mxu0 }
 0x27d   : > { %v966_v41 = vpop.f32.mrf.mxu0 }
 0x27e   : > { %v967_v61 = vadd.f32 %v15592_v12, %v966_v41  ;;  %v15990_v41 = vpop.f32.mrf.mxu2 }
 0x281   : > { %1478 = vmatmul.bf16.gmra.mxu3 %v10833_v43  ;;  %v1356_v43 = vpop.f32.mrf.mxu1 }
 0x285   : > { %v969_v52 = vpop.f32.mrf.mxu0 }
 0x286   : > { %v970_v59 = vadd.f32 %v15592_v12, %v969_v52 }
 0x289   : > { %v15984_v52 = vpop.f32.mrf.mxu1 }
 0x28d   : > { %v971_v4 = vpop.f32.mrf.mxu0 }
 0x28e   : > { %v972_v44 = vadd.f32 %v15592_v12, %v971_v4  ;;  %v965_v4 = vadd.f32 %v15592_v12, %v964_v31  ;;  %v10892_v31 = vld [vmem:[%s20655_s3 + $0x120] sm:$0xf] }
 0x290   : > { %v15976_v1 = vpack.c.bf16 %v972_v44, %v970_v59  ;;  %v15988_v10 = vpack.c.bf16 %v967_v61, %v965_v4  ;;  %v10912_v44 = vld [vmem:[%s20655_s3 + $0x148] sm:$0xf]  ;;  %v10754_v59 = vld [vmem:[%s20655_s3 + $0x1c] sm:$0xf0] }
 0x291   : > { %1483 = vmatmul.bf16.gmra.mxu3 %v10853_v9  ;;  %v962_v9 = vadd.f32 %v15592_v12, %v15906_v24  ;;  %v957_v24 = vadd.f32 %v15592_v12, %v15884_v2  ;;  %v1361_v27 = vpop.f32.mrf.mxu1  ;;  %v1410_v2 = vpop.f32.mrf.mxu2  ;;  %v10914_v61 = vld [vmem:[%s20655_s3 + $0x15c] sm:$0xf0] }
 0x292   : > { %v16018_v33 = vadd.f32 %v1410_v2, %v1356_v43 }
 0x293   : > { %v16005_v19 = vpack.c.bf16 %v962_v9, %v960_v14  ;;  %v16016_v30 = vpack.c.bf16 %v957_v24, %v955_v26  ;;  %v10913_v14 = vor.u32 %v14589_v46, %v10912_v44  ;;  %v10987_v44 = vld [vmem:[%s20655_s3 + $0x168] sm:$0xf] }
 0x295   : > { %v974_v21 = vpop.f32.mrf.mxu0 }
 0x296   : > { %v975_v37 = vadd.f32 %v15592_v12, %v974_v21  ;;  %v10893_v21 = vor.u32 %v14584_v18, %v10892_v31 }
 0x299   : > { %v16042_v25 = vpop.f32.mrf.mxu2 }
 0x29d   : > { %v976_v35 = vpop.f32.mrf.mxu0 }
 0x29e   : > { %v977_v38 = vadd.f32 %v15592_v12, %v976_v35  ;;  %v950_v35 = vadd.f32 %v15592_v12, %v15833_v32  ;;  %v16036_v32 = vpop.f32.mrf.mxu1 }
 0x2a0   : > { %v15967_v45 = vpack.c.bf16 %v977_v38, %v975_v37  ;;  %v945_v37 = vadd.f32 %v15592_v12, %v15799_v17  ;;  %v942_v38 = vadd.f32 %v15592_v12, %v15786_v8  ;;  %v940_v17 = vadd.f32 %v15592_v12, %v15766_v57  ;;  %v14547_v8 = vld [vmem:[%s20655_s3 + $0xc] sm:$0xf] }
 0x2a1   : > { %1488 = vmatmul.bf16.gmra.mxu3 %v10873_v36  ;;  %v16027_v36 = vpack.c.bf16 %v952_v29, %v950_v35  ;;  %v14587_v57 = vld [vmem:[%s20655_s3 + $0x14c] sm:$0xf]  ;;  %v10757_v31 = vor.u32 %v14547_v8, %v10754_v59 }
 0x2a2   : > { %1504 = vmatpush.bf16.msrb.mxu1 %v15967_v45  ;;  %15266 = vmatpush.bf16.msrb.mxu2 %v15967_v45  ;;  %v16040_v43 = vpack.c.bf16 %v947_v51, %v945_v37  ;;  %v16067_v4 = vpack.c.bf16 %v942_v38, %v940_v17  ;;  %v10917_v18 = vor.u32 %v14587_v57, %v10914_v61  ;;  %v14552_v38 = vld [vmem:[%s20655_s3 + $0x34] sm:$0xf] }
 0x2a3   : > { %2081 = vmatpush.bf16.msra.mxu3 %v15967_v45 }
 0x2a5   : > { %v15978_v3 = vpop.f32.mrf.mxu0 }
 0x2a6   : > { %1505 = vmatpush.bf16.msrb.mxu1 %v15976_v1  ;;  %15267 = vmatpush.bf16.msrb.mxu2 %v15976_v1  ;;  %v1366_v24 = vpop.f32.mrf.mxu1 }
 0x2a7   : > { %2082 = vmatpush.bf16.msra.mxu3 %v15976_v1 }
 0x2aa   : > { %1506 = vmatpush.bf16.msrb.mxu1 %v15988_v10  ;;  %15268 = vmatpush.bf16.msrb.mxu2 %v15988_v10 }
 0x2ab   : > { %2083 = vmatpush.bf16.msra.mxu3 %v15988_v10 }
 0x2ad   : > { %v16007_v11 = vpop.f32.mrf.mxu0 }
 0x2ae   : > { %1507 = vmatpush.bf16.msrb.mxu1 %v16005_v19  ;;  %15269 = vmatpush.bf16.msrb.mxu2 %v16005_v19  ;;  %v16080_v51 = vpop.f32.mrf.mxu1 }
 0x2af   : > { %2084 = vmatpush.bf16.msra.mxu3 %v16005_v19  ;;  %20708 = vst [vmem:[#allocation16_spill] sm:$0xff] %v16080_v51 }
 0x2b1   : > { %1493 = vmatmul.bf16.gmra.mxu3 %v10893_v21  ;;  %v1415_v21 = vpop.f32.mrf.mxu2 }
 0x2b2   : > { %1508 = vmatpush.bf16.msrb.mxu1 %v16016_v30  ;;  %15270 = vmatpush.bf16.msrb.mxu2 %v16016_v30  ;;  %v1416_v26 = vadd.f32 %v1415_v21, %v1361_v27  ;;  %v10774_v27 = vld [vmem:[%s20655_s3 + $0x44] sm:$0xf0] }
 0x2b3   : > { %2085 = vmatpush.bf16.msra.mxu3 %v16016_v30  ;;  %v10777_v8 = vor.u32 %v14552_v38, %v10774_v27 }
 0x2b5   : > { %v16029_v40 = vpop.f32.mrf.mxu0 }
 0x2b6   : > { %1509 = vmatpush.bf16.msrb.mxu1 %v16027_v36  ;;  %15271 = vmatpush.bf16.msrb.mxu2 %v16027_v36  ;;  %v1371_v61 = vpop.f32.mrf.mxu1 }
 0x2b7   : > { %2086 = vmatpush.bf16.msra.mxu3 %v16027_v36 }
 0x2b9   : > { %v16082_v37 = vpop.f32.mrf.mxu2 }
 0x2ba   : > { %1510 = vmatpush.bf16.msrb.mxu1 %v16040_v43  ;;  %15272 = vmatpush.bf16.msrb.mxu2 %v16040_v43 }
 0x2bb   : > { %2087 = vmatpush.bf16.msra.mxu3 %v16040_v43 }
 0x2bd   : > { %v16069_v9 = vpop.f32.mrf.mxu0 }
 0x2be   : > { %1511 = vmatpush.bf16.msrb.mxu1 %v16067_v4  ;;  %15273 = vmatpush.bf16.msrb.mxu2 %v16067_v4  ;;  %v16125_v38 = vpop.f32.mrf.mxu1 }
 0x2bf   : > { %2088 = vmatpush.bf16.msra.mxu3 %v16067_v4  ;;  %20710 = vst [vmem:[#allocation18_spill] sm:$0xff] %v16125_v38 }
 0x2c1   : > { %1498 = vmatmul.bf16.gmra.mxu3 %v10913_v14  ;;  %1512 = vmatmul.bf16.vlgmr.msrb.gmra.mxu1 %v10757_v31  ;;  %v1420_v57 = vpop.f32.mrf.mxu2 }
 0x2c2   : > { %1973 = vmatpush.bf16.msra.mxu1 %v15683_v39  ;;  %1552 = vmatmul.bf16.vlgmr.msrb.gmra.mxu2 %v10917_v18  ;;  %v16100_v14 = vadd.f32 %v1420_v57, %v1366_v24  ;;  %v14557_v24 = vld [vmem:[%s20655_s3 + $0x5c] sm:$0xf] }
 0x2c4   : > { %v1459_v29 = vpop.f32.mrf.mxu3 }
 0x2c5   : > { %v989_v2 = vpop.f32.mrf.mxu0  ;;  %v16077_v35 = vadd.f32 %v1459_v29, %v15969_v56  ;;  %v14593_v56 = vld [vmem:[%s20655_s3 + $0x178] sm:$0xf0] }
 0x2c6   : > { %1974 = vmatpush.bf16.msra.mxu1 %v15688_v42  ;;  %v10988_v59 = vor.u32 %v14593_v56, %v10987_v44  ;;  %v990_v38 = vadd.f32 %v15592_v12, %v989_v2 }
 0x2c9   : > { %v16109_v29 = vpop.f32.mrf.mxu2 }
 0x2ca   : > { %1975 = vmatpush.bf16.msra.mxu1 %v15694_v47  ;;  %20709 = vst [vmem:[#allocation17_spill] sm:$0xff] %v16109_v29 }
 0x2cc   : > { %v16097_v17 = vpop.f32.mrf.mxu3 }
 0x2cd   : > { %v991_v46 = vpop.f32.mrf.mxu0 }
 0x2ce   : > { %1976 = vmatpush.bf16.msra.mxu1 %v15699_v49  ;;  %v992_v57 = vadd.f32 %v15592_v12, %v991_v46 }
 0x2d1   : > { %1517 = vmatmul.bf16.gmra.mxu1 %v10777_v8  ;;  %1927 = vmatmul.bf16.vlgmr.msrb.gmra.mxu3 %v10988_v59  ;;  %v1425_v29 = vpop.f32.mrf.mxu2 }
 0x2d2   : > { %1977 = vmatpush.bf16.msra.mxu1 %v15670_v20  ;;  %2550 = vmatpush.bf16.msrb.mxu3 %v15683_v39  ;;  %v10794_v39 = vld [vmem:[%s20655_s3 + $0x6c] sm:$0xf0]  ;;  %v16135_v51 = vadd.f32 %v1425_v29, %v1371_v61  ;;  %v985_v61 = vadd.f32 %v15592_v12, %v16029_v40  ;;  %v980_v40 = vadd.f32 %v15592_v12, %v15978_v3  ;;  %v14550_v29 = vld [vmem:[%s20655_s3 + $0x20] sm:$0xf0] }
 0x2d4   : > { %v1464_v31 = vpop.f32.mrf.mxu3 }
 0x2d5   : > { %v994_v18 = vpop.f32.mrf.mxu0  ;;  %v16105_v21 = vadd.f32 %v1464_v31, %v16018_v33  ;;  %v11007_v33 = vld [vmem:[%s20655_s3 + $0x190] sm:$0xf] }
 0x2d6   : > { %1978 = vmatpush.bf16.msra.mxu1 %v15664_v13  ;;  %2551 = vmatpush.bf16.msrb.mxu3 %v15688_v42  ;;  %v14598_v42 = vld [vmem:[%s20655_s3 + $0x1a0] sm:$0xf0]  ;;  %v995_v8 = vadd.f32 %v15592_v12, %v994_v18  ;;  %v16143_v18 = vpack.c.bf16 %v992_v57, %v990_v38 }
 0x2d7   : > { %v11008_v56 = vor.u32 %v14598_v42, %v11007_v33 }
 0x2da   : > { %1979 = vmatpush.bf16.msra.mxu1 %v15658_v6  ;;  %2552 = vmatpush.bf16.msrb.mxu3 %v15694_v47  ;;  %v10797_v47 = vor.u32 %v14557_v24, %v10794_v39  ;;  %v1376_v39 = vpop.f32.mrf.mxu1 }
 0x2dc   : > { %v16127_v27 = vpop.f32.mrf.mxu3 }
 0x2dd   : > { %v996_v44 = vpop.f32.mrf.mxu0 }
 0x2de   : > { %1980 = vmatpush.bf16.msra.mxu1 %v15648_v0  ;;  %v997_v59 = vadd.f32 %v15592_v12, %v996_v44  ;;  %2553 = vmatpush.bf16.msrb.mxu3 %v15699_v49  ;;  %v987_v49 = vadd.f32 %v15592_v12, %v16069_v9  ;;  %v16156_v9 = vpop.f32.mrf.mxu2 }
 0x2e0   : > { %v16133_v31 = vpack.c.bf16 %v997_v59, %v995_v8  ;;  %v16154_v2 = vpack.c.bf16 %v987_v49, %v985_v61  ;;  %v14567_v49 = vld [vmem:[%s20655_s3 + $0xac] sm:$0xf]  ;;  %v10780_v61 = vld [vmem:[%s20655_s3 + $0x38] sm:$0xf] }
 0x2e1   : > { %1522 = vmatmul.bf16.gmra.mxu1 %v10797_v47  ;;  %1932 = vmatmul.bf16.gmra.mxu3 %v11008_v56 }
 0x2e2   : > { %2554 = vmatpush.bf16.msrb.mxu3 %v15670_v20  ;;  %1562 = vmatpush.bf16.msra.mxu2 %v16133_v31  ;;  %v982_v20 = vadd.f32 %v15592_v12, %v16007_v11  ;;  %v10760_v11 = vld [vmem:[%s20655_s3 + $0x10] sm:$0xf]  ;;  %v11027_v12 = vld [vmem:[%s20655_s3 + $0x1b8] sm:$0xf]  ;;  %v16189_v47 = vpop.f32.mrf.mxu1 }
 0x2e3   : > { %2139 = vmatpush.bf16.msrb.mxu1 %v16133_v31  ;;  %v10761_v38 = vor.u32 %v14550_v29, %v10760_v11 }
 0x2e4   : > { %v1469_v46 = vpop.f32.mrf.mxu3  ;;  %v16181_v3 = vpack.c.bf16 %v982_v20, %v980_v40  ;;  %v11047_v20 = vld [vmem:[%s20655_s3 + $0x1e0] sm:$0xf] }
 0x2e5   : > { %v16145_v24 = vadd.f32 %v1469_v46, %v1416_v26  ;;  %v14562_v26 = vld [vmem:[%s20655_s3 + $0x84] sm:$0xf] }
 0x2e6   : > { %2555 = vmatpush.bf16.msrb.mxu3 %v15664_v13  ;;  %1563 = vmatpush.bf16.msra.mxu2 %v16143_v18  ;;  %v10814_v13 = vld [vmem:[%s20655_s3 + $0x94] sm:$0xf0]  ;;  %v1430_v56 = vpop.f32.mrf.mxu2 }
 0x2e7   : > { %2140 = vmatpush.bf16.msrb.mxu1 %v16143_v18  ;;  %v10817_v42 = vor.u32 %v14562_v26, %v10814_v13  ;;  %v1431_v8 = vadd.f32 %v1430_v56, %v1376_v39  ;;  %v10834_v39 = vld [vmem:[%s20655_s3 + $0xbc] sm:$0xf0]  ;;  %v14608_v26 = vld [vmem:[%s20655_s3 + $0x1f0] sm:$0xf0] }
 0x2e8   : > { %v10837_v13 = vor.u32 %v14567_v49, %v10834_v39  ;;  %v11048_v29 = vor.u32 %v14608_v26, %v11047_v20  ;;  %v10854_v49 = vld [vmem:[%s20655_s3 + $0xe4] sm:$0xf0] }
 0x2e9   : > { %v11067_v39 = vld [vmem:[%s20655_s3 + $0x208] sm:$0xf] }
 0x2ea   : > { %2556 = vmatpush.bf16.msrb.mxu3 %v15658_v6  ;;  %1564 = vmatpush.bf16.msra.mxu2 %v16154_v2  ;;  %v14603_v6 = vld [vmem:[%s20655_s3 + $0x1c8] sm:$0xf0]  ;;  %v1381_v46 = vpop.f32.mrf.mxu1 }
 0x2eb   : > { %2141 = vmatpush.bf16.msrb.mxu1 %v16154_v2  ;;  %v11028_v44 = vor.u32 %v14603_v6, %v11027_v12 }
 0x2ec   : > { %v16183_v33 = vpop.f32.mrf.mxu3 }
 0x2ee   : > { %2557 = vmatpush.bf16.msrb.mxu3 %v15648_v0  ;;  %1565 = vmatpush.bf16.msra.mxu2 %v16181_v3  ;;  %v16197_v57 = vpop.f32.mrf.mxu2 }
 0x2ef   : > { %2142 = vmatpush.bf16.msrb.mxu1 %v16181_v3 }
 0x2f1   : > { %1527 = vmatmul.bf16.gmra.mxu1 %v10817_v42  ;;  %10922 = vmatmul.msk.bf16.vlgmr.msra.gmra.mxu2 %vm1314_vm1, %v10761_v38 }
 0x2f2   : > { %2027 = vmatpush.bf16.msrb.mxu2 %v15757_v48  ;;  %1937 = vmatmul.bf16.gmra.mxu3 %v11028_v44  ;;  %v16223_v42 = vpop.f32.mrf.mxu1 }
 0x2f4   : > { %v1474_v59 = vpop.f32.mrf.mxu3 }
 0x2f5   : > { %v16194_v0 = vadd.f32 %v1474_v59, %v16100_v14  ;;  %v14555_v14 = vld [vmem:[%s20655_s3 + $0x48] sm:$0xf0]  ;;  %v14572_v59 = vld [vmem:[%s20655_s3 + $0xd4] sm:$0xf] }
 0x2f6   : > { %2028 = vmatpush.bf16.msrb.mxu2 %v15763_v54  ;;  %v10781_v11 = vor.u32 %v14555_v14, %v10780_v61  ;;  %v1435_v12 = vpop.f32.mrf.mxu2  ;;  %v14613_v61 = vld [vmem:[%s20655_s3 + $0x218] sm:$0xf0]  ;;  %v10857_v20 = vor.u32 %v14572_v59, %v10854_v49  ;;  %v14575_v54 = vld [vmem:[%s20655_s3 + $0xe8] sm:$0xf0] }
 0x2f7   : > { %v1436_v6 = vadd.f32 %v1435_v12, %v1381_v46  ;;  %v10800_v46 = vld [vmem:[%s20655_s3 + $0x60] sm:$0xf]  ;;  %v14577_v59 = vld [vmem:[%s20655_s3 + $0xfc] sm:$0xf] }
 0x2fa   : > { %2029 = vmatpush.bf16.msrb.mxu2 %v15772_v62  ;;  %v10860_v62 = vld [vmem:[%s20655_s3 + $0xd8] sm:$0xf] }
 0x2fc   : > { %v16218_v40 = vpop.f32.mrf.mxu3 }
 0x2fe   : > { %2030 = vmatpush.bf16.msrb.mxu2 %v15784_v5  ;;  %v16229_v56 = vpop.f32.mrf.mxu2 }
 0x301   : > { %1532 = vmatmul.bf16.gmra.mxu1 %v10837_v13  ;;  %10923 = vmatmul.msk.bf16.gmra.mxu2 %vm1314_vm1, %v10781_v11  ;;  %v1386_v13 = vpop.f32.mrf.mxu1  ;;  %v11068_v11 = vor.u32 %v14613_v61, %v11067_v39  ;;  %v11087_v39 = vld [vmem:[%s20655_s3 + $0x230] sm:$0xf]  ;;  %v14618_v61 = vld [vmem:[%s20655_s3 + $0x240] sm:$0xf0] }
 0x302   : > { %2031 = vmatpush.bf16.msrb.mxu2 %v15726_v15  ;;  %1942 = vmatmul.bf16.gmra.mxu3 %v11048_v29 }
 0x304   : > { %v1479_v38 = vpop.f32.mrf.mxu3 }
 0x305   : > { %v16226_v44 = vadd.f32 %v1479_v38, %v16135_v51  ;;  %v14560_v51 = vld [vmem:[%s20655_s3 + $0x70] sm:$0xf0] }
 0x306   : > { %2032 = vmatpush.bf16.msrb.mxu2 %v15720_v7  ;;  %v10801_v26 = vor.u32 %v14560_v51, %v10800_v46  ;;  %v1440_v29 = vpop.f32.mrf.mxu2  ;;  %v10874_v46 = vld [vmem:[%s20655_s3 + $0x10c] sm:$0xf0]  ;;  %v10820_v51 = vld [vmem:[%s20655_s3 + $0x88] sm:$0xf] }
 0x307   : > { %v1441_v12 = vadd.f32 %v1440_v29, %v1386_v13 }
 0x30a   : > { %2033 = vmatpush.bf16.msrb.mxu2 %v15714_v63  ;;  %v16258_v63 = vpop.f32.mrf.mxu1 }
 0x30c   : > { %v16251_v14 = vpop.f32.mrf.mxu3 }
 0x30e   : > { %2034 = vmatpush.bf16.msrb.mxu2 %v15704_v55  ;;  %v16264_v49 = vpop.f32.mrf.mxu2 }
 0x311   : > { %1537 = vmatmul.bf16.gmra.mxu1 %v10857_v20  ;;  %10924 = vmatmul.msk.bf16.gmra.mxu2 %vm1314_vm1, %v10801_v26  ;;  %v10877_v26 = vor.u32 %v14577_v59, %v10874_v46  ;;  %v14582_v59 = vld [vmem:[%s20655_s3 + $0x124] sm:$0xf]  ;;  %v10894_v46 = vld [vmem:[%s20655_s3 + $0x134] sm:$0xf0] }
 0x312   : > { %2496 = vmatpush.bf16.msra.mxu2 %v15627_v50  ;;  %1947 = vmatmul.bf16.gmra.mxu3 %v11068_v11  ;;  %v11088_v11 = vor.u32 %v14618_v61, %v11087_v39  ;;  %v1391_v29 = vpop.f32.mrf.mxu1  ;;  %v10897_v61 = vor.u32 %v14582_v59, %v10894_v46  ;;  %v14591_v59 = vld [vmem:[%s20655_s3 + $0x16c] sm:$0xf]  ;;  %v10989_v46 = vld [vmem:[%s20655_s3 + $0x17c] sm:$0xf0] }
 0x314   : > { %v1484_v38 = vpop.f32.mrf.mxu3 }
 0x315   : > { %v16256_v55 = vadd.f32 %v1484_v38, %v1431_v8  ;;  %v14565_v8 = vld [vmem:[%s20655_s3 + $0x98] sm:$0xf0] }
 0x316   : > { %2497 = vmatpush.bf16.msra.mxu2 %v15632_v53  ;;  %v10821_v13 = vor.u32 %v14565_v8, %v10820_v51  ;;  %v1445_v38 = vpop.f32.mrf.mxu2  ;;  %v10840_v51 = vld [vmem:[%s20655_s3 + $0xb0] sm:$0xf]  ;;  %v14570_v8 = vld [vmem:[%s20655_s3 + $0xc0] sm:$0xf0] }
 0x317   : > { %v1446_v7 = vadd.f32 %v1445_v38, %v1391_v29 }
 0x31a   : > { %2498 = vmatpush.bf16.msra.mxu2 %v15638_v58 }
 0x31c   : > { %v16282_v20 = vpop.f32.mrf.mxu3 }
 0x31e   : > { %2499 = vmatpush.bf16.msra.mxu2 %v15643_v60 }
 0x321   : > { %1542 = vmatmul.bf16.gmra.mxu1 %v10877_v26  ;;  %10925 = vmatmul.msk.bf16.gmra.mxu2 %vm1314_vm1, %v10821_v13  ;;  %v10841_v26 = vor.u32 %v14570_v8, %v10840_v51  ;;  %v14628_v51 = vld [vmem:[%s20655_s3 + $0x290] sm:$0xf0] }
 0x322   : > { %2500 = vmatpush.bf16.msra.mxu2 %v15614_v34  ;;  %1952 = vmatmul.bf16.gmra.mxu3 %v11088_v11  ;;  %v16311_v11 = vpop.f32.mrf.mxu1 }
 0x323   : > { %20711 = vst [vmem:[#allocation19_spill] sm:$0xff] %v16311_v11  ;;  %v1408_v11 = vadd.f32 %v15990_v41, %v15950_v23  ;;  %v10880_v23 = vld [vmem:[%s20655_s3 + $0x100] sm:$0xf]  ;;  %v14580_v41 = vld [vmem:[%s20655_s3 + $0x110] sm:$0xf0] }
 0x324   : > { %v1489_v15 = vpop.f32.mrf.mxu3 }
 0x325   : > { %v16287_v5 = vadd.f32 %v1489_v15, %v1436_v6  ;;  %v11107_v15 = vld [vmem:[%s20655_s3 + $0x258] sm:$0xf]  ;;  %v14623_v6 = vld [vmem:[%s20655_s3 + $0x268] sm:$0xf0] }
 0x326   : > { %2501 = vmatpush.bf16.msra.mxu2 %v15608_v28  ;;  %v11108_v13 = vor.u32 %v14623_v6, %v11107_v15  ;;  %v16335_v15 = vpop.f32.mrf.mxu2  ;;  %v10861_v6 = vor.u32 %v14575_v54, %v10860_v62 }
 0x327   : > { %20713 = vst [vmem:[#allocation21_spill] sm:$0xff] %v16335_v15 }
 0x32a   : > { %2502 = vmatpush.bf16.msra.mxu2 %v15602_v22 }
 0x32c   : > { %v16308_v39 = vpop.f32.mrf.mxu3 }
 0x32e   : > { %2503 = vmatpush.bf16.msra.mxu2 %v15596_v16 }
 0x331   : > { %1547 = vmatmul.bf16.gmra.mxu1 %v10897_v61  ;;  %10926 = vmatmul.msk.bf16.gmra.mxu2 %vm1314_vm1, %v10841_v26  ;;  %v10992_v61 = vor.u32 %v14591_v59, %v10989_v46 }
 0x332   : > { %1957 = vmatmul.bf16.gmra.mxu3 %v11108_v13 }
 0x334   : > { %v1494_v29 = vpop.f32.mrf.mxu3 }
 0x335   : > { %v16313_v38 = vadd.f32 %v1494_v29, %v1441_v12  ;;  %v11127_v12 = vld [vmem:[%s20655_s3 + $0x280] sm:$0xf] }
 0x336   : > { %v11128_v13 = vor.u32 %v14628_v51, %v11127_v12  ;;  %v10881_v12 = vor.u32 %v14580_v41, %v10880_v23  ;;  %v14592_v23 = vld [vmem:[%s20655_s3 + $0x174] sm:$0xf]  ;;  %v10997_v41 = vld [vmem:[%s20655_s3 + $0x184] sm:$0xf0] }
 0x33c   : > { %v16333_v8 = vpop.f32.mrf.mxu3 }
 0x33d   : > { %20712 = vst [vmem:[#allocation20_spill] sm:$0xff] %v16333_v8  ;;  %v1462_v8 = vadd.f32 %v16097_v17, %v1408_v11  ;;  %v11147_v17 = vld [vmem:[%s20655_s3 + $0x2a8] sm:$0xf]  ;;  %v14633_v11 = vld [vmem:[%s20655_s3 + $0x2b8] sm:$0xf0] }
 0x33e   : > { %v1513_v26 = vpop.f32.mrf.mxu1 }
 0x33f   : > { %v16338_v29 = vadd.f32 %v1513_v26, %v16077_v35 }
 0x341   : > { %10927 = vmatmul.msk.bf16.gmra.mxu2 %vm1314_vm1, %v10861_v6  ;;  %1981 = vmatmul.bf16.vlgmr.msra.gmra.mxu1 %v10992_v61  ;;  %v1413_v61 = vadd.f32 %v16042_v25, %v15984_v52  ;;  %v14585_v52 = vld [vmem:[%s20655_s3 + $0x138] sm:$0xf0] }
 0x342   : > { %1962 = vmatmul.bf16.gmra.mxu3 %v11128_v13  ;;  %2658 = vmatpush.bf16.msra.mxu1 %v15967_v45  ;;  %v14601_v25 = vld [vmem:[%s20655_s3 + $0x1bc] sm:$0xf] }
 0x343   : > { %v1467_v13 = vadd.f32 %v16127_v27, %v1413_v61  ;;  %v11029_v27 = vld [vmem:[%s20655_s3 + $0x1cc] sm:$0xf0] }
 0x344   : > { %v1499_v48 = vpop.f32.mrf.mxu3 }
 0x345   : > { %v1500_v15 = vadd.f32 %v1499_v48, %v1446_v7  ;;  %v1553_v62 = vpop.f32.mrf.mxu2  ;;  %v14596_v7 = vld [vmem:[%s20655_s3 + $0x194] sm:$0xf]  ;;  %v11009_v48 = vld [vmem:[%s20655_s3 + $0x1a4] sm:$0xf0] }
 0x346   : > { %2659 = vmatpush.bf16.msra.mxu1 %v15976_v1  ;;  %v1515_v54 = vpop.f32.mrf.mxu1  ;;  %v11012_v51 = vor.u32 %v14596_v7, %v11009_v48 }
 0x347   : > { %v16346_v59 = vadd.f32 %v1515_v54, %v1462_v8  ;;  %v16348_v35 = vadd.f32 %v1553_v62, %v1500_v15  ;;  %v11148_v15 = vor.u32 %v14633_v11, %v11147_v17  ;;  %v11032_v17 = vor.u32 %v14601_v25, %v11029_v27 }
 0x34a   : > { %2660 = vmatpush.bf16.msra.mxu1 %v15988_v10 }
 0x34c   : > { %v16369_v46 = vpop.f32.mrf.mxu3 }
 0x34e   : > { %2661 = vmatpush.bf16.msra.mxu1 %v16005_v19  ;;  %v1518_v8 = vpop.f32.mrf.mxu1 }
 0x34f   : > { %v16373_v6 = vadd.f32 %v1518_v8, %v16105_v21  ;;  %v10900_v21 = vld [vmem:[%s20655_s3 + $0x128] sm:$0xf]  ;;  %v1418_v8 = vadd.f32 %v16082_v37, %v16036_v32  ;;  %v14590_v32 = vld [vmem:[%s20655_s3 + $0x160] sm:$0xf0]  ;;  %v11049_v37 = vld [vmem:[%s20655_s3 + $0x1f4] sm:$0xf0] }
 0x350   : > { %v10901_v48 = vor.u32 %v14585_v52, %v10900_v21  ;;  %v16439_v21 = vpop.f32.mrf.mxu2 }
 0x351   : > { %10928 = vmatmul.msk.bf16.gmra.mxu2 %vm1314_vm1, %v10881_v12  ;;  %1986 = vmatmul.bf16.gmra.mxu1 %v11012_v51  ;;  %v11000_v12 = vor.u32 %v14592_v23, %v10997_v41  ;;  %v1472_v61 = vadd.f32 %v16183_v33, %v1418_v8  ;;  %v11017_v33 = vld [vmem:[%s20655_s3 + $0x1ac] sm:$0xf0] }
 0x352   : > { %1967 = vmatmul.bf16.gmra.mxu3 %v11148_v15  ;;  %2662 = vmatpush.bf16.msra.mxu1 %v16016_v30 }
 0x354   : > { %v16379_v26 = vpop.f32.mrf.mxu3 }
 0x356   : > { %2663 = vmatpush.bf16.msra.mxu1 %v16027_v36  ;;  %v1520_v54 = vpop.f32.mrf.mxu1 }
 0x357   : > { %v16383_v62 = vadd.f32 %v1520_v54, %v1467_v13 }
 0x35a   : > { %2664 = vmatpush.bf16.msra.mxu1 %v16040_v43 }
 0x35c   : > { %v16404_v7 = vpop.f32.mrf.mxu3 }
 0x35e   : > { %2665 = vmatpush.bf16.msra.mxu1 %v16067_v4  ;;  %v1523_v11 = vpop.f32.mrf.mxu1 }
 0x35f   : > { %v16408_v51 = vadd.f32 %v1523_v11, %v16145_v24  ;;  %v10920_v24 = vld [vmem:[%s20655_s3 + $0x150] sm:$0xf] }
 0x360   : > { %v10921_v25 = vor.u32 %v14590_v32, %v10920_v24  ;;  %v14611_v24 = vld [vmem:[%s20655_s3 + $0x20c] sm:$0xf]  ;;  %v11037_v32 = vld [vmem:[%s20655_s3 + $0x1d4] sm:$0xf0] }
 0x361   : > { %10929 = vmatmul.msk.bf16.gmra.mxu2 %vm1314_vm1, %v10901_v48  ;;  %1991 = vmatmul.bf16.gmra.mxu1 %v11032_v17  ;;  %v20714_v48 = vld [vmem:[#allocation16_spill] sm:$0xff]  ;;  %v20715_v17 = vld [vmem:[#allocation17_spill] sm:$0xff] }
 0x362   : > { %2089 = vmatmul.bf16.vlgmr.msra.gmra.mxu3 %v11000_v12  ;;  %v1423_v11 = vadd.f32 %v20715_v17, %v20714_v48 }
 0x363   : > { %3073 = vmatpush.bf16.msra.mxu3 %v15627_v50  ;;  %v14606_v50 = vld [vmem:[%s20655_s3 + $0x1e4] sm:$0xf] }
 0x364   : > { %v16414_v15 = vpop.f32.mrf.mxu3  ;;  %v11052_v27 = vor.u32 %v14606_v50, %v11049_v37  ;;  %v1477_v8 = vadd.f32 %v16218_v40, %v1423_v11  ;;  %v10995_v40 = vld [vmem:[%s20655_s3 + $0x170] sm:$0xf] }
 0x366   : > { %v1525_v13 = vpop.f32.mrf.mxu1 }
 0x367   : > { %3074 = vmatpush.bf16.msra.mxu3 %v15632_v53  ;;  %v16418_v54 = vadd.f32 %v1525_v13, %v1472_v61  ;;  %v14597_v53 = vld [vmem:[%s20655_s3 + $0x19c] sm:$0xf] }
 0x368   : > { %v11020_v41 = vor.u32 %v14597_v53, %v11017_v33 }
 0x36b   : > { %3075 = vmatpush.bf16.msra.mxu3 %v15638_v58 }
 0x36c   : > { %v16441_v52 = vpop.f32.mrf.mxu3 }
 0x36e   : > { %v1528_v23 = vpop.f32.mrf.mxu1 }
 0x36f   : > { %3076 = vmatpush.bf16.msra.mxu3 %v15643_v60  ;;  %v16445_v58 = vadd.f32 %v1528_v23, %v16194_v0 }
 0x371   : > { %10930 = vmatmul.msk.bf16.gmra.mxu2 %vm1314_vm1, %v10921_v25  ;;  %1996 = vmatmul.bf16.gmra.mxu1 %v11052_v27 }
 0x372   : > { %2094 = vmatmul.bf16.gmra.mxu3 %v11020_v41  ;;  %v20716_v41 = vld [vmem:[#allocation18_spill] sm:$0xff] }
 0x373   : > { %3077 = vmatpush.bf16.msra.mxu3 %v15614_v34  ;;  %v11069_v34 = vld [vmem:[%s20655_s3 + $0x21c] sm:$0xf0]  ;;  %v1428_v48 = vadd.f32 %v16156_v9, %v20716_v41  ;;  %v14616_v9 = vld [vmem:[%s20655_s3 + $0x234] sm:$0xf] }
 0x374   : > { %v1567_v12 = vpop.f32.mrf.mxu2  ;;  %v11072_v53 = vor.u32 %v14611_v24, %v11069_v34  ;;  %v11057_v24 = vld [vmem:[%s20655_s3 + $0x1fc] sm:$0xf0] }
 0x375   : > { %v16453_v61 = vadd.f32 %v1567_v12, %v16338_v29  ;;  %v16455_v13 = vpop.f32.mrf.mxu3  ;;  %v14594_v29 = vld [vmem:[%s20655_s3 + $0x180] sm:$0xf0]  ;;  %v1482_v17 = vadd.f32 %v16251_v14, %v1428_v48  ;;  %v11089_v14 = vld [vmem:[%s20655_s3 + $0x244] sm:$0xf0] }
 0x376   : > { %v1530_v60 = vpop.f32.mrf.mxu1  ;;  %v10996_v33 = vor.u32 %v14594_v29, %v10995_v40  ;;  %v11092_v29 = vor.u32 %v14616_v9, %v11089_v14 }
 0x377   : > { %3078 = vmatpush.bf16.msra.mxu3 %v15608_v28  ;;  %v16458_v0 = vadd.f32 %v1530_v60, %v1477_v8  ;;  %v14602_v28 = vld [vmem:[%s20655_s3 + $0x1c4] sm:$0xf]  ;;  %v14599_v8 = vld [vmem:[%s20655_s3 + $0x1a8] sm:$0xf0] }
 0x378   : > { %v11040_v23 = vor.u32 %v14602_v28, %v11037_v32  ;;  %v14607_v60 = vld [vmem:[%s20655_s3 + $0x1ec] sm:$0xf] }
 0x37b   : > { %3079 = vmatpush.bf16.msra.mxu3 %v15602_v22 }
 0x37c   : > { %v1569_v50 = vpop.f32.mrf.mxu2 }
 0x37d   : > { %v16480_v37 = vadd.f32 %v1569_v50, %v16346_v59  ;;  %v16482_v25 = vpop.f32.mrf.mxu3 }
 0x37e   : > { %v1533_v27 = vpop.f32.mrf.mxu1 }
 0x37f   : > { %3080 = vmatpush.bf16.msra.mxu3 %v15596_v16  ;;  %v16486_v22 = vadd.f32 %v1533_v27, %v16226_v44  ;;  %v1433_v27 = vadd.f32 %v16197_v57, %v16189_v47  ;;  %v11109_v47 = vld [vmem:[%s20655_s3 + $0x26c] sm:$0xf0]  ;;  %v11035_v57 = vld [vmem:[%s20655_s3 + $0x1c0] sm:$0xf] }
 0x381   : > { %2001 = vmatmul.bf16.gmra.mxu1 %v11072_v53  ;;  %2035 = vmatmul.bf16.vlgmr.msrb.gmra.mxu2 %v10996_v33  ;;  %v11060_v53 = vor.u32 %v14607_v60, %v11057_v24 }
 0x382   : > { %2099 = vmatmul.bf16.gmra.mxu3 %v11040_v23  ;;  %2716 = vmatpush.bf16.msrb.mxu2 %v16133_v31 }
 0x384   : > { %v1572_v59 = vpop.f32.mrf.mxu2 }
 0x385   : > { %v16493_v11 = vadd.f32 %v1572_v59, %v16373_v6  ;;  %v16495_v12 = vpop.f32.mrf.mxu3  ;;  %v11015_v6 = vld [vmem:[%s20655_s3 + $0x198] sm:$0xf] }
 0x386   : > { %2717 = vmatpush.bf16.msrb.mxu2 %v16143_v18  ;;  %v1535_v16 = vpop.f32.mrf.mxu1  ;;  %v11016_v28 = vor.u32 %v14599_v8, %v11015_v6 }
 0x387   : > { %v16498_v44 = vadd.f32 %v1535_v16, %v1482_v17  ;;  %v11077_v16 = vld [vmem:[%s20655_s3 + $0x224] sm:$0xf0] }
 0x38a   : > { %2718 = vmatpush.bf16.msrb.mxu2 %v16154_v2 }
 0x38c   : > { %v1574_v34 = vpop.f32.mrf.mxu2 }
 0x38d   : > { %v16520_v40 = vadd.f32 %v1574_v34, %v16383_v62  ;;  %v16522_v32 = vpop.f32.mrf.mxu3  ;;  %v1487_v62 = vadd.f32 %v16282_v20, %v1433_v27  ;;  %v14604_v20 = vld [vmem:[%s20655_s3 + $0x1d0] sm:$0xf0] }
 0x38e   : > { %2719 = vmatpush.bf16.msrb.mxu2 %v16181_v3  ;;  %v1538_v50 = vpop.f32.mrf.mxu1  ;;  %v11036_v8 = vor.u32 %v14604_v20, %v11035_v57 }
 0x38f   : > { %v16526_v33 = vadd.f32 %v1538_v50, %v16256_v55  ;;  %v14621_v55 = vld [vmem:[%s20655_s3 + $0x25c] sm:$0xf] }
 0x390   : > { %v11112_v6 = vor.u32 %v14621_v55, %v11109_v47 }
 0x391   : > { %2006 = vmatmul.bf16.gmra.mxu1 %v11092_v29  ;;  %2040 = vmatmul.bf16.gmra.mxu2 %v11016_v28  ;;  %v1438_v28 = vadd.f32 %v16229_v56, %v16223_v42  ;;  %v11129_v42 = vld [vmem:[%s20655_s3 + $0x294] sm:$0xf0]  ;;  %v11055_v56 = vld [vmem:[%s20655_s3 + $0x1e8] sm:$0xf] }
 0x392   : > { %2104 = vmatmul.bf16.gmra.mxu3 %v11060_v53 }
 0x393   : > { %v1492_v53 = vadd.f32 %v16308_v39, %v1438_v28  ;;  %v14609_v39 = vld [vmem:[%s20655_s3 + $0x1f8] sm:$0xf0] }
 0x394   : > { %v1577_v23 = vpop.f32.mrf.mxu2  ;;  %v11056_v20 = vor.u32 %v14609_v39, %v11055_v56 }
 0x395   : > { %v16532_v41 = vadd.f32 %v1577_v23, %v16408_v51  ;;  %v16534_v48 = vpop.f32.mrf.mxu3  ;;  %v14612_v51 = vld [vmem:[%s20655_s3 + $0x214] sm:$0xf] }
 0x396   : > { %v1540_v59 = vpop.f32.mrf.mxu1  ;;  %v11080_v34 = vor.u32 %v14612_v51, %v11077_v16 }
 0x397   : > { %v16536_v17 = vadd.f32 %v1540_v59, %v1487_v62  ;;  %v11097_v59 = vld [vmem:[%s20655_s3 + $0x24c] sm:$0xf0] }
 0x39c   : > { %v1579_v9 = vpop.f32.mrf.mxu2 }
 0x39d   : > { %v16557_v14 = vadd.f32 %v1579_v9, %v16418_v54  ;;  %v16559_v60 = vpop.f32.mrf.mxu3 }
 0x39e   : > { %v1543_v24 = vpop.f32.mrf.mxu1 }
 0x39f   : > { %v16562_v29 = vadd.f32 %v1543_v24, %v16287_v5  ;;  %v14626_v5 = vld [vmem:[%s20655_s3 + $0x284] sm:$0xf] }
 0x3a0   : > { %v11132_v57 = vor.u32 %v14626_v5, %v11129_v42  ;;  %v14622_v5 = vld [vmem:[%s20655_s3 + $0x264] sm:$0xf]  ;;  %v11117_v42 = vld [vmem:[%s20655_s3 + $0x274] sm:$0xf0] }
 0x3a1   : > { %2011 = vmatmul.bf16.gmra.mxu1 %v11112_v6  ;;  %2045 = vmatmul.bf16.gmra.mxu2 %v11036_v8  ;;  %v1443_v8 = vadd.f32 %v16264_v49, %v16258_v63  ;;  %v11149_v63 = vld [vmem:[%s20655_s3 + $0x2bc] sm:$0xf0]  ;;  %v11075_v49 = vld [vmem:[%s20655_s3 + $0x210] sm:$0xf] }
 0x3a2   : > { %2109 = vmatmul.bf16.gmra.mxu3 %v11080_v34  ;;  %v20717_v34 = vld [vmem:[#allocation20_spill] sm:$0xff] }
 0x3a3   : > { %v1497_v28 = vadd.f32 %v20717_v34, %v1443_v8  ;;  %v14619_v34 = vld [vmem:[%s20655_s3 + $0x248] sm:$0xf0] }
 0x3a4   : > { %v1582_v50 = vpop.f32.mrf.mxu2 }
 0x3a5   : > { %v16568_v54 = vadd.f32 %v1582_v50, %v16445_v58  ;;  %v16570_v27 = vpop.f32.mrf.mxu3  ;;  %v14617_v58 = vld [vmem:[%s20655_s3 + $0x23c] sm:$0xf] }
 0x3a6   : > { %v1545_v23 = vpop.f32.mrf.mxu1  ;;  %v11100_v9 = vor.u32 %v14617_v58, %v11097_v59 }
 0x3a7   : > { %v16572_v62 = vadd.f32 %v1545_v23, %v1492_v53 }
 0x3ac   : > { %v1584_v55 = vpop.f32.mrf.mxu2 }
 0x3ad   : > { %v16593_v47 = vadd.f32 %v1584_v55, %v16458_v0  ;;  %v16595_v51 = vpop.f32.mrf.mxu3 }
 0x3ae   : > { %v1548_v16 = vpop.f32.mrf.mxu1 }
 0x3af   : > { %v16598_v6 = vadd.f32 %v1548_v16, %v16313_v38  ;;  %v14631_v38 = vld [vmem:[%s20655_s3 + $0x2ac] sm:$0xf] }
 0x3b0   : > { %v11152_v58 = vor.u32 %v14631_v38, %v11149_v63  ;;  %v11137_v38 = vld [vmem:[%s20655_s3 + $0x29c] sm:$0xf0] }
 0x3b1   : > { %2016 = vmatmul.bf16.gmra.mxu1 %v11132_v57  ;;  %2050 = vmatmul.bf16.gmra.mxu2 %v11056_v20  ;;  %v11120_v20 = vor.u32 %v14622_v5, %v11117_v42 }
 0x3b2   : > { %2114 = vmatmul.bf16.gmra.mxu3 %v11100_v9 }
 0x3b4   : > { %v1587_v24 = vpop.f32.mrf.mxu2 }
 0x3b5   : > { %v16604_v0 = vadd.f32 %v1587_v24, %v16486_v22  ;;  %v16606_v50 = vpop.f32.mrf.mxu3  ;;  %v14614_v22 = vld [vmem:[%s20655_s3 + $0x220] sm:$0xf0] }
 0x3b6   : > { %v1550_v53 = vpop.f32.mrf.mxu1  ;;  %v11076_v59 = vor.u32 %v14614_v22, %v11075_v49 }
 0x3b7   : > { %20718 = vst [vmem:[#allocation16_spill] sm:$0xff] %v16604_v0  ;;  %v16608_v23 = vadd.f32 %v1550_v53, %v1497_v28  ;;  %v11003_v28 = vld [vmem:[%s20655_s3 + $0x178] sm:$0xf]  ;;  %v14627_v53 = vld [vmem:[%s20655_s3 + $0x28c] sm:$0xf] }
 0x3bc   : > { %v1589_v56 = vpop.f32.mrf.mxu2 }
 0x3bd   : > { %v16629_v39 = vadd.f32 %v1589_v56, %v16498_v44  ;;  %v16631_v55 = vpop.f32.mrf.mxu3  ;;  %v11095_v44 = vld [vmem:[%s20655_s3 + $0x238] sm:$0xf] }
 0x3be   : > { %v16633_v57 = vpop.f32.mrf.mxu1  ;;  %v11096_v22 = vor.u32 %v14619_v34, %v11095_v44  ;;  %v11115_v34 = vld [vmem:[%s20655_s3 + $0x260] sm:$0xf] }
 0x3bf   : > { %20719 = vst [vmem:[#allocation17_spill] sm:$0xff] %v16629_v39 }
 0x3c1   : > { %2021 = vmatmul.bf16.gmra.mxu1 %v11152_v58  ;;  %2055 = vmatmul.bf16.gmra.mxu2 %v11076_v59  ;;  %v11140_v58 = vor.u32 %v14627_v53, %v11137_v38  ;;  %v20722_v59 = vld [vmem:[#allocation12_spill] sm:$0xff]  ;;  %v14600_v53 = vld [vmem:[%s20655_s3 + $0x1b0] sm:$0xf0] }
 0x3c2   : > { %2119 = vmatmul.bf16.gmra.mxu3 %v11120_v20  ;;  %v14632_v38 = vld [vmem:[%s20655_s3 + $0x2b4] sm:$0xf] }
 0x3c4   : > { %v1592_v16 = vpop.f32.mrf.mxu2 }
 0x3c5   : > { %v16636_v9 = vadd.f32 %v1592_v16, %v16526_v33  ;;  %v16638_v8 = vpop.f32.mrf.mxu3  ;;  %v14595_v33 = vld [vmem:[%s20655_s3 + $0x188] sm:$0xf0] }
 0x3c6   : > { %v16640_v24 = vpop.f32.mrf.mxu1  ;;  %v11004_v5 = vor.u32 %v14595_v33, %v11003_v28  ;;  %v20725_v28 = vld [vmem:[#allocation14_spill] sm:$0xff] }
 0x3c7   : > { %20720 = vst [vmem:[#allocation18_spill] sm:$0xff] %v16636_v9  ;;  %v14624_v33 = vld [vmem:[%s20655_s3 + $0x270] sm:$0xf0] }
 0x3cc   : > { %v1594_v63 = vpop.f32.mrf.mxu2 }
 0x3cd   : > { %v16661_v49 = vadd.f32 %v1594_v63, %v16536_v17  ;;  %v16663_v42 = vpop.f32.mrf.mxu3  ;;  %v20724_v17 = vld [vmem:[#allocation13_spill] sm:$0xff] }
 0x3ce   : > { %v16665_v56 = vpop.f32.mrf.mxu1  ;;  %v11157_v63 = vld [vmem:[%s20655_s3 + $0x2c4] sm:$0xf0] }
 0x3cf   : > { %20721 = vst [vmem:[#allocation20_spill] sm:$0xff] %v16661_v49  ;;  %v20728_v49 = vld [vmem:[#allocation11_spill] sm:$0xff] }
 0x3d1   : > { %2060 = vmatmul.bf16.gmra.mxu2 %v11096_v22  ;;  %11165 = vmatmul.msk.bf16.vlgmr.msrb.gmra.mxu1 %vm1314_vm1, %v11004_v5 }
 0x3d2   : > { %2124 = vmatmul.bf16.gmra.mxu3 %v11140_v58  ;;  %3181 = vmatpush.bf16.msrb.mxu1 %v20722_v59  ;;  %v11116_v58 = vor.u32 %v14624_v33, %v11115_v34  ;;  %v20730_v34 = vld [vmem:[#allocation10_spill] sm:$0xff] }
 0x3d4   : > { %v1597_v20 = vpop.f32.mrf.mxu2 }
 0x3d5   : > { %v16670_v16 = vadd.f32 %v1597_v20, %v16562_v29  ;;  %v16672_v9 = vpop.f32.mrf.mxu3  ;;  %v11023_v29 = vld [vmem:[%s20655_s3 + $0x1a0] sm:$0xf] }
 0x3d6   : > { %3182 = vmatpush.bf16.msrb.mxu1 %v20724_v17  ;;  %v16675_v44 = vpop.f32.mrf.mxu1  ;;  %v11024_v59 = vor.u32 %v14600_v53, %v11023_v29  ;;  %v20727_v17 = vld [vmem:[#allocation15_spill] sm:$0xff]  ;;  %v11135_v29 = vld [vmem:[%s20655_s3 + $0x288] sm:$0xf] }
 0x3d7   : > { %20723 = vst [vmem:[#allocation12_spill] sm:$0xff] %v16670_v16  ;;  %v11160_v16 = vor.u32 %v14632_v38, %v11157_v63  ;;  %v20731_v53 = vld [vmem:[#allocation9_spill] sm:$0xff] }
 0x3d8   : > { %v11232_v38 = vld [vmem:[%s20655_s3 + $0x2e4] sm:$0xf0] }
 0x3da   : > { %3183 = vmatpush.bf16.msrb.mxu1 %v20725_v28 }
 0x3dc   : > { %v1599_v22 = vpop.f32.mrf.mxu2 }
 0x3dd   : > { %v16697_v5 = vadd.f32 %v1599_v22, %v16572_v62  ;;  %v16699_v20 = vpop.f32.mrf.mxu3 }
 0x3de   : > { %3184 = vmatpush.bf16.msrb.mxu1 %v20727_v17  ;;  %v16702_v28 = vpop.f32.mrf.mxu1 }
 0x3df   : > { %20726 = vst [vmem:[#allocation13_spill] sm:$0xff] %v16697_v5  ;;  %v11238_v5 = vld [vmem:[%s20655_s3 + $0x2d8] sm:$0xf] }
 0x3e1   : > { %2065 = vmatmul.bf16.gmra.mxu2 %v11116_v58  ;;  %11166 = vmatmul.msk.bf16.gmra.mxu1 %vm1314_vm1, %v11024_v59 }
 0x3e2   : > { %2129 = vmatmul.bf16.gmra.mxu3 %v11160_v16  ;;  %3185 = vmatpush.bf16.msrb.mxu1 %v20728_v49  ;;  %v14629_v16 = vld [vmem:[%s20655_s3 + $0x298] sm:$0xf0]  ;;  %v14636_v49 = vld [vmem:[%s20655_s3 + $0x2d4] sm:$0xf] }
 0x3e3   : > { %v11136_v58 = vor.u32 %v14629_v16, %v11135_v29  ;;  %v20734_v16 = vld [vmem:[#allocation19_spill] sm:$0xff] }
 0x3e4   : > { %v1602_v39 = vpop.f32.mrf.mxu2 }
 0x3e5   : > { %v16707_v0 = vadd.f32 %v1602_v39, %v16598_v6  ;;  %v2090_v62 = vpop.f32.mrf.mxu3  ;;  %v11043_v6 = vld [vmem:[%s20655_s3 + $0x1c8] sm:$0xf]  ;;  %v14605_v39 = vld [vmem:[%s20655_s3 + $0x1d8] sm:$0xf0] }
 0x3e6   : > { %3186 = vmatpush.bf16.msrb.mxu1 %v20730_v34  ;;  %v16710_v33 = vpop.f32.mrf.mxu1  ;;  %v11044_v59 = vor.u32 %v14605_v39, %v11043_v6  ;;  %v20733_v34 = vld [vmem:[#allocation8_spill] sm:$0xff]  ;;  %v20735_v6 = vld [vmem:[#allocation21_spill] sm:$0xff] }
 0x3e7   : > { %20729 = vst [vmem:[#allocation14_spill] sm:$0xff] %v16707_v0  ;;  %v11235_v0 = vor.u32 %v14636_v49, %v11232_v38  ;;  %v1448_v39 = vadd.f32 %v20735_v6, %v20734_v16 }
 0x3ea   : > { %3187 = vmatpush.bf16.msrb.mxu1 %v20731_v53 }
 0x3ec   : > { %v1604_v63 = vpop.f32.mrf.mxu2 }
 0x3ed   : > { %v16732_v22 = vadd.f32 %v1604_v63, %v16608_v23  ;;  %v2092_v17 = vpop.f32.mrf.mxu3  ;;  %v14639_v23 = vld [vmem:[%s20655_s3 + $0x2e8] sm:$0xf0] }
 0x3ee   : > { %3188 = vmatpush.bf16.msrb.mxu1 %v20733_v34  ;;  %v16735_v53 = vpop.f32.mrf.mxu1  ;;  %v11239_v29 = vor.u32 %v14639_v23, %v11238_v5  ;;  %v14610_v5 = vld [vmem:[%s20655_s3 + $0x200] sm:$0xf0]  ;;  %v11252_v34 = vld [vmem:[%s20655_s3 + $0x30c] sm:$0xf0] }
 0x3ef   : > { %20732 = vst [vmem:[#allocation15_spill] sm:$0xff] %v16732_v22  ;;  %v11575_v22 = vld [vmem:[%s20655_s3 + $0x514] sm:$0xf0] }
 0x3f0   : > { %2612 = vmatmul.bf16.vlgmr.msrb.gmra.mxu0 %v11239_v29 }
 0x3f1   : > { %2070 = vmatmul.bf16.gmra.mxu2 %v11136_v58  ;;  %11167 = vmatmul.msk.bf16.gmra.mxu1 %vm1314_vm1, %v11044_v59  ;;  %v1502_v59 = vadd.f32 %v16369_v46, %v1448_v39 }
 0x3f2   : > { %2558 = vmatmul.bf16.vlgmr.msrb.gmra.mxu3 %v11235_v0  ;;  %v11155_v0 = vld [vmem:[%s20655_s3 + $0x2b0] sm:$0xf] }
 0x3f3   : > { %3293 = vmatpush.bf16.msrb.mxu3 %v16133_v31  ;;  %v14634_v31 = vld [vmem:[%s20655_s3 + $0x2c0] sm:$0xf0]  ;;  %v1556_v46 = vadd.f32 %v16439_v21, %v1502_v59  ;;  %v14644_v59 = vld [vmem:[%s20655_s3 + $0x310] sm:$0xf0] }
 0x3f4   : > { %v1607_v63 = vpop.f32.mrf.mxu2  ;;  %v11156_v16 = vor.u32 %v14634_v31, %v11155_v0  ;;  %v1983_v31 = vadd.f32 %v16633_v57, %v16379_v26  ;;  %v11230_v26 = vld [vmem:[%s20655_s3 + $0x2d0] sm:$0xf]  ;;  %v14638_v57 = vld [vmem:[%s20655_s3 + $0x2e0] sm:$0xf0] }
 0x3f5   : > { %v16748_v49 = vadd.f32 %v1607_v63, %v16348_v35  ;;  %v2095_v38 = vpop.f32.mrf.mxu3  ;;  %v11063_v35 = vld [vmem:[%s20655_s3 + $0x1f0] sm:$0xf] }
 0x3f6   : > { %v16750_v58 = vpop.f32.mrf.mxu1  ;;  %v11064_v6 = vor.u32 %v14610_v5, %v11063_v35 }
 0x3f7   : > { %20736 = vst [vmem:[#allocation11_spill] sm:$0xff] %v16748_v49  ;;  %3294 = vmatpush.bf16.msrb.mxu3 %v16143_v18  ;;  %v14641_v18 = vld [vmem:[%s20655_s3 + $0x2fc] sm:$0xf]  ;;  %v14716_v49 = vld [vmem:[%s20655_s3 + $0x554] sm:$0xf] }
 0x3f8   : > { %v11255_v21 = vor.u32 %v14641_v18, %v11252_v34  ;;  %v11083_v34 = vld [vmem:[%s20655_s3 + $0x218] sm:$0xf] }
 0x3fb   : > { %3295 = vmatpush.bf16.msrb.mxu3 %v16154_v2  ;;  %v11258_v2 = vld [vmem:[%s20655_s3 + $0x300] sm:$0xf] }
 0x3fc   : > { %v1609_v23 = vpop.f32.mrf.mxu2  ;;  %v11259_v0 = vor.u32 %v14644_v59, %v11258_v2 }
 0x3fd   : > { %v16774_v29 = vadd.f32 %v1609_v23, %v1556_v46  ;;  %v16776_v39 = vpop.f32.mrf.mxu3  ;;  %v14615_v23 = vld [vmem:[%s20655_s3 + $0x228] sm:$0xf0] }
 0x3fe   : > { %v16778_v63 = vpop.f32.mrf.mxu1  ;;  %v11084_v59 = vor.u32 %v14615_v23, %v11083_v34  ;;  %v1988_v23 = vadd.f32 %v16665_v56, %v16414_v15  ;;  %v14620_v15 = vld [vmem:[%s20655_s3 + $0x250] sm:$0xf0]  ;;  %v11250_v56 = vld [vmem:[%s20655_s3 + $0x2f8] sm:$0xf] }
 0x3ff   : > { %20737 = vst [vmem:[#allocation10_spill] sm:$0xff] %v16774_v29  ;;  %3296 = vmatpush.bf16.msrb.mxu3 %v16181_v3 }
 0x400   : > { %2617 = vmatmul.bf16.gmra.mxu0 %v11259_v0  ;;  %v11231_v0 = vor.u32 %v14638_v57, %v11230_v26 }
 0x401   : > { %2075 = vmatmul.bf16.gmra.mxu2 %v11156_v16  ;;  %11168 = vmatmul.msk.bf16.gmra.mxu1 %vm1314_vm1, %v11064_v6  ;;  %v14646_v16 = vld [vmem:[%s20655_s3 + $0x324] sm:$0xf]  ;;  %v11272_v6 = vld [vmem:[%s20655_s3 + $0x334] sm:$0xf0] }
 0x402   : > { %2563 = vmatmul.bf16.gmra.mxu3 %v11255_v21 }
 0x404   : > { %v2036_v35 = vpop.f32.mrf.mxu2 }
 0x405   : > { %v2037_v5 = vadd.f32 %v2036_v35, %v1983_v31  ;;  %v16790_v3 = vpop.f32.mrf.mxu3 }
 0x406   : > { %v16792_v46 = vpop.f32.mrf.mxu1 }
 0x407   : > { %v16794_v18 = vadd.f32 %v2090_v62, %v2037_v5  ;;  %v1985_v62 = vadd.f32 %v16640_v24, %v16404_v7  ;;  %v11275_v5 = vor.u32 %v14646_v16, %v11272_v6  ;;  %v11278_v7 = vld [vmem:[%s20655_s3 + $0x328] sm:$0xf]  ;;  %v14649_v24 = vld [vmem:[%s20655_s3 + $0x338] sm:$0xf0]  ;;  %v14651_v6 = vld [vmem:[%s20655_s3 + $0x34c] sm:$0xf] }
 0x408   : > { %v11279_v34 = vor.u32 %v14649_v24, %v11278_v7 }
 0x40c   : > { %v2038_v21 = vpop.f32.mrf.mxu2 }
 0x40d   : > { %v2039_v2 = vadd.f32 %v2038_v21, %v1985_v62  ;;  %v16816_v31 = vpop.f32.mrf.mxu3 }
 0x40e   : > { %v16818_v35 = vpop.f32.mrf.mxu1 }
 0x40f   : > { %v16820_v29 = vadd.f32 %v2092_v17, %v2039_v2 }
 0x410   : > { %2622 = vmatmul.bf16.gmra.mxu0 %v11279_v34  ;;  %v14654_v34 = vld [vmem:[%s20655_s3 + $0x360] sm:$0xf0] }
 0x411   : > { %11169 = vmatmul.msk.bf16.gmra.mxu1 %vm1314_vm1, %v11084_v59  ;;  %2504 = vmatmul.bf16.vlgmr.msra.gmra.mxu2 %v11231_v0 }
 0x412   : > { %3235 = vmatpush.bf16.msra.mxu2 %v15967_v45  ;;  %2568 = vmatmul.bf16.gmra.mxu3 %v11275_v5  ;;  %v11103_v45 = vld [vmem:[%s20655_s3 + $0x240] sm:$0xf] }
 0x413   : > { %v11104_v59 = vor.u32 %v14620_v15, %v11103_v45 }
 0x414   : > { %v2041_v17 = vpop.f32.mrf.mxu2 }
 0x415   : > { %v2042_v26 = vadd.f32 %v2041_v17, %v1988_v23  ;;  %v16832_v57 = vpop.f32.mrf.mxu3  ;;  %v1993_v23 = vadd.f32 %v16702_v28, %v16455_v13  ;;  %v14625_v13 = vld [vmem:[%s20655_s3 + $0x278] sm:$0xf0]  ;;  %v11270_v28 = vld [vmem:[%s20655_s3 + $0x320] sm:$0xf] }
 0x416   : > { %3236 = vmatpush.bf16.msra.mxu2 %v15976_v1  ;;  %v16835_v62 = vpop.f32.mrf.mxu1  ;;  %v14643_v1 = vld [vmem:[%s20655_s3 + $0x308] sm:$0xf0] }
 0x417   : > { %v16837_v16 = vadd.f32 %v2095_v38, %v2042_v26  ;;  %v1990_v38 = vadd.f32 %v16675_v44, %v16441_v52  ;;  %v11251_v0 = vor.u32 %v14643_v1, %v11250_v56  ;;  %v11298_v44 = vld [vmem:[%s20655_s3 + $0x350] sm:$0xf]  ;;  %v14656_v56 = vld [vmem:[%s20655_s3 + $0x374] sm:$0xf] }
 0x41a   : > { %3237 = vmatpush.bf16.msra.mxu2 %v15988_v10  ;;  %v11292_v10 = vld [vmem:[%s20655_s3 + $0x35c] sm:$0xf0] }
 0x41b   : > { %v11295_v24 = vor.u32 %v14651_v6, %v11292_v10 }
 0x41c   : > { %v2043_v21 = vpop.f32.mrf.mxu2 }
 0x41d   : > { %v2044_v2 = vadd.f32 %v2043_v21, %v1990_v38  ;;  %v16860_v5 = vpop.f32.mrf.mxu3 }
 0x41e   : > { %3238 = vmatpush.bf16.msra.mxu2 %v16005_v19  ;;  %v16863_v7 = vpop.f32.mrf.mxu1  ;;  %v11299_v19 = vor.u32 %v14654_v34, %v11298_v44 }
 0x41f   : > { %v16866_v52 = vadd.f32 %v16776_v39, %v2044_v2 }
 0x420   : > { %2627 = vmatmul.bf16.gmra.mxu0 %v11299_v19 }
 0x421   : > { %11170 = vmatmul.msk.bf16.gmra.mxu1 %vm1314_vm1, %v11104_v59  ;;  %2509 = vmatmul.bf16.gmra.mxu2 %v11251_v0  ;;  %v14659_v0 = vld [vmem:[%s20655_s3 + $0x388] sm:$0xf0] }
 0x422   : > { %3239 = vmatpush.bf16.msra.mxu2 %v16016_v30  ;;  %2573 = vmatmul.bf16.gmra.mxu3 %v11295_v24  ;;  %v11123_v30 = vld [vmem:[%s20655_s3 + $0x268] sm:$0xf] }
 0x423   : > { %v11124_v6 = vor.u32 %v14625_v13, %v11123_v30  ;;  %v14661_v30 = vld [vmem:[%s20655_s3 + $0x39c] sm:$0xf]  ;;  %v11332_v13 = vld [vmem:[%s20655_s3 + $0x3ac] sm:$0xf0] }
 0x424   : > { %v2046_v39 = vpop.f32.mrf.mxu2 }
 0x425   : > { %v2047_v17 = vadd.f32 %v2046_v39, %v1993_v23  ;;  %v2110_v26 = vpop.f32.mrf.mxu3  ;;  %v11143_v39 = vld [vmem:[%s20655_s3 + $0x290] sm:$0xf] }
 0x426   : > { %3240 = vmatpush.bf16.msra.mxu2 %v16027_v36  ;;  %v16879_v45 = vpop.f32.mrf.mxu1  ;;  %v14648_v36 = vld [vmem:[%s20655_s3 + $0x330] sm:$0xf0] }
 0x427   : > { %v16882_v15 = vadd.f32 %v16790_v3, %v2047_v17  ;;  %v1995_v3 = vadd.f32 %v16710_v33, %v16482_v25  ;;  %v11271_v10 = vor.u32 %v14648_v36, %v11270_v28  ;;  %v11318_v33 = vld [vmem:[%s20655_s3 + $0x378] sm:$0xf]  ;;  %v14630_v17 = vld [vmem:[%s20655_s3 + $0x2a0] sm:$0xf0] }
 0x428   : > { %v11319_v24 = vor.u32 %v14659_v0, %v11318_v33 }
 0x42a   : > { %3241 = vmatpush.bf16.msra.mxu2 %v16040_v43  ;;  %v11312_v43 = vld [vmem:[%s20655_s3 + $0x384] sm:$0xf0] }
 0x42b   : > { %v11315_v59 = vor.u32 %v14656_v56, %v11312_v43 }
 0x42c   : > { %v2048_v1 = vpop.f32.mrf.mxu2 }
 0x42d   : > { %v2049_v38 = vadd.f32 %v2048_v1, %v1995_v3  ;;  %v2112_v21 = vpop.f32.mrf.mxu3  ;;  %v11144_v3 = vor.u32 %v14630_v17, %v11143_v39  ;;  %v14666_v39 = vld [vmem:[%s20655_s3 + $0x3c4] sm:$0xf]  ;;  %v11352_v17 = vld [vmem:[%s20655_s3 + $0x3d4] sm:$0xf0] }
 0x42e   : > { %3242 = vmatpush.bf16.msra.mxu2 %v16067_v4  ;;  %v16906_v2 = vpop.f32.mrf.mxu1  ;;  %v1998_v4 = vadd.f32 %v16735_v53, %v16495_v12  ;;  %v11290_v12 = vld [vmem:[%s20655_s3 + $0x348] sm:$0xf]  ;;  %v14653_v53 = vld [vmem:[%s20655_s3 + $0x358] sm:$0xf0] }
 0x42f   : > { %v16909_v25 = vadd.f32 %v16816_v31, %v2049_v38  ;;  %v11291_v56 = vor.u32 %v14653_v53, %v11290_v12  ;;  %v11335_v38 = vor.u32 %v14661_v30, %v11332_v13 }
 0x430   : > { %2632 = vmatmul.bf16.gmra.mxu0 %v11319_v24 }
 0x431   : > { %11171 = vmatmul.msk.bf16.gmra.mxu1 %vm1314_vm1, %v11124_v6  ;;  %2514 = vmatmul.bf16.gmra.mxu2 %v11271_v10 }
 0x432   : > { %2578 = vmatmul.bf16.gmra.mxu3 %v11315_v59  ;;  %v2003_v59 = vadd.f32 %v16778_v63, %v16534_v48  ;;  %v11310_v48 = vld [vmem:[%s20655_s3 + $0x370] sm:$0xf]  ;;  %v14658_v63 = vld [vmem:[%s20655_s3 + $0x380] sm:$0xf0] }
 0x433   : > { %v11311_v30 = vor.u32 %v14658_v63, %v11310_v48  ;;  %v14671_v48 = vld [vmem:[%s20655_s3 + $0x3ec] sm:$0xf]  ;;  %v11372_v63 = vld [vmem:[%s20655_s3 + $0x3fc] sm:$0xf0] }
 0x434   : > { %v2051_v44 = vpop.f32.mrf.mxu2 }
 0x435   : > { %v2052_v31 = vadd.f32 %v2051_v44, %v1998_v4  ;;  %v2115_v34 = vpop.f32.mrf.mxu3  ;;  %v11163_v44 = vld [vmem:[%s20655_s3 + $0x2b8] sm:$0xf] }
 0x436   : > { %v16920_v19 = vpop.f32.mrf.mxu1 }
 0x437   : > { %v16923_v23 = vadd.f32 %v16832_v57, %v2052_v31  ;;  %v2000_v57 = vadd.f32 %v16750_v58, %v16522_v32  ;;  %v11338_v32 = vld [vmem:[%s20655_s3 + $0x3a0] sm:$0xf]  ;;  %v14664_v58 = vld [vmem:[%s20655_s3 + $0x3b0] sm:$0xf0]  ;;  %v14635_v31 = vld [vmem:[%s20655_s3 + $0x2c8] sm:$0xf0] }
 0x438   : > { %v11339_v10 = vor.u32 %v14664_v58, %v11338_v32 }
 0x43c   : > { %v2053_v28 = vpop.f32.mrf.mxu2 }
 0x43d   : > { %v2054_v36 = vadd.f32 %v2053_v28, %v2000_v57  ;;  %v16945_v43 = vpop.f32.mrf.mxu3  ;;  %v11164_v57 = vor.u32 %v14635_v31, %v11163_v44  ;;  %v11330_v31 = vld [vmem:[%s20655_s3 + $0x398] sm:$0xf] }
 0x43e   : > { %v16947_v1 = vpop.f32.mrf.mxu1 }
 0x43f   : > { %v16950_v6 = vadd.f32 %v16860_v5, %v2054_v36  ;;  %v11355_v36 = vor.u32 %v14666_v39, %v11352_v17 }
 0x440   : > { %2637 = vmatmul.bf16.gmra.mxu0 %v11339_v10 }
 0x441   : > { %11172 = vmatmul.msk.bf16.gmra.mxu1 %vm1314_vm1, %v11144_v3  ;;  %2519 = vmatmul.bf16.gmra.mxu2 %v11291_v56  ;;  %v14701_v56 = vld [vmem:[%s20655_s3 + $0x4dc] sm:$0xf] }
 0x442   : > { %2583 = vmatmul.bf16.gmra.mxu3 %v11335_v38  ;;  %v14669_v38 = vld [vmem:[%s20655_s3 + $0x3d8] sm:$0xf0] }
 0x444   : > { %v2056_v33 = vpop.f32.mrf.mxu2 }
 0x445   : > { %v2057_v5 = vadd.f32 %v2056_v33, %v2003_v59  ;;  %v16961_v0 = vpop.f32.mrf.mxu3 }
 0x446   : > { %v16963_v24 = vpop.f32.mrf.mxu1 }
 0x447   : > { %v16965_v4 = vadd.f32 %v2110_v26, %v2057_v5  ;;  %v2005_v26 = vadd.f32 %v16792_v46, %v16559_v60  ;;  %v11358_v46 = vld [vmem:[%s20655_s3 + $0x3c8] sm:$0xf] }
 0x448   : > { %v11359_v32 = vor.u32 %v14669_v38, %v11358_v46  ;;  %v14674_v46 = vld [vmem:[%s20655_s3 + $0x400] sm:$0xf0] }
 0x44c   : > { %v2058_v12 = vpop.f32.mrf.mxu2 }
 0x44d   : > { %v2059_v53 = vadd.f32 %v2058_v12, %v2005_v26  ;;  %v16987_v13 = vpop.f32.mrf.mxu3 }
 0x44e   : > { %v2144_v28 = vpop.f32.mrf.mxu1 }
 0x44f   : > { %v16990_v3 = vadd.f32 %v2144_v28, %v16794_v18  ;;  %v16992_v60 = vadd.f32 %v2112_v21, %v2059_v53  ;;  %v2008_v18 = vadd.f32 %v16818_v35, %v16570_v27  ;;  %v14663_v27 = vld [vmem:[%s20655_s3 + $0x3a8] sm:$0xf0]  ;;  %v14637_v35 = vld [vmem:[%s20655_s3 + $0x2dc] sm:$0xf] }
 0x450   : > { %2642 = vmatmul.bf16.gmra.mxu0 %v11359_v32  ;;  %v11331_v17 = vor.u32 %v14663_v27, %v11330_v31  ;;  %v11350_v27 = vld [vmem:[%s20655_s3 + $0x3c0] sm:$0xf] }
 0x451   : > { %11173 = vmatmul.msk.bf16.gmra.mxu1 %vm1314_vm1, %v11164_v57  ;;  %2524 = vmatmul.bf16.gmra.mxu2 %v11311_v30  ;;  %v11375_v30 = vor.u32 %v14671_v48, %v11372_v63 }
 0x452   : > { %2588 = vmatmul.bf16.gmra.mxu3 %v11355_v36 }
 0x454   : > { %v2061_v21 = vpop.f32.mrf.mxu2 }
 0x455   : > { %v2062_v58 = vadd.f32 %v2061_v21, %v2008_v18  ;;  %v17005_v10 = vpop.f32.mrf.mxu3 }
 0x456   : > { %v2146_v59 = vpop.f32.mrf.mxu1 }
 0x457   : > { %v17008_v33 = vadd.f32 %v2146_v59, %v16820_v29  ;;  %v17010_v5 = vadd.f32 %v2115_v34, %v2062_v58  ;;  %v11240_v29 = vld [vmem:[%s20655_s3 + $0x2ec] sm:$0xf0]  ;;  %v2010_v34 = vadd.f32 %v16835_v62, %v16595_v51 }
 0x458   : > { %v11243_v12 = vor.u32 %v14637_v35, %v11240_v29  ;;  %v11378_v62 = vld [vmem:[%s20655_s3 + $0x3f0] sm:$0xf]  ;;  %v14676_v35 = vld [vmem:[%s20655_s3 + $0x414] sm:$0xf]  ;;  %v11392_v29 = vld [vmem:[%s20655_s3 + $0x424] sm:$0xf0] }
 0x459   : > { %v11379_v38 = vor.u32 %v14674_v46, %v11378_v62  ;;  %v14679_v46 = vld [vmem:[%s20655_s3 + $0x428] sm:$0xf0] }
 0x45c   : > { %v2063_v26 = vpop.f32.mrf.mxu2 }
 0x45d   : > { %v2064_v39 = vadd.f32 %v2063_v26, %v2010_v34  ;;  %v17034_v53 = vpop.f32.mrf.mxu3 }
 0x45e   : > { %v2149_v57 = vpop.f32.mrf.mxu1 }
 0x45f   : > { %v17037_v28 = vadd.f32 %v2149_v57, %v16837_v16  ;;  %v17040_v51 = vadd.f32 %v16945_v43, %v2064_v39  ;;  %v2013_v16 = vadd.f32 %v16863_v7, %v16606_v50  ;;  %v14668_v50 = vld [vmem:[%s20655_s3 + $0x3d0] sm:$0xf0]  ;;  %v14642_v7 = vld [vmem:[%s20655_s3 + $0x304] sm:$0xf] }
 0x460   : > { %2647 = vmatmul.bf16.gmra.mxu0 %v11379_v38  ;;  %v11351_v63 = vor.u32 %v14668_v50, %v11350_v27 }
 0x461   : > { %2529 = vmatmul.bf16.gmra.mxu2 %v11331_v17  ;;  %2666 = vmatmul.bf16.vlgmr.msra.gmra.mxu1 %v11243_v12  ;;  %v11395_v12 = vor.u32 %v14676_v35, %v11392_v29  ;;  %v14683_v35 = vld [vmem:[%s20655_s3 + $0x448] sm:$0xf0] }
 0x462   : > { %2593 = vmatmul.bf16.gmra.mxu3 %v11375_v30 }
 0x464   : > { %v2066_v43 = vpop.f32.mrf.mxu2 }
 0x465   : > { %v2067_v32 = vadd.f32 %v2066_v43, %v2013_v16  ;;  %v17052_v18 = vpop.f32.mrf.mxu3 }
 0x466   : > { %v2151_v21 = vpop.f32.mrf.mxu1 }
 0x467   : > { %v17055_v58 = vadd.f32 %v2151_v21, %v16866_v52  ;;  %v17058_v59 = vadd.f32 %v16961_v0, %v2067_v32  ;;  %v11260_v52 = vld [vmem:[%s20655_s3 + $0x314] sm:$0xf0]  ;;  %v2015_v0 = vadd.f32 %v16879_v45, %v16631_v55 }
 0x468   : > { %v11263_v26 = vor.u32 %v14642_v7, %v11260_v52  ;;  %v11398_v45 = vld [vmem:[%s20655_s3 + $0x418] sm:$0xf]  ;;  %v11370_v7 = vld [vmem:[%s20655_s3 + $0x3e8] sm:$0xf]  ;;  %v2020_v52 = vadd.f32 %v16920_v19, %v16663_v42 }
 0x46c   : > { %v2068_v34 = vpop.f32.mrf.mxu2 }
 0x46d   : > { %v2069_v48 = vadd.f32 %v2068_v34, %v2015_v0  ;;  %v17082_v39 = vpop.f32.mrf.mxu3  ;;  %v17095_v62 = vpop.f32.mrf.mxu0  ;;  %v11473_v0 = vld [vmem:[%s20655_s3 + $0x438] sm:$0xf] }
 0x46e   : > { %v2154_v17 = vpop.f32.mrf.mxu1 }
 0x46f   : > { %v17085_v57 = vadd.f32 %v2154_v17, %v16882_v15  ;;  %v17088_v55 = vadd.f32 %v16987_v13, %v2069_v48  ;;  %v11399_v15 = vor.u32 %v14679_v46, %v11398_v45  ;;  %v2018_v13 = vadd.f32 %v16906_v2, %v16638_v8  ;;  %v14673_v2 = vld [vmem:[%s20655_s3 + $0x3f8] sm:$0xf0] }
 0x470   : > { %v11371_v48 = vor.u32 %v14673_v2, %v11370_v7 }
 0x471   : > { %2534 = vmatmul.bf16.gmra.mxu2 %v11351_v63  ;;  %2671 = vmatmul.bf16.gmra.mxu1 %v11263_v26 }
 0x472   : > { %2598 = vmatmul.bf16.gmra.mxu3 %v11395_v12  ;;  %2652 = vmatmul.bf16.gmra.mxu0 %v11399_v15  ;;  %v11474_v12 = vor.u32 %v14683_v35, %v11473_v0  ;;  %v14681_v15 = vld [vmem:[%s20655_s3 + $0x43c] sm:$0xf]  ;;  %v2025_v0 = vadd.f32 %v16963_v24, %v16699_v20  ;;  %v11493_v35 = vld [vmem:[%s20655_s3 + $0x460] sm:$0xf] }
 0x473   : > { %v20738_v24 = vld [vmem:[#allocation16_spill] sm:$0xff] }
 0x474   : > { %v2071_v38 = vpop.f32.mrf.mxu2 }
 0x475   : > { %v2072_v16 = vadd.f32 %v2071_v38, %v2018_v13  ;;  %v17102_v43 = vpop.f32.mrf.mxu3  ;;  %v17115_v8 = vpop.f32.mrf.mxu0  ;;  %v11475_v13 = vld [vmem:[%s20655_s3 + $0x44c] sm:$0xf0] }
 0x476   : > { %v2156_v32 = vpop.f32.mrf.mxu1 }
 0x477   : > { %v17105_v21 = vadd.f32 %v2156_v32, %v16909_v25  ;;  %v17108_v27 = vadd.f32 %v17005_v10, %v2072_v16  ;;  %v14647_v25 = vld [vmem:[%s20655_s3 + $0x32c] sm:$0xf]  ;;  %v11280_v10 = vld [vmem:[%s20655_s3 + $0x33c] sm:$0xf0] }
 0x478   : > { %v11283_v63 = vor.u32 %v14647_v25, %v11280_v10 }
 0x47c   : > { %v2073_v29 = vpop.f32.mrf.mxu2 }
 0x47d   : > { %v2074_v34 = vadd.f32 %v2073_v29, %v2020_v52  ;;  %v17134_v26 = vpop.f32.mrf.mxu3  ;;  %v17144_v46 = vpop.f32.mrf.mxu0  ;;  %v11390_v52 = vld [vmem:[%s20655_s3 + $0x410] sm:$0xf]  ;;  %v14688_v29 = vld [vmem:[%s20655_s3 + $0x470] sm:$0xf0] }
 0x47e   : > { %v2159_v17 = vpop.f32.mrf.mxu1 }
 0x47f   : > { %v17137_v45 = vadd.f32 %v2159_v17, %v16923_v23  ;;  %v17140_v42 = vadd.f32 %v17034_v53, %v2074_v34  ;;  %v11478_v23 = vor.u32 %v14681_v15, %v11475_v13  ;;  %v2023_v53 = vadd.f32 %v16947_v1, %v16672_v9  ;;  %v14678_v1 = vld [vmem:[%s20655_s3 + $0x420] sm:$0xf0] }
 0x480   : > { %v11494_v13 = vor.u32 %v14688_v29, %v11493_v35 }
 0x481   : > { %2539 = vmatmul.bf16.gmra.mxu2 %v11371_v48  ;;  %2676 = vmatmul.bf16.gmra.mxu1 %v11283_v63  ;;  %v11391_v63 = vor.u32 %v14678_v1, %v11390_v52 }
 0x482   : > { %3081 = vmatmul.bf16.vlgmr.msra.gmra.mxu3 %v11474_v12  ;;  %3135 = vmatmul.bf16.vlgmr.msra.gmra.mxu0 %v11478_v23 }
 0x484   : > { %v2076_v38 = vpop.f32.mrf.mxu2 }
 0x485   : > { %v2077_v16 = vadd.f32 %v2076_v38, %v2023_v53  ;;  %v17154_v32 = vpop.f32.mrf.mxu3  ;;  %v17167_v9 = vpop.f32.mrf.mxu0 }
 0x486   : > { %v2161_v7 = vpop.f32.mrf.mxu1 }
 0x487   : > { %v17157_v2 = vadd.f32 %v2161_v7, %v16950_v6  ;;  %v17160_v25 = vadd.f32 %v17052_v18, %v2077_v16  ;;  %v14652_v6 = vld [vmem:[%s20655_s3 + $0x354] sm:$0xf]  ;;  %v11300_v18 = vld [vmem:[%s20655_s3 + $0x364] sm:$0xf0]  ;;  %v14686_v16 = vld [vmem:[%s20655_s3 + $0x464] sm:$0xf] }
 0x488   : > { %v11303_v17 = vor.u32 %v14652_v6, %v11300_v18  ;;  %v11495_v7 = vld [vmem:[%s20655_s3 + $0x474] sm:$0xf0] }
 0x48c   : > { %v2078_v34 = vpop.f32.mrf.mxu2 }
 0x48d   : > { %v2079_v48 = vadd.f32 %v2078_v34, %v2025_v0  ;;  %v2566_v12 = vpop.f32.mrf.mxu3  ;;  %v17194_v38 = vpop.f32.mrf.mxu0  ;;  %v14657_v34 = vld [vmem:[%s20655_s3 + $0x37c] sm:$0xf] }
 0x48e   : > { %v2164_v15 = vpop.f32.mrf.mxu1 }
 0x48f   : > { %v17187_v23 = vadd.f32 %v2164_v15, %v16965_v4  ;;  %v17190_v20 = vadd.f32 %v17082_v39, %v2079_v48  ;;  %v11498_v4 = vor.u32 %v14686_v16, %v11495_v7 }
 0x491   : > { %2544 = vmatmul.bf16.gmra.mxu2 %v11391_v63  ;;  %2681 = vmatmul.bf16.gmra.mxu1 %v11303_v17  ;;  %v11513_v63 = vld [vmem:[%s20655_s3 + $0x488] sm:$0xf]  ;;  %v14693_v17 = vld [vmem:[%s20655_s3 + $0x498] sm:$0xf0] }
 0x492   : > { %3086 = vmatmul.bf16.gmra.mxu3 %v11494_v13  ;;  %3140 = vmatmul.bf16.gmra.mxu0 %v11498_v4 }
 0x494   : > { %v2505_v52 = vpop.f32.mrf.mxu2 }
 0x495   : > { %v2560_v39 = vadd.f32 %v17102_v43, %v2505_v52  ;;  %v17203_v1 = vpop.f32.mrf.mxu3  ;;  %v17216_v48 = vpop.f32.mrf.mxu0  ;;  %v11320_v43 = vld [vmem:[%s20655_s3 + $0x38c] sm:$0xf0] }
 0x496   : > { %v2166_v6 = vpop.f32.mrf.mxu1  ;;  %v11323_v16 = vor.u32 %v14657_v34, %v11320_v43 }
 0x497   : > { %v17206_v18 = vadd.f32 %v2166_v6, %v16992_v60  ;;  %v17209_v0 = vadd.f32 %v17095_v62, %v2560_v39  ;;  %v11246_v60 = vld [vmem:[%s20655_s3 + $0x2e0] sm:$0xf]  ;;  %v14640_v62 = vld [vmem:[%s20655_s3 + $0x2f0] sm:$0xf0]  ;;  %v11514_v39 = vor.u32 %v14693_v17, %v11513_v63 }
 0x498   : > { %v11247_v7 = vor.u32 %v14640_v62, %v11246_v60 }
 0x499   : > { %20739 = vst [vmem:[#allocation9_spill] sm:$0xff] %v17206_v18 }
 0x49c   : > { %v2507_v15 = vpop.f32.mrf.mxu2 }
 0x49d   : > { %v2562_v13 = vadd.f32 %v17134_v26, %v2507_v15  ;;  %v2571_v4 = vpop.f32.mrf.mxu3  ;;  %v17243_v19 = vpop.f32.mrf.mxu0  ;;  %v14691_v26 = vld [vmem:[%s20655_s3 + $0x48c] sm:$0xf] }
 0x49e   : > { %v2169_v52 = vpop.f32.mrf.mxu1 }
 0x49f   : > { %v17235_v6 = vadd.f32 %v2169_v52, %v17010_v5  ;;  %v17238_v29 = vadd.f32 %v17115_v8, %v2562_v13  ;;  %v11515_v5 = vld [vmem:[%s20655_s3 + $0x49c] sm:$0xf0]  ;;  %v11533_v52 = vld [vmem:[%s20655_s3 + $0x4b0] sm:$0xf] }
 0x4a0   : > { %v11518_v34 = vor.u32 %v14691_v26, %v11515_v5 }
 0x4a1   : > { %20741 = vst [vmem:[#allocation8_spill] sm:$0xff] %v17235_v6  ;;  %2686 = vmatmul.bf16.gmra.mxu1 %v11323_v16  ;;  %11408 = vmatmul.msk.bf16.vlgmr.msrb.gmra.mxu2 %vm1314_vm1, %v11247_v7  ;;  %v14662_v16 = vld [vmem:[%s20655_s3 + $0x3a4] sm:$0xf] }
 0x4a2   : > { %3091 = vmatmul.bf16.gmra.mxu3 %v11514_v39  ;;  %3145 = vmatmul.bf16.gmra.mxu0 %v11518_v34  ;;  %v14698_v39 = vld [vmem:[%s20655_s3 + $0x4c0] sm:$0xf0] }
 0x4a3   : > { %v11534_v13 = vor.u32 %v14698_v39, %v11533_v52 }
 0x4a4   : > { %v2510_v8 = vpop.f32.mrf.mxu2 }
 0x4a5   : > { %v2565_v43 = vadd.f32 %v17154_v32, %v2510_v8  ;;  %v17252_v60 = vpop.f32.mrf.mxu3  ;;  %v17265_v7 = vpop.f32.mrf.mxu0  ;;  %v11340_v32 = vld [vmem:[%s20655_s3 + $0x3b4] sm:$0xf0] }
 0x4a6   : > { %v2171_v62 = vpop.f32.mrf.mxu1  ;;  %v11343_v34 = vor.u32 %v14662_v16, %v11340_v32 }
 0x4a7   : > { %v17255_v63 = vadd.f32 %v2171_v62, %v17040_v51  ;;  %v17258_v17 = vadd.f32 %v17144_v46, %v2565_v43  ;;  %v11266_v51 = vld [vmem:[%s20655_s3 + $0x308] sm:$0xf]  ;;  %v14645_v46 = vld [vmem:[%s20655_s3 + $0x318] sm:$0xf0] }
 0x4a8   : > { %v11267_v8 = vor.u32 %v14645_v46, %v11266_v51 }
 0x4a9   : > { %20743 = vst [vmem:[#allocation19_spill] sm:$0xff] %v17255_v63 }
 0x4ac   : > { %v2512_v26 = vpop.f32.mrf.mxu2 }
 0x4ad   : > { %v2567_v5 = vadd.f32 %v2566_v12, %v2512_v26  ;;  %v2576_v43 = vpop.f32.mrf.mxu3  ;;  %v17291_v36 = vpop.f32.mrf.mxu0  ;;  %v14696_v12 = vld [vmem:[%s20655_s3 + $0x4b4] sm:$0xf] }
 0x4ae   : > { %v2174_v62 = vpop.f32.mrf.mxu1 }
 0x4af   : > { %v17283_v10 = vadd.f32 %v2174_v62, %v17058_v59  ;;  %v17286_v50 = vadd.f32 %v17167_v9, %v2567_v5  ;;  %v11535_v59 = vld [vmem:[%s20655_s3 + $0x4c4] sm:$0xf0]  ;;  %v14703_v62 = vld [vmem:[%s20655_s3 + $0x4e8] sm:$0xf0] }
 0x4b0   : > { %v11538_v16 = vor.u32 %v14696_v12, %v11535_v59 }
 0x4b1   : > { %20745 = vst [vmem:[#allocation21_spill] sm:$0xff] %v17283_v10  ;;  %2691 = vmatmul.bf16.gmra.mxu1 %v11343_v34  ;;  %11409 = vmatmul.msk.bf16.gmra.mxu2 %vm1314_vm1, %v11267_v8  ;;  %v11553_v8 = vld [vmem:[%s20655_s3 + $0x4d8] sm:$0xf] }
 0x4b2   : > { %3096 = vmatmul.bf16.gmra.mxu3 %v11534_v13  ;;  %3150 = vmatmul.bf16.gmra.mxu0 %v11538_v16  ;;  %v14667_v13 = vld [vmem:[%s20655_s3 + $0x3cc] sm:$0xf]  ;;  %v11554_v5 = vor.u32 %v14703_v62, %v11553_v8 }
 0x4b4   : > { %v2515_v9 = vpop.f32.mrf.mxu2 }
 0x4b5   : > { %v2570_v32 = vadd.f32 %v17203_v1, %v2515_v9  ;;  %v17300_v51 = vpop.f32.mrf.mxu3  ;;  %v17313_v34 = vpop.f32.mrf.mxu0  ;;  %v11360_v1 = vld [vmem:[%s20655_s3 + $0x3dc] sm:$0xf0] }
 0x4b6   : > { %v2176_v46 = vpop.f32.mrf.mxu1  ;;  %v11363_v16 = vor.u32 %v14667_v13, %v11360_v1 }
 0x4b7   : > { %v17303_v52 = vadd.f32 %v2176_v46, %v17088_v55  ;;  %v17306_v39 = vadd.f32 %v17194_v38, %v2570_v32  ;;  %v11286_v55 = vld [vmem:[%s20655_s3 + $0x330] sm:$0xf]  ;;  %v14650_v38 = vld [vmem:[%s20655_s3 + $0x340] sm:$0xf0] }
 0x4b8   : > { %v11287_v9 = vor.u32 %v14650_v38, %v11286_v55 }
 0x4b9   : > { %20747 = vst [vmem:[#allocation16_spill] sm:$0xff] %v17303_v52 }
 0x4bc   : > { %v2517_v12 = vpop.f32.mrf.mxu2 }
 0x4bd   : > { %v2572_v59 = vadd.f32 %v2571_v4, %v2517_v12  ;;  %v2581_v32 = vpop.f32.mrf.mxu3  ;;  %v17342_v4 = vpop.f32.mrf.mxu0 }
 0x4be   : > { %v2179_v46 = vpop.f32.mrf.mxu1 }
 0x4bf   : > { %v17331_v31 = vadd.f32 %v2179_v46, %v17108_v27  ;;  %v17334_v44 = vadd.f32 %v17216_v48, %v2572_v59  ;;  %v11555_v27 = vld [vmem:[%s20655_s3 + $0x4ec] sm:$0xf0]  ;;  %v11573_v59 = vld [vmem:[%s20655_s3 + $0x500] sm:$0xf] }
 0x4c0   : > { %v11558_v13 = vor.u32 %v14701_v56, %v11555_v27 }
 0x4c1   : > { %20749 = vst [vmem:[#allocation22_spill] sm:$0xff] %v17331_v31  ;;  %2696 = vmatmul.bf16.gmra.mxu1 %v11363_v16  ;;  %11410 = vmatmul.msk.bf16.gmra.mxu2 %vm1314_vm1, %v11287_v9  ;;  %v14708_v16 = vld [vmem:[%s20655_s3 + $0x510] sm:$0xf0]  ;;  %v11615_v31 = vld [vmem:[%s20655_s3 + $0x564] sm:$0xf0] }
 0x4c2   : > { %3101 = vmatmul.bf16.gmra.mxu3 %v11554_v5  ;;  %3155 = vmatmul.bf16.gmra.mxu0 %v11558_v13  ;;  %v14672_v5 = vld [vmem:[%s20655_s3 + $0x3f4] sm:$0xf] }
 0x4c4   : > { %v2520_v48 = vpop.f32.mrf.mxu2 }
 0x4c5   : > { %v2575_v1 = vadd.f32 %v17252_v60, %v2520_v48  ;;  %v2584_v55 = vpop.f32.mrf.mxu3  ;;  %v17359_v56 = vpop.f32.mrf.mxu0  ;;  %v11380_v60 = vld [vmem:[%s20655_s3 + $0x404] sm:$0xf0] }
 0x4c6   : > { %v2181_v38 = vpop.f32.mrf.mxu1  ;;  %v11383_v27 = vor.u32 %v14672_v5, %v11380_v60 }
 0x4c7   : > { %v17349_v8 = vadd.f32 %v2181_v38, %v17140_v42  ;;  %v17352_v62 = vadd.f32 %v17243_v19, %v2575_v1  ;;  %v11306_v42 = vld [vmem:[%s20655_s3 + $0x358] sm:$0xf]  ;;  %v14655_v19 = vld [vmem:[%s20655_s3 + $0x368] sm:$0xf0]  ;;  %v11574_v38 = vor.u32 %v14708_v16, %v11573_v59 }
 0x4c8   : > { %v11307_v13 = vor.u32 %v14655_v19, %v11306_v42 }
 0x4c9   : > { %20751 = vst [vmem:[#allocation23_spill] sm:$0xff] %v17349_v8  ;;  %v14706_v8 = vld [vmem:[%s20655_s3 + $0x504] sm:$0xf] }
 0x4cc   : > { %v2522_v9 = vpop.f32.mrf.mxu2 }
 0x4cd   : > { %v2577_v46 = vadd.f32 %v2576_v43, %v2522_v9  ;;  %v2586_v48 = vpop.f32.mrf.mxu3  ;;  %v17391_v5 = vpop.f32.mrf.mxu0  ;;  %v14711_v9 = vld [vmem:[%s20655_s3 + $0x52c] sm:$0xf] }
 0x4ce   : > { %v2184_v1 = vpop.f32.mrf.mxu1 }
 0x4cf   : > { %v17377_v12 = vadd.f32 %v2184_v1, %v17160_v25  ;;  %v17380_v26 = vadd.f32 %v17265_v7, %v2577_v46  ;;  %v11578_v25 = vor.u32 %v14706_v8, %v11575_v22  ;;  %v14677_v22 = vld [vmem:[%s20655_s3 + $0x41c] sm:$0xf] }
 0x4d1   : > { %20752 = vst [vmem:[#allocation24_spill] sm:$0xff] %v17377_v12  ;;  %2701 = vmatmul.bf16.gmra.mxu1 %v11383_v27  ;;  %11411 = vmatmul.msk.bf16.gmra.mxu2 %vm1314_vm1, %v11307_v13  ;;  %v11593_v27 = vld [vmem:[%s20655_s3 + $0x528] sm:$0xf]  ;;  %v14713_v13 = vld [vmem:[%s20655_s3 + $0x538] sm:$0xf0] }
 0x4d2   : > { %3106 = vmatmul.bf16.gmra.mxu3 %v11574_v38  ;;  %3160 = vmatmul.bf16.gmra.mxu0 %v11578_v25  ;;  %v11594_v46 = vor.u32 %v14713_v13, %v11593_v27  ;;  %v11595_v12 = vld [vmem:[%s20655_s3 + $0x53c] sm:$0xf0]  ;;  %v11346_v13 = vld [vmem:[%s20655_s3 + $0x3a8] sm:$0xf] }
 0x4d4   : > { %v2525_v7 = vpop.f32.mrf.mxu2 }
 0x4d5   : > { %v2580_v60 = vadd.f32 %v17300_v51, %v2525_v7  ;;  %v2589_v42 = vpop.f32.mrf.mxu3  ;;  %v17405_v8 = vpop.f32.mrf.mxu0  ;;  %v11400_v51 = vld [vmem:[%s20655_s3 + $0x42c] sm:$0xf0] }
 0x4d6   : > { %v2186_v19 = vpop.f32.mrf.mxu1  ;;  %20755 = vst [vmem:[#allocation26_spill] sm:$0xff] %v17405_v8  ;;  %v11403_v25 = vor.u32 %v14677_v22, %v11400_v51  ;;  %v11598_v22 = vor.u32 %v14711_v9, %v11595_v12  ;;  %v14665_v12 = vld [vmem:[%s20655_s3 + $0x3b8] sm:$0xf0]  ;;  %v14718_v9 = vld [vmem:[%s20655_s3 + $0x560] sm:$0xf0] }
 0x4d7   : > { %v17395_v59 = vadd.f32 %v2186_v19, %v17190_v20  ;;  %v17398_v16 = vadd.f32 %v17291_v36, %v2580_v60  ;;  %v11326_v20 = vld [vmem:[%s20655_s3 + $0x380] sm:$0xf]  ;;  %v14660_v36 = vld [vmem:[%s20655_s3 + $0x390] sm:$0xf0] }
 0x4d8   : > { %v11327_v7 = vor.u32 %v14660_v36, %v11326_v20 }
 0x4d9   : > { %20753 = vst [vmem:[#allocation25_spill] sm:$0xff] %v17395_v59 }
 0x4dc   : > { %v2527_v1 = vpop.f32.mrf.mxu2 }
 0x4dd   : > { %v2582_v38 = vadd.f32 %v2581_v32, %v2527_v1  ;;  %v2591_v60 = vpop.f32.mrf.mxu3  ;;  %v17435_v32 = vpop.f32.mrf.mxu0 }
 0x4de   : > { %v2667_v19 = vpop.f32.mrf.mxu1 }
 0x4df   : > { %v17423_v43 = vadd.f32 %v2667_v19, %v17209_v0  ;;  %v17426_v59 = vadd.f32 %v17313_v34, %v2582_v38 }
 0x4e1   : > { %2706 = vmatmul.bf16.gmra.mxu1 %v11403_v25  ;;  %11412 = vmatmul.msk.bf16.gmra.mxu2 %vm1314_vm1, %v11327_v7  ;;  %v11347_v25 = vor.u32 %v14665_v12, %v11346_v13  ;;  %v11618_v13 = vor.u32 %v14716_v49, %v11615_v31  ;;  %v14670_v49 = vld [vmem:[%s20655_s3 + $0x3e0] sm:$0xf0]  ;;  %v11501_v31 = vld [vmem:[%s20655_s3 + $0x468] sm:$0xf] }
 0x4e2   : > { %3111 = vmatmul.bf16.gmra.mxu3 %v11594_v46  ;;  %3165 = vmatmul.bf16.gmra.mxu0 %v11598_v22 }
 0x4e4   : > { %v2530_v0 = vpop.f32.mrf.mxu2 }
 0x4e5   : > { %v2585_v51 = vadd.f32 %v2584_v55, %v2530_v0  ;;  %v2594_v34 = vpop.f32.mrf.mxu3  ;;  %v17446_v1 = vpop.f32.mrf.mxu0  ;;  %v11481_v55 = vld [vmem:[%s20655_s3 + $0x440] sm:$0xf] }
 0x4e6   : > { %v2669_v20 = vpop.f32.mrf.mxu1  ;;  %20756 = vst [vmem:[#allocation27_spill] sm:$0xff] %v17446_v1 }
 0x4e7   : > { %v17438_v36 = vadd.f32 %v2669_v20, %v17238_v29  ;;  %v17441_v27 = vadd.f32 %v17342_v4, %v2585_v51  ;;  %v14684_v29 = vld [vmem:[%s20655_s3 + $0x450] sm:$0xf0]  ;;  %v11613_v4 = vld [vmem:[%s20655_s3 + $0x550] sm:$0xf] }
 0x4e8   : > { %v11482_v7 = vor.u32 %v14684_v29, %v11481_v55  ;;  %v11614_v0 = vor.u32 %v14718_v9, %v11613_v4  ;;  %v11366_v9 = vld [vmem:[%s20655_s3 + $0x3d0] sm:$0xf] }
 0x4ec   : > { %v2532_v46 = vpop.f32.mrf.mxu2 }
 0x4ed   : > { %v2587_v38 = vadd.f32 %v2586_v48, %v2532_v46  ;;  %v2596_v19 = vpop.f32.mrf.mxu3 }
 0x4ee   : > { %v2672_v22 = vpop.f32.mrf.mxu1 }
 0x4ef   : > { %v17464_v51 = vadd.f32 %v2672_v22, %v17258_v17  ;;  %v17467_v20 = vadd.f32 %v17359_v56, %v2587_v38  ;;  %v17476_v48 = vpop.f32.mrf.mxu0 }
 0x4f1   : > { %11413 = vmatmul.msk.bf16.gmra.mxu2 %vm1314_vm1, %v11347_v25  ;;  %3189 = vmatmul.bf16.vlgmr.msrb.gmra.mxu1 %v11482_v7  ;;  %v11367_v7 = vor.u32 %v14670_v49, %v11366_v9 }
 0x4f2   : > { %3116 = vmatmul.bf16.gmra.mxu3 %v11614_v0  ;;  %3170 = vmatmul.bf16.gmra.mxu0 %v11618_v13 }
 0x4f4   : > { %v2535_v17 = vpop.f32.mrf.mxu2 }
 0x4f5   : > { %v2590_v12 = vadd.f32 %v2589_v42, %v2535_v17  ;;  %v2599_v56 = vpop.f32.mrf.mxu3  ;;  %v14723_v42 = vld [vmem:[%s20655_s3 + $0x588] sm:$0xf0] }
 0x4f6   : > { %v2674_v55 = vpop.f32.mrf.mxu1 }
 0x4f7   : > { %v17479_v29 = vadd.f32 %v2674_v55, %v17286_v50  ;;  %v17482_v4 = vadd.f32 %v17391_v5, %v2590_v12  ;;  %v17487_v46 = vpop.f32.mrf.mxu0  ;;  %v14689_v50 = vld [vmem:[%s20655_s3 + $0x478] sm:$0xf0]  ;;  %v11633_v5 = vld [vmem:[%s20655_s3 + $0x578] sm:$0xf] }
 0x4f8   : > { %20757 = vst [vmem:[#allocation28_spill] sm:$0xff] %v17487_v46  ;;  %v11502_v22 = vor.u32 %v14689_v50, %v11501_v31  ;;  %v11634_v17 = vor.u32 %v14723_v42, %v11633_v5  ;;  %v14721_v55 = vld [vmem:[%s20655_s3 + $0x57c] sm:$0xf]  ;;  %v11635_v46 = vld [vmem:[%s20655_s3 + $0x58c] sm:$0xf0] }
 0x4f9   : > { %v11638_v9 = vor.u32 %v14721_v55, %v11635_v46  ;;  %v11521_v46 = vld [vmem:[%s20655_s3 + $0x490] sm:$0xf] }
 0x4fc   : > { %v2537_v38 = vpop.f32.mrf.mxu2 }
 0x4fd   : > { %v17504_v25 = vadd.f32 %v2591_v60, %v2537_v38  ;;  %v2601_v0 = vpop.f32.mrf.mxu3 }
 0x4fe   : > { %v2677_v13 = vpop.f32.mrf.mxu1 }
 0x4ff   : > { %20758 = vst [vmem:[#allocation29_spill] sm:$0xff] %v17504_v25  ;;  %v17507_v12 = vadd.f32 %v2677_v13, %v17306_v39  ;;  %v3136_v60 = vpop.f32.mrf.mxu0  ;;  %v14685_v13 = vld [vmem:[%s20655_s3 + $0x458] sm:$0xf0] }
 0x501   : > { %11414 = vmatmul.msk.bf16.gmra.mxu2 %vm1314_vm1, %v11367_v7  ;;  %3194 = vmatmul.bf16.gmra.mxu1 %v11502_v22  ;;  %v11386_v7 = vld [vmem:[%s20655_s3 + $0x3f8] sm:$0xf] }
 0x502   : > { %3121 = vmatmul.bf16.gmra.mxu3 %v11634_v17  ;;  %3175 = vmatmul.bf16.gmra.mxu0 %v11638_v9 }
 0x504   : > { %v2540_v49 = vpop.f32.mrf.mxu2 }
 0x505   : > { %v2595_v31 = vadd.f32 %v2594_v34, %v2540_v49  ;;  %v3082_v50 = vpop.f32.mrf.mxu3  ;;  %v14675_v34 = vld [vmem:[%s20655_s3 + $0x408] sm:$0xf0] }
 0x506   : > { %v2679_v39 = vpop.f32.mrf.mxu1  ;;  %v17516_v5 = vadd.f32 %v3136_v60, %v3082_v50  ;;  %v11387_v60 = vor.u32 %v14675_v34, %v11386_v7 }
 0x507   : > { %v17519_v42 = vadd.f32 %v2679_v39, %v17334_v44  ;;  %v17522_v38 = vadd.f32 %v17435_v32, %v2595_v31  ;;  %v17527_v22 = vpop.f32.mrf.mxu0  ;;  %v14694_v44 = vld [vmem:[%s20655_s3 + $0x4a0] sm:$0xf0]  ;;  %v11489_v32 = vld [vmem:[%s20655_s3 + $0x448] sm:$0xf] }
 0x508   : > { %v11522_v9 = vor.u32 %v14694_v44, %v11521_v46  ;;  %v11490_v50 = vor.u32 %v14685_v13, %v11489_v32 }
 0x50c   : > { %v2542_v17 = vpop.f32.mrf.mxu2 }
 0x50d   : > { %v17544_v55 = vadd.f32 %v2596_v19, %v2542_v17  ;;  %v17546_v49 = vpop.f32.mrf.mxu3 }
 0x50e   : > { %v2682_v31 = vpop.f32.mrf.mxu1 }
 0x50f   : > { %20759 = vst [vmem:[#allocation30_spill] sm:$0xff] %v17544_v55  ;;  %v17549_v39 = vadd.f32 %v2682_v31, %v17352_v62  ;;  %v3141_v52 = vpop.f32.mrf.mxu0  ;;  %v11406_v62 = vld [vmem:[%s20655_s3 + $0x420] sm:$0xf] }
 0x511   : > { %11415 = vmatmul.msk.bf16.gmra.mxu2 %vm1314_vm1, %v11387_v60  ;;  %3199 = vmatmul.bf16.gmra.mxu1 %v11522_v9 }
 0x512   : > { %11651 = vmatmul.msk.bf16.vlgmr.msrb.gmra.mxu3 %vm1314_vm1, %v11490_v50 }
 0x514   : > { %v2545_v1 = vpop.f32.mrf.mxu2 }
 0x515   : > { %v2600_v10 = vadd.f32 %v2599_v56, %v2545_v1  ;;  %v3087_v30 = vpop.f32.mrf.mxu3  ;;  %v14680_v1 = vld [vmem:[%s20655_s3 + $0x430] sm:$0xf0] }
 0x516   : > { %v2684_v19 = vpop.f32.mrf.mxu1  ;;  %v17553_v17 = vadd.f32 %v3141_v52, %v3087_v30  ;;  %v11541_v30 = vld [vmem:[%s20655_s3 + $0x4b8] sm:$0xf]  ;;  %v14699_v52 = vld [vmem:[%s20655_s3 + $0x4c8] sm:$0xf0]  ;;  %v11407_v44 = vor.u32 %v14680_v1, %v11406_v62 }
 0x517   : > { %v17556_v7 = vadd.f32 %v2684_v19, %v17380_v26  ;;  %v17559_v34 = vadd.f32 %v17476_v48, %v2600_v10  ;;  %v17564_v46 = vpop.f32.mrf.mxu0  ;;  %v11509_v10 = vld [vmem:[%s20655_s3 + $0x470] sm:$0xf]  ;;  %v14690_v26 = vld [vmem:[%s20655_s3 + $0x480] sm:$0xf0]  ;;  %v11542_v32 = vor.u32 %v14699_v52, %v11541_v30 }
 0x518   : > { %v11510_v9 = vor.u32 %v14690_v26, %v11509_v10  ;;  %v14704_v10 = vld [vmem:[%s20655_s3 + $0x4f0] sm:$0xf0]  ;;  %v11483_v26 = vld [vmem:[%s20655_s3 + $0x454] sm:$0xf0] }
 0x51c   : > { %v2547_v48 = vpop.f32.mrf.mxu2 }
 0x51d   : > { %v17581_v56 = vadd.f32 %v2601_v0, %v2547_v48  ;;  %v17583_v13 = vpop.f32.mrf.mxu3  ;;  %v14695_v48 = vld [vmem:[%s20655_s3 + $0x4a8] sm:$0xf0] }
 0x51e   : > { %v2687_v60 = vpop.f32.mrf.mxu1 }
 0x51f   : > { %20760 = vst [vmem:[#allocation31_spill] sm:$0xff] %v17581_v56  ;;  %v17586_v31 = vadd.f32 %v2687_v60, %v17398_v16  ;;  %v3146_v50 = vpop.f32.mrf.mxu0  ;;  %v11561_v16 = vld [vmem:[%s20655_s3 + $0x4e0] sm:$0xf] }
 0x520   : > { %v11562_v60 = vor.u32 %v14704_v10, %v11561_v16 }
 0x521   : > { %11416 = vmatmul.msk.bf16.gmra.mxu2 %vm1314_vm1, %v11407_v44  ;;  %3204 = vmatmul.bf16.gmra.mxu1 %v11542_v32 }
 0x522   : > { %11652 = vmatmul.msk.bf16.gmra.mxu3 %vm1314_vm1, %v11510_v9 }
 0x524   : > { %v2721_v19 = vpop.f32.mrf.mxu2 }
 0x525   : > { %v17591_v55 = vadd.f32 %v2721_v19, %v17423_v43  ;;  %v3092_v0 = vpop.f32.mrf.mxu3  ;;  %v14682_v43 = vld [vmem:[%s20655_s3 + $0x444] sm:$0xf] }
 0x526   : > { %v2689_v62 = vpop.f32.mrf.mxu1  ;;  %v17593_v1 = vadd.f32 %v3146_v50, %v3092_v0  ;;  %v11486_v9 = vor.u32 %v14682_v43, %v11483_v26  ;;  %v14709_v43 = vld [vmem:[%s20655_s3 + $0x518] sm:$0xf0]  ;;  %v14700_v26 = vld [vmem:[%s20655_s3 + $0x4d0] sm:$0xf0] }
 0x527   : > { %v17596_v30 = vadd.f32 %v2689_v62, %v17426_v59  ;;  %v17601_v52 = vpop.f32.mrf.mxu0  ;;  %v11529_v59 = vld [vmem:[%s20655_s3 + $0x498] sm:$0xf] }
 0x528   : > { %v11530_v0 = vor.u32 %v14695_v48, %v11529_v59 }
 0x52c   : > { %v2723_v44 = vpop.f32.mrf.mxu2 }
 0x52d   : > { %v17619_v32 = vadd.f32 %v2723_v44, %v17438_v36  ;;  %v17621_v50 = vpop.f32.mrf.mxu3 }
 0x52e   : > { %v2692_v19 = vpop.f32.mrf.mxu1 }
 0x52f   : > { %v17624_v62 = vadd.f32 %v2692_v19, %v17441_v27  ;;  %v3151_v56 = vpop.f32.mrf.mxu0  ;;  %v11581_v27 = vld [vmem:[%s20655_s3 + $0x508] sm:$0xf] }
 0x531   : > { %3209 = vmatmul.bf16.gmra.mxu1 %v11562_v60  ;;  %3243 = vmatmul.bf16.vlgmr.msra.gmra.mxu2 %v11486_v9  ;;  %v11582_v60 = vor.u32 %v14709_v43, %v11581_v27  ;;  %v11601_v43 = vld [vmem:[%s20655_s3 + $0x530] sm:$0xf] }
 0x532   : > { %11653 = vmatmul.msk.bf16.gmra.mxu3 %vm1314_vm1, %v11530_v0 }
 0x534   : > { %v2726_v8 = vpop.f32.mrf.mxu2 }
 0x535   : > { %v17628_v25 = vadd.f32 %v2726_v8, %v17464_v51  ;;  %v3097_v36 = vpop.f32.mrf.mxu3  ;;  %v14687_v8 = vld [vmem:[%s20655_s3 + $0x46c] sm:$0xf]  ;;  %v11503_v51 = vld [vmem:[%s20655_s3 + $0x47c] sm:$0xf0] }
 0x536   : > { %v2694_v44 = vpop.f32.mrf.mxu1  ;;  %v17630_v16 = vadd.f32 %v3151_v56, %v3097_v36  ;;  %v11506_v9 = vor.u32 %v14687_v8, %v11503_v51  ;;  %v14692_v8 = vld [vmem:[%s20655_s3 + $0x494] sm:$0xf] }
 0x537   : > { %v17633_v10 = vadd.f32 %v2694_v44, %v17467_v20  ;;  %v17647_v56 = vpop.f32.mrf.mxu0  ;;  %v11549_v20 = vld [vmem:[%s20655_s3 + $0x4c0] sm:$0xf] }
 0x538   : > { %v11550_v36 = vor.u32 %v14700_v26, %v11549_v20 }
 0x53c   : > { %v2728_v59 = vpop.f32.mrf.mxu2 }
 0x53d   : > { %v17656_v48 = vadd.f32 %v2728_v59, %v17479_v29  ;;  %v17658_v19 = vpop.f32.mrf.mxu3 }
 0x53e   : > { %v2697_v0 = vpop.f32.mrf.mxu1 }
 0x53f   : > { %v17661_v44 = vadd.f32 %v2697_v0, %v17482_v4  ;;  %v3156_v29 = vpop.f32.mrf.mxu0  ;;  %v14714_v4 = vld [vmem:[%s20655_s3 + $0x540] sm:$0xf0] }
 0x540   : > { %v11602_v26 = vor.u32 %v14714_v4, %v11601_v43  ;;  %v11621_v43 = vld [vmem:[%s20655_s3 + $0x558] sm:$0xf]  ;;  %v14697_v4 = vld [vmem:[%s20655_s3 + $0x4bc] sm:$0xf] }
 0x541   : > { %3214 = vmatmul.bf16.gmra.mxu1 %v11582_v60  ;;  %3248 = vmatmul.bf16.gmra.mxu2 %v11506_v9 }
 0x542   : > { %11654 = vmatmul.msk.bf16.gmra.mxu3 %vm1314_vm1, %v11550_v36 }
 0x544   : > { %v2731_v63 = vpop.f32.mrf.mxu2 }
 0x545   : > { %v17665_v15 = vadd.f32 %v2731_v63, %v17507_v12  ;;  %v3102_v6 = vpop.f32.mrf.mxu3  ;;  %v11523_v63 = vld [vmem:[%s20655_s3 + $0x4a4] sm:$0xf0]  ;;  %v14705_v12 = vld [vmem:[%s20655_s3 + $0x4f8] sm:$0xf0] }
 0x546   : > { %v17667_v59 = vpop.f32.mrf.mxu1  ;;  %v17669_v27 = vadd.f32 %v3156_v29, %v3102_v6  ;;  %v11569_v6 = vld [vmem:[%s20655_s3 + $0x4e8] sm:$0xf]  ;;  %v11526_v60 = vor.u32 %v14692_v8, %v11523_v63  ;;  %v14710_v8 = vld [vmem:[%s20655_s3 + $0x520] sm:$0xf0] }
 0x547   : > { %20761 = vst [vmem:[#allocation32_spill] sm:$0xff] %v17667_v59  ;;  %v11570_v36 = vor.u32 %v14705_v12, %v11569_v6 }
 0x54c   : > { %v2733_v51 = vpop.f32.mrf.mxu2 }
 0x54d   : > { %v17690_v20 = vadd.f32 %v2733_v51, %v17519_v42  ;;  %v17692_v9 = vpop.f32.mrf.mxu3 }
 0x54e   : > { %v2702_v0 = vpop.f32.mrf.mxu1 }
 0x54f   : > { %v17695_v29 = vadd.f32 %v2702_v0, %v17522_v38  ;;  %v14719_v38 = vld [vmem:[%s20655_s3 + $0x568] sm:$0xf0] }
 0x550   : > { %v11622_v12 = vor.u32 %v14719_v38, %v11621_v43  ;;  %v11641_v43 = vld [vmem:[%s20655_s3 + $0x580] sm:$0xf]  ;;  %v14702_v38 = vld [vmem:[%s20655_s3 + $0x4e4] sm:$0xf] }
 0x551   : > { %3219 = vmatmul.bf16.gmra.mxu1 %v11602_v26  ;;  %3253 = vmatmul.bf16.gmra.mxu2 %v11526_v60 }
 0x552   : > { %11655 = vmatmul.msk.bf16.gmra.mxu3 %vm1314_vm1, %v11570_v36 }
 0x554   : > { %v2736_v59 = vpop.f32.mrf.mxu2 }
 0x555   : > { %v17699_v53 = vadd.f32 %v2736_v59, %v17549_v39  ;;  %v17701_v18 = vpop.f32.mrf.mxu3  ;;  %v11543_v39 = vld [vmem:[%s20655_s3 + $0x4cc] sm:$0xf0] }
 0x556   : > { %20762 = vst [vmem:[#allocation33_spill] sm:$0xff] %v17701_v18  ;;  %v17703_v42 = vpop.f32.mrf.mxu1  ;;  %v11589_v59 = vld [vmem:[%s20655_s3 + $0x510] sm:$0xf]  ;;  %v11546_v51 = vor.u32 %v14697_v4, %v11543_v39  ;;  %v14715_v4 = vld [vmem:[%s20655_s3 + $0x548] sm:$0xf0] }
 0x557   : > { %20763 = vst [vmem:[#allocation34_spill] sm:$0xff] %v17703_v42  ;;  %v11590_v0 = vor.u32 %v14710_v8, %v11589_v59 }
 0x55c   : > { %v2738_v63 = vpop.f32.mrf.mxu2 }
 0x55d   : > { %v17724_v6 = vadd.f32 %v2738_v63, %v17556_v7  ;;  %v17726_v26 = vpop.f32.mrf.mxu3 }
 0x55e   : > { %20764 = vst [vmem:[#allocation35_spill] sm:$0xff] %v17726_v26  ;;  %v2707_v60 = vpop.f32.mrf.mxu1 }
 0x55f   : > { %v17729_v36 = vadd.f32 %v2707_v60, %v17559_v34  ;;  %v14724_v34 = vld [vmem:[%s20655_s3 + $0x590] sm:$0xf0] }
 0x560   : > { %v11642_v8 = vor.u32 %v14724_v34, %v11641_v43  ;;  %v14707_v43 = vld [vmem:[%s20655_s3 + $0x50c] sm:$0xf]  ;;  %v11583_v34 = vld [vmem:[%s20655_s3 + $0x51c] sm:$0xf0] }
 0x561   : > { %3224 = vmatmul.bf16.gmra.mxu1 %v11622_v12  ;;  %3258 = vmatmul.bf16.gmra.mxu2 %v11546_v51 }
 0x562   : > { %11656 = vmatmul.msk.bf16.gmra.mxu3 %vm1314_vm1, %v11590_v0 }
 0x564   : > { %v2741_v42 = vpop.f32.mrf.mxu2 }
 0x565   : > { %v17733_v35 = vadd.f32 %v2741_v42, %v17586_v31  ;;  %v17735_v18 = vpop.f32.mrf.mxu3  ;;  %v11563_v31 = vld [vmem:[%s20655_s3 + $0x4f4] sm:$0xf0] }
 0x566   : > { %20765 = vst [vmem:[#allocation36_spill] sm:$0xff] %v17735_v18  ;;  %v17737_v7 = vpop.f32.mrf.mxu1  ;;  %v11609_v42 = vld [vmem:[%s20655_s3 + $0x538] sm:$0xf]  ;;  %v11566_v63 = vor.u32 %v14702_v38, %v11563_v31  ;;  %v11586_v31 = vor.u32 %v14707_v43, %v11583_v34  ;;  %v11603_v43 = vld [vmem:[%s20655_s3 + $0x544] sm:$0xf0] }
 0x567   : > { %20766 = vst [vmem:[#allocation37_spill] sm:$0xff] %v17737_v7  ;;  %v11610_v60 = vor.u32 %v14715_v4, %v11609_v42 }
 0x56c   : > { %v2743_v39 = vpop.f32.mrf.mxu2 }
 0x56d   : > { %v17758_v59 = vadd.f32 %v2743_v39, %v17596_v30  ;;  %v17760_v12 = vpop.f32.mrf.mxu3 }
 0x56e   : > { %20767 = vst [vmem:[#allocation38_spill] sm:$0xff] %v17760_v12  ;;  %v3190_v51 = vpop.f32.mrf.mxu1 }
 0x56f   : > { %v3191_v0 = vadd.f32 %v3190_v51, %v17516_v5  ;;  %v11629_v5 = vld [vmem:[%s20655_s3 + $0x560] sm:$0xf] }
 0x571   : > { %3229 = vmatmul.bf16.gmra.mxu1 %v11642_v8  ;;  %3263 = vmatmul.bf16.gmra.mxu2 %v11566_v63 }
 0x572   : > { %11657 = vmatmul.msk.bf16.gmra.mxu3 %vm1314_vm1, %v11610_v60 }
 0x574   : > { %v2746_v7 = vpop.f32.mrf.mxu2 }
 0x575   : > { %v17765_v18 = vadd.f32 %v2746_v7, %v17624_v62  ;;  %v17767_v26 = vpop.f32.mrf.mxu3  ;;  %v14720_v62 = vld [vmem:[%s20655_s3 + $0x570] sm:$0xf0] }
 0x576   : > { %20769 = vst [vmem:[#allocation40_spill] sm:$0xff] %v17767_v26  ;;  %v3192_v30 = vpop.f32.mrf.mxu1  ;;  %v11630_v39 = vor.u32 %v14720_v62, %v11629_v5 }
 0x577   : > { %20768 = vst [vmem:[#allocation39_spill] sm:$0xff] %v17765_v18 }
 0x57c   : > { %v2748_v7 = vpop.f32.mrf.mxu2 }
 0x57d   : > { %v17782_v38 = vadd.f32 %v2748_v7, %v17633_v10  ;;  %v17784_v42 = vpop.f32.mrf.mxu3  ;;  %v14712_v10 = vld [vmem:[%s20655_s3 + $0x534] sm:$0xf] }
 0x57e   : > { %20771 = vst [vmem:[#allocation42_spill] sm:$0xff] %v17784_v42  ;;  %v3195_v4 = vpop.f32.mrf.mxu1  ;;  %v11606_v5 = vor.u32 %v14712_v10, %v11603_v43  ;;  %v11623_v10 = vld [vmem:[%s20655_s3 + $0x56c] sm:$0xf0] }
 0x57f   : > { %20770 = vst [vmem:[#allocation41_spill] sm:$0xff] %v17782_v38  ;;  %v3196_v8 = vadd.f32 %v3195_v4, %v17553_v17  ;;  %v11649_v17 = vld [vmem:[%s20655_s3 + $0x588] sm:$0xf]  ;;  %v20780_v38 = vmax.f32 %v16453_v61, %v16990_v3  ;;  %v3144_v61 = vadd.f32 %v17564_v46, %v17583_v13 }
 0x581   : > { %3268 = vmatmul.bf16.gmra.mxu2 %v11586_v31 }
 0x582   : > { %11658 = vmatmul.msk.bf16.gmra.mxu3 %vm1314_vm1, %v11630_v39 }
 0x584   : > { %v2751_v63 = vpop.f32.mrf.mxu2 }
 0x585   : > { %v17789_v51 = vadd.f32 %v2751_v63, %v17661_v44  ;;  %v17791_v60 = vpop.f32.mrf.mxu3  ;;  %v14725_v44 = vld [vmem:[%s20655_s3 + $0x598] sm:$0xf0] }
 0x586   : > { %20773 = vst [vmem:[#allocation44_spill] sm:$0xff] %v17791_v60  ;;  %v3197_v26 = vpop.f32.mrf.mxu1  ;;  %v11650_v31 = vor.u32 %v14725_v44, %v11649_v17 }
 0x587   : > { %20772 = vst [vmem:[#allocation43_spill] sm:$0xff] %v17789_v51 }
 0x58c   : > { %v17805_v34 = vpop.f32.mrf.mxu2 }
 0x58d   : > { %20774 = vst [vmem:[#allocation45_spill] sm:$0xff] %v17805_v34  ;;  %v17807_v62 = vpop.f32.mrf.mxu3  ;;  %v14717_v34 = vld [vmem:[%s20655_s3 + $0x55c] sm:$0xf] }
 0x58e   : > { %20775 = vst [vmem:[#allocation46_spill] sm:$0xff] %v17807_v62  ;;  %v3200_v7 = vpop.f32.mrf.mxu1  ;;  %v14722_v62 = vld [vmem:[%s20655_s3 + $0x584] sm:$0xf] }
 0x58f   : > { %v3201_v4 = vadd.f32 %v3200_v7, %v17593_v1  ;;  %v11626_v1 = vor.u32 %v14717_v34, %v11623_v10  ;;  %v11643_v34 = vld [vmem:[%s20655_s3 + $0x594] sm:$0xf0] }
 0x591   : > { %3273 = vmatmul.bf16.gmra.mxu2 %v11606_v5 }
 0x592   : > { %11659 = vmatmul.msk.bf16.gmra.mxu3 %vm1314_vm1, %v11650_v31 }
 0x594   : > { %v2756_v39 = vpop.f32.mrf.mxu2 }
 0x595   : > { %v17812_v63 = vadd.f32 %v2756_v39, %v17695_v29  ;;  %v3298_v60 = vpop.f32.mrf.mxu3 }
 0x596   : > { %v3202_v42 = vpop.f32.mrf.mxu1 }
 0x597   : > { %20776 = vst [vmem:[#allocation47_spill] sm:$0xff] %v17812_v63  ;;  %v3139_v63 = vadd.f32 %v17527_v22, %v17546_v49 }
 0x599   : > { %v3193_v12 = vadd.f32 %v3192_v30, %v3139_v63 }
 0x59c   : > { %v17820_v43 = vpop.f32.mrf.mxu2 }
 0x59d   : > { %20777 = vst [vmem:[#allocation48_spill] sm:$0xff] %v17820_v43  ;;  %v3300_v44 = vpop.f32.mrf.mxu3 }
 0x59e   : > { %v3205_v17 = vpop.f32.mrf.mxu1 }
 0x59f   : > { %v17823_v5 = vadd.f32 %v3205_v17, %v17630_v16  ;;  %v11646_v16 = vor.u32 %v14722_v62, %v11643_v34 }
 0x5a1   : > { %3278 = vmatmul.bf16.gmra.mxu2 %v11626_v1 }
 0x5a4   : > { %v2761_v29 = vpop.f32.mrf.mxu2 }
 0x5a5   : > { %v17826_v7 = vadd.f32 %v2761_v29, %v17729_v36  ;;  %v3303_v39 = vpop.f32.mrf.mxu3 }
 0x5a6   : > { %v17828_v31 = vpop.f32.mrf.mxu1 }
 0x5a7   : > { %20778 = vst [vmem:[#allocation49_spill] sm:$0xff] %v17826_v7 }
 0x5ac   : > { %v17836_v10 = vpop.f32.mrf.mxu2 }
 0x5ad   : > { %20779 = vst [vmem:[#allocation50_spill] sm:$0xff] %v17836_v10  ;;  %v3305_v36 = vpop.f32.mrf.mxu3 }
 0x5ae   : > { %v3210_v17 = vpop.f32.mrf.mxu1 }
 0x5af   : > { %v17839_v1 = vadd.f32 %v3210_v17, %v17669_v27 }
 0x5b1   : > { %3283 = vmatmul.bf16.gmra.mxu2 %v11646_v16 }
 0x5b4   : > { %v3244_v29 = vpop.f32.mrf.mxu2 }
 0x5b5   : > { %v3245_v7 = vadd.f32 %v3244_v29, %v3191_v0  ;;  %v3308_v34 = vpop.f32.mrf.mxu3  ;;  %v20781_v0 = vmax.f32 %v16480_v37, %v17008_v33 }
 0x5b7   : > { %v3299_v43 = vadd.f32 %v3298_v60, %v3245_v7 }
 0x5b9   : > { %v3361_v51 = vmax.f32 %v17591_v55, %v3299_v43  ;;  %v20783_v43 = vmax.f32 %v16520_v40, %v17055_v58 }
 0x5bb   : > { %v3379_v10 = vmax.f32 %v20780_v38, %v3361_v51 }
 0x5bc   : > { %v3246_v62 = vpop.f32.mrf.mxu2 }
 0x5bd   : > { %v3247_v18 = vadd.f32 %v3246_v62, %v3193_v12  ;;  %v3397_v17 = vmax.f32 %v3379_v10, 0.0  ;;  %v3310_v55 = vpop.f32.mrf.mxu3 }
 0x5bf   : > { %v3301_v27 = vadd.f32 %v3300_v44, %v3247_v18  ;;  %v3198_v18 = vadd.f32 %v3197_v26, %v3144_v61 }
 0x5c1   : > { %v3362_v16 = vmax.f32 %v17619_v32, %v3301_v27  ;;  %v20782_v32 = vmax.f32 %v16493_v11, %v17037_v28  ;;  %v3149_v11 = vadd.f32 %v17601_v52, %v17621_v50 }
 0x5c3   : > { %v3380_v60 = vmax.f32 %v20781_v0, %v3362_v16  ;;  %v3203_v29 = vadd.f32 %v3202_v42, %v3149_v11  ;;  %v3158_v42 = vpop.f32.mrf.mxu0 }
 0x5c4   : > { %v3249_v7 = vpop.f32.mrf.mxu2 }
 0x5c5   : > { %v3398_v22 = vmax.f32 %v3380_v60, 0.0  ;;  %v3250_v49 = vadd.f32 %v3249_v7, %v3196_v8  ;;  %v3313_v51 = vpop.f32.mrf.mxu3 }
 0x5c7   : > { %v17851_v30 = vpack.c.bf16 %v3398_v22, %v3397_v17  ;;  %v3304_v63 = vadd.f32 %v3303_v39, %v3250_v49  ;;  %v3154_v17 = vadd.f32 %v17647_v56, %v17658_v19 }
 0x5c9   : > { %v3363_v3 = vmax.f32 %v17628_v25, %v3304_v63  ;;  %v3208_v22 = vadd.f32 %v17828_v31, %v3154_v17 }
 0x5cb   : > { %v3381_v12 = vmax.f32 %v20782_v32, %v3363_v3  ;;  %v3161_v61 = vpop.f32.mrf.mxu0  ;;  %v20787_v32 = vmax.f32 %v16593_v47, %v17157_v2 }
 0x5cc   : > { %v3251_v37 = vpop.f32.mrf.mxu2 }
 0x5cd   : > { %v3252_v33 = vadd.f32 %v3251_v37, %v3198_v18  ;;  %v3399_v10 = vmax.f32 %v3381_v12, 0.0 }
 0x5cf   : > { %v3306_v38 = vadd.f32 %v3305_v36, %v3252_v33  ;;  %v3315_v36 = vpop.f32.mrf.mxu3  ;;  %v3159_v33 = vadd.f32 %v3158_v42, %v17692_v9  ;;  %v14740_v9 = vld [vmem:[%s20657_s5 + $0x30] sm:$0xff]  ;;  %v20796_v42 = vld [vmem:[#allocation8_spill] sm:$0xff] }
 0x5d1   : > { %v3364_v8 = vmax.f32 %v17656_v48, %v3306_v38  ;;  %v20784_v48 = vmax.f32 %v16532_v41, %v17085_v57  ;;  %v3212_v57 = vpop.f32.mrf.mxu1 }
 0x5d3   : > { %v3382_v44 = vmax.f32 %v20783_v43, %v3364_v8  ;;  %v20788_v8 = vmax.f32 %v20738_v24, %v17187_v23  ;;  %v20790_v24 = vld [vmem:[#allocation17_spill] sm:$0xff] }
 0x5d4   : > { %v3254_v39 = vpop.f32.mrf.mxu2 }
 0x5d5   : > { %v3400_v46 = vmax.f32 %v3382_v44, 0.0  ;;  %v3255_v13 = vadd.f32 %v3254_v39, %v3201_v4  ;;  %v20785_v4 = vmax.f32 %v16557_v14, %v17105_v21  ;;  %v20786_v14 = vmax.f32 %v16568_v54, %v17137_v45 }
 0x5d7   : > { %v17863_v25 = vpack.c.bf16 %v3400_v46, %v3399_v10  ;;  %v3309_v26 = vadd.f32 %v3308_v34, %v3255_v13  ;;  %v3318_v60 = vpop.f32.mrf.mxu3 }
 0x5d9   : > { %v3365_v28 = vmax.f32 %v17665_v15, %v3309_v26  ;;  %v3215_v18 = vpop.f32.mrf.mxu1  ;;  %v20791_v26 = vld [vmem:[#allocation9_spill] sm:$0xff] }
 0x5da   : > { %v20792_v11 = vmax.f32 %v20790_v24, %v20791_v26  ;;  %v20808_v24 = vld [vmem:[#allocation21_spill] sm:$0xff] }
 0x5db   : > { %v3383_v62 = vmax.f32 %v20784_v48, %v3365_v28  ;;  %v14739_v48 = vld [vmem:[%s20657_s5 + $0x28] sm:$0xff] }
 0x5dc   : > { %v3256_v40 = vpop.f32.mrf.mxu2 }
 0x5dd   : > { %v3257_v58 = vadd.f32 %v3256_v40, %v3203_v29  ;;  %v3401_v52 = vmax.f32 %v3383_v62, 0.0 }
 0x5df   : > { %v3311_v27 = vadd.f32 %v3310_v55, %v3257_v58  ;;  %v3320_v63 = vpop.f32.mrf.mxu3 }
 0x5e1   : > { %v3366_v16 = vmax.f32 %v17690_v20, %v3311_v27  ;;  %v3217_v2 = vpop.f32.mrf.mxu1 }
 0x5e3   : > { %v3384_v34 = vmax.f32 %v20785_v4, %v3366_v16  ;;  %v14738_v4 = vld [vmem:[%s20657_s5 + $0x20] sm:$0xff] }
 0x5e4   : > { %v3259_v0 = vpop.f32.mrf.mxu2 }
 0x5e5   : > { %v3402_v50 = vmax.f32 %v3384_v34, 0.0  ;;  %v3260_v15 = vadd.f32 %v3259_v0, %v17823_v5  ;;  %v20793_v34 = vld [vmem:[#allocation35_spill] sm:$0xff] }
 0x5e7   : > { %v17876_v7 = vpack.c.bf16 %v3402_v50, %v3401_v52  ;;  %v3314_v41 = vadd.f32 %v3313_v51, %v3260_v15  ;;  %v3323_v45 = vpop.f32.mrf.mxu3  ;;  %v3163_v51 = vpop.f32.mrf.mxu0  ;;  %v20795_v15 = vld [vmem:[#allocation18_spill] sm:$0xff] }
 0x5e8   : > { %v3164_v0 = vadd.f32 %v3163_v51, %v20793_v34 }
 0x5e9   : > { %v3367_v20 = vmax.f32 %v17699_v53, %v3314_v41  ;;  %v3220_v27 = vpop.f32.mrf.mxu1  ;;  %v20797_v41 = vmax.f32 %v20795_v15, %v20796_v42 }
 0x5ea   : > { %v3218_v50 = vadd.f32 %v3217_v2, %v3164_v0  ;;  %v14734_v2 = vld [vmem:[%s20657_s5] sm:$0xff] }
 0x5eb   : > { %v3385_v21 = vmax.f32 %v20786_v14, %v3367_v20 }
 0x5ec   : > { %v3261_v49 = vpop.f32.mrf.mxu2 }
 0x5ed   : > { %v3262_v55 = vadd.f32 %v3261_v49, %v3208_v22  ;;  %v3403_v53 = vmax.f32 %v3385_v21, 0.0  ;;  %v14737_v22 = vld [vmem:[%s20657_s5 + $0x18] sm:$0xff] }
 0x5ef   : > { %v3316_v5 = vadd.f32 %v3315_v36, %v3262_v55  ;;  %v3325_v13 = vpop.f32.mrf.mxu3  ;;  %v3166_v36 = vpop.f32.mrf.mxu0 }
 0x5f1   : > { %v3368_v3 = vmax.f32 %v17724_v6, %v3316_v5  ;;  %v3213_v6 = vadd.f32 %v3212_v57, %v3159_v33  ;;  %v3222_v55 = vpop.f32.mrf.mxu1  ;;  %v20798_v5 = vld [vmem:[#allocation36_spill] sm:$0xff] }
 0x5f3   : > { %v3386_v56 = vmax.f32 %v20787_v32, %v3368_v3  ;;  %v20799_v3 = vld [vmem:[#allocation41_spill] sm:$0xff] }
 0x5f4   : > { %v3264_v19 = vpop.f32.mrf.mxu2 }
 0x5f5   : > { %v3404_v12 = vmax.f32 %v3386_v56, 0.0  ;;  %v3265_v31 = vadd.f32 %v3264_v19, %v17839_v1  ;;  %v14741_v1 = vld [vmem:[%s20657_s5 + $0x38] sm:$0xff]  ;;  %v20800_v56 = vld [vmem:[#allocation20_spill] sm:$0xff] }
 0x5f6   : > { %3612 = vmatpush.bf16.msrb.mxu2 %v14741_v1  ;;  %v20801_v19 = vld [vmem:[#allocation19_spill] sm:$0xff] }
 0x5f7   : > { %v17890_v37 = vpack.c.bf16 %v3404_v12, %v3403_v53  ;;  %v3319_v54 = vadd.f32 %v3318_v60, %v3265_v31  ;;  %v20794_v60 = vld [vmem:[#allocation39_spill] sm:$0xff]  ;;  %v3328_v20 = vpop.f32.mrf.mxu3  ;;  %v3168_v21 = vpop.f32.mrf.mxu0  ;;  %v20802_v53 = vmax.f32 %v20800_v56, %v20801_v19  ;;  %v20820_v19 = vld [vmem:[#allocation14_spill] sm:$0xff] }
 0x5f9   : > { %v3369_v38 = vmax.f32 %v17733_v35, %v3319_v54  ;;  %v20789_v35 = vld [vmem:[#allocation33_spill] sm:$0xff] }
 0x5fa   : > { %v3162_v10 = vadd.f32 %v3161_v61, %v20789_v35  ;;  %3613 = vmatpush.bf16.msrb.mxu2 %v14740_v9  ;;  %v3167_v61 = vadd.f32 %v3166_v36, %v20798_v5  ;;  %v14735_v54 = vld [vmem:[%s20657_s5 + $0x8] sm:$0xff]  ;;  %v3225_v9 = vpop.f32.mrf.mxu1 }
 0x5fb   : > { %v3387_v47 = vmax.f32 %v20788_v8, %v3369_v38  ;;  %v20805_v35 = vld [vmem:[#allocation29_spill] sm:$0xff]  ;;  %v20810_v36 = vld [vmem:[#allocation32_spill] sm:$0xff] }
 0x5fc   : > { %v3266_v43 = vpop.f32.mrf.mxu2  ;;  %v3216_v23 = vadd.f32 %v3215_v18, %v3162_v10  ;;  %v3221_v32 = vadd.f32 %v3220_v27, %v3167_v61  ;;  %v20806_v10 = vld [vmem:[#allocation26_spill] sm:$0xff] }
 0x5fd   : > { %v3267_v44 = vadd.f32 %v3266_v43, %v3213_v6  ;;  %v3405_v62 = vmax.f32 %v3387_v47, 0.0  ;;  %v20803_v43 = vld [vmem:[#allocation38_spill] sm:$0xff] }
 0x5fe   : > { %3614 = vmatpush.bf16.msrb.mxu2 %v14739_v48  ;;  %v3169_v1 = vadd.f32 %v3168_v21, %v20803_v43 }
 0x5ff   : > { %v3321_v39 = vadd.f32 %v3320_v63, %v3267_v44  ;;  %v14736_v63 = vld [vmem:[%s20657_s5 + $0x10] sm:$0xff]  ;;  %v3330_v51 = vpop.f32.mrf.mxu3  ;;  %v3171_v47 = vpop.f32.mrf.mxu0  ;;  %v20804_v44 = vld [vmem:[#allocation43_spill] sm:$0xff] }
 0x601   : > { %v3370_v46 = vmax.f32 %v17758_v59, %v3321_v39 }
 0x602   : > { %3615 = vmatpush.bf16.msrb.mxu2 %v14738_v4 }
 0x603   : > { %v3388_v28 = vmax.f32 %v20792_v11, %v3370_v46  ;;  %v2646_v46 = vadd.f32 %v20806_v10, %v20805_v35  ;;  %v20826_v10 = vld [vmem:[#allocation15_spill] sm:$0xff] }
 0x604   : > { %v3269_v29 = vpop.f32.mrf.mxu2 }
 0x605   : > { %v3406_v40 = vmax.f32 %v3388_v28, 0.0  ;;  %v3270_v58 = vadd.f32 %v3269_v29, %v3216_v23  ;;  %v20807_v23 = vld [vmem:[#allocation12_spill] sm:$0xff]  ;;  %v2700_v29 = vadd.f32 %v20810_v36, %v2646_v46  ;;  %v20827_v46 = vld [vmem:[#allocation23_spill] sm:$0xff] }
 0x606   : > { %3616 = vmatpush.bf16.msrb.mxu2 %v14737_v22  ;;  %v20809_v26 = vmax.f32 %v20807_v23, %v20808_v24 }
 0x607   : > { %v17911_v16 = vpack.c.bf16 %v3406_v40, %v3405_v62  ;;  %v3324_v59 = vadd.f32 %v3323_v45, %v3270_v58  ;;  %v20811_v62 = vld [vmem:[#allocation45_spill] sm:$0xff]  ;;  %v3333_v27 = vpop.f32.mrf.mxu3  ;;  %v3173_v0 = vpop.f32.mrf.mxu0 }
 0x608   : > { %v2754_v40 = vadd.f32 %v20811_v62, %v2700_v29 }
 0x609   : > { %v3371_v52 = vmax.f32 %v20794_v60, %v3324_v59  ;;  %v20812_v59 = vld [vmem:[#allocation40_spill] sm:$0xff] }
 0x60a   : > { %3617 = vmatpush.bf16.msrb.mxu2 %v14736_v63  ;;  %v3172_v4 = vadd.f32 %v3171_v47, %v20812_v59  ;;  %v20817_v63 = vld [vmem:[#allocation47_spill] sm:$0xff]  ;;  %v20824_v47 = vld [vmem:[#allocation48_spill] sm:$0xff] }
 0x60b   : > { %v3389_v57 = vmax.f32 %v20797_v41, %v3371_v52  ;;  %v20813_v52 = vld [vmem:[#allocation13_spill] sm:$0xff]  ;;  %v3227_v41 = vpop.f32.mrf.mxu1 }
 0x60c   : > { %v3271_v17 = vpop.f32.mrf.mxu2  ;;  %v3226_v60 = vadd.f32 %v3225_v9, %v3172_v4  ;;  %v20831_v4 = vld [vmem:[#allocation31_spill] sm:$0xff] }
 0x60d   : > { %v3272_v14 = vadd.f32 %v3271_v17, %v3218_v50  ;;  %v3407_v45 = vmax.f32 %v3389_v57, 0.0  ;;  %v20814_v50 = vld [vmem:[#allocation16_spill] sm:$0xff] }
 0x60e   : > { %3618 = vmatpush.bf16.msrb.mxu2 %v14735_v54  ;;  %v20815_v15 = vmax.f32 %v20813_v52, %v20814_v50  ;;  %v20833_v52 = vld [vmem:[#allocation11_spill] sm:$0xff]  ;;  %v20834_v50 = vld [vmem:[#allocation24_spill] sm:$0xff] }
 0x60f   : > { %v3326_v49 = vadd.f32 %v3325_v13, %v3272_v14  ;;  %v3223_v13 = vadd.f32 %v3222_v55, %v3169_v1  ;;  %v3335_v61 = vpop.f32.mrf.mxu3  ;;  %v3176_v54 = vpop.f32.mrf.mxu0  ;;  %v20825_v1 = vld [vmem:[#allocation44_spill] sm:$0xff] }
 0x611   : > { %v3372_v18 = vmax.f32 %v20799_v3, %v3326_v49  ;;  %v20816_v49 = vld [vmem:[#allocation42_spill] sm:$0xff] }
 0x612   : > { %3619 = vmatpush.bf16.msrb.mxu2 %v14734_v2  ;;  %v3174_v55 = vadd.f32 %v3173_v0, %v20816_v49  ;;  %v20818_v3 = vld [vmem:[#allocation30_spill] sm:$0xff] }
 0x613   : > { %v3390_v12 = vmax.f32 %v20802_v53, %v3372_v18  ;;  %v20819_v18 = vld [vmem:[#allocation27_spill] sm:$0xff]  ;;  %v20821_v53 = vld [vmem:[#allocation22_spill] sm:$0xff] }
 0x614   : > { %v3274_v31 = vpop.f32.mrf.mxu2  ;;  %v3228_v56 = vadd.f32 %v3227_v41, %v3174_v55 }
 0x615   : > { %v3408_v33 = vmax.f32 %v3390_v12, 0.0  ;;  %v3275_v38 = vadd.f32 %v3274_v31, %v3221_v32  ;;  %v2651_v32 = vadd.f32 %v20819_v18, %v20818_v3  ;;  %v20822_v12 = vmax.f32 %v20820_v19, %v20821_v53  ;;  %v14726_v19 = vld [vmem:[%s20656_s4 + $0x4] sm:$0xf]  ;;  %v11664_v53 = vld [vmem:[%s20656_s4 + $0x8] sm:$0xf0] }
 0x617   : > { %v17935_v6 = vpack.c.bf16 %v3408_v33, %v3407_v45  ;;  %v3329_v8 = vadd.f32 %v3328_v20, %v3275_v38  ;;  %v20823_v33 = vld [vmem:[#allocation34_spill] sm:$0xff]  ;;  %v3338_v9 = vpop.f32.mrf.mxu3  ;;  %v3178_v36 = vpop.f32.mrf.mxu0 }
 0x618   : > { %v2705_v38 = vadd.f32 %v20823_v33, %v2651_v32  ;;  %v14755_v33 = vld [vmem:[%s20657_s5 + $0x68] sm:$0xff] }
 0x619   : > { %v3373_v39 = vmax.f32 %v20804_v44, %v3329_v8  ;;  %v3230_v8 = vpop.f32.mrf.mxu1  ;;  %v3177_v44 = vadd.f32 %v3176_v54, %v20825_v1  ;;  %v11667_v54 = vor.u32 %v14726_v19, %v11664_v53  ;;  %v14733_v19 = vld [vmem:[%s20656_s4 + $0x34] sm:$0xf0]  ;;  %v11762_v53 = vld [vmem:[%s20656_s4 + $0x70] sm:$0xf] }
 0x61a   : > { %v2759_v2 = vadd.f32 %v20824_v47, %v2705_v38  ;;  %v11662_v38 = vld [vmem:[%s20656_s4] sm:$0xf]  ;;  %v14743_v47 = vld [vmem:[%s20656_s4 + $0x44] sm:$0xf0] }
 0x61b   : > { %v3391_v11 = vmax.f32 %v20809_v26, %v3373_v39  ;;  %v3231_v35 = vadd.f32 %v3230_v8, %v3177_v44  ;;  %v11738_v8 = vld [vmem:[%s20656_s4 + $0x40] sm:$0xf]  ;;  %v14728_v44 = vld [vmem:[%s20656_s4 + $0x14] sm:$0xf] }
 0x61c   : > { %v3276_v28 = vpop.f32.mrf.mxu2  ;;  %v11739_v1 = vor.u32 %v14743_v47, %v11738_v8  ;;  %v11832_v8 = vld [vmem:[%s20656_s4 + $0x88] sm:$0xf0] }
 0x61d   : > { %v3277_v48 = vadd.f32 %v3276_v28, %v3223_v13  ;;  %v3409_v17 = vmax.f32 %v3391_v11, 0.0  ;;  %v20828_v13 = vmax.f32 %v20826_v10, %v20827_v46  ;;  %v14773_v10 = vld [vmem:[%s20657_s5 + $0xb8] sm:$0xff]  ;;  %v14752_v46 = vld [vmem:[%s20657_s5 + $0x50] sm:$0xff] }
 0x61f   : > { %v3331_v58 = vadd.f32 %v3330_v51, %v3277_v48  ;;  %v3340_v41 = vpop.f32.mrf.mxu3 }
 0x621   : > { %v3374_v34 = vmax.f32 %v2754_v40, %v3331_v58  ;;  %v3232_v62 = vpop.f32.mrf.mxu1  ;;  %v20829_v40 = vld [vmem:[#allocation46_spill] sm:$0xff] }
 0x622   : > { %v3179_v58 = vadd.f32 %v3178_v36, %v20829_v40  ;;  %v14729_v36 = vld [vmem:[%s20656_s4 + $0x14] sm:$0xf0]  ;;  %v14750_v40 = vld [vmem:[%s20657_s5 + $0x40] sm:$0xff] }
 0x623   : > { %v3392_v42 = vmax.f32 %v20815_v15, %v3374_v34  ;;  %v20832_v34 = vld [vmem:[#allocation28_spill] sm:$0xff]  ;;  %v20835_v15 = vmax.f32 %v20833_v52, %v20834_v50  ;;  %v14769_v50 = vld [vmem:[%s20657_s5 + $0x98] sm:$0xff] }
 0x624   : > { %v3279_v57 = vpop.f32.mrf.mxu2  ;;  %v2656_v0 = vadd.f32 %v20832_v34, %v20831_v4  ;;  %v14730_v34 = vld [vmem:[%s20656_s4 + $0x24] sm:$0xf] }
 0x625   : > { %v3410_v20 = vmax.f32 %v3392_v42, 0.0  ;;  %v3280_v22 = vadd.f32 %v3279_v57, %v3226_v60  ;;  %v3233_v60 = vadd.f32 %v3232_v62, %v3179_v58  ;;  %v14745_v62 = vld [vmem:[%s20656_s4 + $0x54] sm:$0xf0]  ;;  %v14787_v58 = vld [vmem:[%s20657_s5 + $0xe8] sm:$0xff] }
 0x627   : > { %v17953_v14 = vpack.c.bf16 %v3410_v20, %v3409_v17  ;;  %v3334_v21 = vadd.f32 %v3333_v27, %v3280_v22  ;;  %v20830_v27 = vld [vmem:[#allocation49_spill] sm:$0xff] }
 0x628   : > { %v20836_v17 = vld [vmem:[#allocation37_spill] sm:$0xff] }
 0x629   : > { %v3375_v5 = vmax.f32 %v20817_v63, %v3334_v21  ;;  %v2710_v20 = vadd.f32 %v20836_v17, %v2656_v0  ;;  %v20837_v21 = vld [vmem:[#allocation50_spill] sm:$0xff]  ;;  %v11680_v0 = vld [vmem:[%s20656_s4 + $0x28] sm:$0xf0]  ;;  %v11678_v17 = vld [vmem:[%s20656_s4 + $0x20] sm:$0xf] }
 0x62a   : > { %v11683_v52 = vor.u32 %v14730_v34, %v11680_v0 }
 0x62b   : > { %v3393_v31 = vmax.f32 %v20822_v12, %v3375_v5  ;;  %v2764_v49 = vadd.f32 %v20837_v21, %v2710_v20  ;;  %v20838_v5 = vld [vmem:[#allocation10_spill] sm:$0xff]  ;;  %v14731_v20 = vld [vmem:[%s20656_s4 + $0x24] sm:$0xf0] }
 0x62c   : > { %v3281_v45 = vpop.f32.mrf.mxu2  ;;  %v14747_v21 = vld [vmem:[%s20656_s4 + $0x64] sm:$0xf0] }
 0x62d   : > { %v3282_v51 = vadd.f32 %v3281_v45, %v3228_v56  ;;  %v3411_v26 = vmax.f32 %v3393_v31, 0.0  ;;  %v14757_v31 = vld [vmem:[%s20657_s5 + $0x78] sm:$0xff]  ;;  %v14756_v45 = vld [vmem:[%s20657_s5 + $0x70] sm:$0xff] }
 0x62f   : > { %v3336_v43 = vadd.f32 %v3335_v61, %v3282_v51  ;;  %v20839_v61 = vld [vmem:[#allocation25_spill] sm:$0xff] }
 0x630   : > { %v20840_v3 = vmax.f32 %v20838_v5, %v20839_v61  ;;  %v14727_v51 = vld [vmem:[%s20656_s4 + $0x4] sm:$0xf0]  ;;  %v14732_v61 = vld [vmem:[%s20656_s4 + $0x34] sm:$0xf] }
 0x631   : > { %v3376_v39 = vmax.f32 %v2759_v2, %v3336_v43  ;;  %v14754_v2 = vld [vmem:[%s20657_s5 + $0x60] sm:$0xff]  ;;  %v11663_v43 = vor.u32 %v14727_v51, %v11662_v38  ;;  %v11740_v38 = vld [vmem:[%s20656_s4 + $0x48] sm:$0xf0] }
 0x632   : > { %v14758_v51 = vld [vmem:[%s20656_s4 + $0x84] sm:$0xf] }
 0x633   : > { %v3394_v23 = vmax.f32 %v20828_v13, %v3376_v39  ;;  %v11672_v39 = vld [vmem:[%s20656_s4 + $0x18] sm:$0xf0] }
 0x634   : > { %v3284_v24 = vpop.f32.mrf.mxu2  ;;  %v14789_v13 = vld [vmem:[%s20657_s5 + $0xf8] sm:$0xff] }
 0x635   : > { %v3412_v11 = vmax.f32 %v3394_v23, 0.0  ;;  %v3285_v28 = vadd.f32 %v3284_v24, %v3231_v35  ;;  %v11675_v35 = vor.u32 %v14728_v44, %v11672_v39  ;;  %v14772_v23 = vld [vmem:[%s20657_s5 + $0xb0] sm:$0xff]  ;;  %v14751_v24 = vld [vmem:[%s20657_s5 + $0x48] sm:$0xff]  ;;  %v14746_v39 = vld [vmem:[%s20656_s4 + $0x64] sm:$0xf] }
 0x637   : > { %v17968_v29 = vpack.c.bf16 %v3412_v11, %v3411_v26  ;;  %v3339_v48 = vadd.f32 %v3338_v9, %v3285_v28  ;;  %v14753_v9 = vld [vmem:[%s20657_s5 + $0x58] sm:$0xff]  ;;  %v14788_v26 = vld [vmem:[%s20657_s5 + $0xf0] sm:$0xff]  ;;  %v14771_v11 = vld [vmem:[%s20657_s5 + $0xa8] sm:$0xff] }
 0x638   : > { %v11670_v28 = vld [vmem:[%s20656_s4 + $0x10] sm:$0xf] }
 0x639   : > { %v3377_v59 = vmax.f32 %v20830_v27, %v3339_v48  ;;  %3486 = vmatpush.bf16.msrb.mxu0 %v17968_v29  ;;  %3706 = vmatpush.bf16.msra.mxu3 %v17968_v29  ;;  %v11746_v48 = vld [vmem:[%s20656_s4 + $0x50] sm:$0xf]  ;;  %v11671_v27 = vor.u32 %v14729_v36, %v11670_v28 }
 0x63a   : > { %3927 = vmatpush.bf16.msra.mxu2 %v17968_v29  ;;  %v11747_v4 = vor.u32 %v14745_v62, %v11746_v48 }
 0x63b   : > { %v3395_v42 = vmax.f32 %v20835_v15, %v3377_v59  ;;  %v14770_v59 = vld [vmem:[%s20657_s5 + $0xa0] sm:$0xff]  ;;  %v14785_v15 = vld [vmem:[%s20657_s5 + $0xd8] sm:$0xff] }
 0x63c   : > { %v3286_v57 = vpop.f32.mrf.mxu2 }
 0x63d   : > { %v3287_v22 = vadd.f32 %v3286_v57, %v3233_v60  ;;  %3487 = vmatpush.bf16.msrb.mxu0 %v17953_v14  ;;  %3707 = vmatpush.bf16.msra.mxu3 %v17953_v14  ;;  %v3413_v32 = vmax.f32 %v3395_v42, 0.0  ;;  %v14786_v60 = vld [vmem:[%s20657_s5 + $0xe0] sm:$0xff]  ;;  %v14768_v42 = vld [vmem:[%s20657_s5 + $0x90] sm:$0xff]  ;;  %v14767_v57 = vld [vmem:[%s20657_s5 + $0x88] sm:$0xff] }
 0x63e   : > { %3928 = vmatpush.bf16.msra.mxu2 %v17953_v14 }
 0x63f   : > { %v3341_v55 = vadd.f32 %v3340_v41, %v3287_v22  ;;  %v14784_v41 = vld [vmem:[%s20657_s5 + $0xd0] sm:$0xff]  ;;  %v11754_v22 = vld [vmem:[%s20656_s4 + $0x60] sm:$0xf] }
 0x640   : > { %v11755_v5 = vor.u32 %v14747_v21, %v11754_v22  ;;  %v14760_v22 = vld [vmem:[%s20656_s4 + $0x94] sm:$0xf]  ;;  %v11840_v21 = vld [vmem:[%s20656_s4 + $0x98] sm:$0xf0] }
 0x641   : > { %v3378_v63 = vmax.f32 %v2764_v49, %v3341_v55  ;;  %3488 = vmatpush.bf16.msrb.mxu0 %v17935_v6  ;;  %3708 = vmatpush.bf16.msra.mxu3 %v17935_v6  ;;  %v14783_v49 = vld [vmem:[%s20657_s5 + $0xc8] sm:$0xff]  ;;  %v14766_v55 = vld [vmem:[%s20657_s5 + $0x80] sm:$0xff] }
 0x642   : > { %3929 = vmatpush.bf16.msra.mxu2 %v17935_v6 }
 0x643   : > { %v3396_v18 = vmax.f32 %v20840_v3, %v3378_v63  ;;  %v11679_v63 = vor.u32 %v14731_v20, %v11678_v17  ;;  %v11688_v3 = vld [vmem:[%s20656_s4 + $0x38] sm:$0xf0] }
 0x645   : > { %v3414_v56 = vmax.f32 %v3396_v18, 0.0  ;;  %3489 = vmatpush.bf16.msrb.mxu0 %v17911_v16  ;;  %3709 = vmatpush.bf16.msra.mxu3 %v17911_v16  ;;  %v14782_v18 = vld [vmem:[%s20657_s5 + $0xc0] sm:$0xff] }
 0x646   : > { %3930 = vmatpush.bf16.msra.mxu2 %v17911_v16 }
 0x647   : > { %v18000_v12 = vpack.c.bf16 %v3414_v56, %v3413_v32  ;;  %v11691_v32 = vor.u32 %v14732_v61, %v11688_v3  ;;  %v11686_v56 = vld [vmem:[%s20656_s4 + $0x30] sm:$0xf] }
 0x649   : > { %3490 = vmatpush.bf16.msrb.mxu0 %v17890_v37  ;;  %3522 = vmatpush.bf16.msra.mxu1 %v18000_v12 }
 0x64a   : > { %3710 = vmatpush.bf16.msra.mxu3 %v17890_v37  ;;  %3931 = vmatpush.bf16.msra.mxu2 %v17890_v37 }
 0x64c   : > { %11692 = vmatmul.msk.bf16.vlgmr.msra.gmra.mxu1 %vm3473_vm2, %v11667_v54  ;;  %v11687_v54 = vor.u32 %v14733_v19, %v11686_v56  ;;  %v14762_v19 = vld [vmem:[%s20656_s4 + $0xa4] sm:$0xf] }
 0x64d   : > { %3833 = vmatpush.bf16.msrb.mxu1 %v14757_v31  ;;  %3491 = vmatpush.bf16.msrb.mxu0 %v17876_v7  ;;  %v14749_v31 = vld [vmem:[%s20656_s4 + $0x74] sm:$0xf0] }
 0x64e   : > { %3711 = vmatpush.bf16.msra.mxu3 %v17876_v7  ;;  %3932 = vmatpush.bf16.msra.mxu2 %v17876_v7 }
 0x651   : > { %3834 = vmatpush.bf16.msrb.mxu1 %v14756_v45  ;;  %3492 = vmatpush.bf16.msrb.mxu0 %v17863_v25  ;;  %v11763_v45 = vor.u32 %v14749_v31, %v11762_v53  ;;  %v11848_v53 = vld [vmem:[%s20656_s4 + $0xa8] sm:$0xf0] }
 0x652   : > { %3712 = vmatpush.bf16.msra.mxu3 %v17863_v25  ;;  %3933 = vmatpush.bf16.msra.mxu2 %v17863_v25  ;;  %v11851_v31 = vor.u32 %v14762_v19, %v11848_v53 }
 0x655   : > { %3835 = vmatpush.bf16.msrb.mxu1 %v14755_v33  ;;  %3493 = vmatpush.bf16.msrb.mxu0 %v17851_v30  ;;  %v14742_v33 = vld [vmem:[%s20656_s4 + $0x44] sm:$0xf] }
 0x656   : > { %3713 = vmatpush.bf16.msra.mxu3 %v17851_v30  ;;  %3934 = vmatpush.bf16.msra.mxu2 %v17851_v30  ;;  %v11743_v47 = vor.u32 %v14742_v33, %v11740_v38 }
 0x658   : > { %3494 = vmatmul.bf16.vlgmr.msrb.gmra.mxu0 %v11663_v43  ;;  %v14744_v43 = vld [vmem:[%s20656_s4 + $0x54] sm:$0xf] }
 0x659   : > { %3742 = vmatpush.bf16.msra.mxu0 %v18000_v12  ;;  %3836 = vmatpush.bf16.msrb.mxu1 %v14754_v2  ;;  %v11835_v2 = vor.u32 %v14758_v51, %v11832_v8 }
 0x65a   : > { %3963 = vmatpush.bf16.msrb.mxu3 %v18000_v12 }
 0x65b   : > { %3714 = vmatmul.bf16.vlgmr.msra.gmra.mxu3 %v11739_v1  ;;  %v11748_v1 = vld [vmem:[%s20656_s4 + $0x58] sm:$0xf0] }
 0x65c   : > { %11693 = vmatmul.msk.bf16.gmra.mxu1 %vm3473_vm2, %v11675_v35  ;;  %v11751_v44 = vor.u32 %v14744_v43, %v11748_v1  ;;  %v14805_v1 = vld [vmem:[%s20657_s5 + $0x138] sm:$0xff] }
 0x65d   : > { %3837 = vmatpush.bf16.msrb.mxu1 %v14753_v9  ;;  %4054 = vmatpush.bf16.msrb.mxu0 %v14773_v10  ;;  %v11756_v9 = vld [vmem:[%s20656_s4 + $0x68] sm:$0xf0]  ;;  %v14748_v10 = vld [vmem:[%s20656_s4 + $0x74] sm:$0xf] }
 0x65e   : > { %4275 = vmatpush.bf16.msra.mxu3 %v14789_v13  ;;  %v11759_v35 = vor.u32 %v14746_v39, %v11756_v9  ;;  %v14764_v39 = vld [vmem:[%s20656_s4 + $0xb4] sm:$0xf]  ;;  %v11856_v9 = vld [vmem:[%s20656_s4 + $0xb8] sm:$0xf0] }
 0x661   : > { %3838 = vmatpush.bf16.msrb.mxu1 %v14752_v46  ;;  %4055 = vmatpush.bf16.msrb.mxu0 %v14772_v23  ;;  %v11764_v46 = vld [vmem:[%s20656_s4 + $0x78] sm:$0xf0] }
 0x662   : > { %4276 = vmatpush.bf16.msra.mxu3 %v14788_v26  ;;  %v11767_v13 = vor.u32 %v14748_v10, %v11764_v46  ;;  %v11838_v10 = vld [vmem:[%s20656_s4 + $0x90] sm:$0xf]  ;;  %v14761_v46 = vld [vmem:[%s20656_s4 + $0x94] sm:$0xf0] }
 0x665   : > { %3839 = vmatpush.bf16.msrb.mxu1 %v14751_v24  ;;  %4056 = vmatpush.bf16.msrb.mxu0 %v14771_v11 }
 0x666   : > { %4277 = vmatpush.bf16.msra.mxu3 %v14787_v58 }
 0x668   : > { %3499 = vmatmul.bf16.gmra.mxu0 %v11671_v27 }
 0x669   : > { %3840 = vmatpush.bf16.msrb.mxu1 %v14750_v40  ;;  %4057 = vmatpush.bf16.msrb.mxu0 %v14770_v59 }
 0x66a   : > { %4278 = vmatpush.bf16.msra.mxu3 %v14786_v60 }
 0x66b   : > { %3719 = vmatmul.bf16.gmra.mxu3 %v11747_v4 }
 0x66c   : > { %11694 = vmatmul.msk.bf16.gmra.mxu1 %vm3473_vm2, %v11683_v52 }
 0x66d   : > { %4148 = vmatpush.bf16.msra.mxu1 %v17968_v29  ;;  %4058 = vmatpush.bf16.msrb.mxu0 %v14769_v50 }
 0x66e   : > { %4279 = vmatpush.bf16.msra.mxu3 %v14785_v15 }
 0x671   : > { %4149 = vmatpush.bf16.msra.mxu1 %v17953_v14  ;;  %4059 = vmatpush.bf16.msrb.mxu0 %v14768_v42 }
 0x672   : > { %4280 = vmatpush.bf16.msra.mxu3 %v14784_v41 }
 0x675   : > { %4150 = vmatpush.bf16.msra.mxu1 %v17935_v6  ;;  %4060 = vmatpush.bf16.msrb.mxu0 %v14767_v57 }
 0x676   : > { %4281 = vmatpush.bf16.msra.mxu3 %v14783_v49  ;;  %v11843_v49 = vor.u32 %v14760_v22, %v11840_v21  ;;  %v14765_v22 = vld [vmem:[%s20656_s4 + $0xb4] sm:$0xf0] }
 0x678   : > { %3504 = vmatmul.bf16.gmra.mxu0 %v11679_v63 }
 0x679   : > { %4151 = vmatpush.bf16.msra.mxu1 %v17911_v16  ;;  %4061 = vmatpush.bf16.msrb.mxu0 %v14766_v55 }
 0x67a   : > { %4282 = vmatpush.bf16.msra.mxu3 %v14782_v18 }
 0x67b   : > { %3724 = vmatmul.bf16.gmra.mxu3 %v11755_v5 }
 0x67c   : > { %11695 = vmatmul.msk.bf16.gmra.mxu1 %vm3473_vm2, %v11691_v32 }
 0x67d   : > { %4152 = vmatpush.bf16.msra.mxu1 %v17890_v37 }
 0x681   : > { %4153 = vmatpush.bf16.msra.mxu1 %v17876_v7 }
 0x685   : > { %4154 = vmatpush.bf16.msra.mxu1 %v17863_v25 }
 0x688   : > { %3509 = vmatmul.bf16.gmra.mxu0 %v11687_v54  ;;  %v11830_v54 = vld [vmem:[%s20656_s4 + $0x80] sm:$0xf] }
 0x689   : > { %4155 = vmatpush.bf16.msra.mxu1 %v17851_v30 }
 0x68b   : > { %3729 = vmatmul.bf16.gmra.mxu3 %v11763_v45  ;;  %v14759_v45 = vld [vmem:[%s20656_s4 + $0x84] sm:$0xf0] }
 0x68c   : > { %v11831_v8 = vor.u32 %v14759_v45, %v11830_v54  ;;  %v14820_v54 = vld [vmem:[%s20657_s5 + $0x170] sm:$0xff] }
 0x68d   : > { %v11930_v45 = vld [vmem:[%s20656_s4 + $0xd0] sm:$0xf] }
 0x698   : > { %11768 = vmatmul.msk.bf16.vlgmr.msra.gmra.mxu0 %vm3473_vm2, %v11743_v47 }
 0x699   : > { %4369 = vmatpush.bf16.msra.mxu0 %v17968_v29 }
 0x69b   : > { %11860 = vmatmul.msk.bf16.vlgmr.msrb.gmra.mxu3 %vm3473_vm2, %v11835_v2 }
 0x69c   : > { %4590 = vmatpush.bf16.msrb.mxu3 %v17968_v29 }
 0x69d   : > { %4370 = vmatpush.bf16.msra.mxu0 %v17953_v14 }
 0x6a0   : > { %4591 = vmatpush.bf16.msrb.mxu3 %v17953_v14 }
 0x6a1   : > { %4371 = vmatpush.bf16.msra.mxu0 %v17935_v6 }
 0x6a4   : > { %4592 = vmatpush.bf16.msrb.mxu3 %v17935_v6 }
 0x6a5   : > { %4372 = vmatpush.bf16.msra.mxu0 %v17911_v16 }
 0x6a8   : > { %4593 = vmatpush.bf16.msrb.mxu3 %v17911_v16  ;;  %11769 = vmatmul.msk.bf16.gmra.mxu0 %vm3473_vm2, %v11751_v44  ;;  %v14804_v44 = vld [vmem:[%s20657_s5 + $0x130] sm:$0xff] }
 0x6a9   : > { %4373 = vmatpush.bf16.msra.mxu0 %v17890_v37 }
 0x6ab   : > { %11861 = vmatmul.msk.bf16.gmra.mxu3 %vm3473_vm2, %v11843_v49 }
 0x6ac   : > { %4594 = vmatpush.bf16.msrb.mxu3 %v17890_v37 }
 0x6ad   : > { %4374 = vmatpush.bf16.msra.mxu0 %v17876_v7 }
 0x6b0   : > { %4595 = vmatpush.bf16.msrb.mxu3 %v17876_v7 }
 0x6b1   : > { %4375 = vmatpush.bf16.msra.mxu0 %v17863_v25 }
 0x6b4   : > { %4596 = vmatpush.bf16.msrb.mxu3 %v17863_v25 }
 0x6b5   : > { %4376 = vmatpush.bf16.msra.mxu0 %v17851_v30 }
 0x6b8   : > { %4597 = vmatpush.bf16.msrb.mxu3 %v17851_v30  ;;  %11770 = vmatmul.msk.bf16.gmra.mxu0 %vm3473_vm2, %v11759_v35  ;;  %v11859_v35 = vor.u32 %v14764_v39, %v11856_v9  ;;  %v14817_v39 = vld [vmem:[%s20657_s5 + $0x158] sm:$0xff]  ;;  %v14816_v9 = vld [vmem:[%s20657_s5 + $0x150] sm:$0xff] }
 0x6bb   : > { %11862 = vmatmul.msk.bf16.gmra.mxu3 %vm3473_vm2, %v11851_v31  ;;  %v14821_v31 = vld [vmem:[%s20657_s5 + $0x178] sm:$0xff] }
 0x6c8   : > { %11771 = vmatmul.msk.bf16.gmra.mxu0 %vm3473_vm2, %v11767_v13 }
 0x6c9   : > { %v3524_v23 = vpop.f32.mrf.mxu1 }
 0x6cb   : > { %11863 = vmatmul.msk.bf16.gmra.mxu3 %vm3473_vm2, %v11859_v35  ;;  %v11938_v35 = vld [vmem:[%s20656_s4 + $0xe0] sm:$0xf] }
 0x6d1   : > { %v3526_v24 = vpop.f32.mrf.mxu1 }
 0x6d5   : > { %v3495_v26 = vpop.f32.mrf.mxu0 }
 0x6d6   : > { %v3525_v36 = vadd.f32 %v3524_v23, %v3495_v26  ;;  %v14803_v26 = vld [vmem:[%s20657_s5 + $0x128] sm:$0xff] }
 0x6d9   : > { %v3529_v11 = vpop.f32.mrf.mxu1 }
 0x6dd   : > { %v3497_v28 = vpop.f32.mrf.mxu0 }
 0x6de   : > { %v3527_v48 = vadd.f32 %v3526_v24, %v3497_v28  ;;  %v3715_v20 = vpop.f32.mrf.mxu3  ;;  %v11839_v28 = vor.u32 %v14761_v46, %v11838_v10  ;;  %v14779_v10 = vld [vmem:[%s20656_s4 + $0xe4] sm:$0xf0]  ;;  %v14778_v46 = vld [vmem:[%s20656_s4 + $0xe4] sm:$0xf] }
 0x6e0   : > { %v3544_v62 = vpack.c.bf16 %v3527_v48, %v3525_v36  ;;  %v14802_v48 = vld [vmem:[%s20657_s5 + $0x120] sm:$0xff] }
 0x6e1   : > { %v3531_v58 = vpop.f32.mrf.mxu1 }
 0x6e2   : > { %3620 = vmatmul.bf16.vlgmr.msrb.gmra.mxu2 %v3544_v62  ;;  %v14801_v62 = vld [vmem:[%s20657_s5 + $0x118] sm:$0xff] }
 0x6e3   : > { %4184 = vmatpush.bf16.msrb.mxu2 %v18000_v12 }
 0x6e5   : > { %v3500_v40 = vpop.f32.mrf.mxu0 }
 0x6e6   : > { %v3530_v59 = vadd.f32 %v3529_v11, %v3500_v40  ;;  %v3717_v3 = vpop.f32.mrf.mxu3 }
 0x6e9   : > { %v3534_v34 = vpop.f32.mrf.mxu1 }
 0x6ed   : > { %v3502_v27 = vpop.f32.mrf.mxu0 }
 0x6ee   : > { %v3532_v4 = vadd.f32 %v3531_v58, %v3502_v27  ;;  %v3720_v56 = vpop.f32.mrf.mxu3  ;;  %v14800_v27 = vld [vmem:[%s20657_s5 + $0x110] sm:$0xff] }
 0x6f0   : > { %v3545_v0 = vpack.c.bf16 %v3532_v4, %v3530_v59  ;;  %v11846_v59 = vld [vmem:[%s20656_s4 + $0xa0] sm:$0xf]  ;;  %v14763_v4 = vld [vmem:[%s20656_s4 + $0xa4] sm:$0xf0] }
 0x6f1   : > { %v3536_v52 = vpop.f32.mrf.mxu1 }
 0x6f2   : > { %3625 = vmatmul.bf16.gmra.mxu2 %v3545_v0 }
 0x6f5   : > { %v3505_v60 = vpop.f32.mrf.mxu0 }
 0x6f6   : > { %v3535_v15 = vadd.f32 %v3534_v34, %v3505_v60  ;;  %v3722_v2 = vpop.f32.mrf.mxu3  ;;  %v14799_v34 = vld [vmem:[%s20657_s5 + $0x108] sm:$0xff] }
 0x6f9   : > { %v3539_v57 = vpop.f32.mrf.mxu1 }
 0x6fd   : > { %v3507_v50 = vpop.f32.mrf.mxu0 }
 0x6fe   : > { %v3537_v42 = vadd.f32 %v3536_v52, %v3507_v50  ;;  %v3725_v24 = vpop.f32.mrf.mxu3  ;;  %v11847_v50 = vor.u32 %v14763_v4, %v11846_v59 }
 0x700   : > { %v3546_v41 = vpack.c.bf16 %v3537_v42, %v3535_v15  ;;  %v14798_v15 = vld [vmem:[%s20657_s5 + $0x100] sm:$0xff] }
 0x701   : > { %v3541_v63 = vpop.f32.mrf.mxu1 }
 0x702   : > { %3630 = vmatmul.bf16.gmra.mxu2 %v3546_v41 }
 0x705   : > { %v3510_v17 = vpop.f32.mrf.mxu0 }
 0x706   : > { %v3540_v5 = vadd.f32 %v3539_v57, %v3510_v17  ;;  %v3727_v58 = vpop.f32.mrf.mxu3 }
 0x70d   : > { %v3512_v55 = vpop.f32.mrf.mxu0 }
 0x70e   : > { %v3542_v61 = vadd.f32 %v3541_v63, %v3512_v55  ;;  %v3730_v41 = vpop.f32.mrf.mxu3 }
 0x710   : > { %v3547_v18 = vpack.c.bf16 %v3542_v61, %v3540_v5  ;;  %v11922_v61 = vld [vmem:[%s20656_s4 + $0xc0] sm:$0xf] }
 0x712   : > { %3635 = vmatmul.bf16.gmra.mxu2 %v3547_v18  ;;  %v14774_v18 = vld [vmem:[%s20656_s4 + $0xc4] sm:$0xf] }
 0x715   : > { %v3744_v32 = vpop.f32.mrf.mxu0 }
 0x716   : > { %v3745_v33 = vadd.f32 %v3744_v32, %v3715_v20  ;;  %v3732_v17 = vpop.f32.mrf.mxu3  ;;  %v11854_v20 = vld [vmem:[%s20656_s4 + $0xb0] sm:$0xf]  ;;  %v11924_v32 = vld [vmem:[%s20656_s4 + $0xc8] sm:$0xf0] }
 0x717   : > { %v11855_v63 = vor.u32 %v14765_v22, %v11854_v20  ;;  %v11927_v19 = vor.u32 %v14774_v18, %v11924_v32 }
 0x71d   : > { %v3746_v38 = vpop.f32.mrf.mxu0 }
 0x71e   : > { %v3747_v51 = vadd.f32 %v3746_v38, %v3717_v3  ;;  %v14775_v3 = vld [vmem:[%s20656_s4 + $0xc4] sm:$0xf0]  ;;  %v14776_v38 = vld [vmem:[%s20656_s4 + $0xd4] sm:$0xf] }
 0x720   : > { %v3764_v47 = vpack.c.bf16 %v3747_v51, %v3745_v33  ;;  %v14777_v33 = vld [vmem:[%s20656_s4 + $0xd4] sm:$0xf0]  ;;  %v11932_v51 = vld [vmem:[%s20656_s4 + $0xd8] sm:$0xf0] }
 0x722   : > { %3841 = vmatmul.bf16.vlgmr.msrb.gmra.mxu1 %v3764_v47  ;;  %3935 = vmatmul.bf16.vlgmr.msra.gmra.mxu2 %v11831_v8  ;;  %v14819_v47 = vld [vmem:[%s20657_s5 + $0x168] sm:$0xff] }
 0x723   : > { %4405 = vmatpush.bf16.msrb.mxu1 %v18000_v12  ;;  %4496 = vmatpush.bf16.msra.mxu2 %v14805_v1  ;;  %v14818_v1 = vld [vmem:[%s20657_s5 + $0x160] sm:$0xff] }
 0x725   : > { %v3749_v43 = vpop.f32.mrf.mxu0 }
 0x726   : > { %v3750_v13 = vadd.f32 %v3749_v43, %v3720_v56  ;;  %v11923_v56 = vor.u32 %v14775_v3, %v11922_v61  ;;  %v11935_v43 = vor.u32 %v14776_v38, %v11932_v51 }
 0x727   : > { %4497 = vmatpush.bf16.msra.mxu2 %v14804_v44 }
 0x72b   : > { %4498 = vmatpush.bf16.msra.mxu2 %v14803_v26  ;;  %v11939_v26 = vor.u32 %v14779_v10, %v11938_v35 }
 0x72d   : > { %v3751_v23 = vpop.f32.mrf.mxu0 }
 0x72e   : > { %v3752_v11 = vadd.f32 %v3751_v23, %v3722_v2  ;;  %v11931_v2 = vor.u32 %v14777_v33, %v11930_v45 }
 0x72f   : > { %4499 = vmatpush.bf16.msra.mxu2 %v14802_v48  ;;  %v11946_v48 = vld [vmem:[%s20656_s4 + $0xf0] sm:$0xf] }
 0x730   : > { %v3765_v36 = vpack.c.bf16 %v3752_v11, %v3750_v13  ;;  %v11940_v13 = vld [vmem:[%s20656_s4 + $0xe8] sm:$0xf0] }
 0x731   : > { %v11943_v11 = vor.u32 %v14778_v46, %v11940_v13 }
 0x732   : > { %3846 = vmatmul.bf16.gmra.mxu1 %v3765_v36  ;;  %3940 = vmatmul.bf16.gmra.mxu2 %v11839_v28  ;;  %v14814_v28 = vld [vmem:[%s20657_s5 + $0x140] sm:$0xff] }
 0x733   : > { %4500 = vmatpush.bf16.msra.mxu2 %v14801_v62  ;;  %v14781_v62 = vld [vmem:[%s20656_s4 + $0xf4] sm:$0xf0] }
 0x734   : > { %v11947_v59 = vor.u32 %v14781_v62, %v11946_v48  ;;  %v12024_v48 = vld [vmem:[%s20656_s4 + $0x118] sm:$0xf0] }
 0x735   : > { %v3754_v40 = vpop.f32.mrf.mxu0 }
 0x736   : > { %v3755_v0 = vadd.f32 %v3754_v40, %v3725_v24  ;;  %v14815_v24 = vld [vmem:[%s20657_s5 + $0x148] sm:$0xff]  ;;  %v14780_v40 = vld [vmem:[%s20656_s4 + $0xf4] sm:$0xf] }
 0x737   : > { %4501 = vmatpush.bf16.msra.mxu2 %v14800_v27 }
 0x73b   : > { %4502 = vmatpush.bf16.msra.mxu2 %v14799_v34 }
 0x73d   : > { %v3756_v60 = vpop.f32.mrf.mxu0 }
 0x73e   : > { %v3757_v52 = vadd.f32 %v3756_v60, %v3727_v58  ;;  %v11948_v58 = vld [vmem:[%s20656_s4 + $0xf8] sm:$0xf0]  ;;  %v15328_v60 = vld [vmem:[%s20658_s6] ss:$0 sm:$0xff] }
 0x73f   : > { %4503 = vmatpush.bf16.msra.mxu2 %v14798_v15  ;;  %v11951_v4 = vor.u32 %v14780_v40, %v11948_v58 }
 0x740   : > { %v3766_v42 = vpack.c.bf16 %v3757_v52, %v3755_v0  ;;  %v3965_v0 = vpop.f32.mrf.mxu3  ;;  %v14790_v52 = vld [vmem:[%s20656_s4 + $0x104] sm:$0xf] }
 0x742   : > { %3851 = vmatmul.bf16.gmra.mxu1 %v3766_v42  ;;  %3945 = vmatmul.bf16.gmra.mxu2 %v11847_v50  ;;  %v12016_v50 = vld [vmem:[%s20656_s4 + $0x108] sm:$0xf0] }
 0x745   : > { %v3759_v57 = vpop.f32.mrf.mxu0 }
 0x746   : > { %v3760_v21 = vadd.f32 %v3759_v57, %v3730_v41  ;;  %v12019_v41 = vor.u32 %v14790_v52, %v12016_v50  ;;  %v14794_v50 = vld [vmem:[%s20656_s4 + $0x124] sm:$0xf] }
 0x748   : > { %v3967_v20 = vpop.f32.mrf.mxu3 }
 0x74d   : > { %v3761_v49 = vpop.f32.mrf.mxu0 }
 0x74e   : > { %v3762_v55 = vadd.f32 %v3761_v49, %v3732_v17 }
 0x750   : > { %v3767_v5 = vpack.c.bf16 %v3762_v55, %v3760_v21  ;;  %v3970_v49 = vpop.f32.mrf.mxu3 }
 0x752   : > { %3856 = vmatmul.bf16.gmra.mxu1 %v3767_v5  ;;  %3950 = vmatmul.bf16.gmra.mxu2 %v11855_v63 }
 0x762   : > { %4156 = vmatmul.bf16.vlgmr.msra.gmra.mxu1 %v11923_v56  ;;  %11952 = vmatmul.msk.bf16.vlgmr.msrb.gmra.mxu2 %vm3473_vm2, %v11927_v19  ;;  %v3972_v19 = vpop.f32.mrf.mxu3 }
 0x763   : > { %4811 = vmatpush.bf16.msrb.mxu2 %v17968_v29  ;;  %4717 = vmatpush.bf16.msra.mxu1 %v14821_v31 }
 0x765   : > { %v3621_v53 = vpop.f32.mrf.mxu2 }
 0x766   : > { %v3641_v42 = vadd.f32 %v15328_v60, %v3621_v53 }
 0x767   : > { %4812 = vmatpush.bf16.msrb.mxu2 %v17953_v14  ;;  %4718 = vmatpush.bf16.msra.mxu1 %v14820_v54 }
 0x76a   : > { %v3975_v51 = vpop.f32.mrf.mxu3 }
 0x76b   : > { %4813 = vmatpush.bf16.msrb.mxu2 %v17935_v6  ;;  %4719 = vmatpush.bf16.msra.mxu1 %v14819_v47 }
 0x76d   : > { %v18323_v8 = vpop.f32.mrf.mxu2 }
 0x76e   : > { %20841 = vst [vmem:[#allocation33_spill] sm:$0xff] %v18323_v8 }
 0x76f   : > { %4814 = vmatpush.bf16.msrb.mxu2 %v17911_v16  ;;  %4720 = vmatpush.bf16.msra.mxu1 %v14818_v1 }
 0x772   : > { %4161 = vmatmul.bf16.gmra.mxu1 %v11931_v2  ;;  %11953 = vmatmul.msk.bf16.gmra.mxu2 %vm3473_vm2, %v11935_v43 }
 0x773   : > { %4815 = vmatpush.bf16.msrb.mxu2 %v17890_v37  ;;  %4721 = vmatpush.bf16.msra.mxu1 %v14817_v39 }
 0x775   : > { %v3626_v44 = vpop.f32.mrf.mxu2 }
 0x776   : > { %v3643_v63 = vadd.f32 %v15328_v60, %v3626_v44  ;;  %v3977_v44 = vpop.f32.mrf.mxu3 }
 0x777   : > { %4816 = vmatpush.bf16.msrb.mxu2 %v17876_v7  ;;  %4722 = vmatpush.bf16.msra.mxu1 %v14816_v9 }
 0x77b   : > { %4817 = vmatpush.bf16.msrb.mxu2 %v17863_v25  ;;  %4723 = vmatpush.bf16.msra.mxu1 %v14815_v24 }
 0x77d   : > { %v18354_v23 = vpop.f32.mrf.mxu2 }
 0x77f   : > { %4818 = vmatpush.bf16.msrb.mxu2 %v17851_v30  ;;  %4724 = vmatpush.bf16.msra.mxu1 %v14814_v28 }
 0x782   : > { %4166 = vmatmul.bf16.gmra.mxu1 %v11939_v26  ;;  %11954 = vmatmul.msk.bf16.gmra.mxu2 %vm3473_vm2, %v11943_v11  ;;  %v3980_v26 = vpop.f32.mrf.mxu3 }
 0x785   : > { %v3631_v36 = vpop.f32.mrf.mxu2 }
 0x786   : > { %v3645_v54 = vadd.f32 %v15328_v60, %v3631_v36  ;;  %v14792_v36 = vld [vmem:[%s20656_s4 + $0x114] sm:$0xf] }
 0x787   : > { %v12027_v62 = vor.u32 %v14792_v36, %v12024_v48  ;;  %v12030_v36 = vld [vmem:[%s20656_s4 + $0x120] sm:$0xf]  ;;  %v14795_v48 = vld [vmem:[%s20656_s4 + $0x124] sm:$0xf0] }
 0x78a   : > { %v3982_v58 = vpop.f32.mrf.mxu3 }
 0x78d   : > { %v18376_v27 = vpop.f32.mrf.mxu2 }
 0x792   : > { %4171 = vmatmul.bf16.gmra.mxu1 %v11947_v59  ;;  %11955 = vmatmul.msk.bf16.gmra.mxu2 %vm3473_vm2, %v11951_v4 }
 0x795   : > { %v3636_v34 = vpop.f32.mrf.mxu2 }
 0x796   : > { %v3647_v9 = vadd.f32 %v15328_v60, %v3636_v34 }
 0x79d   : > { %v18388_v15 = vpop.f32.mrf.mxu2 }
 0x79f   : > { %v3842_v57 = vpop.f32.mrf.mxu1 }
 0x7a0   : > { %v18390_v17 = vadd.f32 %v3842_v57, %v3641_v42  ;;  %v12032_v42 = vld [vmem:[%s20656_s4 + $0x128] sm:$0xf0]  ;;  %v12014_v57 = vld [vmem:[%s20656_s4 + $0x100] sm:$0xf] }
 0x7a2   : > { %12044 = vmatmul.msk.bf16.vlgmr.msrb.gmra.mxu1 %vm3473_vm2, %v12019_v41  ;;  %v12035_v41 = vor.u32 %v14794_v50, %v12032_v42  ;;  %v12038_v42 = vld [vmem:[%s20656_s4 + $0x130] sm:$0xf] }
 0x7a3   : > { %5032 = vmatpush.bf16.msrb.mxu1 %v17968_v29 }
 0x7a5   : > { %v3936_v22 = vpop.f32.mrf.mxu2 }
 0x7a6   : > { %v3966_v5 = vadd.f32 %v3965_v0, %v3936_v22 }
 0x7a7   : > { %5033 = vmatpush.bf16.msrb.mxu1 %v17953_v14  ;;  %v18395_v21 = vpop.f32.mrf.mxu1 }
 0x7a8   : > { %20842 = vst [vmem:[#allocation17_spill] sm:$0xff] %v18395_v21 }
 0x7ab   : > { %5034 = vmatpush.bf16.msrb.mxu1 %v17935_v6 }
 0x7ad   : > { %v3938_v55 = vpop.f32.mrf.mxu2 }
 0x7ae   : > { %v3968_v61 = vadd.f32 %v3967_v20, %v3938_v55  ;;  %v14791_v20 = vld [vmem:[%s20656_s4 + $0x104] sm:$0xf0] }
 0x7af   : > { %5035 = vmatpush.bf16.msrb.mxu1 %v17911_v16  ;;  %v3847_v3 = vpop.f32.mrf.mxu1 }
 0x7b0   : > { %v3985_v18 = vpack.c.bf16 %v3968_v61, %v3966_v5  ;;  %v18399_v32 = vadd.f32 %v3847_v3, %v3643_v63  ;;  %v12015_v63 = vor.u32 %v14791_v20, %v12014_v57 }
 0x7b2   : > { %4062 = vmatmul.bf16.vlgmr.msrb.gmra.mxu0 %v3985_v18  ;;  %12045 = vmatmul.msk.bf16.gmra.mxu1 %vm3473_vm2, %v12027_v62  ;;  %v14837_v18 = vld [vmem:[%s20657_s5 + $0x1b8] sm:$0xff]  ;;  %v14831_v62 = vld [vmem:[%s20657_s5 + $0x188] sm:$0xff] }
 0x7b3   : > { %4626 = vmatpush.bf16.msrb.mxu0 %v18000_v12  ;;  %5036 = vmatpush.bf16.msrb.mxu1 %v17890_v37 }
 0x7b5   : > { %v3941_v56 = vpop.f32.mrf.mxu2 }
 0x7b6   : > { %v3971_v45 = vadd.f32 %v3970_v49, %v3941_v56 }
 0x7b7   : > { %5037 = vmatpush.bf16.msrb.mxu1 %v17876_v7  ;;  %v18404_v53 = vpop.f32.mrf.mxu1 }
 0x7bb   : > { %5038 = vmatpush.bf16.msrb.mxu1 %v17863_v25 }
 0x7bd   : > { %v3943_v31 = vpop.f32.mrf.mxu2 }
 0x7be   : > { %v3973_v33 = vadd.f32 %v3972_v19, %v3943_v31  ;;  %v14836_v19 = vld [vmem:[%s20657_s5 + $0x1b0] sm:$0xff] }
 0x7bf   : > { %5039 = vmatpush.bf16.msrb.mxu1 %v17851_v30  ;;  %v3852_v38 = vpop.f32.mrf.mxu1  ;;  %v14796_v31 = vld [vmem:[%s20656_s4 + $0x134] sm:$0xf] }
 0x7c0   : > { %v3986_v47 = vpack.c.bf16 %v3973_v33, %v3971_v45  ;;  %v18408_v2 = vadd.f32 %v3852_v38, %v3645_v54  ;;  %v12040_v54 = vld [vmem:[%s20656_s4 + $0x138] sm:$0xf0]  ;;  %v12022_v33 = vld [vmem:[%s20656_s4 + $0x110] sm:$0xf]  ;;  %v14793_v38 = vld [vmem:[%s20656_s4 + $0x114] sm:$0xf0] }
 0x7c1   : > { %v12043_v45 = vor.u32 %v14796_v31, %v12040_v54  ;;  %v14853_v54 = vld [vmem:[%s20657_s5 + $0x1f8] sm:$0xff] }
 0x7c2   : > { %4067 = vmatmul.bf16.gmra.mxu0 %v3986_v47  ;;  %12046 = vmatmul.msk.bf16.gmra.mxu1 %vm3473_vm2, %v12035_v41  ;;  %v14797_v41 = vld [vmem:[%s20656_s4 + $0x134] sm:$0xf0] }
 0x7c5   : > { %v3946_v43 = vpop.f32.mrf.mxu2 }
 0x7c6   : > { %v3976_v35 = vadd.f32 %v3975_v51, %v3946_v43  ;;  %v14835_v43 = vld [vmem:[%s20657_s5 + $0x1a8] sm:$0xff] }
 0x7c7   : > { %v18410_v1 = vpop.f32.mrf.mxu1 }
 0x7cd   : > { %v3948_v39 = vpop.f32.mrf.mxu2 }
 0x7ce   : > { %v3978_v10 = vadd.f32 %v3977_v44, %v3948_v39  ;;  %v12023_v39 = vor.u32 %v14793_v38, %v12022_v33  ;;  %v14852_v33 = vld [vmem:[%s20657_s5 + $0x1f0] sm:$0xff]  ;;  %v14851_v38 = vld [vmem:[%s20657_s5 + $0x1e8] sm:$0xff] }
 0x7cf   : > { %v3857_v46 = vpop.f32.mrf.mxu1 }
 0x7d0   : > { %v3987_v13 = vpack.c.bf16 %v3978_v10, %v3976_v35  ;;  %v18412_v24 = vadd.f32 %v3857_v46, %v3647_v9  ;;  %v14834_v10 = vld [vmem:[%s20657_s5 + $0x1a0] sm:$0xff]  ;;  %v14833_v46 = vld [vmem:[%s20657_s5 + $0x198] sm:$0xff] }
 0x7d2   : > { %4072 = vmatmul.bf16.gmra.mxu0 %v3987_v13  ;;  %12047 = vmatmul.msk.bf16.gmra.mxu1 %vm3473_vm2, %v12043_v45 }
 0x7d5   : > { %v3951_v11 = vpop.f32.mrf.mxu2 }
 0x7d6   : > { %v3981_v59 = vadd.f32 %v3980_v26, %v3951_v11  ;;  %v14832_v11 = vld [vmem:[%s20657_s5 + $0x190] sm:$0xff] }
 0x7d7   : > { %v18414_v28 = vpop.f32.mrf.mxu1 }
 0x7dd   : > { %v3953_v40 = vpop.f32.mrf.mxu2 }
 0x7de   : > { %v3983_v4 = vadd.f32 %v3982_v58, %v3953_v40 }
 0x7df   : > { %v4157_v34 = vpop.f32.mrf.mxu1 }
 0x7e0   : > { %v3988_v0 = vpack.c.bf16 %v3983_v4, %v3981_v59  ;;  %v12031_v4 = vor.u32 %v14795_v48, %v12030_v36  ;;  %v14810_v36 = vld [vmem:[%s20656_s4 + $0x164] sm:$0xf]  ;;  %v12124_v48 = vld [vmem:[%s20656_s4 + $0x168] sm:$0xf0] }
 0x7e2   : > { %4077 = vmatmul.bf16.gmra.mxu0 %v3988_v0  ;;  %v14830_v0 = vld [vmem:[%s20657_s5 + $0x180] sm:$0xff] }
 0x7e5   : > { %v4186_v60 = vpop.f32.mrf.mxu2 }
 0x7e6   : > { %v4187_v22 = vadd.f32 %v4186_v60, %v4157_v34 }
 0x7e7   : > { %v4159_v52 = vpop.f32.mrf.mxu1 }
 0x7ed   : > { %v4188_v49 = vpop.f32.mrf.mxu2 }
 0x7ee   : > { %v4189_v55 = vadd.f32 %v4188_v49, %v4159_v52  ;;  %v12039_v49 = vor.u32 %v14797_v41, %v12038_v42 }
 0x7ef   : > { %v4162_v5 = vpop.f32.mrf.mxu1 }
 0x7f0   : > { %v4206_v61 = vpack.c.bf16 %v4189_v55, %v4187_v22 }
 0x7f2   : > { %4283 = vmatmul.bf16.vlgmr.msra.gmra.mxu3 %v4206_v61  ;;  %4377 = vmatmul.bf16.vlgmr.msra.gmra.mxu0 %v12015_v63  ;;  %v12106_v63 = vld [vmem:[%s20656_s4 + $0x140] sm:$0xf]  ;;  %v14806_v61 = vld [vmem:[%s20656_s4 + $0x144] sm:$0xf] }
 0x7f3   : > { %4847 = vmatpush.bf16.msra.mxu3 %v18000_v12  ;;  %4938 = vmatpush.bf16.msra.mxu0 %v14837_v18 }
 0x7f5   : > { %v4191_v3 = vpop.f32.mrf.mxu2 }
 0x7f6   : > { %v4192_v51 = vadd.f32 %v4191_v3, %v4162_v5  ;;  %v14807_v5 = vld [vmem:[%s20656_s4 + $0x144] sm:$0xf0]  ;;  %v12108_v3 = vld [vmem:[%s20656_s4 + $0x148] sm:$0xf0] }
 0x7f7   : > { %v4164_v56 = vpop.f32.mrf.mxu1  ;;  %4939 = vmatpush.bf16.msra.mxu0 %v14836_v19  ;;  %v12107_v18 = vor.u32 %v14807_v5, %v12106_v63  ;;  %v12200_v63 = vld [vmem:[%s20656_s4 + $0x188] sm:$0xf0] }
 0x7fb   : > { %4940 = vmatpush.bf16.msra.mxu0 %v14835_v43  ;;  %v12116_v43 = vld [vmem:[%s20656_s4 + $0x158] sm:$0xf0] }
 0x7fd   : > { %v4193_v47 = vpop.f32.mrf.mxu2 }
 0x7fe   : > { %v4194_v44 = vadd.f32 %v4193_v47, %v4164_v56  ;;  %v12111_v56 = vor.u32 %v14806_v61, %v12108_v3  ;;  %v14808_v47 = vld [vmem:[%s20656_s4 + $0x154] sm:$0xf] }
 0x7ff   : > { %v4167_v9 = vpop.f32.mrf.mxu1  ;;  %4941 = vmatpush.bf16.msra.mxu0 %v14834_v10  ;;  %v14850_v10 = vld [vmem:[%s20657_s5 + $0x1e0] sm:$0xff] }
 0x800   : > { %v4207_v35 = vpack.c.bf16 %v4194_v44, %v4192_v51  ;;  %v14809_v51 = vld [vmem:[%s20656_s4 + $0x154] sm:$0xf0] }
 0x802   : > { %4288 = vmatmul.bf16.gmra.mxu3 %v4207_v35  ;;  %4382 = vmatmul.bf16.gmra.mxu0 %v12023_v39  ;;  %v12119_v39 = vor.u32 %v14808_v47, %v12116_v43 }
 0x803   : > { %4942 = vmatpush.bf16.msra.mxu0 %v14833_v46  ;;  %v14849_v46 = vld [vmem:[%s20657_s5 + $0x1d8] sm:$0xff] }
 0x805   : > { %v4196_v13 = vpop.f32.mrf.mxu2 }
 0x806   : > { %v4197_v40 = vadd.f32 %v4196_v13, %v4167_v9 }
 0x807   : > { %v4169_v26 = vpop.f32.mrf.mxu1  ;;  %4943 = vmatpush.bf16.msra.mxu0 %v14832_v11  ;;  %v14811_v11 = vld [vmem:[%s20656_s4 + $0x164] sm:$0xf0] }
 0x80b   : > { %4944 = vmatpush.bf16.msra.mxu0 %v14831_v62  ;;  %v14847_v62 = vld [vmem:[%s20657_s5 + $0x1c8] sm:$0xff] }
 0x80d   : > { %v4198_v58 = vpop.f32.mrf.mxu2 }
 0x80e   : > { %v4199_v59 = vadd.f32 %v4198_v58, %v4169_v26  ;;  %v12122_v26 = vld [vmem:[%s20656_s4 + $0x160] sm:$0xf]  ;;  %v12127_v58 = vor.u32 %v14810_v36, %v12124_v48 }
 0x80f   : > { %v4172_v60 = vpop.f32.mrf.mxu1  ;;  %4945 = vmatpush.bf16.msra.mxu0 %v14830_v0 }
 0x810   : > { %v4208_v34 = vpack.c.bf16 %v4199_v59, %v4197_v40  ;;  %v12123_v40 = vor.u32 %v14811_v11, %v12122_v26 }
 0x812   : > { %4293 = vmatmul.bf16.gmra.mxu3 %v4208_v34  ;;  %4387 = vmatmul.bf16.gmra.mxu0 %v12031_v4  ;;  %v14846_v34 = vld [vmem:[%s20657_s5 + $0x1c0] sm:$0xff] }
 0x815   : > { %v4201_v52 = vpop.f32.mrf.mxu2 }
 0x816   : > { %v4202_v57 = vadd.f32 %v4201_v52, %v4172_v60  ;;  %v12130_v60 = vld [vmem:[%s20656_s4 + $0x170] sm:$0xf]  ;;  %v14813_v52 = vld [vmem:[%s20656_s4 + $0x174] sm:$0xf0] }
 0x817   : > { %v4174_v50 = vpop.f32.mrf.mxu1  ;;  %v12131_v42 = vor.u32 %v14813_v52, %v12130_v60  ;;  %v14824_v52 = vld [vmem:[%s20656_s4 + $0x194] sm:$0xf] }
 0x81d   : > { %v4203_v20 = vpop.f32.mrf.mxu2 }
 0x81e   : > { %v4204_v22 = vadd.f32 %v4203_v20, %v4174_v50  ;;  %v12132_v50 = vld [vmem:[%s20656_s4 + $0x178] sm:$0xf0] }
 0x820   : > { %v4209_v55 = vpack.c.bf16 %v4204_v22, %v4202_v57  ;;  %v4407_v22 = vpop.f32.mrf.mxu1 }
 0x822   : > { %4298 = vmatmul.bf16.gmra.mxu3 %v4209_v55  ;;  %4392 = vmatmul.bf16.gmra.mxu0 %v12039_v49  ;;  %v14822_v55 = vld [vmem:[%s20656_s4 + $0x184] sm:$0xf] }
 0x823   : > { %v12203_v61 = vor.u32 %v14822_v55, %v12200_v63 }
 0x828   : > { %v4409_v5 = vpop.f32.mrf.mxu1 }
 0x82f   : > { %v4063_v19 = vpop.f32.mrf.mxu0 }
 0x830   : > { %v18499_v31 = vadd.f32 %v4063_v19, %v18390_v17  ;;  %v12114_v17 = vld [vmem:[%s20656_s4 + $0x150] sm:$0xf] }
 0x831   : > { %v12115_v44 = vor.u32 %v14809_v51, %v12114_v17 }
 0x832   : > { %4598 = vmatmul.bf16.vlgmr.msrb.gmra.mxu3 %v12107_v18  ;;  %12136 = vmatmul.msk.bf16.vlgmr.msrb.gmra.mxu0 %vm3473_vm2, %v12111_v56  ;;  %v4412_v18 = vpop.f32.mrf.mxu1 }
 0x833   : > { %5253 = vmatpush.bf16.msrb.mxu0 %v17968_v29  ;;  %5159 = vmatpush.bf16.msrb.mxu3 %v14853_v54 }
 0x837   : > { %5254 = vmatpush.bf16.msrb.mxu0 %v17953_v14  ;;  %v18507_v45 = vpop.f32.mrf.mxu0  ;;  %5160 = vmatpush.bf16.msrb.mxu3 %v14852_v33 }
 0x838   : > { %20843 = vst [vmem:[#allocation9_spill] sm:$0xff] %v18507_v45 }
 0x83a   : > { %v4414_v47 = vpop.f32.mrf.mxu1 }
 0x83b   : > { %5255 = vmatpush.bf16.msrb.mxu0 %v17935_v6  ;;  %5161 = vmatpush.bf16.msrb.mxu3 %v14851_v38 }
 0x83f   : > { %5256 = vmatpush.bf16.msrb.mxu0 %v17911_v16  ;;  %v4068_v9 = vpop.f32.mrf.mxu0  ;;  %5162 = vmatpush.bf16.msrb.mxu3 %v14850_v10 }
 0x840   : > { %v18530_v35 = vadd.f32 %v4068_v9, %v18399_v32  ;;  %v14848_v32 = vld [vmem:[%s20657_s5 + $0x1d0] sm:$0xff] }
 0x842   : > { %4603 = vmatmul.bf16.gmra.mxu3 %v12115_v44  ;;  %12137 = vmatmul.msk.bf16.gmra.mxu0 %vm3473_vm2, %v12119_v39  ;;  %v4417_v10 = vpop.f32.mrf.mxu1 }
 0x843   : > { %5257 = vmatpush.bf16.msrb.mxu0 %v17890_v37  ;;  %5163 = vmatpush.bf16.msrb.mxu3 %v14849_v46 }
 0x847   : > { %5258 = vmatpush.bf16.msrb.mxu0 %v17876_v7  ;;  %v18541_v13 = vpop.f32.mrf.mxu0  ;;  %5164 = vmatpush.bf16.msrb.mxu3 %v14848_v32 }
 0x84a   : > { %v4419_v11 = vpop.f32.mrf.mxu1 }
 0x84b   : > { %5259 = vmatpush.bf16.msrb.mxu0 %v17863_v25  ;;  %5165 = vmatpush.bf16.msrb.mxu3 %v14847_v62 }
 0x84f   : > { %5260 = vmatpush.bf16.msrb.mxu0 %v17851_v30  ;;  %v4073_v59 = vpop.f32.mrf.mxu0  ;;  %5166 = vmatpush.bf16.msrb.mxu3 %v14846_v34 }
 0x850   : > { %v4087_v4 = vadd.f32 %v4073_v59, %v18408_v2  ;;  %v14812_v2 = vld [vmem:[%s20656_s4 + $0x174] sm:$0xf] }
 0x851   : > { %v12135_v41 = vor.u32 %v14812_v2, %v12132_v50  ;;  %v12208_v2 = vld [vmem:[%s20656_s4 + $0x198] sm:$0xf0] }
 0x852   : > { %4608 = vmatmul.bf16.gmra.mxu3 %v12123_v40  ;;  %12138 = vmatmul.msk.bf16.gmra.mxu0 %vm3473_vm2, %v12127_v58  ;;  %v4422_v34 = vpop.f32.mrf.mxu1  ;;  %v12211_v50 = vor.u32 %v14824_v52, %v12208_v2 }
 0x857   : > { %v18568_v0 = vpop.f32.mrf.mxu0 }
 0x85f   : > { %v4078_v57 = vpop.f32.mrf.mxu0 }
 0x860   : > { %v4089_v20 = vadd.f32 %v4078_v57, %v18412_v24  ;;  %v4424_v57 = vpop.f32.mrf.mxu1 }
 0x862   : > { %4613 = vmatmul.bf16.gmra.mxu3 %v12131_v42  ;;  %12139 = vmatmul.msk.bf16.gmra.mxu0 %vm3473_vm2, %v12135_v41 }
 0x867   : > { %v18584_v49 = vpop.f32.mrf.mxu0 }
 0x86f   : > { %v4378_v3 = vpop.f32.mrf.mxu0 }
 0x870   : > { %v4408_v54 = vadd.f32 %v4407_v22, %v4378_v3  ;;  %v14826_v3 = vld [vmem:[%s20656_s4 + $0x1a4] sm:$0xf] }
 0x872   : > { %12228 = vmatmul.msk.bf16.vlgmr.msra.gmra.mxu3 %vm3473_vm2, %v12203_v61 }
 0x873   : > { %5474 = vmatpush.bf16.msra.mxu3 %v17968_v29 }
 0x875   : > { %v4284_v24 = vpop.f32.mrf.mxu3 }
 0x876   : > { %v18595_v56 = vadd.f32 %v4284_v24, %v18499_v31 }
 0x877   : > { %5475 = vmatpush.bf16.msra.mxu3 %v17953_v14  ;;  %v4380_v19 = vpop.f32.mrf.mxu0 }
 0x878   : > { %v4410_v33 = vadd.f32 %v4409_v5, %v4380_v19  ;;  %v12198_v19 = vld [vmem:[%s20656_s4 + $0x180] sm:$0xf] }
 0x87a   : > { %v4427_v17 = vpack.c.bf16 %v4410_v33, %v4408_v54  ;;  %v14823_v54 = vld [vmem:[%s20656_s4 + $0x184] sm:$0xf0] }
 0x87b   : > { %5476 = vmatpush.bf16.msra.mxu3 %v17935_v6 }
 0x87c   : > { %4504 = vmatmul.bf16.vlgmr.msra.gmra.mxu2 %v4427_v17  ;;  %v12199_v17 = vor.u32 %v14823_v54, %v12198_v19 }
 0x87d   : > { %5068 = vmatpush.bf16.msra.mxu2 %v18000_v12  ;;  %v18600_v38 = vpop.f32.mrf.mxu3 }
 0x87e   : > { %20844 = vst [vmem:[#allocation35_spill] sm:$0xff] %v18600_v38 }
 0x87f   : > { %5477 = vmatpush.bf16.msra.mxu3 %v17911_v16  ;;  %v4383_v51 = vpop.f32.mrf.mxu0 }
 0x880   : > { %v4413_v39 = vadd.f32 %v4412_v18, %v4383_v51 }
 0x882   : > { %12229 = vmatmul.msk.bf16.gmra.mxu3 %vm3473_vm2, %v12211_v50 }
 0x883   : > { %5478 = vmatpush.bf16.msra.mxu3 %v17890_v37 }
 0x885   : > { %v4289_v31 = vpop.f32.mrf.mxu3 }
 0x886   : > { %v18605_v43 = vadd.f32 %v4289_v31, %v18530_v35 }
 0x887   : > { %5479 = vmatpush.bf16.msra.mxu3 %v17876_v7  ;;  %v4385_v44 = vpop.f32.mrf.mxu0 }
 0x888   : > { %v4415_v9 = vadd.f32 %v4414_v47, %v4385_v44 }
 0x88a   : > { %v4428_v46 = vpack.c.bf16 %v4415_v9, %v4413_v39  ;;  %v14869_v39 = vld [vmem:[%s20657_s5 + $0x238] sm:$0xff] }
 0x88b   : > { %5480 = vmatpush.bf16.msra.mxu3 %v17863_v25 }
 0x88c   : > { %4509 = vmatmul.bf16.gmra.mxu2 %v4428_v46  ;;  %v14828_v46 = vld [vmem:[%s20656_s4 + $0x1b4] sm:$0xf] }
 0x88d   : > { %v18609_v32 = vpop.f32.mrf.mxu3 }
 0x88f   : > { %5481 = vmatpush.bf16.msra.mxu3 %v17851_v30  ;;  %v4388_v26 = vpop.f32.mrf.mxu0 }
 0x890   : > { %v4418_v62 = vadd.f32 %v4417_v10, %v4388_v26  ;;  %v14868_v10 = vld [vmem:[%s20657_s5 + $0x230] sm:$0xff]  ;;  %v12224_v26 = vld [vmem:[%s20656_s4 + $0x1b8] sm:$0xf0] }
 0x895   : > { %v4294_v36 = vpop.f32.mrf.mxu3 }
 0x896   : > { %v18612_v48 = vadd.f32 %v4294_v36, %v4087_v4 }
 0x897   : > { %v4390_v35 = vpop.f32.mrf.mxu0 }
 0x898   : > { %v4420_v40 = vadd.f32 %v4419_v11, %v4390_v35  ;;  %v12227_v11 = vor.u32 %v14828_v46, %v12224_v26  ;;  %v12206_v35 = vld [vmem:[%s20656_s4 + $0x190] sm:$0xf] }
 0x89a   : > { %v4429_v58 = vpack.c.bf16 %v4420_v40, %v4418_v62  ;;  %v14825_v62 = vld [vmem:[%s20656_s4 + $0x194] sm:$0xf0]  ;;  %v14867_v40 = vld [vmem:[%s20657_s5 + $0x228] sm:$0xff] }
 0x89c   : > { %4514 = vmatmul.bf16.gmra.mxu2 %v4429_v58 }
 0x89d   : > { %v18614_v59 = vpop.f32.mrf.mxu3 }
 0x89f   : > { %v4393_v60 = vpop.f32.mrf.mxu0 }
 0x8a0   : > { %v4423_v22 = vadd.f32 %v4422_v34, %v4393_v60  ;;  %v12207_v34 = vor.u32 %v14825_v62, %v12206_v35  ;;  %v14866_v60 = vld [vmem:[%s20657_s5 + $0x220] sm:$0xff]  ;;  %v12292_v35 = vld [vmem:[%s20656_s4 + $0x1c8] sm:$0xf0] }
 0x8a5   : > { %v4299_v4 = vpop.f32.mrf.mxu3 }
 0x8a6   : > { %v18622_v42 = vadd.f32 %v4299_v4, %v4089_v20  ;;  %v12216_v20 = vld [vmem:[%s20656_s4 + $0x1a8] sm:$0xf0] }
 0x8a7   : > { %v4395_v41 = vpop.f32.mrf.mxu0  ;;  %v12219_v24 = vor.u32 %v14826_v3, %v12216_v20  ;;  %v14863_v3 = vld [vmem:[%s20657_s5 + $0x208] sm:$0xff] }
 0x8a8   : > { %v4425_v55 = vadd.f32 %v4424_v57, %v4395_v41  ;;  %v14865_v41 = vld [vmem:[%s20657_s5 + $0x218] sm:$0xff] }
 0x8a9   : > { %12230 = vmatmul.msk.bf16.gmra.mxu3 %vm3473_vm2, %v12219_v24 }
 0x8aa   : > { %v4430_v63 = vpack.c.bf16 %v4425_v55, %v4423_v22  ;;  %v14864_v22 = vld [vmem:[%s20657_s5 + $0x210] sm:$0xff] }
 0x8ac   : > { %4519 = vmatmul.bf16.gmra.mxu2 %v4430_v63  ;;  %v12214_v63 = vld [vmem:[%s20656_s4 + $0x1a0] sm:$0xf] }
 0x8ad   : > { %v18625_v5 = vpop.f32.mrf.mxu3 }
 0x8af   : > { %v4628_v61 = vpop.f32.mrf.mxu0 }
 0x8b5   : > { %v4599_v18 = vpop.f32.mrf.mxu3 }
 0x8b6   : > { %v4629_v51 = vadd.f32 %v4628_v61, %v4599_v18  ;;  %v14827_v61 = vld [vmem:[%s20656_s4 + $0x1a4] sm:$0xf0]  ;;  %v14862_v18 = vld [vmem:[%s20657_s5 + $0x200] sm:$0xff] }
 0x8b7   : > { %v4630_v33 = vpop.f32.mrf.mxu0  ;;  %v12215_v24 = vor.u32 %v14827_v61, %v12214_v63  ;;  %v14883_v63 = vld [vmem:[%s20657_s5 + $0x268] sm:$0xff] }
 0x8b9   : > { %12231 = vmatmul.msk.bf16.gmra.mxu3 %vm3473_vm2, %v12227_v11 }
 0x8bc   : > { %4819 = vmatmul.bf16.vlgmr.msrb.gmra.mxu2 %v12199_v17 }
 0x8bd   : > { %v4601_v47 = vpop.f32.mrf.mxu3  ;;  %5380 = vmatpush.bf16.msrb.mxu2 %v14869_v39 }
 0x8be   : > { %v4631_v31 = vadd.f32 %v4630_v33, %v4601_v47 }
 0x8bf   : > { %v4633_v44 = vpop.f32.mrf.mxu0 }
 0x8c0   : > { %v4648_v9 = vpack.c.bf16 %v4631_v31, %v4629_v51  ;;  %v12222_v31 = vld [vmem:[%s20656_s4 + $0x1b0] sm:$0xf] }
 0x8c1   : > { %5381 = vmatpush.bf16.msrb.mxu2 %v14868_v10 }
 0x8c2   : > { %4725 = vmatmul.bf16.vlgmr.msra.gmra.mxu1 %v4648_v9 }
 0x8c3   : > { %5289 = vmatpush.bf16.msra.mxu1 %v18000_v12 }
 0x8c5   : > { %v4604_v36 = vpop.f32.mrf.mxu3  ;;  %5382 = vmatpush.bf16.msrb.mxu2 %v14867_v40  ;;  %v12290_v40 = vld [vmem:[%s20656_s4 + $0x1c0] sm:$0xf] }
 0x8c6   : > { %v4634_v52 = vadd.f32 %v4633_v44, %v4604_v36  ;;  %v14829_v44 = vld [vmem:[%s20656_s4 + $0x1b4] sm:$0xf0]  ;;  %v14838_v36 = vld [vmem:[%s20656_s4 + $0x1c4] sm:$0xf] }
 0x8c7   : > { %v4635_v58 = vpop.f32.mrf.mxu0  ;;  %v12223_v39 = vor.u32 %v14829_v44, %v12222_v31  ;;  %v12295_v62 = vor.u32 %v14838_v36, %v12292_v35  ;;  %v14879_v31 = vld [vmem:[%s20657_s5 + $0x248] sm:$0xff]  ;;  %v14845_v35 = vld [vmem:[%s20656_s4 + $0x1f4] sm:$0xf0] }
 0x8c9   : > { %5383 = vmatpush.bf16.msrb.mxu2 %v14866_v60 }
 0x8cc   : > { %4824 = vmatmul.bf16.gmra.mxu2 %v12207_v34 }
 0x8cd   : > { %v4606_v2 = vpop.f32.mrf.mxu3  ;;  %5384 = vmatpush.bf16.msrb.mxu2 %v14865_v41 }
 0x8ce   : > { %v4636_v50 = vadd.f32 %v4635_v58, %v4606_v2  ;;  %v14839_v58 = vld [vmem:[%s20656_s4 + $0x1c4] sm:$0xf0]  ;;  %v14885_v2 = vld [vmem:[%s20657_s5 + $0x278] sm:$0xff] }
 0x8cf   : > { %v4638_v4 = vpop.f32.mrf.mxu0  ;;  %v12291_v34 = vor.u32 %v14839_v58, %v12290_v40 }
 0x8d0   : > { %v4649_v57 = vpack.c.bf16 %v4636_v50, %v4634_v52  ;;  %v14840_v50 = vld [vmem:[%s20656_s4 + $0x1d4] sm:$0xf] }
 0x8d1   : > { %5385 = vmatpush.bf16.msrb.mxu2 %v14864_v22  ;;  %v12298_v22 = vld [vmem:[%s20656_s4 + $0x1d0] sm:$0xf] }
 0x8d2   : > { %4730 = vmatmul.bf16.gmra.mxu1 %v4649_v57  ;;  %v14884_v57 = vld [vmem:[%s20657_s5 + $0x270] sm:$0xff] }
 0x8d5   : > { %v4609_v55 = vpop.f32.mrf.mxu3  ;;  %5386 = vmatpush.bf16.msrb.mxu2 %v14863_v3 }
 0x8d6   : > { %v4639_v19 = vadd.f32 %v4638_v4, %v4609_v55  ;;  %v12300_v4 = vld [vmem:[%s20656_s4 + $0x1d8] sm:$0xf0]  ;;  %v14841_v55 = vld [vmem:[%s20656_s4 + $0x1d4] sm:$0xf0] }
 0x8d7   : > { %v4640_v20 = vpop.f32.mrf.mxu0  ;;  %v12303_v41 = vor.u32 %v14840_v50, %v12300_v4  ;;  %v12299_v61 = vor.u32 %v14841_v55, %v12298_v22  ;;  %v14854_v50 = vld [vmem:[%s20656_s4 + $0x204] sm:$0xf]  ;;  %v12384_v4 = vld [vmem:[%s20656_s4 + $0x208] sm:$0xf0] }
 0x8d9   : > { %5387 = vmatpush.bf16.msrb.mxu2 %v14862_v18  ;;  %v14881_v18 = vld [vmem:[%s20657_s5 + $0x258] sm:$0xff] }
 0x8dc   : > { %4829 = vmatmul.bf16.gmra.mxu2 %v12215_v24  ;;  %v14882_v24 = vld [vmem:[%s20657_s5 + $0x260] sm:$0xff] }
 0x8dd   : > { %v4611_v54 = vpop.f32.mrf.mxu3 }
 0x8de   : > { %v4641_v33 = vadd.f32 %v4640_v20, %v4611_v54 }
 0x8df   : > { %v4643_v51 = vpop.f32.mrf.mxu0 }
 0x8e0   : > { %v4650_v17 = vpack.c.bf16 %v4641_v33, %v4639_v19  ;;  %v14842_v19 = vld [vmem:[%s20656_s4 + $0x1e4] sm:$0xf] }
 0x8e2   : > { %4735 = vmatmul.bf16.gmra.mxu1 %v4650_v17  ;;  %v14880_v17 = vld [vmem:[%s20657_s5 + $0x250] sm:$0xff] }
 0x8e5   : > { %v4614_v47 = vpop.f32.mrf.mxu3 }
 0x8e6   : > { %v4644_v10 = vadd.f32 %v4643_v51, %v4614_v47  ;;  %v12306_v51 = vld [vmem:[%s20656_s4 + $0x1e0] sm:$0xf]  ;;  %v14843_v47 = vld [vmem:[%s20656_s4 + $0x1e4] sm:$0xf0] }
 0x8e7   : > { %v4645_v9 = vpop.f32.mrf.mxu0  ;;  %v12307_v44 = vor.u32 %v14843_v47, %v12306_v51 }
 0x8ec   : > { %4834 = vmatmul.bf16.gmra.mxu2 %v12223_v39 }
 0x8ed   : > { %v4616_v46 = vpop.f32.mrf.mxu3 }
 0x8ee   : > { %v4646_v26 = vadd.f32 %v4645_v9, %v4616_v46  ;;  %v14844_v46 = vld [vmem:[%s20656_s4 + $0x1f4] sm:$0xf] }
 0x8f0   : > { %v4651_v11 = vpack.c.bf16 %v4646_v26, %v4644_v10  ;;  %v14878_v10 = vld [vmem:[%s20657_s5 + $0x240] sm:$0xff]  ;;  %v12316_v26 = vld [vmem:[%s20656_s4 + $0x1f8] sm:$0xf0] }
 0x8f1   : > { %v12319_v36 = vor.u32 %v14844_v46, %v12316_v26 }
 0x8f2   : > { %4740 = vmatmul.bf16.gmra.mxu1 %v4651_v11 }
 0x8fc   : > { %12320 = vmatmul.msk.bf16.vlgmr.msra.gmra.mxu2 %vm3473_vm2, %v12295_v62 }
 0x8fd   : > { %5695 = vmatpush.bf16.msra.mxu2 %v17968_v29 }
 0x8ff   : > { %v4505_v60 = vpop.f32.mrf.mxu2 }
 0x900   : > { %v18705_v52 = vadd.f32 %v4505_v60, %v18595_v56 }
 0x901   : > { %5696 = vmatpush.bf16.msra.mxu2 %v17953_v14 }
 0x902   : > { %5040 = vmatmul.bf16.vlgmr.msrb.gmra.mxu1 %v12291_v34  ;;  %v4849_v34 = vpop.f32.mrf.mxu3 }
 0x903   : > { %5601 = vmatpush.bf16.msrb.mxu1 %v14885_v2 }
 0x905   : > { %5697 = vmatpush.bf16.msra.mxu2 %v17935_v6 }
 0x907   : > { %v18718_v56 = vpop.f32.mrf.mxu2  ;;  %5602 = vmatpush.bf16.msrb.mxu1 %v14884_v57 }
 0x908   : > { %20845 = vst [vmem:[#allocation39_spill] sm:$0xff] %v18718_v56 }
 0x909   : > { %5698 = vmatpush.bf16.msra.mxu2 %v17911_v16 }
 0x90a   : > { %v4851_v2 = vpop.f32.mrf.mxu3 }
 0x90b   : > { %5603 = vmatpush.bf16.msrb.mxu1 %v14883_v63 }
 0x90c   : > { %12321 = vmatmul.msk.bf16.gmra.mxu2 %vm3473_vm2, %v12303_v41  ;;  %v12387_v41 = vor.u32 %v14854_v50, %v12384_v4 }
 0x90d   : > { %5699 = vmatpush.bf16.msra.mxu2 %v17890_v37 }
 0x90f   : > { %v4510_v3 = vpop.f32.mrf.mxu2  ;;  %5604 = vmatpush.bf16.msrb.mxu1 %v14882_v24 }
 0x910   : > { %v4527_v20 = vadd.f32 %v4510_v3, %v18605_v43  ;;  %v12308_v43 = vld [vmem:[%s20656_s4 + $0x1e8] sm:$0xf0] }
 0x911   : > { %5700 = vmatpush.bf16.msra.mxu2 %v17876_v7  ;;  %v12311_v33 = vor.u32 %v14842_v19, %v12308_v43 }
 0x912   : > { %5045 = vmatmul.bf16.gmra.mxu1 %v12299_v61 }
 0x913   : > { %5605 = vmatpush.bf16.msrb.mxu1 %v14881_v18 }
 0x915   : > { %5701 = vmatpush.bf16.msra.mxu2 %v17863_v25 }
 0x917   : > { %v18750_v54 = vpop.f32.mrf.mxu2  ;;  %5606 = vmatpush.bf16.msrb.mxu1 %v14880_v17 }
 0x919   : > { %5702 = vmatpush.bf16.msra.mxu2 %v17851_v30 }
 0x91b   : > { %5607 = vmatpush.bf16.msrb.mxu1 %v14879_v31 }
 0x91c   : > { %12322 = vmatmul.msk.bf16.gmra.mxu2 %vm3473_vm2, %v12311_v33 }
 0x91f   : > { %v4515_v39 = vpop.f32.mrf.mxu2  ;;  %5608 = vmatpush.bf16.msrb.mxu1 %v14878_v10 }
 0x920   : > { %v4529_v9 = vadd.f32 %v4515_v39, %v18612_v48  ;;  %v12314_v48 = vld [vmem:[%s20656_s4 + $0x1f0] sm:$0xf] }
 0x921   : > { %v12315_v62 = vor.u32 %v14845_v35, %v12314_v48 }
 0x922   : > { %5050 = vmatmul.bf16.gmra.mxu1 %v12307_v44 }
 0x927   : > { %v18776_v11 = vpop.f32.mrf.mxu2 }
 0x92c   : > { %12323 = vmatmul.msk.bf16.gmra.mxu2 %vm3473_vm2, %v12319_v36 }
 0x92f   : > { %v4520_v40 = vpop.f32.mrf.mxu2 }
 0x930   : > { %v4531_v58 = vadd.f32 %v4520_v40, %v18622_v42  ;;  %v4854_v42 = vpop.f32.mrf.mxu3 }
 0x932   : > { %5055 = vmatmul.bf16.gmra.mxu1 %v12315_v62 }
 0x937   : > { %v18786_v60 = vpop.f32.mrf.mxu2 }
 0x938   : > { %20846 = vst [vmem:[#allocation18_spill] sm:$0xff] %v18786_v60 }
 0x93f   : > { %v4726_v57 = vpop.f32.mrf.mxu1  ;;  %v4820_v22 = vpop.f32.mrf.mxu2 }
 0x940   : > { %v18795_v55 = vadd.f32 %v4726_v57, %v18705_v52  ;;  %v4850_v3 = vadd.f32 %v4849_v34, %v4820_v22  ;;  %v4856_v52 = vpop.f32.mrf.mxu3 }
 0x942   : > { %12412 = vmatmul.msk.bf16.vlgmr.msra.gmra.mxu1 %vm3473_vm2, %v12387_v41  ;;  %v14856_v41 = vld [vmem:[%s20656_s4 + $0x214] sm:$0xf] }
 0x943   : > { %5916 = vmatpush.bf16.msra.mxu1 %v17968_v29 }
 0x947   : > { %5917 = vmatpush.bf16.msra.mxu1 %v17953_v14  ;;  %v18800_v63 = vpop.f32.mrf.mxu1  ;;  %v4822_v61 = vpop.f32.mrf.mxu2 }
 0x948   : > { %20847 = vst [vmem:[#allocation8_spill] sm:$0xff] %v18800_v63  ;;  %v4852_v24 = vadd.f32 %v4851_v2, %v4822_v61  ;;  %v4859_v44 = vpop.f32.mrf.mxu3 }
 0x94a   : > { %v4869_v18 = vpack.c.bf16 %v4852_v24, %v4850_v3 }
 0x94b   : > { %5918 = vmatpush.bf16.msra.mxu1 %v17935_v6 }
 0x94c   : > { %4946 = vmatmul.bf16.vlgmr.msra.gmra.mxu0 %v4869_v18 }
 0x94d   : > { %5510 = vmatpush.bf16.msra.mxu0 %v18000_v12 }
 0x94f   : > { %5919 = vmatpush.bf16.msra.mxu1 %v17911_v16  ;;  %v4731_v19 = vpop.f32.mrf.mxu1  ;;  %v4825_v43 = vpop.f32.mrf.mxu2 }
 0x950   : > { %v18805_v33 = vadd.f32 %v4731_v19, %v4527_v20  ;;  %v4855_v47 = vadd.f32 %v4854_v42, %v4825_v43  ;;  %v4861_v26 = vpop.f32.mrf.mxu3  ;;  %v14858_v19 = vld [vmem:[%s20656_s4 + $0x224] sm:$0xf]  ;;  %v12400_v43 = vld [vmem:[%s20656_s4 + $0x228] sm:$0xf0] }
 0x953   : > { %5920 = vmatpush.bf16.msra.mxu1 %v17890_v37 }
 0x957   : > { %5921 = vmatpush.bf16.msra.mxu1 %v17876_v7  ;;  %v18809_v17 = vpop.f32.mrf.mxu1  ;;  %v4827_v51 = vpop.f32.mrf.mxu2 }
 0x958   : > { %v4857_v31 = vadd.f32 %v4856_v52, %v4827_v51  ;;  %v4864_v34 = vpop.f32.mrf.mxu3  ;;  %v12403_v51 = vor.u32 %v14858_v19, %v12400_v43  ;;  %v14898_v19 = vld [vmem:[%s20657_s5 + $0x2a0] sm:$0xff]  ;;  %v14897_v43 = vld [vmem:[%s20657_s5 + $0x298] sm:$0xff] }
 0x95a   : > { %v4870_v39 = vpack.c.bf16 %v4857_v31, %v4855_v47  ;;  %v12382_v47 = vld [vmem:[%s20656_s4 + $0x200] sm:$0xf]  ;;  %v14855_v31 = vld [vmem:[%s20656_s4 + $0x204] sm:$0xf0] }
 0x95b   : > { %5922 = vmatpush.bf16.msra.mxu1 %v17863_v25 }
 0x95c   : > { %4951 = vmatmul.bf16.gmra.mxu0 %v4870_v39 }
 0x95f   : > { %5923 = vmatpush.bf16.msra.mxu1 %v17851_v30  ;;  %v4736_v10 = vpop.f32.mrf.mxu1  ;;  %v4830_v46 = vpop.f32.mrf.mxu2 }
 0x960   : > { %v18813_v20 = vadd.f32 %v4736_v10, %v4529_v9  ;;  %v4860_v35 = vadd.f32 %v4859_v44, %v4830_v46  ;;  %v12392_v9 = vld [vmem:[%s20656_s4 + $0x218] sm:$0xf0]  ;;  %v4866_v22 = vpop.f32.mrf.mxu3 }
 0x961   : > { %v12395_v57 = vor.u32 %v14856_v41, %v12392_v9  ;;  %v12390_v9 = vld [vmem:[%s20656_s4 + $0x210] sm:$0xf] }
 0x963   : > { %12413 = vmatmul.msk.bf16.gmra.mxu1 %vm3473_vm2, %v12395_v57  ;;  %v14857_v57 = vld [vmem:[%s20656_s4 + $0x214] sm:$0xf0] }
 0x967   : > { %v18815_v36 = vpop.f32.mrf.mxu1  ;;  %v4832_v48 = vpop.f32.mrf.mxu2 }
 0x968   : > { %v4862_v62 = vadd.f32 %v4861_v26, %v4832_v48  ;;  %v12383_v26 = vor.u32 %v14855_v31, %v12382_v47  ;;  %v14896_v31 = vld [vmem:[%s20657_s5 + $0x290] sm:$0xff] }
 0x96a   : > { %v4871_v40 = vpack.c.bf16 %v4862_v62, %v4860_v35 }
 0x96c   : > { %4956 = vmatmul.bf16.gmra.mxu0 %v4871_v40  ;;  %v14901_v40 = vld [vmem:[%s20657_s5 + $0x2b8] sm:$0xff] }
 0x96f   : > { %v4741_v2 = vpop.f32.mrf.mxu1  ;;  %v4835_v50 = vpop.f32.mrf.mxu2 }
 0x970   : > { %v18817_v4 = vadd.f32 %v4741_v2, %v4531_v58  ;;  %v4865_v3 = vadd.f32 %v4864_v34, %v4835_v50  ;;  %v14900_v34 = vld [vmem:[%s20657_s5 + $0x2b0] sm:$0xff]  ;;  %v12408_v50 = vld [vmem:[%s20656_s4 + $0x238] sm:$0xf0] }
 0x971   : > { %v14860_v2 = vld [vmem:[%s20656_s4 + $0x234] sm:$0xf] }
 0x972   : > { %v12411_v41 = vor.u32 %v14860_v2, %v12408_v50 }
 0x973   : > { %12414 = vmatmul.msk.bf16.gmra.mxu1 %vm3473_vm2, %v12403_v51 }
 0x977   : > { %v18826_v42 = vpop.f32.mrf.mxu1  ;;  %v4837_v61 = vpop.f32.mrf.mxu2 }
 0x978   : > { %20848 = vst [vmem:[#allocation36_spill] sm:$0xff] %v18826_v42  ;;  %v4867_v24 = vadd.f32 %v4866_v22, %v4837_v61 }
 0x97a   : > { %v4872_v18 = vpack.c.bf16 %v4867_v24, %v4865_v3  ;;  %v14899_v24 = vld [vmem:[%s20657_s5 + $0x2a8] sm:$0xff] }
 0x97c   : > { %4961 = vmatmul.bf16.gmra.mxu0 %v4872_v18 }
 0x97f   : > { %v5041_v58 = vpop.f32.mrf.mxu1  ;;  %v5070_v52 = vpop.f32.mrf.mxu2 }
 0x980   : > { %v5071_v44 = vadd.f32 %v5070_v52, %v5041_v58  ;;  %v12391_v58 = vor.u32 %v14857_v57, %v12390_v9  ;;  %v14861_v9 = vld [vmem:[%s20656_s4 + $0x234] sm:$0xf0] }
 0x983   : > { %12415 = vmatmul.msk.bf16.gmra.mxu1 %vm3473_vm2, %v12411_v41  ;;  %v12406_v41 = vld [vmem:[%s20656_s4 + $0x230] sm:$0xf] }
 0x987   : > { %v5043_v39 = vpop.f32.mrf.mxu1  ;;  %v5072_v10 = vpop.f32.mrf.mxu2 }
 0x988   : > { %v5073_v46 = vadd.f32 %v5072_v10, %v5043_v39  ;;  %v14859_v39 = vld [vmem:[%s20656_s4 + $0x224] sm:$0xf0] }
 0x989   : > { %v14895_v10 = vld [vmem:[%s20657_s5 + $0x288] sm:$0xff] }
 0x98a   : > { %v5090_v48 = vpack.c.bf16 %v5073_v46, %v5071_v44  ;;  %v12398_v44 = vld [vmem:[%s20656_s4 + $0x220] sm:$0xf] }
 0x98c   : > { %5167 = vmatmul.bf16.vlgmr.msrb.gmra.mxu3 %v5090_v48  ;;  %5261 = vmatmul.bf16.vlgmr.msrb.gmra.mxu0 %v12383_v26 }
 0x98d   : > { %5731 = vmatpush.bf16.msrb.mxu3 %v18000_v12  ;;  %5822 = vmatpush.bf16.msrb.mxu0 %v14901_v40 }
 0x98f   : > { %v5046_v35 = vpop.f32.mrf.mxu1  ;;  %v5075_v62 = vpop.f32.mrf.mxu2 }
 0x990   : > { %v5076_v22 = vadd.f32 %v5075_v62, %v5046_v35  ;;  %v12399_v62 = vor.u32 %v14859_v39, %v12398_v44  ;;  %v14917_v39 = vld [vmem:[%s20657_s5 + $0x2f8] sm:$0xff] }
 0x991   : > { %5823 = vmatpush.bf16.msrb.mxu0 %v14900_v34  ;;  %v14894_v34 = vld [vmem:[%s20657_s5 + $0x280] sm:$0xff] }
 0x995   : > { %5824 = vmatpush.bf16.msrb.mxu0 %v14899_v24  ;;  %v12407_v24 = vor.u32 %v14861_v9, %v12406_v41  ;;  %v14914_v41 = vld [vmem:[%s20657_s5 + $0x2e0] sm:$0xff]  ;;  %v14913_v9 = vld [vmem:[%s20657_s5 + $0x2d8] sm:$0xff] }
 0x997   : > { %v5048_v61 = vpop.f32.mrf.mxu1  ;;  %v5077_v3 = vpop.f32.mrf.mxu2 }
 0x998   : > { %v5078_v18 = vadd.f32 %v5077_v3, %v5048_v61 }
 0x999   : > { %5825 = vmatpush.bf16.msrb.mxu0 %v14898_v19  ;;  %v14870_v19 = vld [vmem:[%s20656_s4 + $0x244] sm:$0xf] }
 0x99a   : > { %v5091_v52 = vpack.c.bf16 %v5078_v18, %v5076_v22 }
 0x99c   : > { %5172 = vmatmul.bf16.gmra.mxu3 %v5091_v52  ;;  %5266 = vmatmul.bf16.gmra.mxu0 %v12391_v58  ;;  %v12474_v58 = vld [vmem:[%s20656_s4 + $0x240] sm:$0xf]  ;;  %v14871_v52 = vld [vmem:[%s20656_s4 + $0x244] sm:$0xf0] }
 0x99d   : > { %5826 = vmatpush.bf16.msrb.mxu0 %v14897_v43  ;;  %v12476_v43 = vld [vmem:[%s20656_s4 + $0x248] sm:$0xf0] }
 0x99f   : > { %v5051_v51 = vpop.f32.mrf.mxu1  ;;  %v5080_v47 = vpop.f32.mrf.mxu2 }
 0x9a0   : > { %v5081_v46 = vadd.f32 %v5080_v47, %v5051_v51  ;;  %v12475_v51 = vor.u32 %v14871_v52, %v12474_v58  ;;  %v12479_v47 = vor.u32 %v14870_v19, %v12476_v43 }
 0x9a1   : > { %5827 = vmatpush.bf16.msrb.mxu0 %v14896_v31 }
 0x9a5   : > { %5828 = vmatpush.bf16.msrb.mxu0 %v14895_v10 }
 0x9a7   : > { %v5053_v26 = vpop.f32.mrf.mxu1  ;;  %v5082_v48 = vpop.f32.mrf.mxu2 }
 0x9a8   : > { %v5083_v35 = vadd.f32 %v5082_v48, %v5053_v26  ;;  %v14915_v26 = vld [vmem:[%s20657_s5 + $0x2e8] sm:$0xff]  ;;  %v14873_v48 = vld [vmem:[%s20656_s4 + $0x254] sm:$0xf0] }
 0x9a9   : > { %5829 = vmatpush.bf16.msrb.mxu0 %v14894_v34 }
 0x9aa   : > { %v5092_v40 = vpack.c.bf16 %v5083_v35, %v5081_v46  ;;  %v14916_v46 = vld [vmem:[%s20657_s5 + $0x2f0] sm:$0xff] }
 0x9ab   : > { %v14872_v35 = vld [vmem:[%s20656_s4 + $0x254] sm:$0xf] }
 0x9ac   : > { %5177 = vmatmul.bf16.gmra.mxu3 %v5092_v40  ;;  %5271 = vmatmul.bf16.gmra.mxu0 %v12399_v62  ;;  %v12484_v62 = vld [vmem:[%s20656_s4 + $0x258] sm:$0xf0] }
 0x9ad   : > { %v12487_v34 = vor.u32 %v14872_v35, %v12484_v62 }
 0x9af   : > { %v5056_v2 = vpop.f32.mrf.mxu1  ;;  %v5085_v50 = vpop.f32.mrf.mxu2 }
 0x9b0   : > { %v5086_v57 = vadd.f32 %v5085_v50, %v5056_v2 }
 0x9b7   : > { %v5058_v22 = vpop.f32.mrf.mxu1  ;;  %v5087_v61 = vpop.f32.mrf.mxu2 }
 0x9b8   : > { %v5088_v3 = vadd.f32 %v5087_v61, %v5058_v22  ;;  %v12490_v22 = vld [vmem:[%s20656_s4 + $0x260] sm:$0xf]  ;;  %v14875_v61 = vld [vmem:[%s20656_s4 + $0x264] sm:$0xf0] }
 0x9b9   : > { %v12491_v58 = vor.u32 %v14875_v61, %v12490_v22 }
 0x9ba   : > { %v5093_v18 = vpack.c.bf16 %v5088_v3, %v5086_v57  ;;  %v14874_v3 = vld [vmem:[%s20656_s4 + $0x264] sm:$0xf] }
 0x9bc   : > { %5182 = vmatmul.bf16.gmra.mxu3 %v5093_v18  ;;  %5276 = vmatmul.bf16.gmra.mxu0 %v12407_v24  ;;  %v12492_v24 = vld [vmem:[%s20656_s4 + $0x268] sm:$0xf0] }
 0x9bd   : > { %v14911_v18 = vld [vmem:[%s20657_s5 + $0x2c8] sm:$0xff]  ;;  %v12495_v52 = vor.u32 %v14874_v3, %v12492_v24 }
 0x9bf   : > { %v5291_v62 = vpop.f32.mrf.mxu1 }
 0x9c9   : > { %v4947_v31 = vpop.f32.mrf.mxu0 }
 0x9ca   : > { %v18904_v44 = vadd.f32 %v4947_v31, %v18795_v55  ;;  %v12482_v55 = vld [vmem:[%s20656_s4 + $0x250] sm:$0xf] }
 0x9cb   : > { %v12483_v40 = vor.u32 %v14873_v48, %v12482_v55  ;;  %v12498_v31 = vld [vmem:[%s20656_s4 + $0x270] sm:$0xf] }
 0x9cc   : > { %5482 = vmatmul.bf16.vlgmr.msra.gmra.mxu3 %v12475_v51  ;;  %12504 = vmatmul.msk.bf16.vlgmr.msra.gmra.mxu0 %vm3473_vm2, %v12479_v47  ;;  %v14910_v51 = vld [vmem:[%s20657_s5 + $0x2c0] sm:$0xff] }
 0x9cd   : > { %6137 = vmatpush.bf16.msra.mxu0 %v17968_v29  ;;  %6043 = vmatpush.bf16.msra.mxu3 %v14917_v39  ;;  %v14877_v39 = vld [vmem:[%s20656_s4 + $0x274] sm:$0xf0] }
 0x9ce   : > { %v12499_v55 = vor.u32 %v14877_v39, %v12498_v31 }
 0x9d1   : > { %6138 = vmatpush.bf16.msra.mxu0 %v17953_v14  ;;  %v18912_v10 = vpop.f32.mrf.mxu0  ;;  %6044 = vmatpush.bf16.msra.mxu3 %v14916_v46  ;;  %v12500_v46 = vld [vmem:[%s20656_s4 + $0x278] sm:$0xf0] }
 0x9d2   : > { %20849 = vst [vmem:[#allocation41_spill] sm:$0xff] %v18912_v10 }
 0x9d5   : > { %6139 = vmatpush.bf16.msra.mxu0 %v17935_v6  ;;  %6045 = vmatpush.bf16.msra.mxu3 %v14915_v26 }
 0x9d9   : > { %6140 = vmatpush.bf16.msra.mxu0 %v17911_v16  ;;  %v4952_v2 = vpop.f32.mrf.mxu0  ;;  %6046 = vmatpush.bf16.msra.mxu3 %v14914_v41  ;;  %v5293_v41 = vpop.f32.mrf.mxu1 }
 0x9da   : > { %v18935_v50 = vadd.f32 %v4952_v2, %v18805_v33  ;;  %v14912_v33 = vld [vmem:[%s20657_s5 + $0x2d0] sm:$0xff]  ;;  %v12568_v2 = vld [vmem:[%s20656_s4 + $0x288] sm:$0xf0] }
 0x9dc   : > { %5487 = vmatmul.bf16.gmra.mxu3 %v12483_v40  ;;  %12505 = vmatmul.msk.bf16.gmra.mxu0 %vm3473_vm2, %v12487_v34  ;;  %v14886_v34 = vld [vmem:[%s20656_s4 + $0x284] sm:$0xf] }
 0x9dd   : > { %6141 = vmatpush.bf16.msra.mxu0 %v17890_v37  ;;  %6047 = vmatpush.bf16.msra.mxu3 %v14913_v9  ;;  %v12571_v9 = vor.u32 %v14886_v34, %v12568_v2 }
 0x9e1   : > { %6142 = vmatpush.bf16.msra.mxu0 %v17876_v7  ;;  %v18946_v57 = vpop.f32.mrf.mxu0  ;;  %6048 = vmatpush.bf16.msra.mxu3 %v14912_v33  ;;  %v5296_v22 = vpop.f32.mrf.mxu1 }
 0x9e5   : > { %6143 = vmatpush.bf16.msra.mxu0 %v17863_v25  ;;  %6049 = vmatpush.bf16.msra.mxu3 %v14911_v18 }
 0x9e9   : > { %6144 = vmatpush.bf16.msra.mxu0 %v17851_v30  ;;  %v4957_v19 = vpop.f32.mrf.mxu0  ;;  %6050 = vmatpush.bf16.msra.mxu3 %v14910_v51  ;;  %v5298_v51 = vpop.f32.mrf.mxu1 }
 0x9ea   : > { %v4971_v43 = vadd.f32 %v4957_v19, %v18813_v20  ;;  %v14876_v20 = vld [vmem:[%s20656_s4 + $0x274] sm:$0xf] }
 0x9eb   : > { %v12503_v26 = vor.u32 %v14876_v20, %v12500_v46 }
 0x9ec   : > { %5492 = vmatmul.bf16.gmra.mxu3 %v12491_v58  ;;  %12506 = vmatmul.msk.bf16.gmra.mxu0 %vm3473_vm2, %v12495_v52 }
 0x9f1   : > { %v18973_v47 = vpop.f32.mrf.mxu0 }
 0x9f9   : > { %v4962_v48 = vpop.f32.mrf.mxu0 }
 0x9fa   : > { %v4973_v35 = vadd.f32 %v4962_v48, %v18817_v4 }
 0x9fc   : > { %5497 = vmatmul.bf16.gmra.mxu3 %v12499_v55  ;;  %12507 = vmatmul.msk.bf16.gmra.mxu0 %vm3473_vm2, %v12503_v26  ;;  %v5301_v55 = vpop.f32.mrf.mxu1 }
 0xa01   : > { %v18989_v40 = vpop.f32.mrf.mxu0 }
 0xa02   : > { %20850 = vst [vmem:[#allocation20_spill] sm:$0xff] %v18989_v40 }
 0xa04   : > { %v5303_v34 = vpop.f32.mrf.mxu1 }
 0xa09   : > { %v5262_v33 = vpop.f32.mrf.mxu0 }
 0xa0a   : > { %v5292_v24 = vadd.f32 %v5291_v62, %v5262_v33 }
 0xa0c   : > { %12596 = vmatmul.msk.bf16.vlgmr.msrb.gmra.mxu3 %vm3473_vm2, %v12571_v9 }
 0xa0d   : > { %6358 = vmatpush.bf16.msrb.mxu3 %v17968_v29 }
 0xa0f   : > { %v5168_v4 = vpop.f32.mrf.mxu3 }
 0xa10   : > { %v19000_v61 = vadd.f32 %v5168_v4, %v18904_v44 }
 0xa11   : > { %6359 = vmatpush.bf16.msrb.mxu3 %v17953_v14  ;;  %v5264_v3 = vpop.f32.mrf.mxu0 }
 0xa12   : > { %v5294_v18 = vadd.f32 %v5293_v41, %v5264_v3  ;;  %v5306_v3 = vpop.f32.mrf.mxu1 }
 0xa14   : > { %v5311_v58 = vpack.c.bf16 %v5294_v18, %v5292_v24  ;;  %v14888_v18 = vld [vmem:[%s20656_s4 + $0x294] sm:$0xf] }
 0xa15   : > { %6360 = vmatpush.bf16.msrb.mxu3 %v17935_v6 }
 0xa16   : > { %5388 = vmatmul.bf16.vlgmr.msrb.gmra.mxu2 %v5311_v58  ;;  %v12576_v58 = vld [vmem:[%s20656_s4 + $0x298] sm:$0xf0] }
 0xa17   : > { %5952 = vmatpush.bf16.msrb.mxu2 %v18000_v12  ;;  %v19005_v52 = vpop.f32.mrf.mxu3 }
 0xa18   : > { %20851 = vst [vmem:[#allocation19_spill] sm:$0xff] %v19005_v52 }
 0xa19   : > { %6361 = vmatpush.bf16.msrb.mxu3 %v17911_v16  ;;  %v5267_v19 = vpop.f32.mrf.mxu0 }
 0xa1a   : > { %v5297_v20 = vadd.f32 %v5296_v22, %v5267_v19  ;;  %v12579_v19 = vor.u32 %v14888_v18, %v12576_v58 }
 0xa1c   : > { %12597 = vmatmul.msk.bf16.gmra.mxu3 %vm3473_vm2, %v12579_v19 }
 0xa1d   : > { %6362 = vmatpush.bf16.msrb.mxu3 %v17890_v37 }
 0xa1f   : > { %v5173_v44 = vpop.f32.mrf.mxu3 }
 0xa20   : > { %v19010_v31 = vadd.f32 %v5173_v44, %v18935_v50 }
 0xa21   : > { %6363 = vmatpush.bf16.msrb.mxu3 %v17876_v7  ;;  %v5269_v39 = vpop.f32.mrf.mxu0 }
 0xa22   : > { %v5299_v46 = vadd.f32 %v5298_v51, %v5269_v39  ;;  %v5308_v39 = vpop.f32.mrf.mxu1 }
 0xa24   : > { %v5312_v26 = vpack.c.bf16 %v5299_v46, %v5297_v20 }
 0xa25   : > { %6364 = vmatpush.bf16.msrb.mxu3 %v17863_v25 }
 0xa26   : > { %5393 = vmatmul.bf16.gmra.mxu2 %v5312_v26 }
 0xa27   : > { %v19014_v48 = vpop.f32.mrf.mxu3 }
 0xa29   : > { %6365 = vmatpush.bf16.msrb.mxu3 %v17851_v30  ;;  %v5272_v62 = vpop.f32.mrf.mxu0 }
 0xa2a   : > { %v5302_v9 = vadd.f32 %v5301_v55, %v5272_v62 }
 0xa2f   : > { %v5178_v2 = vpop.f32.mrf.mxu3 }
 0xa30   : > { %v19017_v41 = vadd.f32 %v5178_v2, %v4971_v43 }
 0xa31   : > { %v5274_v50 = vpop.f32.mrf.mxu0 }
 0xa32   : > { %v5304_v33 = vadd.f32 %v5303_v34, %v5274_v50  ;;  %v14890_v34 = vld [vmem:[%s20656_s4 + $0x2a4] sm:$0xf] }
 0xa34   : > { %v5313_v4 = vpack.c.bf16 %v5304_v33, %v5302_v9  ;;  %v12566_v9 = vld [vmem:[%s20656_s4 + $0x280] sm:$0xf]  ;;  %v14887_v33 = vld [vmem:[%s20656_s4 + $0x284] sm:$0xf0] }
 0xa36   : > { %5398 = vmatmul.bf16.gmra.mxu2 %v5313_v4 }
 0xa37   : > { %v19019_v22 = vpop.f32.mrf.mxu3 }
 0xa39   : > { %v5277_v24 = vpop.f32.mrf.mxu0 }
 0xa3a   : > { %v5307_v20 = vadd.f32 %v5306_v3, %v5277_v24  ;;  %v12567_v3 = vor.u32 %v14887_v33, %v12566_v9  ;;  %v14930_v33 = vld [vmem:[%s20657_s5 + $0x320] sm:$0xff] }
 0xa3f   : > { %v5183_v43 = vpop.f32.mrf.mxu3 }
 0xa40   : > { %v19027_v51 = vadd.f32 %v5183_v43, %v4973_v35  ;;  %v12584_v35 = vld [vmem:[%s20656_s4 + $0x2a8] sm:$0xf0]  ;;  %v14933_v43 = vld [vmem:[%s20657_s5 + $0x338] sm:$0xff] }
 0xa41   : > { %v5279_v44 = vpop.f32.mrf.mxu0  ;;  %v12587_v2 = vor.u32 %v14890_v34, %v12584_v35  ;;  %v12574_v34 = vld [vmem:[%s20656_s4 + $0x290] sm:$0xf]  ;;  %v14889_v35 = vld [vmem:[%s20656_s4 + $0x294] sm:$0xf0] }
 0xa42   : > { %v5309_v46 = vadd.f32 %v5308_v39, %v5279_v44  ;;  %v14932_v39 = vld [vmem:[%s20657_s5 + $0x330] sm:$0xff]  ;;  %v12575_v9 = vor.u32 %v14889_v35, %v12574_v34  ;;  %v14926_v34 = vld [vmem:[%s20657_s5 + $0x300] sm:$0xff] }
 0xa43   : > { %12598 = vmatmul.msk.bf16.gmra.mxu3 %vm3473_vm2, %v12587_v2  ;;  %v14931_v2 = vld [vmem:[%s20657_s5 + $0x328] sm:$0xff] }
 0xa44   : > { %v5314_v55 = vpack.c.bf16 %v5309_v46, %v5307_v20  ;;  %v14892_v20 = vld [vmem:[%s20656_s4 + $0x2b4] sm:$0xf]  ;;  %v12592_v46 = vld [vmem:[%s20656_s4 + $0x2b8] sm:$0xf0] }
 0xa46   : > { %5403 = vmatmul.bf16.gmra.mxu2 %v5314_v55  ;;  %v12595_v55 = vor.u32 %v14892_v20, %v12592_v46  ;;  %v14891_v20 = vld [vmem:[%s20656_s4 + $0x2a4] sm:$0xf0] }
 0xa47   : > { %v19030_v26 = vpop.f32.mrf.mxu3  ;;  %v14927_v46 = vld [vmem:[%s20657_s5 + $0x308] sm:$0xff] }
 0xa48   : > { %20852 = vst [vmem:[#allocation38_spill] sm:$0xff] %v19030_v26 }
 0xa49   : > { %v5512_v62 = vpop.f32.mrf.mxu0 }
 0xa4f   : > { %v5483_v50 = vpop.f32.mrf.mxu3 }
 0xa50   : > { %v5513_v24 = vadd.f32 %v5512_v62, %v5483_v50 }
 0xa51   : > { %v5514_v4 = vpop.f32.mrf.mxu0 }
 0xa53   : > { %12599 = vmatmul.msk.bf16.gmra.mxu3 %vm3473_vm2, %v12595_v55 }
 0xa56   : > { %5703 = vmatmul.bf16.vlgmr.msra.gmra.mxu2 %v12567_v3 }
 0xa57   : > { %v5485_v18 = vpop.f32.mrf.mxu3  ;;  %6264 = vmatpush.bf16.msra.mxu2 %v14933_v43 }
 0xa58   : > { %v5515_v58 = vadd.f32 %v5514_v4, %v5485_v18 }
 0xa59   : > { %v5517_v19 = vpop.f32.mrf.mxu0 }
 0xa5a   : > { %v5532_v44 = vpack.c.bf16 %v5515_v58, %v5513_v24  ;;  %v14929_v58 = vld [vmem:[%s20657_s5 + $0x318] sm:$0xff] }
 0xa5b   : > { %6265 = vmatpush.bf16.msra.mxu2 %v14932_v39 }
 0xa5c   : > { %5609 = vmatmul.bf16.vlgmr.msrb.gmra.mxu1 %v5532_v44  ;;  %v14928_v44 = vld [vmem:[%s20657_s5 + $0x310] sm:$0xff] }
 0xa5d   : > { %6173 = vmatpush.bf16.msrb.mxu1 %v18000_v12 }
 0xa5f   : > { %v5488_v62 = vpop.f32.mrf.mxu3  ;;  %6266 = vmatpush.bf16.msra.mxu2 %v14931_v2 }
 0xa60   : > { %v5518_v4 = vadd.f32 %v5517_v19, %v5488_v62  ;;  %v12582_v19 = vld [vmem:[%s20656_s4 + $0x2a0] sm:$0xf] }
 0xa61   : > { %v5519_v50 = vpop.f32.mrf.mxu0  ;;  %v12583_v62 = vor.u32 %v14891_v20, %v12582_v19  ;;  %v14902_v20 = vld [vmem:[%s20656_s4 + $0x2c4] sm:$0xf] }
 0xa63   : > { %6267 = vmatpush.bf16.msra.mxu2 %v14930_v33 }
 0xa66   : > { %5708 = vmatmul.bf16.gmra.mxu2 %v12575_v9 }
 0xa67   : > { %v5490_v3 = vpop.f32.mrf.mxu3  ;;  %6268 = vmatpush.bf16.msra.mxu2 %v14929_v58 }
 0xa68   : > { %v5520_v24 = vadd.f32 %v5519_v50, %v5490_v3  ;;  %v12590_v3 = vld [vmem:[%s20656_s4 + $0x2b0] sm:$0xf] }
 0xa69   : > { %v5522_v18 = vpop.f32.mrf.mxu0 }
 0xa6a   : > { %v5533_v43 = vpack.c.bf16 %v5520_v24, %v5518_v4  ;;  %v14893_v24 = vld [vmem:[%s20656_s4 + $0x2b4] sm:$0xf0] }
 0xa6b   : > { %6269 = vmatpush.bf16.msra.mxu2 %v14928_v44  ;;  %v12591_v58 = vor.u32 %v14893_v24, %v12590_v3  ;;  %v14948_v24 = vld [vmem:[%s20657_s5 + $0x370] sm:$0xff] }
 0xa6c   : > { %5614 = vmatmul.bf16.gmra.mxu1 %v5533_v43 }
 0xa6f   : > { %v5493_v39 = vpop.f32.mrf.mxu3  ;;  %6270 = vmatpush.bf16.msra.mxu2 %v14927_v46  ;;  %v12660_v46 = vld [vmem:[%s20656_s4 + $0x2c8] sm:$0xf0] }
 0xa70   : > { %v5523_v35 = vadd.f32 %v5522_v18, %v5493_v39 }
 0xa71   : > { %v5524_v55 = vpop.f32.mrf.mxu0 }
 0xa73   : > { %6271 = vmatpush.bf16.msra.mxu2 %v14926_v34  ;;  %v14903_v34 = vld [vmem:[%s20656_s4 + $0x2c4] sm:$0xf0] }
 0xa76   : > { %5713 = vmatmul.bf16.gmra.mxu2 %v12583_v62  ;;  %v12658_v62 = vld [vmem:[%s20656_s4 + $0x2c0] sm:$0xf] }
 0xa77   : > { %v5495_v2 = vpop.f32.mrf.mxu3 }
 0xa78   : > { %v5525_v50 = vadd.f32 %v5524_v55, %v5495_v2  ;;  %v12663_v55 = vor.u32 %v14902_v20, %v12660_v46  ;;  %v14946_v20 = vld [vmem:[%s20657_s5 + $0x360] sm:$0xff]  ;;  %v14945_v46 = vld [vmem:[%s20657_s5 + $0x358] sm:$0xff] }
 0xa79   : > { %v5527_v33 = vpop.f32.mrf.mxu0 }
 0xa7a   : > { %v5534_v9 = vpack.c.bf16 %v5525_v50, %v5523_v35  ;;  %v12659_v35 = vor.u32 %v14903_v34, %v12658_v62 }
 0xa7c   : > { %5619 = vmatmul.bf16.gmra.mxu1 %v5534_v9  ;;  %v14949_v9 = vld [vmem:[%s20657_s5 + $0x378] sm:$0xff] }
 0xa7f   : > { %v5498_v4 = vpop.f32.mrf.mxu3 }
 0xa80   : > { %v5528_v44 = vadd.f32 %v5527_v33, %v5498_v4  ;;  %v14904_v33 = vld [vmem:[%s20656_s4 + $0x2d4] sm:$0xf]  ;;  %v12668_v4 = vld [vmem:[%s20656_s4 + $0x2d8] sm:$0xf0] }
 0xa81   : > { %v5529_v43 = vpop.f32.mrf.mxu0  ;;  %v12671_v3 = vor.u32 %v14904_v33, %v12668_v4  ;;  %v14943_v33 = vld [vmem:[%s20657_s5 + $0x348] sm:$0xff] }
 0xa86   : > { %5718 = vmatmul.bf16.gmra.mxu2 %v12591_v58  ;;  %v12666_v58 = vld [vmem:[%s20656_s4 + $0x2d0] sm:$0xf] }
 0xa87   : > { %v5500_v18 = vpop.f32.mrf.mxu3 }
 0xa88   : > { %v5530_v39 = vadd.f32 %v5529_v43, %v5500_v18  ;;  %v14905_v43 = vld [vmem:[%s20656_s4 + $0x2d4] sm:$0xf0] }
 0xa89   : > { %v12667_v18 = vor.u32 %v14905_v43, %v12666_v58  ;;  %v14942_v58 = vld [vmem:[%s20657_s5 + $0x340] sm:$0xff]  ;;  %v14908_v43 = vld [vmem:[%s20656_s4 + $0x2f4] sm:$0xf] }
 0xa8a   : > { %v5535_v19 = vpack.c.bf16 %v5530_v39, %v5528_v44  ;;  %v14947_v44 = vld [vmem:[%s20657_s5 + $0x368] sm:$0xff] }
 0xa8c   : > { %5624 = vmatmul.bf16.gmra.mxu1 %v5535_v19 }
 0xa96   : > { %12688 = vmatmul.msk.bf16.vlgmr.msrb.gmra.mxu2 %vm3473_vm2, %v12663_v55  ;;  %v14906_v55 = vld [vmem:[%s20656_s4 + $0x2e4] sm:$0xf] }
 0xa97   : > { %6579 = vmatpush.bf16.msrb.mxu2 %v17968_v29 }
 0xa99   : > { %v5389_v2 = vpop.f32.mrf.mxu2 }
 0xa9a   : > { %v19110_v50 = vadd.f32 %v5389_v2, %v19000_v61  ;;  %v12674_v2 = vld [vmem:[%s20656_s4 + $0x2e0] sm:$0xf] }
 0xa9b   : > { %6580 = vmatpush.bf16.msrb.mxu2 %v17953_v14 }
 0xa9c   : > { %5924 = vmatmul.bf16.vlgmr.msra.gmra.mxu1 %v12659_v35  ;;  %v14944_v35 = vld [vmem:[%s20657_s5 + $0x350] sm:$0xff] }
 0xa9d   : > { %6485 = vmatpush.bf16.msra.mxu1 %v14949_v9  ;;  %v14907_v9 = vld [vmem:[%s20656_s4 + $0x2e4] sm:$0xf0] }
 0xa9e   : > { %v12675_v4 = vor.u32 %v14907_v9, %v12674_v2  ;;  %v14918_v9 = vld [vmem:[%s20656_s4 + $0x304] sm:$0xf] }
 0xa9f   : > { %6581 = vmatpush.bf16.msrb.mxu2 %v17935_v6 }
 0xaa1   : > { %v19123_v61 = vpop.f32.mrf.mxu2  ;;  %6486 = vmatpush.bf16.msra.mxu1 %v14948_v24 }
 0xaa2   : > { %20853 = vst [vmem:[#allocation43_spill] sm:$0xff] %v19123_v61 }
 0xaa3   : > { %6582 = vmatpush.bf16.msrb.mxu2 %v17911_v16 }
 0xaa5   : > { %6487 = vmatpush.bf16.msra.mxu1 %v14947_v44  ;;  %v12684_v44 = vld [vmem:[%s20656_s4 + $0x2f8] sm:$0xf0] }
 0xaa6   : > { %12689 = vmatmul.msk.bf16.gmra.mxu2 %vm3473_vm2, %v12671_v3 }
 0xaa7   : > { %6583 = vmatpush.bf16.msrb.mxu2 %v17890_v37 }
 0xaa9   : > { %v5394_v39 = vpop.f32.mrf.mxu2  ;;  %6488 = vmatpush.bf16.msra.mxu1 %v14946_v20  ;;  %v14909_v20 = vld [vmem:[%s20656_s4 + $0x2f4] sm:$0xf0] }
 0xaaa   : > { %v5411_v19 = vadd.f32 %v5394_v39, %v19010_v31  ;;  %v12676_v31 = vld [vmem:[%s20656_s4 + $0x2e8] sm:$0xf0]  ;;  %v12687_v39 = vor.u32 %v14908_v43, %v12684_v44 }
 0xaab   : > { %6584 = vmatpush.bf16.msrb.mxu2 %v17876_v7  ;;  %v12679_v34 = vor.u32 %v14906_v55, %v12676_v31 }
 0xaac   : > { %5929 = vmatmul.bf16.gmra.mxu1 %v12667_v18 }
 0xaad   : > { %6489 = vmatpush.bf16.msra.mxu1 %v14945_v46 }
 0xaaf   : > { %6585 = vmatpush.bf16.msrb.mxu2 %v17863_v25 }
 0xab1   : > { %v19155_v62 = vpop.f32.mrf.mxu2  ;;  %6490 = vmatpush.bf16.msra.mxu1 %v14944_v35 }
 0xab3   : > { %6586 = vmatpush.bf16.msrb.mxu2 %v17851_v30 }
 0xab5   : > { %6491 = vmatpush.bf16.msra.mxu1 %v14943_v33  ;;  %v12752_v33 = vld [vmem:[%s20656_s4 + $0x308] sm:$0xf0] }
 0xab6   : > { %12690 = vmatmul.msk.bf16.gmra.mxu2 %vm3473_vm2, %v12679_v34  ;;  %v5733_v34 = vpop.f32.mrf.mxu3 }
 0xab9   : > { %v5399_v3 = vpop.f32.mrf.mxu2  ;;  %6492 = vmatpush.bf16.msra.mxu1 %v14942_v58 }
 0xaba   : > { %v5413_v24 = vadd.f32 %v5399_v3, %v19017_v41  ;;  %v12682_v41 = vld [vmem:[%s20656_s4 + $0x2f0] sm:$0xf] }
 0xabb   : > { %v12683_v46 = vor.u32 %v14909_v20, %v12682_v41 }
 0xabc   : > { %5934 = vmatmul.bf16.gmra.mxu1 %v12675_v4  ;;  %v12755_v4 = vor.u32 %v14918_v9, %v12752_v33 }
 0xabe   : > { %v5735_v2 = vpop.f32.mrf.mxu3 }
 0xac1   : > { %v19181_v18 = vpop.f32.mrf.mxu2 }
 0xac6   : > { %12691 = vmatmul.msk.bf16.gmra.mxu2 %vm3473_vm2, %v12687_v39 }
 0xac9   : > { %v5404_v55 = vpop.f32.mrf.mxu2 }
 0xaca   : > { %v5415_v31 = vadd.f32 %v5404_v55, %v19027_v51  ;;  %v5738_v51 = vpop.f32.mrf.mxu3 }
 0xacc   : > { %5939 = vmatmul.bf16.gmra.mxu1 %v12683_v46 }
 0xad1   : > { %v19191_v35 = vpop.f32.mrf.mxu2 }
 0xad2   : > { %20854 = vst [vmem:[#allocation29_spill] sm:$0xff] %v19191_v35 }
 0xad9   : > { %v5610_v3 = vpop.f32.mrf.mxu1  ;;  %v5704_v58 = vpop.f32.mrf.mxu2 }
 0xada   : > { %v19200_v43 = vadd.f32 %v5610_v3, %v19110_v50  ;;  %v5734_v41 = vadd.f32 %v5733_v34, %v5704_v58  ;;  %v5740_v50 = vpop.f32.mrf.mxu3 }
 0xadc   : > { %12780 = vmatmul.msk.bf16.vlgmr.msrb.gmra.mxu1 %vm3473_vm2, %v12755_v4 }
 0xadd   : > { %6800 = vmatpush.bf16.msrb.mxu1 %v17968_v29 }
 0xae1   : > { %6801 = vmatpush.bf16.msrb.mxu1 %v17953_v14  ;;  %v19205_v44 = vpop.f32.mrf.mxu1  ;;  %v5706_v39 = vpop.f32.mrf.mxu2 }
 0xae2   : > { %20855 = vst [vmem:[#allocation26_spill] sm:$0xff] %v19205_v44  ;;  %v5736_v20 = vadd.f32 %v5735_v2, %v5706_v39  ;;  %v5743_v58 = vpop.f32.mrf.mxu3 }
 0xae4   : > { %v5753_v46 = vpack.c.bf16 %v5736_v20, %v5734_v41 }
 0xae5   : > { %6802 = vmatpush.bf16.msrb.mxu1 %v17935_v6 }
 0xae6   : > { %5830 = vmatmul.bf16.vlgmr.msrb.gmra.mxu0 %v5753_v46 }
 0xae7   : > { %6394 = vmatpush.bf16.msrb.mxu0 %v18000_v12 }
 0xae9   : > { %6803 = vmatpush.bf16.msrb.mxu1 %v17911_v16  ;;  %v5615_v55 = vpop.f32.mrf.mxu1  ;;  %v5709_v9 = vpop.f32.mrf.mxu2 }
 0xaea   : > { %v19210_v33 = vadd.f32 %v5615_v55, %v5411_v19  ;;  %v5739_v2 = vadd.f32 %v5738_v51, %v5709_v9  ;;  %v5745_v46 = vpop.f32.mrf.mxu3 }
 0xaed   : > { %6804 = vmatpush.bf16.msrb.mxu1 %v17890_v37 }
 0xaf1   : > { %6805 = vmatpush.bf16.msrb.mxu1 %v17876_v7  ;;  %v19214_v4 = vpop.f32.mrf.mxu1  ;;  %v5711_v34 = vpop.f32.mrf.mxu2 }
 0xaf2   : > { %v5741_v3 = vadd.f32 %v5740_v50, %v5711_v34  ;;  %v5748_v51 = vpop.f32.mrf.mxu3 }
 0xaf4   : > { %v5754_v39 = vpack.c.bf16 %v5741_v3, %v5739_v2  ;;  %v14920_v2 = vld [vmem:[%s20656_s4 + $0x314] sm:$0xf] }
 0xaf5   : > { %6806 = vmatpush.bf16.msrb.mxu1 %v17863_v25 }
 0xaf6   : > { %5835 = vmatmul.bf16.gmra.mxu0 %v5754_v39 }
 0xaf9   : > { %6807 = vmatpush.bf16.msrb.mxu1 %v17851_v30  ;;  %v5620_v41 = vpop.f32.mrf.mxu1  ;;  %v5714_v20 = vpop.f32.mrf.mxu2 }
 0xafa   : > { %v19218_v19 = vadd.f32 %v5620_v41, %v5413_v24  ;;  %v5744_v61 = vadd.f32 %v5743_v58, %v5714_v20  ;;  %v12760_v24 = vld [vmem:[%s20656_s4 + $0x318] sm:$0xf0]  ;;  %v5750_v39 = vpop.f32.mrf.mxu3  ;;  %v14922_v20 = vld [vmem:[%s20656_s4 + $0x324] sm:$0xf] }
 0xafb   : > { %v12763_v3 = vor.u32 %v14920_v2, %v12760_v24  ;;  %v12750_v2 = vld [vmem:[%s20656_s4 + $0x300] sm:$0xf] }
 0xafd   : > { %12781 = vmatmul.msk.bf16.gmra.mxu1 %vm3473_vm2, %v12763_v3 }
 0xb01   : > { %v19220_v55 = vpop.f32.mrf.mxu1  ;;  %v5716_v44 = vpop.f32.mrf.mxu2 }
 0xb02   : > { %v5746_v52 = vadd.f32 %v5745_v46, %v5716_v44  ;;  %v12768_v46 = vld [vmem:[%s20656_s4 + $0x328] sm:$0xf0] }
 0xb04   : > { %v5755_v10 = vpack.c.bf16 %v5746_v52, %v5744_v61 }
 0xb06   : > { %5840 = vmatmul.bf16.gmra.mxu0 %v5755_v10 }
 0xb09   : > { %v5625_v50 = vpop.f32.mrf.mxu1  ;;  %v5719_v9 = vpop.f32.mrf.mxu2 }
 0xb0a   : > { %v19222_v34 = vadd.f32 %v5625_v50, %v5415_v31  ;;  %v5749_v52 = vadd.f32 %v5748_v51, %v5719_v9  ;;  %v12771_v50 = vor.u32 %v14922_v20, %v12768_v46  ;;  %v14919_v51 = vld [vmem:[%s20656_s4 + $0x304] sm:$0xf0]  ;;  %v14965_v20 = vld [vmem:[%s20657_s5 + $0x3b8] sm:$0xff] }
 0xb0b   : > { %v12776_v46 = vld [vmem:[%s20656_s4 + $0x338] sm:$0xf0] }
 0xb0d   : > { %12782 = vmatmul.msk.bf16.gmra.mxu1 %vm3473_vm2, %v12771_v50 }
 0xb11   : > { %v19231_v44 = vpop.f32.mrf.mxu1  ;;  %v5721_v10 = vpop.f32.mrf.mxu2 }
 0xb12   : > { %20856 = vst [vmem:[#allocation12_spill] sm:$0xff] %v19231_v44  ;;  %v5751_v61 = vadd.f32 %v5750_v39, %v5721_v10  ;;  %v12751_v10 = vor.u32 %v14919_v51, %v12750_v2  ;;  %v12758_v2 = vld [vmem:[%s20656_s4 + $0x310] sm:$0xf]  ;;  %v14921_v51 = vld [vmem:[%s20656_s4 + $0x314] sm:$0xf0] }
 0xb14   : > { %v5756_v58 = vpack.c.bf16 %v5751_v61, %v5749_v52 }
 0xb16   : > { %5845 = vmatmul.bf16.gmra.mxu0 %v5756_v58 }
 0xb19   : > { %v5925_v31 = vpop.f32.mrf.mxu1  ;;  %v5954_v41 = vpop.f32.mrf.mxu2 }
 0xb1a   : > { %v5955_v9 = vadd.f32 %v5954_v41, %v5925_v31  ;;  %v14964_v31 = vld [vmem:[%s20657_s5 + $0x3b0] sm:$0xff] }
 0xb1b   : > { %v14924_v41 = vld [vmem:[%s20656_s4 + $0x334] sm:$0xf] }
 0xb1c   : > { %v12779_v50 = vor.u32 %v14924_v41, %v12776_v46  ;;  %v14962_v41 = vld [vmem:[%s20657_s5 + $0x3a0] sm:$0xff]  ;;  %v14960_v46 = vld [vmem:[%s20657_s5 + $0x390] sm:$0xff] }
 0xb1e   : > { %12783 = vmatmul.msk.bf16.gmra.mxu1 %vm3473_vm2, %v12779_v50  ;;  %v12766_v50 = vld [vmem:[%s20656_s4 + $0x320] sm:$0xf] }
 0xb21   : > { %v5927_v24 = vpop.f32.mrf.mxu1  ;;  %v5956_v3 = vpop.f32.mrf.mxu2 }
 0xb22   : > { %v5957_v39 = vadd.f32 %v5956_v3, %v5927_v24 }
 0xb24   : > { %v5974_v52 = vpack.c.bf16 %v5957_v39, %v5955_v9  ;;  %v14963_v39 = vld [vmem:[%s20657_s5 + $0x3a8] sm:$0xff] }
 0xb26   : > { %6051 = vmatmul.bf16.vlgmr.msra.gmra.mxu3 %v5974_v52  ;;  %6145 = vmatmul.bf16.vlgmr.msra.gmra.mxu0 %v12751_v10  ;;  %v12759_v52 = vor.u32 %v14921_v51, %v12758_v2  ;;  %v14923_v2 = vld [vmem:[%s20656_s4 + $0x324] sm:$0xf0] }
 0xb27   : > { %6615 = vmatpush.bf16.msra.mxu3 %v18000_v12  ;;  %6706 = vmatpush.bf16.msra.mxu0 %v14965_v20  ;;  %v14959_v51 = vld [vmem:[%s20657_s5 + $0x388] sm:$0xff] }
 0xb29   : > { %v5930_v61 = vpop.f32.mrf.mxu1  ;;  %v5959_v58 = vpop.f32.mrf.mxu2 }
 0xb2a   : > { %v5960_v9 = vadd.f32 %v5959_v58, %v5930_v61  ;;  %v14961_v61 = vld [vmem:[%s20657_s5 + $0x398] sm:$0xff] }
 0xb2b   : > { %6707 = vmatpush.bf16.msra.mxu0 %v14964_v31 }
 0xb2f   : > { %6708 = vmatpush.bf16.msra.mxu0 %v14963_v39 }
 0xb31   : > { %v5932_v24 = vpop.f32.mrf.mxu1  ;;  %v5961_v3 = vpop.f32.mrf.mxu2 }
 0xb32   : > { %v5962_v10 = vadd.f32 %v5961_v3, %v5932_v24 }
 0xb33   : > { %6709 = vmatpush.bf16.msra.mxu0 %v14962_v41 }
 0xb34   : > { %v5975_v20 = vpack.c.bf16 %v5962_v10, %v5960_v9  ;;  %v12767_v10 = vor.u32 %v14923_v2, %v12766_v50 }
 0xb36   : > { %6056 = vmatmul.bf16.gmra.mxu3 %v5975_v20  ;;  %6150 = vmatmul.bf16.gmra.mxu0 %v12759_v52  ;;  %v14958_v20 = vld [vmem:[%s20657_s5 + $0x380] sm:$0xff] }
 0xb37   : > { %6710 = vmatpush.bf16.msra.mxu0 %v14961_v61 }
 0xb39   : > { %v5935_v58 = vpop.f32.mrf.mxu1  ;;  %v5964_v31 = vpop.f32.mrf.mxu2 }
 0xb3a   : > { %v5965_v9 = vadd.f32 %v5964_v31, %v5935_v58  ;;  %v14925_v58 = vld [vmem:[%s20656_s4 + $0x334] sm:$0xf0] }
 0xb3b   : > { %6711 = vmatpush.bf16.msra.mxu0 %v14960_v46  ;;  %v12774_v46 = vld [vmem:[%s20656_s4 + $0x330] sm:$0xf] }
 0xb3f   : > { %6712 = vmatpush.bf16.msra.mxu0 %v14959_v51 }
 0xb41   : > { %v5937_v24 = vpop.f32.mrf.mxu1  ;;  %v5966_v3 = vpop.f32.mrf.mxu2 }
 0xb42   : > { %v5967_v39 = vadd.f32 %v5966_v3, %v5937_v24  ;;  %v12842_v3 = vld [vmem:[%s20656_s4 + $0x340] sm:$0xf] }
 0xb43   : > { %6713 = vmatpush.bf16.msra.mxu0 %v14958_v20 }
 0xb44   : > { %v5976_v52 = vpack.c.bf16 %v5967_v39, %v5965_v9  ;;  %v12775_v9 = vor.u32 %v14925_v58, %v12774_v46  ;;  %v14935_v39 = vld [vmem:[%s20656_s4 + $0x344] sm:$0xf0]  ;;  %v14981_v58 = vld [vmem:[%s20657_s5 + $0x3f8] sm:$0xff] }
 0xb45   : > { %v12843_v20 = vor.u32 %v14935_v39, %v12842_v3 }
 0xb46   : > { %6061 = vmatmul.bf16.gmra.mxu3 %v5976_v52  ;;  %6155 = vmatmul.bf16.gmra.mxu0 %v12767_v10  ;;  %v14934_v10 = vld [vmem:[%s20656_s4 + $0x344] sm:$0xf]  ;;  %v12844_v52 = vld [vmem:[%s20656_s4 + $0x348] sm:$0xf0] }
 0xb49   : > { %v5940_v41 = vpop.f32.mrf.mxu1  ;;  %v5969_v61 = vpop.f32.mrf.mxu2 }
 0xb4a   : > { %v5970_v31 = vadd.f32 %v5969_v61, %v5940_v41  ;;  %v12847_v41 = vor.u32 %v14934_v10, %v12844_v52 }
 0xb51   : > { %v5942_v50 = vpop.f32.mrf.mxu1  ;;  %v5971_v2 = vpop.f32.mrf.mxu2 }
 0xb52   : > { %v5972_v51 = vadd.f32 %v5971_v2, %v5942_v50  ;;  %v14980_v50 = vld [vmem:[%s20657_s5 + $0x3f0] sm:$0xff]  ;;  %v14979_v2 = vld [vmem:[%s20657_s5 + $0x3e8] sm:$0xff] }
 0xb54   : > { %v5977_v24 = vpack.c.bf16 %v5972_v51, %v5970_v31  ;;  %v14937_v51 = vld [vmem:[%s20656_s4 + $0x354] sm:$0xf0] }
 0xb56   : > { %6066 = vmatmul.bf16.gmra.mxu3 %v5977_v24  ;;  %6160 = vmatmul.bf16.gmra.mxu0 %v12775_v9  ;;  %v14936_v9 = vld [vmem:[%s20656_s4 + $0x354] sm:$0xf]  ;;  %v12852_v24 = vld [vmem:[%s20656_s4 + $0x358] sm:$0xf0] }
 0xb57   : > { %v12855_v39 = vor.u32 %v14936_v9, %v12852_v24 }
 0xb63   : > { %v5831_v61 = vpop.f32.mrf.mxu0 }
 0xb64   : > { %v19309_v46 = vadd.f32 %v5831_v61, %v19200_v43  ;;  %v12850_v43 = vld [vmem:[%s20656_s4 + $0x350] sm:$0xf] }
 0xb65   : > { %v12851_v3 = vor.u32 %v14937_v51, %v12850_v43  ;;  %v14938_v43 = vld [vmem:[%s20656_s4 + $0x364] sm:$0xf]  ;;  %v14975_v51 = vld [vmem:[%s20657_s5 + $0x3c8] sm:$0xff] }
 0xb66   : > { %6366 = vmatmul.bf16.vlgmr.msrb.gmra.mxu3 %v12843_v20  ;;  %12872 = vmatmul.msk.bf16.vlgmr.msrb.gmra.mxu0 %vm3473_vm2, %v12847_v41  ;;  %v14978_v20 = vld [vmem:[%s20657_s5 + $0x3e0] sm:$0xff]  ;;  %v14977_v41 = vld [vmem:[%s20657_s5 + $0x3d8] sm:$0xff] }
 0xb67   : > { %7021 = vmatpush.bf16.msrb.mxu0 %v17968_v29  ;;  %6927 = vmatpush.bf16.msrb.mxu3 %v14981_v58  ;;  %v12858_v58 = vld [vmem:[%s20656_s4 + $0x360] sm:$0xf] }
 0xb6b   : > { %7022 = vmatpush.bf16.msrb.mxu0 %v17953_v14  ;;  %v19317_v31 = vpop.f32.mrf.mxu0  ;;  %6928 = vmatpush.bf16.msrb.mxu3 %v14980_v50  ;;  %v14939_v50 = vld [vmem:[%s20656_s4 + $0x364] sm:$0xf0] }
 0xb6c   : > { %20857 = vst [vmem:[#allocation21_spill] sm:$0xff] %v19317_v31  ;;  %v12859_v9 = vor.u32 %v14939_v50, %v12858_v58  ;;  %v12868_v58 = vld [vmem:[%s20656_s4 + $0x378] sm:$0xf0] }
 0xb6f   : > { %7023 = vmatpush.bf16.msrb.mxu0 %v17935_v6  ;;  %6929 = vmatpush.bf16.msrb.mxu3 %v14979_v2  ;;  %v12860_v2 = vld [vmem:[%s20656_s4 + $0x368] sm:$0xf0] }
 0xb70   : > { %v12863_v24 = vor.u32 %v14938_v43, %v12860_v2 }
 0xb73   : > { %7024 = vmatpush.bf16.msrb.mxu0 %v17911_v16  ;;  %v5836_v10 = vpop.f32.mrf.mxu0  ;;  %6930 = vmatpush.bf16.msrb.mxu3 %v14978_v20 }
 0xb74   : > { %v19340_v52 = vadd.f32 %v5836_v10, %v19210_v33  ;;  %v14976_v33 = vld [vmem:[%s20657_s5 + $0x3d0] sm:$0xff]  ;;  %v14974_v10 = vld [vmem:[%s20657_s5 + $0x3c0] sm:$0xff] }
 0xb76   : > { %6371 = vmatmul.bf16.gmra.mxu3 %v12851_v3  ;;  %12873 = vmatmul.msk.bf16.gmra.mxu0 %vm3473_vm2, %v12855_v39 }
 0xb77   : > { %7025 = vmatpush.bf16.msrb.mxu0 %v17890_v37  ;;  %6931 = vmatpush.bf16.msrb.mxu3 %v14977_v41  ;;  %v12866_v41 = vld [vmem:[%s20656_s4 + $0x370] sm:$0xf] }
 0xb7b   : > { %7026 = vmatpush.bf16.msrb.mxu0 %v17876_v7  ;;  %v19351_v61 = vpop.f32.mrf.mxu0  ;;  %6932 = vmatpush.bf16.msrb.mxu3 %v14976_v33  ;;  %v14941_v33 = vld [vmem:[%s20656_s4 + $0x374] sm:$0xf0] }
 0xb7c   : > { %v12867_v50 = vor.u32 %v14941_v33, %v12866_v41 }
 0xb7f   : > { %7027 = vmatpush.bf16.msrb.mxu0 %v17863_v25  ;;  %6933 = vmatpush.bf16.msrb.mxu3 %v14975_v51 }
 0xb83   : > { %7028 = vmatpush.bf16.msrb.mxu0 %v17851_v30  ;;  %v5841_v3 = vpop.f32.mrf.mxu0  ;;  %6934 = vmatpush.bf16.msrb.mxu3 %v14974_v10  ;;  %v12936_v10 = vld [vmem:[%s20656_s4 + $0x388] sm:$0xf0] }
 0xb84   : > { %v5855_v39 = vadd.f32 %v5841_v3, %v19218_v19  ;;  %v14940_v19 = vld [vmem:[%s20656_s4 + $0x374] sm:$0xf]  ;;  %v14950_v3 = vld [vmem:[%s20656_s4 + $0x384] sm:$0xf] }
 0xb85   : > { %v12871_v43 = vor.u32 %v14940_v19, %v12868_v58  ;;  %v12939_v41 = vor.u32 %v14950_v3, %v12936_v10 }
 0xb86   : > { %6376 = vmatmul.bf16.gmra.mxu3 %v12859_v9  ;;  %12874 = vmatmul.msk.bf16.gmra.mxu0 %vm3473_vm2, %v12863_v24  ;;  %v6175_v9 = vpop.f32.mrf.mxu1 }
 0xb8b   : > { %v19378_v20 = vpop.f32.mrf.mxu0 }
 0xb8e   : > { %v6177_v31 = vpop.f32.mrf.mxu1 }
 0xb93   : > { %v5846_v2 = vpop.f32.mrf.mxu0 }
 0xb94   : > { %v5857_v51 = vadd.f32 %v5846_v2, %v19222_v34 }
 0xb96   : > { %6381 = vmatmul.bf16.gmra.mxu3 %v12867_v50  ;;  %12875 = vmatmul.msk.bf16.gmra.mxu0 %vm3473_vm2, %v12871_v43  ;;  %v6180_v19 = vpop.f32.mrf.mxu1 }
 0xb9b   : > { %v19394_v24 = vpop.f32.mrf.mxu0 }
 0xb9c   : > { %20858 = vst [vmem:[#allocation32_spill] sm:$0xff] %v19394_v24 }
 0xba3   : > { %v6146_v33 = vpop.f32.mrf.mxu0 }
 0xba4   : > { %v6176_v43 = vadd.f32 %v6175_v9, %v6146_v33 }
 0xba6   : > { %12964 = vmatmul.msk.bf16.vlgmr.msra.gmra.mxu3 %vm3473_vm2, %v12939_v41  ;;  %v6182_v41 = vpop.f32.mrf.mxu1 }
 0xba7   : > { %7242 = vmatpush.bf16.msra.mxu3 %v17968_v29 }
 0xba9   : > { %v6052_v34 = vpop.f32.mrf.mxu3 }
 0xbaa   : > { %v19405_v58 = vadd.f32 %v6052_v34, %v19309_v46 }
 0xbab   : > { %7243 = vmatpush.bf16.msra.mxu3 %v17953_v14  ;;  %v6148_v50 = vpop.f32.mrf.mxu0 }
 0xbac   : > { %v6178_v2 = vadd.f32 %v6177_v31, %v6148_v50 }
 0xbae   : > { %v6195_v24 = vpack.c.bf16 %v6178_v2, %v6176_v43 }
 0xbaf   : > { %7244 = vmatpush.bf16.msra.mxu3 %v17935_v6 }
 0xbb0   : > { %6272 = vmatmul.bf16.vlgmr.msra.gmra.mxu2 %v6195_v24  ;;  %v6185_v24 = vpop.f32.mrf.mxu1 }
 0xbb1   : > { %6836 = vmatpush.bf16.msra.mxu2 %v18000_v12  ;;  %v19410_v3 = vpop.f32.mrf.mxu3 }
 0xbb2   : > { %20859 = vst [vmem:[#allocation45_spill] sm:$0xff] %v19410_v3 }
 0xbb3   : > { %7245 = vmatpush.bf16.msra.mxu3 %v17911_v16  ;;  %v6151_v10 = vpop.f32.mrf.mxu0 }
 0xbb4   : > { %v6181_v9 = vadd.f32 %v6180_v19, %v6151_v10 }
 0xbb7   : > { %7246 = vmatpush.bf16.msra.mxu3 %v17890_v37 }
 0xbb8   : > { %v6187_v3 = vpop.f32.mrf.mxu1 }
 0xbb9   : > { %v6057_v46 = vpop.f32.mrf.mxu3 }
 0xbba   : > { %v19415_v34 = vadd.f32 %v6057_v46, %v19340_v52 }
 0xbbb   : > { %7247 = vmatpush.bf16.msra.mxu3 %v17876_v7  ;;  %v6153_v31 = vpop.f32.mrf.mxu0 }
 0xbbc   : > { %v6183_v33 = vadd.f32 %v6182_v41, %v6153_v31  ;;  %v14952_v31 = vld [vmem:[%s20656_s4 + $0x394] sm:$0xf] }
 0xbbe   : > { %v6196_v50 = vpack.c.bf16 %v6183_v33, %v6181_v9  ;;  %v12944_v9 = vld [vmem:[%s20656_s4 + $0x398] sm:$0xf0] }
 0xbbf   : > { %7248 = vmatpush.bf16.msra.mxu3 %v17863_v25  ;;  %v12947_v33 = vor.u32 %v14952_v31, %v12944_v9 }
 0xbc0   : > { %6277 = vmatmul.bf16.gmra.mxu2 %v6196_v50  ;;  %v6190_v10 = vpop.f32.mrf.mxu1 }
 0xbc1   : > { %v19419_v43 = vpop.f32.mrf.mxu3  ;;  %12965 = vmatmul.msk.bf16.gmra.mxu3 %vm3473_vm2, %v12947_v33 }
 0xbc3   : > { %7249 = vmatpush.bf16.msra.mxu3 %v17851_v30  ;;  %v6156_v2 = vpop.f32.mrf.mxu0 }
 0xbc4   : > { %v6186_v46 = vadd.f32 %v6185_v24, %v6156_v2 }
 0xbc9   : > { %v6062_v63 = vpop.f32.mrf.mxu3 }
 0xbca   : > { %v19422_v44 = vadd.f32 %v6062_v63, %v5855_v39 }
 0xbcb   : > { %v6158_v52 = vpop.f32.mrf.mxu0 }
 0xbcc   : > { %v6188_v56 = vadd.f32 %v6187_v3, %v6158_v52 }
 0xbce   : > { %v6197_v35 = vpack.c.bf16 %v6188_v56, %v6186_v46  ;;  %v14954_v46 = vld [vmem:[%s20656_s4 + $0x3a4] sm:$0xf] }
 0xbd0   : > { %6282 = vmatmul.bf16.gmra.mxu2 %v6197_v35  ;;  %v6192_v35 = vpop.f32.mrf.mxu1 }
 0xbd1   : > { %v19424_v19 = vpop.f32.mrf.mxu3 }
 0xbd3   : > { %v6161_v41 = vpop.f32.mrf.mxu0 }
 0xbd4   : > { %v6191_v3 = vadd.f32 %v6190_v10, %v6161_v41  ;;  %v12934_v10 = vld [vmem:[%s20656_s4 + $0x380] sm:$0xf]  ;;  %v14951_v41 = vld [vmem:[%s20656_s4 + $0x384] sm:$0xf0] }
 0xbd9   : > { %v6067_v63 = vpop.f32.mrf.mxu3 }
 0xbda   : > { %v19432_v39 = vadd.f32 %v6067_v63, %v5857_v51  ;;  %v12952_v51 = vld [vmem:[%s20656_s4 + $0x3a8] sm:$0xf0]  ;;  %v12935_v63 = vor.u32 %v14951_v41, %v12934_v10  ;;  %v12942_v41 = vld [vmem:[%s20656_s4 + $0x390] sm:$0xf] }
 0xbdb   : > { %v6163_v56 = vpop.f32.mrf.mxu0  ;;  %v12955_v31 = vor.u32 %v14954_v46, %v12952_v51  ;;  %v14996_v51 = vld [vmem:[%s20657_s5 + $0x430] sm:$0xff] }
 0xbdc   : > { %v6193_v24 = vadd.f32 %v6192_v35, %v6163_v56 }
 0xbdd   : > { %12966 = vmatmul.msk.bf16.gmra.mxu3 %vm3473_vm2, %v12955_v31  ;;  %v12960_v31 = vld [vmem:[%s20656_s4 + $0x3b8] sm:$0xf0] }
 0xbde   : > { %v6198_v50 = vpack.c.bf16 %v6193_v24, %v6191_v3 }
 0xbe0   : > { %6287 = vmatmul.bf16.gmra.mxu2 %v6198_v50  ;;  %v14997_v50 = vld [vmem:[%s20657_s5 + $0x438] sm:$0xff] }
 0xbe1   : > { %v19435_v2 = vpop.f32.mrf.mxu3 }
 0xbe2   : > { %20860 = vst [vmem:[#allocation40_spill] sm:$0xff] %v19435_v2 }
 0xbe3   : > { %v6396_v52 = vpop.f32.mrf.mxu0 }
 0xbe9   : > { %v6367_v9 = vpop.f32.mrf.mxu3 }
 0xbea   : > { %v6397_v56 = vadd.f32 %v6396_v52, %v6367_v9  ;;  %v14956_v52 = vld [vmem:[%s20656_s4 + $0x3b4] sm:$0xf] }
 0xbeb   : > { %v6398_v33 = vpop.f32.mrf.mxu0  ;;  %v12963_v9 = vor.u32 %v14956_v52, %v12960_v31 }
 0xbed   : > { %12967 = vmatmul.msk.bf16.gmra.mxu3 %vm3473_vm2, %v12963_v9  ;;  %v14992_v9 = vld [vmem:[%s20657_s5 + $0x410] sm:$0xff] }
 0xbf0   : > { %6587 = vmatmul.bf16.vlgmr.msrb.gmra.mxu2 %v12935_v63  ;;  %v14995_v63 = vld [vmem:[%s20657_s5 + $0x428] sm:$0xff] }
 0xbf1   : > { %v6369_v35 = vpop.f32.mrf.mxu3  ;;  %7148 = vmatpush.bf16.msrb.mxu2 %v14997_v50 }
 0xbf2   : > { %v6399_v3 = vadd.f32 %v6398_v33, %v6369_v35  ;;  %v14953_v33 = vld [vmem:[%s20656_s4 + $0x394] sm:$0xf0] }
 0xbf3   : > { %v6401_v24 = vpop.f32.mrf.mxu0  ;;  %v12943_v35 = vor.u32 %v14953_v33, %v12942_v41  ;;  %v14991_v33 = vld [vmem:[%s20657_s5 + $0x408] sm:$0xff] }
 0xbf4   : > { %v6416_v46 = vpack.c.bf16 %v6399_v3, %v6397_v56  ;;  %v14994_v3 = vld [vmem:[%s20657_s5 + $0x420] sm:$0xff] }
 0xbf5   : > { %7149 = vmatpush.bf16.msrb.mxu2 %v14996_v51  ;;  %v14993_v51 = vld [vmem:[%s20657_s5 + $0x418] sm:$0xff] }
 0xbf6   : > { %6493 = vmatmul.bf16.vlgmr.msra.gmra.mxu1 %v6416_v46 }
 0xbf7   : > { %7057 = vmatpush.bf16.msra.mxu1 %v18000_v12 }
 0xbf9   : > { %v6372_v10 = vpop.f32.mrf.mxu3  ;;  %7150 = vmatpush.bf16.msrb.mxu2 %v14995_v63 }
 0xbfa   : > { %v6402_v50 = vadd.f32 %v6401_v24, %v6372_v10  ;;  %v12950_v24 = vld [vmem:[%s20656_s4 + $0x3a0] sm:$0xf]  ;;  %v14955_v10 = vld [vmem:[%s20656_s4 + $0x3a4] sm:$0xf0] }
 0xbfb   : > { %v6403_v56 = vpop.f32.mrf.mxu0 }
 0xbfd   : > { %7151 = vmatpush.bf16.msrb.mxu2 %v14994_v3 }
 0xc00   : > { %6592 = vmatmul.bf16.gmra.mxu2 %v12943_v35 }
 0xc01   : > { %v6374_v46 = vpop.f32.mrf.mxu3  ;;  %7152 = vmatpush.bf16.msrb.mxu2 %v14993_v51 }
 0xc02   : > { %v6404_v52 = vadd.f32 %v6403_v56, %v6374_v46  ;;  %v14990_v56 = vld [vmem:[%s20657_s5 + $0x400] sm:$0xff] }
 0xc03   : > { %v6406_v31 = vpop.f32.mrf.mxu0 }
 0xc04   : > { %v6417_v2 = vpack.c.bf16 %v6404_v52, %v6402_v50 }
 0xc05   : > { %7153 = vmatpush.bf16.msrb.mxu2 %v14992_v9  ;;  %v12958_v9 = vld [vmem:[%s20656_s4 + $0x3b0] sm:$0xf] }
 0xc06   : > { %6498 = vmatmul.bf16.gmra.mxu1 %v6417_v2  ;;  %v12951_v2 = vor.u32 %v14955_v10, %v12950_v24  ;;  %v14957_v24 = vld [vmem:[%s20656_s4 + $0x3b4] sm:$0xf0] }
 0xc07   : > { %v12959_v10 = vor.u32 %v14957_v24, %v12958_v9  ;;  %v14968_v9 = vld [vmem:[%s20656_s4 + $0x3d4] sm:$0xf]  ;;  %v13036_v24 = vld [vmem:[%s20656_s4 + $0x3d8] sm:$0xf0] }
 0xc09   : > { %v6377_v41 = vpop.f32.mrf.mxu3  ;;  %7154 = vmatpush.bf16.msrb.mxu2 %v14991_v33 }
 0xc0a   : > { %v6407_v35 = vadd.f32 %v6406_v31, %v6377_v41 }
 0xc0b   : > { %v6408_v63 = vpop.f32.mrf.mxu0 }
 0xc0d   : > { %7155 = vmatpush.bf16.msrb.mxu2 %v14990_v56  ;;  %v13028_v56 = vld [vmem:[%s20656_s4 + $0x3c8] sm:$0xf0] }
 0xc10   : > { %6597 = vmatmul.bf16.gmra.mxu2 %v12951_v2 }
 0xc11   : > { %v6379_v3 = vpop.f32.mrf.mxu3 }
 0xc12   : > { %v6409_v50 = vadd.f32 %v6408_v63, %v6379_v3  ;;  %v14966_v63 = vld [vmem:[%s20656_s4 + $0x3c4] sm:$0xf]  ;;  %v13026_v3 = vld [vmem:[%s20656_s4 + $0x3c0] sm:$0xf] }
 0xc13   : > { %v6411_v52 = vpop.f32.mrf.mxu0 }
 0xc14   : > { %v6418_v46 = vpack.c.bf16 %v6409_v50, %v6407_v35  ;;  %v13031_v35 = vor.u32 %v14966_v63, %v13028_v56  ;;  %v14967_v50 = vld [vmem:[%s20656_s4 + $0x3c4] sm:$0xf0] }
 0xc16   : > { %6503 = vmatmul.bf16.gmra.mxu1 %v6418_v46 }
 0xc19   : > { %v6382_v51 = vpop.f32.mrf.mxu3 }
 0xc1a   : > { %v6412_v38 = vadd.f32 %v6411_v52, %v6382_v51  ;;  %v15013_v51 = vld [vmem:[%s20657_s5 + $0x478] sm:$0xff] }
 0xc1b   : > { %v6413_v33 = vpop.f32.mrf.mxu0 }
 0xc20   : > { %6602 = vmatmul.bf16.gmra.mxu2 %v12959_v10  ;;  %v13039_v10 = vor.u32 %v14968_v9, %v13036_v24  ;;  %v15008_v9 = vld [vmem:[%s20657_s5 + $0x450] sm:$0xff]  ;;  %v13042_v24 = vld [vmem:[%s20656_s4 + $0x3e0] sm:$0xf] }
 0xc21   : > { %v6384_v31 = vpop.f32.mrf.mxu3 }
 0xc22   : > { %v6414_v41 = vadd.f32 %v6413_v33, %v6384_v31  ;;  %v15012_v33 = vld [vmem:[%s20657_s5 + $0x470] sm:$0xff] }
 0xc23   : > { %v13034_v31 = vld [vmem:[%s20656_s4 + $0x3d0] sm:$0xf] }
 0xc24   : > { %v6419_v2 = vpack.c.bf16 %v6414_v41, %v6412_v38  ;;  %v13027_v38 = vor.u32 %v14967_v50, %v13026_v3  ;;  %v14969_v41 = vld [vmem:[%s20656_s4 + $0x3d4] sm:$0xf0]  ;;  %v15010_v3 = vld [vmem:[%s20657_s5 + $0x460] sm:$0xff] }
 0xc25   : > { %v13035_v63 = vor.u32 %v14969_v41, %v13034_v31  ;;  %v15009_v50 = vld [vmem:[%s20657_s5 + $0x458] sm:$0xff] }
 0xc26   : > { %6508 = vmatmul.bf16.gmra.mxu1 %v6419_v2  ;;  %v15011_v2 = vld [vmem:[%s20657_s5 + $0x468] sm:$0xff] }
 0xc30   : > { %13056 = vmatmul.msk.bf16.vlgmr.msra.gmra.mxu2 %vm3473_vm2, %v13031_v35 }
 0xc31   : > { %7463 = vmatpush.bf16.msra.mxu2 %v17968_v29 }
 0xc33   : > { %v6273_v46 = vpop.f32.mrf.mxu2 }
 0xc34   : > { %v19515_v52 = vadd.f32 %v6273_v46, %v19405_v58 }
 0xc35   : > { %7464 = vmatpush.bf16.msra.mxu2 %v17953_v14 }
 0xc36   : > { %6808 = vmatmul.bf16.vlgmr.msrb.gmra.mxu1 %v13027_v38  ;;  %v14970_v38 = vld [vmem:[%s20656_s4 + $0x3e4] sm:$0xf] }
 0xc37   : > { %7369 = vmatpush.bf16.msrb.mxu1 %v15013_v51 }
 0xc39   : > { %7465 = vmatpush.bf16.msra.mxu2 %v17935_v6 }
 0xc3b   : > { %v19528_v58 = vpop.f32.mrf.mxu2  ;;  %7370 = vmatpush.bf16.msrb.mxu1 %v15012_v33  ;;  %v15007_v33 = vld [vmem:[%s20657_s5 + $0x448] sm:$0xff] }
 0xc3c   : > { %20861 = vst [vmem:[#allocation13_spill] sm:$0xff] %v19528_v58 }
 0xc3d   : > { %7466 = vmatpush.bf16.msra.mxu2 %v17911_v16 }
 0xc3f   : > { %7371 = vmatpush.bf16.msrb.mxu1 %v15011_v2 }
 0xc40   : > { %13057 = vmatmul.msk.bf16.gmra.mxu2 %vm3473_vm2, %v13039_v10  ;;  %v14971_v10 = vld [vmem:[%s20656_s4 + $0x3e4] sm:$0xf0] }
 0xc41   : > { %7467 = vmatpush.bf16.msra.mxu2 %v17890_v37  ;;  %v13043_v31 = vor.u32 %v14971_v10, %v13042_v24  ;;  %v6617_v10 = vpop.f32.mrf.mxu3 }
 0xc43   : > { %v6278_v56 = vpop.f32.mrf.mxu2  ;;  %7372 = vmatpush.bf16.msrb.mxu1 %v15010_v3  ;;  %v13052_v3 = vld [vmem:[%s20656_s4 + $0x3f8] sm:$0xf0] }
 0xc44   : > { %v6295_v35 = vadd.f32 %v6278_v56, %v19415_v34  ;;  %v13044_v34 = vld [vmem:[%s20656_s4 + $0x3e8] sm:$0xf0]  ;;  %v14972_v56 = vld [vmem:[%s20656_s4 + $0x3f4] sm:$0xf] }
 0xc45   : > { %7468 = vmatpush.bf16.msra.mxu2 %v17876_v7  ;;  %v13047_v51 = vor.u32 %v14970_v38, %v13044_v34  ;;  %v13055_v38 = vor.u32 %v14972_v56, %v13052_v3  ;;  %v14973_v34 = vld [vmem:[%s20656_s4 + $0x3f4] sm:$0xf0] }
 0xc46   : > { %6813 = vmatmul.bf16.gmra.mxu1 %v13035_v63  ;;  %v15006_v63 = vld [vmem:[%s20657_s5 + $0x440] sm:$0xff] }
 0xc47   : > { %7373 = vmatpush.bf16.msrb.mxu1 %v15009_v50 }
 0xc49   : > { %7469 = vmatpush.bf16.msra.mxu2 %v17863_v25 }
 0xc4b   : > { %v19560_v46 = vpop.f32.mrf.mxu2  ;;  %7374 = vmatpush.bf16.msrb.mxu1 %v15008_v9 }
 0xc4d   : > { %7470 = vmatpush.bf16.msra.mxu2 %v17851_v30 }
 0xc4f   : > { %7375 = vmatpush.bf16.msrb.mxu1 %v15007_v33 }
 0xc50   : > { %13058 = vmatmul.msk.bf16.gmra.mxu2 %vm3473_vm2, %v13047_v51 }
 0xc53   : > { %v6283_v41 = vpop.f32.mrf.mxu2  ;;  %7376 = vmatpush.bf16.msrb.mxu1 %v15006_v63  ;;  %v13120_v63 = vld [vmem:[%s20656_s4 + $0x408] sm:$0xf0] }
 0xc54   : > { %v6297_v2 = vadd.f32 %v6283_v41, %v19422_v44  ;;  %v13050_v44 = vld [vmem:[%s20656_s4 + $0x3f0] sm:$0xf]  ;;  %v14982_v41 = vld [vmem:[%s20656_s4 + $0x404] sm:$0xf] }
 0xc55   : > { %v13051_v51 = vor.u32 %v14973_v34, %v13050_v44  ;;  %v13123_v56 = vor.u32 %v14982_v41, %v13120_v63 }
 0xc56   : > { %6818 = vmatmul.bf16.gmra.mxu1 %v13043_v31  ;;  %v6619_v31 = vpop.f32.mrf.mxu3 }
 0xc5b   : > { %v19586_v50 = vpop.f32.mrf.mxu2 }
 0xc5c   : > { %20862 = vst [vmem:[#allocation16_spill] sm:$0xff] %v19586_v50 }
 0xc60   : > { %13059 = vmatmul.msk.bf16.gmra.mxu2 %vm3473_vm2, %v13055_v38 }
 0xc63   : > { %v6288_v9 = vpop.f32.mrf.mxu2 }
 0xc64   : > { %v6299_v24 = vadd.f32 %v6288_v9, %v19432_v39  ;;  %v6622_v39 = vpop.f32.mrf.mxu3 }
 0xc66   : > { %6823 = vmatmul.bf16.gmra.mxu1 %v13051_v51 }
 0xc6b   : > { %v19596_v33 = vpop.f32.mrf.mxu2 }
 0xc6c   : > { %20863 = vst [vmem:[#allocation42_spill] sm:$0xff] %v19596_v33 }
 0xc73   : > { %v6494_v3 = vpop.f32.mrf.mxu1  ;;  %v6588_v38 = vpop.f32.mrf.mxu2 }
 0xc74   : > { %v19605_v44 = vadd.f32 %v6494_v3, %v19515_v52  ;;  %v6618_v9 = vadd.f32 %v6617_v10, %v6588_v38  ;;  %v6624_v52 = vpop.f32.mrf.mxu3 }
 0xc76   : > { %13148 = vmatmul.msk.bf16.vlgmr.msra.gmra.mxu1 %vm3473_vm2, %v13123_v56 }
 0xc77   : > { %7684 = vmatpush.bf16.msra.mxu1 %v17968_v29 }
 0xc7b   : > { %7685 = vmatpush.bf16.msra.mxu1 %v17953_v14  ;;  %v19610_v34 = vpop.f32.mrf.mxu1  ;;  %v6590_v51 = vpop.f32.mrf.mxu2 }
 0xc7c   : > { %20864 = vst [vmem:[#allocation47_spill] sm:$0xff] %v19610_v34  ;;  %v6620_v58 = vadd.f32 %v6619_v31, %v6590_v51  ;;  %v6627_v38 = vpop.f32.mrf.mxu3 }
 0xc7e   : > { %v6637_v33 = vpack.c.bf16 %v6620_v58, %v6618_v9 }
 0xc7f   : > { %7686 = vmatpush.bf16.msra.mxu1 %v17935_v6 }
 0xc80   : > { %6714 = vmatmul.bf16.vlgmr.msra.gmra.mxu0 %v6637_v33 }
 0xc81   : > { %7278 = vmatpush.bf16.msra.mxu0 %v18000_v12 }
 0xc83   : > { %7687 = vmatpush.bf16.msra.mxu1 %v17911_v16  ;;  %v6499_v41 = vpop.f32.mrf.mxu1  ;;  %v6593_v63 = vpop.f32.mrf.mxu2 }
 0xc84   : > { %v19615_v56 = vadd.f32 %v6499_v41, %v6295_v35  ;;  %v6623_v58 = vadd.f32 %v6622_v39, %v6593_v63  ;;  %v6629_v41 = vpop.f32.mrf.mxu3 }
 0xc87   : > { %7688 = vmatpush.bf16.msra.mxu1 %v17890_v37 }
 0xc8b   : > { %7689 = vmatpush.bf16.msra.mxu1 %v17876_v7  ;;  %v19619_v3 = vpop.f32.mrf.mxu1  ;;  %v6595_v10 = vpop.f32.mrf.mxu2 }
 0xc8c   : > { %v6625_v31 = vadd.f32 %v6624_v52, %v6595_v10  ;;  %v6632_v39 = vpop.f32.mrf.mxu3 }
 0xc8e   : > { %v6638_v33 = vpack.c.bf16 %v6625_v31, %v6623_v58  ;;  %v14984_v58 = vld [vmem:[%s20656_s4 + $0x414] sm:$0xf] }
 0xc8f   : > { %7690 = vmatpush.bf16.msra.mxu1 %v17863_v25 }
 0xc90   : > { %6719 = vmatmul.bf16.gmra.mxu0 %v6638_v33 }
 0xc93   : > { %7691 = vmatpush.bf16.msra.mxu1 %v17851_v30  ;;  %v6504_v51 = vpop.f32.mrf.mxu1  ;;  %v6598_v9 = vpop.f32.mrf.mxu2 }
 0xc94   : > { %v19623_v35 = vadd.f32 %v6504_v51, %v6297_v2  ;;  %v6628_v45 = vadd.f32 %v6627_v38, %v6598_v9  ;;  %v13128_v2 = vld [vmem:[%s20656_s4 + $0x418] sm:$0xf0]  ;;  %v6634_v33 = vpop.f32.mrf.mxu3  ;;  %v14986_v9 = vld [vmem:[%s20656_s4 + $0x424] sm:$0xf] }
 0xc95   : > { %v13131_v31 = vor.u32 %v14984_v58, %v13128_v2  ;;  %v13118_v58 = vld [vmem:[%s20656_s4 + $0x400] sm:$0xf] }
 0xc97   : > { %13149 = vmatmul.msk.bf16.gmra.mxu1 %vm3473_vm2, %v13131_v31 }
 0xc9b   : > { %v19625_v34 = vpop.f32.mrf.mxu1  ;;  %v6600_v26 = vpop.f32.mrf.mxu2 }
 0xc9c   : > { %20865 = vst [vmem:[#allocation30_spill] sm:$0xff] %v19625_v34  ;;  %v6630_v40 = vadd.f32 %v6629_v41, %v6600_v26  ;;  %v13136_v41 = vld [vmem:[%s20656_s4 + $0x428] sm:$0xf0] }
 0xc9e   : > { %v6639_v21 = vpack.c.bf16 %v6630_v40, %v6628_v45 }
 0xca0   : > { %6724 = vmatmul.bf16.gmra.mxu0 %v6639_v21 }
 0xca3   : > { %v6509_v52 = vpop.f32.mrf.mxu1  ;;  %v6603_v63 = vpop.f32.mrf.mxu2 }
 0xca4   : > { %v19627_v10 = vadd.f32 %v6509_v52, %v6299_v24  ;;  %v6633_v45 = vadd.f32 %v6632_v39, %v6603_v63  ;;  %v13139_v52 = vor.u32 %v14986_v9, %v13136_v41  ;;  %v14983_v39 = vld [vmem:[%s20656_s4 + $0x404] sm:$0xf0]  ;;  %v15029_v9 = vld [vmem:[%s20657_s5 + $0x4b8] sm:$0xff] }
 0xca5   : > { %v13144_v41 = vld [vmem:[%s20656_s4 + $0x438] sm:$0xf0] }
 0xca7   : > { %13150 = vmatmul.msk.bf16.gmra.mxu1 %vm3473_vm2, %v13139_v52 }
 0xcab   : > { %v19636_v26 = vpop.f32.mrf.mxu1  ;;  %v6605_v21 = vpop.f32.mrf.mxu2 }
 0xcac   : > { %20866 = vst [vmem:[#allocation27_spill] sm:$0xff] %v19636_v26  ;;  %v6635_v40 = vadd.f32 %v6634_v33, %v6605_v21  ;;  %v13119_v21 = vor.u32 %v14983_v39, %v13118_v58  ;;  %v13126_v58 = vld [vmem:[%s20656_s4 + $0x410] sm:$0xf]  ;;  %v14985_v39 = vld [vmem:[%s20656_s4 + $0x414] sm:$0xf0] }
 0xcae   : > { %v6640_v38 = vpack.c.bf16 %v6635_v40, %v6633_v45 }
 0xcb0   : > { %6729 = vmatmul.bf16.gmra.mxu0 %v6640_v38 }
 0xcb3   : > { %v6809_v24 = vpop.f32.mrf.mxu1  ;;  %v6838_v51 = vpop.f32.mrf.mxu2 }
 0xcb4   : > { %v6839_v63 = vadd.f32 %v6838_v51, %v6809_v24  ;;  %v15028_v24 = vld [vmem:[%s20657_s5 + $0x4b0] sm:$0xff] }
 0xcb5   : > { %v14988_v51 = vld [vmem:[%s20656_s4 + $0x434] sm:$0xf] }
 0xcb6   : > { %v13147_v52 = vor.u32 %v14988_v51, %v13144_v41  ;;  %v15026_v51 = vld [vmem:[%s20657_s5 + $0x4a0] sm:$0xff]  ;;  %v15024_v41 = vld [vmem:[%s20657_s5 + $0x490] sm:$0xff] }
 0xcb8   : > { %13151 = vmatmul.msk.bf16.gmra.mxu1 %vm3473_vm2, %v13147_v52  ;;  %v13134_v52 = vld [vmem:[%s20656_s4 + $0x420] sm:$0xf] }
 0xcbb   : > { %v6811_v2 = vpop.f32.mrf.mxu1  ;;  %v6840_v31 = vpop.f32.mrf.mxu2 }
 0xcbc   : > { %v6841_v33 = vadd.f32 %v6840_v31, %v6811_v2 }
 0xcbe   : > { %v6858_v45 = vpack.c.bf16 %v6841_v33, %v6839_v63  ;;  %v15027_v33 = vld [vmem:[%s20657_s5 + $0x4a8] sm:$0xff] }
 0xcc0   : > { %6935 = vmatmul.bf16.vlgmr.msrb.gmra.mxu3 %v6858_v45  ;;  %7029 = vmatmul.bf16.vlgmr.msrb.gmra.mxu0 %v13119_v21  ;;  %v13127_v45 = vor.u32 %v14985_v39, %v13126_v58  ;;  %v14987_v58 = vld [vmem:[%s20656_s4 + $0x424] sm:$0xf0] }
 0xcc1   : > { %7499 = vmatpush.bf16.msrb.mxu3 %v18000_v12  ;;  %7590 = vmatpush.bf16.msrb.mxu0 %v15029_v9  ;;  %v15023_v39 = vld [vmem:[%s20657_s5 + $0x488] sm:$0xff] }
 0xcc3   : > { %v6814_v40 = vpop.f32.mrf.mxu1  ;;  %v6843_v38 = vpop.f32.mrf.mxu2 }
 0xcc4   : > { %v6844_v63 = vadd.f32 %v6843_v38, %v6814_v40  ;;  %v15025_v40 = vld [vmem:[%s20657_s5 + $0x498] sm:$0xff] }
 0xcc5   : > { %7591 = vmatpush.bf16.msrb.mxu0 %v15028_v24 }
 0xcc9   : > { %7592 = vmatpush.bf16.msrb.mxu0 %v15027_v33 }
 0xccb   : > { %v6816_v2 = vpop.f32.mrf.mxu1  ;;  %v6845_v31 = vpop.f32.mrf.mxu2 }
 0xccc   : > { %v6846_v21 = vadd.f32 %v6845_v31, %v6816_v2 }
 0xccd   : > { %7593 = vmatpush.bf16.msrb.mxu0 %v15026_v51 }
 0xcce   : > { %v6859_v9 = vpack.c.bf16 %v6846_v21, %v6844_v63  ;;  %v13135_v21 = vor.u32 %v14987_v58, %v13134_v52 }
 0xcd0   : > { %6940 = vmatmul.bf16.gmra.mxu3 %v6859_v9  ;;  %7034 = vmatmul.bf16.gmra.mxu0 %v13127_v45  ;;  %v15022_v9 = vld [vmem:[%s20657_s5 + $0x480] sm:$0xff] }
 0xcd1   : > { %7594 = vmatpush.bf16.msrb.mxu0 %v15025_v40 }
 0xcd3   : > { %v6819_v38 = vpop.f32.mrf.mxu1  ;;  %v6848_v24 = vpop.f32.mrf.mxu2 }
 0xcd4   : > { %v6849_v63 = vadd.f32 %v6848_v24, %v6819_v38  ;;  %v14989_v38 = vld [vmem:[%s20656_s4 + $0x434] sm:$0xf0] }
 0xcd5   : > { %7595 = vmatpush.bf16.msrb.mxu0 %v15024_v41  ;;  %v13142_v41 = vld [vmem:[%s20656_s4 + $0x430] sm:$0xf] }
 0xcd9   : > { %7596 = vmatpush.bf16.msrb.mxu0 %v15023_v39 }
 0xcdb   : > { %v6821_v2 = vpop.f32.mrf.mxu1  ;;  %v6850_v31 = vpop.f32.mrf.mxu2 }
 0xcdc   : > { %v6851_v33 = vadd.f32 %v6850_v31, %v6821_v2  ;;  %v13210_v31 = vld [vmem:[%s20656_s4 + $0x440] sm:$0xf] }
 0xcdd   : > { %7597 = vmatpush.bf16.msrb.mxu0 %v15022_v9 }
 0xcde   : > { %v6860_v45 = vpack.c.bf16 %v6851_v33, %v6849_v63  ;;  %v13143_v63 = vor.u32 %v14989_v38, %v13142_v41  ;;  %v14999_v33 = vld [vmem:[%s20656_s4 + $0x444] sm:$0xf0]  ;;  %v15045_v38 = vld [vmem:[%s20657_s5 + $0x4f8] sm:$0xff] }
 0xcdf   : > { %v13211_v9 = vor.u32 %v14999_v33, %v13210_v31 }
 0xce0   : > { %6945 = vmatmul.bf16.gmra.mxu3 %v6860_v45  ;;  %7039 = vmatmul.bf16.gmra.mxu0 %v13135_v21  ;;  %v14998_v21 = vld [vmem:[%s20656_s4 + $0x444] sm:$0xf]  ;;  %v13212_v45 = vld [vmem:[%s20656_s4 + $0x448] sm:$0xf0] }
 0xce3   : > { %v6824_v51 = vpop.f32.mrf.mxu1  ;;  %v6853_v40 = vpop.f32.mrf.mxu2 }
 0xce4   : > { %v6854_v24 = vadd.f32 %v6853_v40, %v6824_v51  ;;  %v13215_v51 = vor.u32 %v14998_v21, %v13212_v45 }
 0xceb   : > { %v6826_v52 = vpop.f32.mrf.mxu1  ;;  %v6855_v58 = vpop.f32.mrf.mxu2 }
 0xcec   : > { %v6856_v39 = vadd.f32 %v6855_v58, %v6826_v52  ;;  %v15044_v52 = vld [vmem:[%s20657_s5 + $0x4f0] sm:$0xff]  ;;  %v15043_v58 = vld [vmem:[%s20657_s5 + $0x4e8] sm:$0xff] }
 0xcee   : > { %v6861_v2 = vpack.c.bf16 %v6856_v39, %v6854_v24  ;;  %v15001_v39 = vld [vmem:[%s20656_s4 + $0x454] sm:$0xf0] }
 0xcf0   : > { %6950 = vmatmul.bf16.gmra.mxu3 %v6861_v2  ;;  %7044 = vmatmul.bf16.gmra.mxu0 %v13143_v63  ;;  %v15000_v63 = vld [vmem:[%s20656_s4 + $0x454] sm:$0xf]  ;;  %v13220_v2 = vld [vmem:[%s20656_s4 + $0x458] sm:$0xf0] }
 0xcf1   : > { %v13223_v33 = vor.u32 %v15000_v63, %v13220_v2 }
 0xcfd   : > { %v6715_v40 = vpop.f32.mrf.mxu0 }
 0xcfe   : > { %v19714_v41 = vadd.f32 %v6715_v40, %v19605_v44  ;;  %v13218_v44 = vld [vmem:[%s20656_s4 + $0x450] sm:$0xf] }
 0xcff   : > { %v13219_v31 = vor.u32 %v15001_v39, %v13218_v44  ;;  %v15002_v44 = vld [vmem:[%s20656_s4 + $0x464] sm:$0xf]  ;;  %v15039_v39 = vld [vmem:[%s20657_s5 + $0x4c8] sm:$0xff] }
 0xd00   : > { %7250 = vmatmul.bf16.vlgmr.msra.gmra.mxu3 %v13211_v9  ;;  %13240 = vmatmul.msk.bf16.vlgmr.msra.gmra.mxu0 %vm3473_vm2, %v13215_v51  ;;  %v15042_v9 = vld [vmem:[%s20657_s5 + $0x4e0] sm:$0xff]  ;;  %v15041_v51 = vld [vmem:[%s20657_s5 + $0x4d8] sm:$0xff] }
 0xd01   : > { %7905 = vmatpush.bf16.msra.mxu0 %v17968_v29  ;;  %7811 = vmatpush.bf16.msra.mxu3 %v15045_v38  ;;  %v13226_v38 = vld [vmem:[%s20656_s4 + $0x460] sm:$0xf] }
 0xd05   : > { %7906 = vmatpush.bf16.msra.mxu0 %v17953_v14  ;;  %v19722_v24 = vpop.f32.mrf.mxu0  ;;  %7812 = vmatpush.bf16.msra.mxu3 %v15044_v52  ;;  %v15003_v52 = vld [vmem:[%s20656_s4 + $0x464] sm:$0xf0] }
 0xd06   : > { %20867 = vst [vmem:[#allocation14_spill] sm:$0xff] %v19722_v24  ;;  %v13227_v63 = vor.u32 %v15003_v52, %v13226_v38  ;;  %v13236_v38 = vld [vmem:[%s20656_s4 + $0x478] sm:$0xf0] }
 0xd09   : > { %7907 = vmatpush.bf16.msra.mxu0 %v17935_v6  ;;  %7813 = vmatpush.bf16.msra.mxu3 %v15043_v58  ;;  %v13228_v58 = vld [vmem:[%s20656_s4 + $0x468] sm:$0xf0] }
 0xd0a   : > { %v13231_v2 = vor.u32 %v15002_v44, %v13228_v58 }
 0xd0d   : > { %7908 = vmatpush.bf16.msra.mxu0 %v17911_v16  ;;  %v6720_v21 = vpop.f32.mrf.mxu0  ;;  %7814 = vmatpush.bf16.msra.mxu3 %v15042_v9 }
 0xd0e   : > { %v19745_v45 = vadd.f32 %v6720_v21, %v19615_v56  ;;  %v15040_v56 = vld [vmem:[%s20657_s5 + $0x4d0] sm:$0xff]  ;;  %v15038_v21 = vld [vmem:[%s20657_s5 + $0x4c0] sm:$0xff] }
 0xd10   : > { %7255 = vmatmul.bf16.gmra.mxu3 %v13219_v31  ;;  %13241 = vmatmul.msk.bf16.gmra.mxu0 %vm3473_vm2, %v13223_v33 }
 0xd11   : > { %7909 = vmatpush.bf16.msra.mxu0 %v17890_v37  ;;  %7815 = vmatpush.bf16.msra.mxu3 %v15041_v51  ;;  %v13234_v51 = vld [vmem:[%s20656_s4 + $0x470] sm:$0xf] }
 0xd15   : > { %7910 = vmatpush.bf16.msra.mxu0 %v17876_v7  ;;  %v19756_v40 = vpop.f32.mrf.mxu0  ;;  %7816 = vmatpush.bf16.msra.mxu3 %v15040_v56  ;;  %v15005_v56 = vld [vmem:[%s20656_s4 + $0x474] sm:$0xf0] }
 0xd16   : > { %v13235_v52 = vor.u32 %v15005_v56, %v13234_v51 }
 0xd19   : > { %7911 = vmatpush.bf16.msra.mxu0 %v17863_v25  ;;  %7817 = vmatpush.bf16.msra.mxu3 %v15039_v39 }
 0xd1d   : > { %7912 = vmatpush.bf16.msra.mxu0 %v17851_v30  ;;  %v6725_v31 = vpop.f32.mrf.mxu0  ;;  %7818 = vmatpush.bf16.msra.mxu3 %v15038_v21  ;;  %v13304_v21 = vld [vmem:[%s20656_s4 + $0x488] sm:$0xf0] }
 0xd1e   : > { %v6739_v33 = vadd.f32 %v6725_v31, %v19623_v35  ;;  %v15004_v35 = vld [vmem:[%s20656_s4 + $0x474] sm:$0xf]  ;;  %v15014_v31 = vld [vmem:[%s20656_s4 + $0x484] sm:$0xf] }
 0xd1f   : > { %v13239_v44 = vor.u32 %v15004_v35, %v13236_v38  ;;  %v13307_v51 = vor.u32 %v15014_v31, %v13304_v21 }
 0xd20   : > { %7260 = vmatmul.bf16.gmra.mxu3 %v13227_v63  ;;  %13242 = vmatmul.msk.bf16.gmra.mxu0 %vm3473_vm2, %v13231_v2  ;;  %v7059_v63 = vpop.f32.mrf.mxu1 }
 0xd25   : > { %v19783_v9 = vpop.f32.mrf.mxu0 }
 0xd26   : > { %20868 = vst [vmem:[#allocation22_spill] sm:$0xff] %v19783_v9 }
 0xd28   : > { %v7061_v24 = vpop.f32.mrf.mxu1 }
 0xd2d   : > { %v6730_v58 = vpop.f32.mrf.mxu0 }
 0xd2e   : > { %v6741_v39 = vadd.f32 %v6730_v58, %v19627_v10 }
 0xd30   : > { %7265 = vmatmul.bf16.gmra.mxu3 %v13235_v52  ;;  %13243 = vmatmul.msk.bf16.gmra.mxu0 %vm3473_vm2, %v13239_v44  ;;  %v7064_v35 = vpop.f32.mrf.mxu1 }
 0xd35   : > { %v19799_v2 = vpop.f32.mrf.mxu0 }
 0xd36   : > { %20869 = vst [vmem:[#allocation34_spill] sm:$0xff] %v19799_v2 }
 0xd3d   : > { %v7030_v56 = vpop.f32.mrf.mxu0 }
 0xd3e   : > { %v7060_v44 = vadd.f32 %v7059_v63, %v7030_v56 }
 0xd40   : > { %13332 = vmatmul.msk.bf16.vlgmr.msrb.gmra.mxu3 %vm3473_vm2, %v13307_v51  ;;  %v7066_v51 = vpop.f32.mrf.mxu1 }
 0xd41   : > { %8126 = vmatpush.bf16.msrb.mxu3 %v17968_v29 }
 0xd43   : > { %v6936_v10 = vpop.f32.mrf.mxu3 }
 0xd44   : > { %v19810_v38 = vadd.f32 %v6936_v10, %v19714_v41 }
 0xd45   : > { %8127 = vmatpush.bf16.msrb.mxu3 %v17953_v14  ;;  %v7032_v52 = vpop.f32.mrf.mxu0 }
 0xd46   : > { %v7062_v58 = vadd.f32 %v7061_v24, %v7032_v52 }
 0xd48   : > { %v7079_v2 = vpack.c.bf16 %v7062_v58, %v7060_v44 }
 0xd49   : > { %8128 = vmatpush.bf16.msrb.mxu3 %v17935_v6 }
 0xd4a   : > { %7156 = vmatmul.bf16.vlgmr.msrb.gmra.mxu2 %v7079_v2  ;;  %v7069_v2 = vpop.f32.mrf.mxu1 }
 0xd4b   : > { %7720 = vmatpush.bf16.msrb.mxu2 %v18000_v12  ;;  %v19815_v31 = vpop.f32.mrf.mxu3 }
 0xd4c   : > { %20870 = vst [vmem:[#allocation48_spill] sm:$0xff] %v19815_v31 }
 0xd4d   : > { %8129 = vmatpush.bf16.msrb.mxu3 %v17911_v16  ;;  %v7035_v21 = vpop.f32.mrf.mxu0 }
 0xd4e   : > { %v7065_v63 = vadd.f32 %v7064_v35, %v7035_v21 }
 0xd51   : > { %8130 = vmatpush.bf16.msrb.mxu3 %v17890_v37 }
 0xd52   : > { %v7071_v31 = vpop.f32.mrf.mxu1 }
 0xd53   : > { %v6941_v41 = vpop.f32.mrf.mxu3 }
 0xd54   : > { %v19820_v10 = vadd.f32 %v6941_v41, %v19745_v45 }
 0xd55   : > { %8131 = vmatpush.bf16.msrb.mxu3 %v17876_v7  ;;  %v7037_v24 = vpop.f32.mrf.mxu0 }
 0xd56   : > { %v7067_v56 = vadd.f32 %v7066_v51, %v7037_v24  ;;  %v15016_v24 = vld [vmem:[%s20656_s4 + $0x494] sm:$0xf] }
 0xd58   : > { %v7080_v52 = vpack.c.bf16 %v7067_v56, %v7065_v63  ;;  %v13312_v63 = vld [vmem:[%s20656_s4 + $0x498] sm:$0xf0] }
 0xd59   : > { %8132 = vmatpush.bf16.msrb.mxu3 %v17863_v25  ;;  %v13315_v56 = vor.u32 %v15016_v24, %v13312_v63 }
 0xd5a   : > { %7161 = vmatmul.bf16.gmra.mxu2 %v7080_v52  ;;  %v7074_v21 = vpop.f32.mrf.mxu1 }
 0xd5b   : > { %v19824_v44 = vpop.f32.mrf.mxu3  ;;  %13333 = vmatmul.msk.bf16.gmra.mxu3 %vm3473_vm2, %v13315_v56 }
 0xd5d   : > { %8133 = vmatpush.bf16.msrb.mxu3 %v17851_v30  ;;  %v7040_v58 = vpop.f32.mrf.mxu0 }
 0xd5e   : > { %v7070_v41 = vadd.f32 %v7069_v2, %v7040_v58 }
 0xd63   : > { %v6946_v26 = vpop.f32.mrf.mxu3 }
 0xd64   : > { %v19827_v9 = vadd.f32 %v6946_v26, %v6739_v33 }
 0xd65   : > { %v7042_v45 = vpop.f32.mrf.mxu0 }
 0xd66   : > { %v7072_v34 = vadd.f32 %v7071_v31, %v7042_v45 }
 0xd68   : > { %v7081_v42 = vpack.c.bf16 %v7072_v34, %v7070_v41  ;;  %v15018_v41 = vld [vmem:[%s20656_s4 + $0x4a4] sm:$0xf] }
 0xd6a   : > { %7166 = vmatmul.bf16.gmra.mxu2 %v7081_v42  ;;  %v7076_v42 = vpop.f32.mrf.mxu1 }
 0xd6b   : > { %v19829_v35 = vpop.f32.mrf.mxu3 }
 0xd6c   : > { %20871 = vst [vmem:[#allocation44_spill] sm:$0xff] %v19829_v35 }
 0xd6d   : > { %v7045_v51 = vpop.f32.mrf.mxu0 }
 0xd6e   : > { %v7075_v31 = vadd.f32 %v7074_v21, %v7045_v51  ;;  %v13302_v21 = vld [vmem:[%s20656_s4 + $0x480] sm:$0xf]  ;;  %v15015_v51 = vld [vmem:[%s20656_s4 + $0x484] sm:$0xf0] }
 0xd73   : > { %v6951_v26 = vpop.f32.mrf.mxu3 }
 0xd74   : > { %v19837_v33 = vadd.f32 %v6951_v26, %v6741_v39  ;;  %v13320_v39 = vld [vmem:[%s20656_s4 + $0x4a8] sm:$0xf0]  ;;  %v13303_v26 = vor.u32 %v15015_v51, %v13302_v21  ;;  %v13310_v51 = vld [vmem:[%s20656_s4 + $0x490] sm:$0xf] }
 0xd75   : > { %v7047_v34 = vpop.f32.mrf.mxu0  ;;  %v13323_v24 = vor.u32 %v15018_v41, %v13320_v39  ;;  %v15060_v39 = vld [vmem:[%s20657_s5 + $0x530] sm:$0xff] }
 0xd76   : > { %v7077_v2 = vadd.f32 %v7076_v42, %v7047_v34 }
 0xd77   : > { %13334 = vmatmul.msk.bf16.gmra.mxu3 %vm3473_vm2, %v13323_v24  ;;  %v13328_v24 = vld [vmem:[%s20656_s4 + $0x4b8] sm:$0xf0] }
 0xd78   : > { %v7082_v52 = vpack.c.bf16 %v7077_v2, %v7075_v31 }
 0xd7a   : > { %7171 = vmatmul.bf16.gmra.mxu2 %v7082_v52  ;;  %v15061_v52 = vld [vmem:[%s20657_s5 + $0x538] sm:$0xff] }
 0xd7b   : > { %v19840_v58 = vpop.f32.mrf.mxu3 }
 0xd7c   : > { %20872 = vst [vmem:[#allocation15_spill] sm:$0xff] %v19840_v58 }
 0xd7d   : > { %v7280_v45 = vpop.f32.mrf.mxu0 }
 0xd83   : > { %v7251_v63 = vpop.f32.mrf.mxu3 }
 0xd84   : > { %v7281_v34 = vadd.f32 %v7280_v45, %v7251_v63  ;;  %v15020_v45 = vld [vmem:[%s20656_s4 + $0x4b4] sm:$0xf] }
 0xd85   : > { %v7282_v56 = vpop.f32.mrf.mxu0  ;;  %v13331_v63 = vor.u32 %v15020_v45, %v13328_v24 }
 0xd87   : > { %13335 = vmatmul.msk.bf16.gmra.mxu3 %vm3473_vm2, %v13331_v63  ;;  %v15056_v63 = vld [vmem:[%s20657_s5 + $0x510] sm:$0xff] }
 0xd8a   : > { %7471 = vmatmul.bf16.vlgmr.msra.gmra.mxu2 %v13303_v26  ;;  %v15059_v26 = vld [vmem:[%s20657_s5 + $0x528] sm:$0xff] }
 0xd8b   : > { %v7253_v42 = vpop.f32.mrf.mxu3  ;;  %8032 = vmatpush.bf16.msra.mxu2 %v15061_v52 }
 0xd8c   : > { %v7283_v31 = vadd.f32 %v7282_v56, %v7253_v42  ;;  %v15017_v56 = vld [vmem:[%s20656_s4 + $0x494] sm:$0xf0] }
 0xd8d   : > { %v7285_v2 = vpop.f32.mrf.mxu0  ;;  %v13311_v42 = vor.u32 %v15017_v56, %v13310_v51  ;;  %v15055_v56 = vld [vmem:[%s20657_s5 + $0x508] sm:$0xff] }
 0xd8e   : > { %v7300_v41 = vpack.c.bf16 %v7283_v31, %v7281_v34  ;;  %v15058_v31 = vld [vmem:[%s20657_s5 + $0x520] sm:$0xff] }
 0xd8f   : > { %8033 = vmatpush.bf16.msra.mxu2 %v15060_v39  ;;  %v15057_v39 = vld [vmem:[%s20657_s5 + $0x518] sm:$0xff] }
 0xd90   : > { %7377 = vmatmul.bf16.vlgmr.msrb.gmra.mxu1 %v7300_v41 }
 0xd91   : > { %7941 = vmatpush.bf16.msrb.mxu1 %v18000_v12 }
 0xd93   : > { %v7256_v21 = vpop.f32.mrf.mxu3  ;;  %8034 = vmatpush.bf16.msra.mxu2 %v15059_v26 }
 0xd94   : > { %v7286_v52 = vadd.f32 %v7285_v2, %v7256_v21  ;;  %v13318_v2 = vld [vmem:[%s20656_s4 + $0x4a0] sm:$0xf]  ;;  %v15019_v21 = vld [vmem:[%s20656_s4 + $0x4a4] sm:$0xf0] }
 0xd95   : > { %v7287_v34 = vpop.f32.mrf.mxu0 }
 0xd97   : > { %8035 = vmatpush.bf16.msra.mxu2 %v15058_v31 }
 0xd9a   : > { %7476 = vmatmul.bf16.gmra.mxu2 %v13311_v42 }
 0xd9b   : > { %v7258_v41 = vpop.f32.mrf.mxu3  ;;  %8036 = vmatpush.bf16.msra.mxu2 %v15057_v39 }
 0xd9c   : > { %v7288_v45 = vadd.f32 %v7287_v34, %v7258_v41  ;;  %v15054_v34 = vld [vmem:[%s20657_s5 + $0x500] sm:$0xff] }
 0xd9d   : > { %v7290_v24 = vpop.f32.mrf.mxu0 }
 0xd9e   : > { %v7301_v58 = vpack.c.bf16 %v7288_v45, %v7286_v52 }
 0xd9f   : > { %8037 = vmatpush.bf16.msra.mxu2 %v15056_v63  ;;  %v13326_v63 = vld [vmem:[%s20656_s4 + $0x4b0] sm:$0xf] }
 0xda0   : > { %7382 = vmatmul.bf16.gmra.mxu1 %v7301_v58  ;;  %v13319_v58 = vor.u32 %v15019_v21, %v13318_v2  ;;  %v15021_v2 = vld [vmem:[%s20656_s4 + $0x4b4] sm:$0xf0] }
 0xda1   : > { %v13327_v21 = vor.u32 %v15021_v2, %v13326_v63  ;;  %v15032_v63 = vld [vmem:[%s20656_s4 + $0x4d4] sm:$0xf]  ;;  %v13404_v2 = vld [vmem:[%s20656_s4 + $0x4d8] sm:$0xf0] }
 0xda3   : > { %v7261_v51 = vpop.f32.mrf.mxu3  ;;  %8038 = vmatpush.bf16.msra.mxu2 %v15055_v56 }
 0xda4   : > { %v7291_v42 = vadd.f32 %v7290_v24, %v7261_v51 }
 0xda5   : > { %v7292_v26 = vpop.f32.mrf.mxu0 }
 0xda7   : > { %8039 = vmatpush.bf16.msra.mxu2 %v15054_v34  ;;  %v13396_v34 = vld [vmem:[%s20656_s4 + $0x4c8] sm:$0xf0] }
 0xdaa   : > { %7481 = vmatmul.bf16.gmra.mxu2 %v13319_v58 }
 0xdab   : > { %v7263_v31 = vpop.f32.mrf.mxu3 }
 0xdac   : > { %v7293_v52 = vadd.f32 %v7292_v26, %v7263_v31  ;;  %v15030_v26 = vld [vmem:[%s20656_s4 + $0x4c4] sm:$0xf]  ;;  %v13394_v31 = vld [vmem:[%s20656_s4 + $0x4c0] sm:$0xf] }
 0xdad   : > { %v7295_v45 = vpop.f32.mrf.mxu0 }
 0xdae   : > { %v7302_v41 = vpack.c.bf16 %v7293_v52, %v7291_v42  ;;  %v13399_v42 = vor.u32 %v15030_v26, %v13396_v34  ;;  %v15031_v52 = vld [vmem:[%s20656_s4 + $0x4c4] sm:$0xf0] }
 0xdb0   : > { %7387 = vmatmul.bf16.gmra.mxu1 %v7302_v41 }
 0xdb3   : > { %v7266_v39 = vpop.f32.mrf.mxu3 }
 0xdb4   : > { %v7296_v35 = vadd.f32 %v7295_v45, %v7266_v39  ;;  %v15077_v39 = vld [vmem:[%s20657_s5 + $0x578] sm:$0xff] }
 0xdb5   : > { %v7297_v56 = vpop.f32.mrf.mxu0 }
 0xdba   : > { %7486 = vmatmul.bf16.gmra.mxu2 %v13327_v21  ;;  %v13407_v21 = vor.u32 %v15032_v63, %v13404_v2  ;;  %v15072_v63 = vld [vmem:[%s20657_s5 + $0x550] sm:$0xff]  ;;  %v13410_v2 = vld [vmem:[%s20656_s4 + $0x4e0] sm:$0xf] }
 0xdbb   : > { %v7268_v24 = vpop.f32.mrf.mxu3 }
 0xdbc   : > { %v7298_v51 = vadd.f32 %v7297_v56, %v7268_v24  ;;  %v15076_v56 = vld [vmem:[%s20657_s5 + $0x570] sm:$0xff] }
 0xdbd   : > { %v13402_v24 = vld [vmem:[%s20656_s4 + $0x4d0] sm:$0xf] }
 0xdbe   : > { %v7303_v58 = vpack.c.bf16 %v7298_v51, %v7296_v35  ;;  %v13395_v35 = vor.u32 %v15031_v52, %v13394_v31  ;;  %v15033_v51 = vld [vmem:[%s20656_s4 + $0x4d4] sm:$0xf0]  ;;  %v15074_v31 = vld [vmem:[%s20657_s5 + $0x560] sm:$0xff] }
 0xdbf   : > { %v13403_v26 = vor.u32 %v15033_v51, %v13402_v24  ;;  %v15073_v52 = vld [vmem:[%s20657_s5 + $0x558] sm:$0xff] }
 0xdc0   : > { %7392 = vmatmul.bf16.gmra.mxu1 %v7303_v58  ;;  %v15075_v58 = vld [vmem:[%s20657_s5 + $0x568] sm:$0xff] }
 0xdca   : > { %13424 = vmatmul.msk.bf16.vlgmr.msrb.gmra.mxu2 %vm3473_vm2, %v13399_v42 }
 0xdcb   : > { %8347 = vmatpush.bf16.msrb.mxu2 %v17968_v29 }
 0xdcd   : > { %v7157_v41 = vpop.f32.mrf.mxu2 }
 0xdce   : > { %v19920_v45 = vadd.f32 %v7157_v41, %v19810_v38 }
 0xdcf   : > { %8348 = vmatpush.bf16.msrb.mxu2 %v17953_v14 }
 0xdd0   : > { %7692 = vmatmul.bf16.vlgmr.msra.gmra.mxu1 %v13395_v35  ;;  %v15034_v35 = vld [vmem:[%s20656_s4 + $0x4e4] sm:$0xf] }
 0xdd1   : > { %8253 = vmatpush.bf16.msra.mxu1 %v15077_v39 }
 0xdd3   : > { %8349 = vmatpush.bf16.msrb.mxu2 %v17935_v6 }
 0xdd5   : > { %v19933_v38 = vpop.f32.mrf.mxu2  ;;  %8254 = vmatpush.bf16.msra.mxu1 %v15076_v56  ;;  %v15071_v56 = vld [vmem:[%s20657_s5 + $0x548] sm:$0xff] }
 0xdd6   : > { %20873 = vst [vmem:[#allocation23_spill] sm:$0xff] %v19933_v38 }
 0xdd7   : > { %8350 = vmatpush.bf16.msrb.mxu2 %v17911_v16 }
 0xdd9   : > { %8255 = vmatpush.bf16.msra.mxu1 %v15075_v58 }
 0xdda   : > { %13425 = vmatmul.msk.bf16.gmra.mxu2 %vm3473_vm2, %v13407_v21  ;;  %v15035_v21 = vld [vmem:[%s20656_s4 + $0x4e4] sm:$0xf0] }
 0xddb   : > { %8351 = vmatpush.bf16.msrb.mxu2 %v17890_v37  ;;  %v13411_v24 = vor.u32 %v15035_v21, %v13410_v2  ;;  %v7501_v21 = vpop.f32.mrf.mxu3 }
 0xddd   : > { %v7162_v34 = vpop.f32.mrf.mxu2  ;;  %8256 = vmatpush.bf16.msra.mxu1 %v15074_v31  ;;  %v13420_v31 = vld [vmem:[%s20656_s4 + $0x4f8] sm:$0xf0] }
 0xdde   : > { %v7179_v42 = vadd.f32 %v7162_v34, %v19820_v10  ;;  %v13412_v10 = vld [vmem:[%s20656_s4 + $0x4e8] sm:$0xf0]  ;;  %v15036_v34 = vld [vmem:[%s20656_s4 + $0x4f4] sm:$0xf] }
 0xddf   : > { %8352 = vmatpush.bf16.msrb.mxu2 %v17876_v7  ;;  %v13415_v39 = vor.u32 %v15034_v35, %v13412_v10  ;;  %v13423_v35 = vor.u32 %v15036_v34, %v13420_v31  ;;  %v15037_v10 = vld [vmem:[%s20656_s4 + $0x4f4] sm:$0xf0] }
 0xde0   : > { %7697 = vmatmul.bf16.gmra.mxu1 %v13403_v26  ;;  %v15070_v26 = vld [vmem:[%s20657_s5 + $0x540] sm:$0xff] }
 0xde1   : > { %8257 = vmatpush.bf16.msra.mxu1 %v15073_v52 }
 0xde3   : > { %8353 = vmatpush.bf16.msrb.mxu2 %v17863_v25 }
 0xde5   : > { %v19965_v41 = vpop.f32.mrf.mxu2  ;;  %8258 = vmatpush.bf16.msra.mxu1 %v15072_v63 }
 0xde7   : > { %8354 = vmatpush.bf16.msrb.mxu2 %v17851_v30 }
 0xde9   : > { %8259 = vmatpush.bf16.msra.mxu1 %v15071_v56 }
 0xdea   : > { %13426 = vmatmul.msk.bf16.gmra.mxu2 %vm3473_vm2, %v13415_v39 }
 0xded   : > { %v7167_v51 = vpop.f32.mrf.mxu2  ;;  %8260 = vmatpush.bf16.msra.mxu1 %v15070_v26  ;;  %v13488_v26 = vld [vmem:[%s20656_s4 + $0x508] sm:$0xf0] }
 0xdee   : > { %v7181_v58 = vadd.f32 %v7167_v51, %v19827_v9  ;;  %v13418_v9 = vld [vmem:[%s20656_s4 + $0x4f0] sm:$0xf]  ;;  %v15046_v51 = vld [vmem:[%s20656_s4 + $0x504] sm:$0xf] }
 0xdef   : > { %v13419_v39 = vor.u32 %v15037_v10, %v13418_v9  ;;  %v13491_v34 = vor.u32 %v15046_v51, %v13488_v26 }
 0xdf0   : > { %7702 = vmatmul.bf16.gmra.mxu1 %v13411_v24  ;;  %v7503_v24 = vpop.f32.mrf.mxu3 }
 0xdf5   : > { %v19991_v52 = vpop.f32.mrf.mxu2 }
 0xdf6   : > { %20874 = vst [vmem:[#allocation46_spill] sm:$0xff] %v19991_v52 }
 0xdfa   : > { %13427 = vmatmul.msk.bf16.gmra.mxu2 %vm3473_vm2, %v13423_v35 }
 0xdfd   : > { %v7172_v63 = vpop.f32.mrf.mxu2 }
 0xdfe   : > { %v7183_v2 = vadd.f32 %v7172_v63, %v19837_v33  ;;  %v7506_v33 = vpop.f32.mrf.mxu3 }
 0xe00   : > { %7707 = vmatmul.bf16.gmra.mxu1 %v13419_v39 }
 0xe05   : > { %v20001_v56 = vpop.f32.mrf.mxu2 }
 0xe06   : > { %20875 = vst [vmem:[#allocation49_spill] sm:$0xff] %v20001_v56 }
 0xe0d   : > { %v7378_v31 = vpop.f32.mrf.mxu1  ;;  %v7472_v35 = vpop.f32.mrf.mxu2 }
 0xe0e   : > { %v20010_v9 = vadd.f32 %v7378_v31, %v19920_v45  ;;  %v7502_v63 = vadd.f32 %v7501_v21, %v7472_v35  ;;  %v7508_v45 = vpop.f32.mrf.mxu3 }
 0xe10   : > { %13516 = vmatmul.msk.bf16.vlgmr.msrb.gmra.mxu1 %vm3473_vm2, %v13491_v34 }
 0xe11   : > { %8568 = vmatpush.bf16.msrb.mxu1 %v17968_v29 }
 0xe15   : > { %8569 = vmatpush.bf16.msrb.mxu1 %v17953_v14  ;;  %v20015_v10 = vpop.f32.mrf.mxu1  ;;  %v7474_v39 = vpop.f32.mrf.mxu2 }
 0xe16   : > { %20876 = vst [vmem:[#allocation31_spill] sm:$0xff] %v20015_v10  ;;  %v7504_v38 = vadd.f32 %v7503_v24, %v7474_v39  ;;  %v7511_v35 = vpop.f32.mrf.mxu3 }
 0xe18   : > { %v7521_v56 = vpack.c.bf16 %v7504_v38, %v7502_v63 }
 0xe19   : > { %8570 = vmatpush.bf16.msrb.mxu1 %v17935_v6 }
 0xe1a   : > { %7598 = vmatmul.bf16.vlgmr.msrb.gmra.mxu0 %v7521_v56 }
 0xe1b   : > { %8162 = vmatpush.bf16.msrb.mxu0 %v18000_v12 }
 0xe1d   : > { %8571 = vmatpush.bf16.msrb.mxu1 %v17911_v16  ;;  %v7383_v51 = vpop.f32.mrf.mxu1  ;;  %v7477_v26 = vpop.f32.mrf.mxu2 }
 0xe1e   : > { %v20020_v34 = vadd.f32 %v7383_v51, %v7179_v42  ;;  %v7507_v38 = vadd.f32 %v7506_v33, %v7477_v26  ;;  %v7513_v51 = vpop.f32.mrf.mxu3 }
 0xe21   : > { %8572 = vmatpush.bf16.msrb.mxu1 %v17890_v37 }
 0xe25   : > { %8573 = vmatpush.bf16.msrb.mxu1 %v17876_v7  ;;  %v20024_v31 = vpop.f32.mrf.mxu1  ;;  %v7479_v21 = vpop.f32.mrf.mxu2 }
 0xe26   : > { %v7509_v24 = vadd.f32 %v7508_v45, %v7479_v21  ;;  %v7516_v33 = vpop.f32.mrf.mxu3 }
 0xe28   : > { %v7522_v56 = vpack.c.bf16 %v7509_v24, %v7507_v38  ;;  %v15048_v38 = vld [vmem:[%s20656_s4 + $0x514] sm:$0xf] }
 0xe29   : > { %8574 = vmatpush.bf16.msrb.mxu1 %v17863_v25 }
 0xe2a   : > { %7603 = vmatmul.bf16.gmra.mxu0 %v7522_v56 }
 0xe2d   : > { %8575 = vmatpush.bf16.msrb.mxu1 %v17851_v30  ;;  %v7388_v39 = vpop.f32.mrf.mxu1  ;;  %v7482_v63 = vpop.f32.mrf.mxu2 }
 0xe2e   : > { %v20028_v42 = vadd.f32 %v7388_v39, %v7181_v58  ;;  %v7512_v8 = vadd.f32 %v7511_v35, %v7482_v63  ;;  %v13496_v58 = vld [vmem:[%s20656_s4 + $0x518] sm:$0xf0]  ;;  %v7518_v56 = vpop.f32.mrf.mxu3  ;;  %v15050_v63 = vld [vmem:[%s20656_s4 + $0x524] sm:$0xf] }
 0xe2f   : > { %v13499_v24 = vor.u32 %v15048_v38, %v13496_v58  ;;  %v13486_v38 = vld [vmem:[%s20656_s4 + $0x500] sm:$0xf] }
 0xe31   : > { %13517 = vmatmul.msk.bf16.gmra.mxu1 %vm3473_vm2, %v13499_v24 }
 0xe35   : > { %v20030_v10 = vpop.f32.mrf.mxu1  ;;  %v7484_v52 = vpop.f32.mrf.mxu2 }
 0xe36   : > { %20877 = vst [vmem:[#allocation28_spill] sm:$0xff] %v20030_v10  ;;  %v7514_v50 = vadd.f32 %v7513_v51, %v7484_v52  ;;  %v13504_v51 = vld [vmem:[%s20656_s4 + $0x528] sm:$0xf0] }
 0xe38   : > { %v7523_v60 = vpack.c.bf16 %v7514_v50, %v7512_v8 }
 0xe3a   : > { %7608 = vmatmul.bf16.gmra.mxu0 %v7523_v60 }
 0xe3d   : > { %v7393_v45 = vpop.f32.mrf.mxu1  ;;  %v7487_v26 = vpop.f32.mrf.mxu2 }
 0xe3e   : > { %v20032_v21 = vadd.f32 %v7393_v45, %v7183_v2  ;;  %v7517_v60 = vadd.f32 %v7516_v33, %v7487_v26  ;;  %v13507_v45 = vor.u32 %v15050_v63, %v13504_v51  ;;  %v15047_v33 = vld [vmem:[%s20656_s4 + $0x504] sm:$0xf0]  ;;  %v15093_v63 = vld [vmem:[%s20657_s5 + $0x5b8] sm:$0xff] }
 0xe3f   : > { %v13512_v51 = vld [vmem:[%s20656_s4 + $0x538] sm:$0xf0] }
 0xe41   : > { %13518 = vmatmul.msk.bf16.gmra.mxu1 %vm3473_vm2, %v13507_v45 }
 0xe45   : > { %v20041_v52 = vpop.f32.mrf.mxu1  ;;  %v7489_v8 = vpop.f32.mrf.mxu2 }
 0xe46   : > { %20878 = vst [vmem:[#allocation11_spill] sm:$0xff] %v20041_v52  ;;  %v7519_v50 = vadd.f32 %v7518_v56, %v7489_v8  ;;  %v13487_v8 = vor.u32 %v15047_v33, %v13486_v38  ;;  %v13494_v38 = vld [vmem:[%s20656_s4 + $0x510] sm:$0xf]  ;;  %v15049_v33 = vld [vmem:[%s20656_s4 + $0x514] sm:$0xf0] }
 0xe48   : > { %v7524_v35 = vpack.c.bf16 %v7519_v50, %v7517_v60 }
 0xe4a   : > { %7613 = vmatmul.bf16.gmra.mxu0 %v7524_v35 }
 0xe4d   : > { %v7693_v2 = vpop.f32.mrf.mxu1  ;;  %v7722_v39 = vpop.f32.mrf.mxu2 }
 0xe4e   : > { %v7723_v26 = vadd.f32 %v7722_v39, %v7693_v2  ;;  %v15092_v2 = vld [vmem:[%s20657_s5 + $0x5b0] sm:$0xff] }
 0xe4f   : > { %v15052_v39 = vld [vmem:[%s20656_s4 + $0x534] sm:$0xf] }
 0xe50   : > { %v13515_v45 = vor.u32 %v15052_v39, %v13512_v51  ;;  %v15090_v39 = vld [vmem:[%s20657_s5 + $0x5a0] sm:$0xff]  ;;  %v15088_v51 = vld [vmem:[%s20657_s5 + $0x590] sm:$0xff] }
 0xe52   : > { %13519 = vmatmul.msk.bf16.gmra.mxu1 %vm3473_vm2, %v13515_v45  ;;  %v13502_v45 = vld [vmem:[%s20656_s4 + $0x520] sm:$0xf] }
 0xe55   : > { %v7695_v58 = vpop.f32.mrf.mxu1  ;;  %v7724_v24 = vpop.f32.mrf.mxu2 }
 0xe56   : > { %v7725_v56 = vadd.f32 %v7724_v24, %v7695_v58 }
 0xe58   : > { %v7742_v60 = vpack.c.bf16 %v7725_v56, %v7723_v26  ;;  %v15091_v56 = vld [vmem:[%s20657_s5 + $0x5a8] sm:$0xff] }
 0xe5a   : > { %7819 = vmatmul.bf16.vlgmr.msra.gmra.mxu3 %v7742_v60  ;;  %7913 = vmatmul.bf16.vlgmr.msra.gmra.mxu0 %v13487_v8  ;;  %v13495_v60 = vor.u32 %v15049_v33, %v13494_v38  ;;  %v15051_v38 = vld [vmem:[%s20656_s4 + $0x524] sm:$0xf0] }
 0xe5b   : > { %8383 = vmatpush.bf16.msra.mxu3 %v18000_v12  ;;  %8474 = vmatpush.bf16.msra.mxu0 %v15093_v63  ;;  %v15087_v33 = vld [vmem:[%s20657_s5 + $0x588] sm:$0xff] }
 0xe5d   : > { %v7698_v50 = vpop.f32.mrf.mxu1  ;;  %v7727_v35 = vpop.f32.mrf.mxu2 }
 0xe5e   : > { %v7728_v26 = vadd.f32 %v7727_v35, %v7698_v50  ;;  %v15089_v50 = vld [vmem:[%s20657_s5 + $0x598] sm:$0xff] }
 0xe5f   : > { %8475 = vmatpush.bf16.msra.mxu0 %v15092_v2 }
 0xe63   : > { %8476 = vmatpush.bf16.msra.mxu0 %v15091_v56 }
 0xe65   : > { %v7700_v58 = vpop.f32.mrf.mxu1  ;;  %v7729_v24 = vpop.f32.mrf.mxu2 }
 0xe66   : > { %v7730_v8 = vadd.f32 %v7729_v24, %v7700_v58 }
 0xe67   : > { %8477 = vmatpush.bf16.msra.mxu0 %v15090_v39 }
 0xe68   : > { %v7743_v63 = vpack.c.bf16 %v7730_v8, %v7728_v26  ;;  %v13503_v8 = vor.u32 %v15051_v38, %v13502_v45 }
 0xe6a   : > { %7824 = vmatmul.bf16.gmra.mxu3 %v7743_v63  ;;  %7918 = vmatmul.bf16.gmra.mxu0 %v13495_v60  ;;  %v15086_v63 = vld [vmem:[%s20657_s5 + $0x580] sm:$0xff] }
 0xe6b   : > { %8478 = vmatpush.bf16.msra.mxu0 %v15089_v50 }
 0xe6d   : > { %v7703_v35 = vpop.f32.mrf.mxu1  ;;  %v7732_v2 = vpop.f32.mrf.mxu2 }
 0xe6e   : > { %v7733_v26 = vadd.f32 %v7732_v2, %v7703_v35  ;;  %v15053_v35 = vld [vmem:[%s20656_s4 + $0x534] sm:$0xf0] }
 0xe6f   : > { %8479 = vmatpush.bf16.msra.mxu0 %v15088_v51  ;;  %v13510_v51 = vld [vmem:[%s20656_s4 + $0x530] sm:$0xf] }
 0xe73   : > { %8480 = vmatpush.bf16.msra.mxu0 %v15087_v33 }
 0xe75   : > { %v7705_v58 = vpop.f32.mrf.mxu1  ;;  %v7734_v24 = vpop.f32.mrf.mxu2 }
 0xe76   : > { %v7735_v56 = vadd.f32 %v7734_v24, %v7705_v58  ;;  %v13578_v24 = vld [vmem:[%s20656_s4 + $0x540] sm:$0xf] }
 0xe77   : > { %8481 = vmatpush.bf16.msra.mxu0 %v15086_v63 }
 0xe78   : > { %v7744_v60 = vpack.c.bf16 %v7735_v56, %v7733_v26  ;;  %v13511_v26 = vor.u32 %v15053_v35, %v13510_v51  ;;  %v15063_v56 = vld [vmem:[%s20656_s4 + $0x544] sm:$0xf0] }
 0xe79   : > { %v13579_v63 = vor.u32 %v15063_v56, %v13578_v24 }
 0xe7a   : > { %7829 = vmatmul.bf16.gmra.mxu3 %v7744_v60  ;;  %7923 = vmatmul.bf16.gmra.mxu0 %v13503_v8  ;;  %v15062_v8 = vld [vmem:[%s20656_s4 + $0x544] sm:$0xf]  ;;  %v13580_v60 = vld [vmem:[%s20656_s4 + $0x548] sm:$0xf0] }
 0xe7d   : > { %v7708_v39 = vpop.f32.mrf.mxu1  ;;  %v7737_v50 = vpop.f32.mrf.mxu2 }
 0xe7e   : > { %v7738_v2 = vadd.f32 %v7737_v50, %v7708_v39  ;;  %v13583_v39 = vor.u32 %v15062_v8, %v13580_v60  ;;  %v13602_v60 = vld [vmem:[%s20656_s4 + $0x570] sm:$0xf] }
 0xe85   : > { %v7710_v45 = vpop.f32.mrf.mxu1  ;;  %v7739_v38 = vpop.f32.mrf.mxu2 }
 0xe86   : > { %v7740_v33 = vadd.f32 %v7739_v38, %v7710_v45  ;;  %v15065_v45 = vld [vmem:[%s20656_s4 + $0x554] sm:$0xf0] }
 0xe88   : > { %v7745_v58 = vpack.c.bf16 %v7740_v33, %v7738_v2  ;;  %v13586_v2 = vld [vmem:[%s20656_s4 + $0x550] sm:$0xf] }
 0xe8a   : > { %7834 = vmatmul.bf16.gmra.mxu3 %v7745_v58  ;;  %7928 = vmatmul.bf16.gmra.mxu0 %v13511_v26  ;;  %v13594_v58 = vld [vmem:[%s20656_s4 + $0x560] sm:$0xf] }
 0xe97   : > { %v7599_v50 = vpop.f32.mrf.mxu0 }
 0xe98   : > { %v7619_v51 = vadd.f32 %v7599_v50, %v20010_v9  ;;  %v15064_v9 = vld [vmem:[%s20656_s4 + $0x554] sm:$0xf] }
 0xe9a   : > { %8134 = vmatmul.bf16.vlgmr.msrb.gmra.mxu3 %v13579_v63  ;;  %13608 = vmatmul.msk.bf16.vlgmr.msrb.gmra.mxu0 %vm3473_vm2, %v13583_v39  ;;  %v15069_v63 = vld [vmem:[%s20656_s4 + $0x574] sm:$0xf0] }
 0xe9b   : > { %8789 = vmatpush.bf16.msrb.mxu0 %v17968_v29  ;;  %v13587_v29 = vor.u32 %v15065_v45, %v13586_v2  ;;  %v13603_v39 = vor.u32 %v15069_v63, %v13602_v60 }
 0xe9f   : > { %8790 = vmatpush.bf16.msrb.mxu0 %v17953_v14  ;;  %v20122_v35 = vpop.f32.mrf.mxu0  ;;  %v13588_v14 = vld [vmem:[%s20656_s4 + $0x558] sm:$0xf0] }
 0xea0   : > { %20879 = vst [vmem:[#allocation24_spill] sm:$0xff] %v20122_v35  ;;  %v13591_v38 = vor.u32 %v15064_v9, %v13588_v14  ;;  %v7943_v9 = vpop.f32.mrf.mxu1 }
 0xea3   : > { %8791 = vmatpush.bf16.msrb.mxu0 %v17935_v6 }
 0xea7   : > { %8792 = vmatpush.bf16.msrb.mxu0 %v17911_v16  ;;  %v7604_v33 = vpop.f32.mrf.mxu0  ;;  %v15067_v16 = vld [vmem:[%s20656_s4 + $0x564] sm:$0xf0] }
 0xea8   : > { %v7621_v26 = vadd.f32 %v7604_v33, %v20020_v34  ;;  %v15066_v34 = vld [vmem:[%s20656_s4 + $0x564] sm:$0xf] }
 0xeaa   : > { %8139 = vmatmul.bf16.gmra.mxu3 %v13587_v29  ;;  %13609 = vmatmul.msk.bf16.gmra.mxu0 %vm3473_vm2, %v13591_v38  ;;  %v7945_v29 = vpop.f32.mrf.mxu1 }
 0xeab   : > { %8793 = vmatpush.bf16.msrb.mxu0 %v17890_v37  ;;  %v13595_v37 = vor.u32 %v15067_v16, %v13594_v58 }
 0xeaf   : > { %8794 = vmatpush.bf16.msrb.mxu0 %v17876_v7  ;;  %v20142_v6 = vpop.f32.mrf.mxu0  ;;  %v13596_v7 = vld [vmem:[%s20656_s4 + $0x568] sm:$0xf0] }
 0xeb0   : > { %v13599_v24 = vor.u32 %v15066_v34, %v13596_v7 }
 0xeb2   : > { %v7948_v58 = vpop.f32.mrf.mxu1 }
 0xeb3   : > { %8795 = vmatpush.bf16.msrb.mxu0 %v17863_v25 }
 0xeb7   : > { %8796 = vmatpush.bf16.msrb.mxu0 %v17851_v30  ;;  %v7609_v56 = vpop.f32.mrf.mxu0  ;;  %v15068_v30 = vld [vmem:[%s20656_s4 + $0x574] sm:$0xf] }
 0xeb8   : > { %v7623_v8 = vadd.f32 %v7609_v56, %v20028_v42  ;;  %v13604_v42 = vld [vmem:[%s20656_s4 + $0x578] sm:$0xf0] }
 0xeb9   : > { %v13607_v50 = vor.u32 %v15068_v30, %v13604_v42 }
 0xeba   : > { %8144 = vmatmul.bf16.gmra.mxu3 %v13595_v37  ;;  %13610 = vmatmul.msk.bf16.gmra.mxu0 %vm3473_vm2, %v13599_v24  ;;  %v7950_v60 = vpop.f32.mrf.mxu1 }
 0xebf   : > { %v20160_v25 = vpop.f32.mrf.mxu0 }
 0xec0   : > { %20880 = vst [vmem:[#allocation37_spill] sm:$0xff] %v20160_v25 }
 0xec7   : > { %v7614_v2 = vpop.f32.mrf.mxu0 }
 0xec8   : > { %v7625_v45 = vadd.f32 %v7614_v2, %v20032_v21  ;;  %v7953_v2 = vpop.f32.mrf.mxu1 }
 0xeca   : > { %8149 = vmatmul.bf16.gmra.mxu3 %v13603_v39  ;;  %13611 = vmatmul.msk.bf16.gmra.mxu0 %vm3473_vm2, %v13607_v50 }
 0xecf   : > { %v20176_v14 = vpop.f32.mrf.mxu0 }
 0xed0   : > { %20881 = vst [vmem:[#allocation50_spill] sm:$0xff] %v20176_v14 }
 0xed7   : > { %v7914_v38 = vpop.f32.mrf.mxu0 }
 0xed8   : > { %v7944_v7 = vadd.f32 %v7943_v9, %v7914_v38  ;;  %v15078_v38 = vld [vmem:[%s20656_s4 + $0x584] sm:$0xf] }
 0xedd   : > { %v7820_v33 = vpop.f32.mrf.mxu3 }
 0xede   : > { %v20178_v16 = vadd.f32 %v7820_v33, %v7619_v51 }
 0xedf   : > { %v7916_v34 = vpop.f32.mrf.mxu0 }
 0xee0   : > { %v7946_v37 = vadd.f32 %v7945_v29, %v7916_v34  ;;  %v7955_v29 = vpop.f32.mrf.mxu1  ;;  %v13672_v34 = vld [vmem:[%s20656_s4 + $0x588] sm:$0xf0] }
 0xee2   : > { %v7963_v24 = vpack.c.bf16 %v7946_v37, %v7944_v7 }
 0xee4   : > { %8040 = vmatmul.bf16.vlgmr.msra.gmra.mxu2 %v7963_v24 }
 0xee5   : > { %8604 = vmatpush.bf16.msra.mxu2 %v18000_v12  ;;  %v20181_v21 = vpop.f32.mrf.mxu3 }
 0xee6   : > { %20882 = vst [vmem:[#allocation10_spill] sm:$0xff] %v20181_v21 }
 0xee7   : > { %v7919_v56 = vpop.f32.mrf.mxu0 }
 0xee8   : > { %v7949_v39 = vadd.f32 %v7948_v58, %v7919_v56 }
 0xeed   : > { %v7825_v63 = vpop.f32.mrf.mxu3 }
 0xeee   : > { %v20183_v30 = vadd.f32 %v7825_v63, %v7621_v26  ;;  %v13675_v26 = vor.u32 %v15078_v38, %v13672_v34 }
 0xeef   : > { %v7921_v42 = vpop.f32.mrf.mxu0 }
 0xef0   : > { %v7951_v50 = vadd.f32 %v7950_v60, %v7921_v42  ;;  %13700 = vmatmul.msk.bf16.vlgmr.msra.gmra.mxu3 %vm3473_vm2, %v13675_v26  ;;  %v7958_v42 = vpop.f32.mrf.mxu1 }
 0xef2   : > { %v7964_v51 = vpack.c.bf16 %v7951_v50, %v7949_v39  ;;  %v15080_v50 = vld [vmem:[%s20656_s4 + $0x594] sm:$0xf] }
 0xef4   : > { %8045 = vmatmul.bf16.gmra.mxu2 %v7964_v51 }
 0xef5   : > { %v20185_v33 = vpop.f32.mrf.mxu3 }
 0xef7   : > { %v7924_v9 = vpop.f32.mrf.mxu0 }
 0xef8   : > { %v7954_v24 = vadd.f32 %v7953_v2, %v7924_v9  ;;  %v7960_v9 = vpop.f32.mrf.mxu1 }
 0xefd   : > { %v7830_v7 = vpop.f32.mrf.mxu3 }
 0xefe   : > { %v20193_v37 = vadd.f32 %v7830_v7, %v7623_v8  ;;  %v13680_v8 = vld [vmem:[%s20656_s4 + $0x598] sm:$0xf0] }
 0xeff   : > { %v7926_v58 = vpop.f32.mrf.mxu0  ;;  %v13683_v51 = vor.u32 %v15080_v50, %v13680_v8 }
 0xf00   : > { %v7956_v56 = vadd.f32 %v7955_v29, %v7926_v58 }
 0xf01   : > { %13701 = vmatmul.msk.bf16.gmra.mxu3 %vm3473_vm2, %v13683_v51 }
 0xf02   : > { %v7965_v60 = vpack.c.bf16 %v7956_v56, %v7954_v24  ;;  %v15082_v56 = vld [vmem:[%s20656_s4 + $0x5a4] sm:$0xf] }
 0xf04   : > { %8050 = vmatmul.bf16.gmra.mxu2 %v7965_v60 }
 0xf05   : > { %v20196_v63 = vpop.f32.mrf.mxu3 }
 0xf06   : > { %20883 = vst [vmem:[#allocation25_spill] sm:$0xff] %v20196_v63 }
 0xf07   : > { %v7929_v39 = vpop.f32.mrf.mxu0 }
 0xf08   : > { %v7959_v29 = vadd.f32 %v7958_v42, %v7929_v39  ;;  %v13670_v42 = vld [vmem:[%s20656_s4 + $0x580] sm:$0xf]  ;;  %v15079_v39 = vld [vmem:[%s20656_s4 + $0x584] sm:$0xf0] }
 0xf09   : > { %v13671_v51 = vor.u32 %v15079_v39, %v13670_v42 }
 0xf0d   : > { %v7835_v38 = vpop.f32.mrf.mxu3 }
 0xf0e   : > { %v20204_v34 = vadd.f32 %v7835_v38, %v7625_v45  ;;  %v13688_v45 = vld [vmem:[%s20656_s4 + $0x5a8] sm:$0xf0] }
 0xf0f   : > { %v7931_v2 = vpop.f32.mrf.mxu0  ;;  %v13691_v60 = vor.u32 %v15082_v56, %v13688_v45  ;;  %v13696_v56 = vld [vmem:[%s20656_s4 + $0x5b8] sm:$0xf0] }
 0xf10   : > { %v7961_v26 = vadd.f32 %v7960_v9, %v7931_v2 }
 0xf11   : > { %13702 = vmatmul.msk.bf16.gmra.mxu3 %vm3473_vm2, %v13691_v60 }
 0xf12   : > { %v7966_v7 = vpack.c.bf16 %v7961_v26, %v7959_v29 }
 0xf14   : > { %8055 = vmatmul.bf16.gmra.mxu2 %v7966_v7  ;;  %v15084_v7 = vld [vmem:[%s20656_s4 + $0x5b4] sm:$0xf] }
 0xf15   : > { %v20207_v58 = vpop.f32.mrf.mxu3  ;;  %v13699_v45 = vor.u32 %v15084_v7, %v13696_v56  ;;  %v15083_v7 = vld [vmem:[%s20656_s4 + $0x5a4] sm:$0xf0] }
 0xf16   : > { %20884 = vst [vmem:[#allocation51_spill] sm:$0xff] %v20207_v58 }
 0xf17   : > { %v8164_v24 = vpop.f32.mrf.mxu0 }
 0xf1d   : > { %v8135_v50 = vpop.f32.mrf.mxu3 }
 0xf1e   : > { %v8165_v38 = vadd.f32 %v8164_v24, %v8135_v50  ;;  %v13678_v24 = vld [vmem:[%s20656_s4 + $0x590] sm:$0xf]  ;;  %v15081_v50 = vld [vmem:[%s20656_s4 + $0x594] sm:$0xf0] }
 0xf1f   : > { %v8166_v8 = vpop.f32.mrf.mxu0  ;;  %v13679_v42 = vor.u32 %v15081_v50, %v13678_v24 }
 0xf21   : > { %13703 = vmatmul.msk.bf16.gmra.mxu3 %vm3473_vm2, %v13699_v45 }
 0xf24   : > { %8355 = vmatmul.bf16.vlgmr.msrb.gmra.mxu2 %v13671_v51 }
 0xf25   : > { %v8137_v2 = vpop.f32.mrf.mxu3 }
 0xf26   : > { %v8167_v9 = vadd.f32 %v8166_v8, %v8137_v2 }
 0xf27   : > { %v8169_v29 = vpop.f32.mrf.mxu0 }
 0xf28   : > { %v8184_v26 = vpack.c.bf16 %v8167_v9, %v8165_v38 }
 0xf2a   : > { %8261 = vmatmul.bf16.vlgmr.msra.gmra.mxu1 %v8184_v26  ;;  %v13686_v26 = vld [vmem:[%s20656_s4 + $0x5a0] sm:$0xf] }
 0xf2b   : > { %8825 = vmatpush.bf16.msra.mxu1 %v18000_v12  ;;  %v13687_v45 = vor.u32 %v15083_v7, %v13686_v26  ;;  %v13764_v7 = vld [vmem:[%s20656_s4 + $0x5c8] sm:$0xf0] }
 0xf2d   : > { %v8140_v60 = vpop.f32.mrf.mxu3 }
 0xf2e   : > { %v8170_v39 = vadd.f32 %v8169_v29, %v8140_v60 }
 0xf2f   : > { %v8171_v12 = vpop.f32.mrf.mxu0 }
 0xf34   : > { %8360 = vmatmul.bf16.gmra.mxu2 %v13679_v42  ;;  %v13694_v42 = vld [vmem:[%s20656_s4 + $0x5b0] sm:$0xf] }
 0xf35   : > { %v8142_v8 = vpop.f32.mrf.mxu3 }
 0xf36   : > { %v8172_v51 = vadd.f32 %v8171_v12, %v8142_v8 }
 0xf37   : > { %v8174_v38 = vpop.f32.mrf.mxu0 }
 0xf38   : > { %v8185_v2 = vpack.c.bf16 %v8172_v51, %v8170_v39  ;;  %v15085_v39 = vld [vmem:[%s20656_s4 + $0x5b4] sm:$0xf0] }
 0xf39   : > { %v13695_v8 = vor.u32 %v15085_v39, %v13694_v42  ;;  %v13772_v42 = vld [vmem:[%s20656_s4 + $0x5d8] sm:$0xf0] }
 0xf3a   : > { %8266 = vmatmul.bf16.gmra.mxu1 %v8185_v2 }
 0xf3d   : > { %v8145_v9 = vpop.f32.mrf.mxu3 }
 0xf3e   : > { %v8175_v21 = vadd.f32 %v8174_v38, %v8145_v9 }
 0xf3f   : > { %v8176_v56 = vpop.f32.mrf.mxu0 }
 0xf44   : > { %8365 = vmatmul.bf16.gmra.mxu2 %v13687_v45  ;;  %v13762_v45 = vld [vmem:[%s20656_s4 + $0x5c0] sm:$0xf] }
 0xf45   : > { %v8147_v29 = vpop.f32.mrf.mxu3 }
 0xf46   : > { %v8177_v60 = vadd.f32 %v8176_v56, %v8147_v29  ;;  %v15095_v29 = vld [vmem:[%s20656_s4 + $0x5c4] sm:$0xf0] }
 0xf47   : > { %v8179_v50 = vpop.f32.mrf.mxu0 }
 0xf48   : > { %v8186_v24 = vpack.c.bf16 %v8177_v60, %v8175_v21  ;;  %v15094_v21 = vld [vmem:[%s20656_s4 + $0x5c4] sm:$0xf]  ;;  %v13763_v60 = vor.u32 %v15095_v29, %v13762_v45  ;;  %v13778_v45 = vld [vmem:[%s20656_s4 + $0x5e0] sm:$0xf] }
 0xf49   : > { %v13767_v56 = vor.u32 %v15094_v21, %v13764_v7  ;;  %v13780_v21 = vld [vmem:[%s20656_s4 + $0x5e8] sm:$0xf0] }
 0xf4a   : > { %8271 = vmatmul.bf16.gmra.mxu1 %v8186_v24 }
 0xf4d   : > { %v8150_v12 = vpop.f32.mrf.mxu3 }
 0xf4e   : > { %v8180_v2 = vadd.f32 %v8179_v50, %v8150_v12  ;;  %v15096_v12 = vld [vmem:[%s20656_s4 + $0x5d4] sm:$0xf] }
 0xf4f   : > { %v8181_v51 = vpop.f32.mrf.mxu0 }
 0xf54   : > { %8370 = vmatmul.bf16.gmra.mxu2 %v13695_v8  ;;  %v13775_v8 = vor.u32 %v15096_v12, %v13772_v42  ;;  %v15100_v12 = vld [vmem:[%s20656_s4 + $0x5f4] sm:$0xf]  ;;  %v13788_v42 = vld [vmem:[%s20656_s4 + $0x5f8] sm:$0xf0] }
 0xf55   : > { %v8152_v38 = vpop.f32.mrf.mxu3 }
 0xf56   : > { %v8182_v9 = vadd.f32 %v8181_v51, %v8152_v38  ;;  %v13770_v51 = vld [vmem:[%s20656_s4 + $0x5d0] sm:$0xf] }
 0xf58   : > { %v8187_v26 = vpack.c.bf16 %v8182_v9, %v8180_v2 }
 0xf5a   : > { %8276 = vmatmul.bf16.gmra.mxu1 %v8187_v26  ;;  %v15098_v26 = vld [vmem:[%s20656_s4 + $0x5e4] sm:$0xf] }
 0xf64   : > { %13792 = vmatmul.msk.bf16.vlgmr.msra.gmra.mxu2 %vm3473_vm2, %v13767_v56  ;;  %v13783_v56 = vor.u32 %v15098_v26, %v13780_v21 }
 0xf67   : > { %v8041_v24 = vpop.f32.mrf.mxu2 }
 0xf68   : > { %v8061_v50 = vadd.f32 %v8041_v24, %v20178_v16  ;;  %v15097_v16 = vld [vmem:[%s20656_s4 + $0x5d4] sm:$0xf0] }
 0xf69   : > { %v13771_v2 = vor.u32 %v15097_v16, %v13770_v51  ;;  %v13791_v51 = vor.u32 %v15100_v12, %v13788_v42  ;;  %v13786_v16 = vld [vmem:[%s20656_s4 + $0x5f0] sm:$0xf] }
 0xf6a   : > { %8576 = vmatmul.bf16.vlgmr.msrb.gmra.mxu1 %v13763_v60 }
 0xf6f   : > { %v20268_v39 = vpop.f32.mrf.mxu2 }
 0xf70   : > { %20885 = vst [vmem:[#allocation52_spill] sm:$0xff] %v20268_v39 }
 0xf73   : > { %v8385_v21 = vpop.f32.mrf.mxu3 }
 0xf74   : > { %13793 = vmatmul.msk.bf16.gmra.mxu2 %vm3473_vm2, %v13775_v8 }
 0xf77   : > { %v8046_v38 = vpop.f32.mrf.mxu2 }
 0xf78   : > { %v8063_v9 = vadd.f32 %v8046_v38, %v20183_v30  ;;  %v15099_v30 = vld [vmem:[%s20656_s4 + $0x5e4] sm:$0xf0] }
 0xf79   : > { %v13779_v29 = vor.u32 %v15099_v30, %v13778_v45 }
 0xf7a   : > { %8581 = vmatmul.bf16.gmra.mxu1 %v13771_v2 }
 0xf7b   : > { %v8387_v45 = vpop.f32.mrf.mxu3 }
 0xf7f   : > { %v20284_v7 = vpop.f32.mrf.mxu2 }
 0xf84   : > { %13794 = vmatmul.msk.bf16.gmra.mxu2 %vm3473_vm2, %v13783_v56  ;;  %v8390_v12 = vpop.f32.mrf.mxu3 }
 0xf87   : > { %v8051_v60 = vpop.f32.mrf.mxu2 }
 0xf88   : > { %v8065_v24 = vadd.f32 %v8051_v60, %v20193_v37  ;;  %v15101_v37 = vld [vmem:[%s20656_s4 + $0x5f4] sm:$0xf0] }
 0xf89   : > { %v13787_v2 = vor.u32 %v15101_v37, %v13786_v16 }
 0xf8a   : > { %8586 = vmatmul.bf16.gmra.mxu1 %v13779_v29 }
 0xf8c   : > { %v8392_v16 = vpop.f32.mrf.mxu3 }
 0xf8f   : > { %v20300_v8 = vpop.f32.mrf.mxu2 }
 0xf90   : > { %20886 = vst [vmem:[#allocation53_spill] sm:$0xff] %v20300_v8 }
 0xf94   : > { %13795 = vmatmul.msk.bf16.gmra.mxu2 %vm3473_vm2, %v13791_v51 }
 0xf97   : > { %v8056_v38 = vpop.f32.mrf.mxu2 }
 0xf98   : > { %v8067_v26 = vadd.f32 %v8056_v38, %v20204_v34  ;;  %v15109_v34 = vld [vmem:[%s20657_s5 + $0x5f8] sm:$0xff] }
 0xf99   : > { %8695 = vmatpush.bf16.msrb.mxu3 %v15109_v34 }
 0xf9a   : > { %8591 = vmatmul.bf16.gmra.mxu1 %v13787_v2 }
 0xf9f   : > { %v20310_v56 = vpop.f32.mrf.mxu2 }
 0xfa0   : > { %20887 = vst [vmem:[#allocation54_spill] sm:$0xff] %v20310_v56 }
 0xfa7   : > { %v8262_v30 = vpop.f32.mrf.mxu1  ;;  %v8356_v29 = vpop.f32.mrf.mxu2 }
 0xfa8   : > { %v20312_v60 = vadd.f32 %v8262_v30, %v8061_v50  ;;  %v8386_v35 = vadd.f32 %v8385_v21, %v8356_v29  ;;  %v15108_v50 = vld [vmem:[%s20657_s5 + $0x5f0] sm:$0xff]  ;;  %v8395_v30 = vpop.f32.mrf.mxu3 }
 0xfa9   : > { %8696 = vmatpush.bf16.msrb.mxu3 %v15108_v50 }
 0xfaf   : > { %v20314_v42 = vpop.f32.mrf.mxu1  ;;  %v8358_v39 = vpop.f32.mrf.mxu2 }
 0xfb0   : > { %20888 = vst [vmem:[#allocation55_spill] sm:$0xff] %v20314_v42  ;;  %v8388_v58 = vadd.f32 %v8387_v45, %v8358_v39 }
 0xfb2   : > { %v8405_v51 = vpack.c.bf16 %v8388_v58, %v8386_v35  ;;  %v15107_v35 = vld [vmem:[%s20657_s5 + $0x5e8] sm:$0xff] }
 0xfb3   : > { %8697 = vmatpush.bf16.msrb.mxu3 %v15107_v35  ;;  %v15110_v35 = vld [vmem:[%s20656_s4 + $0x604] sm:$0xf] }
 0xfb4   : > { %8482 = vmatmul.bf16.vlgmr.msra.gmra.mxu0 %v8405_v51  ;;  %v15105_v51 = vld [vmem:[%s20657_s5 + $0x5d8] sm:$0xff] }
 0xfb7   : > { %v8267_v37 = vpop.f32.mrf.mxu1  ;;  %v8361_v2 = vpop.f32.mrf.mxu2 }
 0xfb8   : > { %v20319_v38 = vadd.f32 %v8267_v37, %v8063_v9  ;;  %v8391_v21 = vadd.f32 %v8390_v12, %v8361_v2  ;;  %v15106_v9 = vld [vmem:[%s20657_s5 + $0x5e0] sm:$0xff]  ;;  %v15104_v12 = vld [vmem:[%s20657_s5 + $0x5d0] sm:$0xff]  ;;  %v15103_v2 = vld [vmem:[%s20657_s5 + $0x5c8] sm:$0xff] }
 0xfb9   : > { %8698 = vmatpush.bf16.msrb.mxu3 %v15106_v9 }
 0xfbd   : > { %8699 = vmatpush.bf16.msrb.mxu3 %v15105_v51  ;;  %v15102_v51 = vld [vmem:[%s20657_s5 + $0x5c0] sm:$0xff] }
 0xfbf   : > { %v20327_v58 = vpop.f32.mrf.mxu1  ;;  %v8363_v39 = vpop.f32.mrf.mxu2 }
 0xfc0   : > { %v8393_v45 = vadd.f32 %v8392_v16, %v8363_v39  ;;  %v8397_v16 = vpop.f32.mrf.mxu3  ;;  %v13856_v39 = vld [vmem:[%s20656_s4 + $0x608] sm:$0xf0] }
 0xfc1   : > { %8700 = vmatpush.bf16.msrb.mxu3 %v15104_v12 }
 0xfc2   : > { %v8406_v29 = vpack.c.bf16 %v8393_v45, %v8391_v21 }
 0xfc4   : > { %8487 = vmatmul.bf16.gmra.mxu0 %v8406_v29 }
 0xfc5   : > { %8701 = vmatpush.bf16.msrb.mxu3 %v15103_v2 }
 0xfc7   : > { %v8272_v34 = vpop.f32.mrf.mxu1  ;;  %v8366_v37 = vpop.f32.mrf.mxu2 }
 0xfc8   : > { %v20335_v50 = vadd.f32 %v8272_v34, %v8065_v24  ;;  %v13859_v24 = vor.u32 %v15110_v35, %v13856_v39  ;;  %v8396_v9 = vadd.f32 %v8395_v30, %v8366_v37  ;;  %v8400_v12 = vpop.f32.mrf.mxu3  ;;  %v15112_v35 = vld [vmem:[%s20656_s4 + $0x614] sm:$0xf]  ;;  %v13864_v30 = vld [vmem:[%s20656_s4 + $0x618] sm:$0xf0] }
 0xfc9   : > { %8702 = vmatpush.bf16.msrb.mxu3 %v15102_v51  ;;  %v13867_v37 = vor.u32 %v15112_v35, %v13864_v30  ;;  %v13872_v51 = vld [vmem:[%s20656_s4 + $0x628] sm:$0xf0]  ;;  %v13854_v35 = vld [vmem:[%s20656_s4 + $0x600] sm:$0xf] }
 0xfca   : > { %13884 = vmatmul.msk.bf16.vlgmr.msra.gmra.mxu1 %vm3473_vm2, %v13859_v24 }
 0xfcf   : > { %v20350_v21 = vpop.f32.mrf.mxu1  ;;  %v8368_v45 = vpop.f32.mrf.mxu2 }
 0xfd0   : > { %20889 = vst [vmem:[#allocation56_spill] sm:$0xff] %v20350_v21  ;;  %v8398_v29 = vadd.f32 %v8397_v16, %v8368_v45  ;;  %v8402_v16 = vpop.f32.mrf.mxu3 }
 0xfd2   : > { %v8407_v34 = vpack.c.bf16 %v8398_v29, %v8396_v9  ;;  %v15114_v29 = vld [vmem:[%s20656_s4 + $0x624] sm:$0xf] }
 0xfd4   : > { %8492 = vmatmul.bf16.gmra.mxu0 %v8407_v34  ;;  %v13875_v34 = vor.u32 %v15114_v29, %v13872_v51  ;;  %v15116_v29 = vld [vmem:[%s20656_s4 + $0x634] sm:$0xf]  ;;  %v13880_v51 = vld [vmem:[%s20656_s4 + $0x638] sm:$0xf0] }
 0xfd7   : > { %v8277_v42 = vpop.f32.mrf.mxu1  ;;  %v8371_v56 = vpop.f32.mrf.mxu2 }
 0xfd8   : > { %v20355_v14 = vadd.f32 %v8277_v42, %v8067_v26  ;;  %v8401_v24 = vadd.f32 %v8400_v12, %v8371_v56  ;;  %v15111_v56 = vld [vmem:[%s20656_s4 + $0x604] sm:$0xf0] }
 0xfda   : > { %13885 = vmatmul.msk.bf16.gmra.mxu1 %vm3473_vm2, %v13867_v37 }
 0xfdf   : > { %v20364_v2 = vpop.f32.mrf.mxu1  ;;  %v8373_v39 = vpop.f32.mrf.mxu2 }
 0xfe0   : > { %20890 = vst [vmem:[#allocation57_spill] sm:$0xff] %v20364_v2  ;;  %v8403_v45 = vadd.f32 %v8402_v16, %v8373_v39  ;;  %v13855_v39 = vor.u32 %v15111_v56, %v13854_v35 }
 0xfe2   : > { %v8408_v9 = vpack.c.bf16 %v8403_v45, %v8401_v24 }
 0xfe4   : > { %8497 = vmatmul.bf16.gmra.mxu0 %v8408_v9 }
 0xfe7   : > { %v8577_v26 = vpop.f32.mrf.mxu1  ;;  %v8606_v42 = vpop.f32.mrf.mxu2 }
 0xfe8   : > { %v8607_v12 = vadd.f32 %v8606_v42, %v8577_v26  ;;  %v13883_v26 = vor.u32 %v15116_v29, %v13880_v51  ;;  %v13862_v42 = vld [vmem:[%s20656_s4 + $0x610] sm:$0xf]  ;;  %v13870_v29 = vld [vmem:[%s20656_s4 + $0x620] sm:$0xf]  ;;  %v15115_v51 = vld [vmem:[%s20656_s4 + $0x624] sm:$0xf0] }
 0xfe9   : > { %v13871_v52 = vor.u32 %v15115_v51, %v13870_v29  ;;  %v15125_v51 = vld [vmem:[%s20657_s5 + $0x638] sm:$0xff] }
 0xfea   : > { %13886 = vmatmul.msk.bf16.gmra.mxu1 %vm3473_vm2, %v13875_v34  ;;  %v15113_v34 = vld [vmem:[%s20656_s4 + $0x614] sm:$0xf0]  ;;  %8916 = vmatpush.bf16.msrb.mxu2 %v15125_v51 }
 0xfef   : > { %v8579_v30 = vpop.f32.mrf.mxu1  ;;  %v8608_v37 = vpop.f32.mrf.mxu2 }
 0xff0   : > { %v8609_v16 = vadd.f32 %v8608_v37, %v8579_v30  ;;  %v13863_v37 = vor.u32 %v15113_v34, %v13862_v42 }
 0xff2   : > { %v8626_v24 = vpack.c.bf16 %v8609_v16, %v8607_v12 }
 0xff4   : > { %8703 = vmatmul.bf16.vlgmr.msrb.gmra.mxu3 %v8626_v24  ;;  %8797 = vmatmul.bf16.vlgmr.msrb.gmra.mxu0 %v13855_v39 }
 0xff7   : > { %v8582_v45 = vpop.f32.mrf.mxu1  ;;  %v8611_v9 = vpop.f32.mrf.mxu2 }
 0xff8   : > { %v8612_v35 = vadd.f32 %v8611_v9, %v8582_v45 }
 0xffa   : > { %13887 = vmatmul.msk.bf16.gmra.mxu1 %vm3473_vm2, %v13883_v26 }
 0xfff   : > { %v8584_v56 = vpop.f32.mrf.mxu1  ;;  %v8613_v12 = vpop.f32.mrf.mxu2 }
0x1000   : > { %v8614_v30 = vadd.f32 %v8613_v12, %v8584_v56  ;;  %v15117_v12 = vld [vmem:[%s20656_s4 + $0x634] sm:$0xf0] }
0x1002   : > { %v8627_v16 = vpack.c.bf16 %v8614_v30, %v8612_v35  ;;  %v13878_v35 = vld [vmem:[%s20656_s4 + $0x630] sm:$0xf] }
0x1004   : > { %8708 = vmatmul.bf16.gmra.mxu3 %v8627_v16  ;;  %8802 = vmatmul.bf16.gmra.mxu0 %v13863_v37 }
0x1007   : > { %v8587_v39 = vpop.f32.mrf.mxu1  ;;  %v8616_v24 = vpop.f32.mrf.mxu2 }
0x1008   : > { %v8617_v45 = vadd.f32 %v8616_v24, %v8587_v39  ;;  %v13879_v24 = vor.u32 %v15117_v12, %v13878_v35 }
0x100f   : > { %v8589_v9 = vpop.f32.mrf.mxu1  ;;  %v8618_v26 = vpop.f32.mrf.mxu2 }
0x1010   : > { %v8619_v2 = vadd.f32 %v8618_v26, %v8589_v9 }
0x1012   : > { %v8628_v56 = vpack.c.bf16 %v8619_v2, %v8617_v45 }
0x1014   : > { %8713 = vmatmul.bf16.gmra.mxu3 %v8628_v56  ;;  %8807 = vmatmul.bf16.gmra.mxu0 %v13871_v52  ;;  %v15124_v56 = vld [vmem:[%s20657_s5 + $0x630] sm:$0xff] }
0x1015   : > { %8917 = vmatpush.bf16.msrb.mxu2 %v15124_v56 }
0x1017   : > { %v8592_v42 = vpop.f32.mrf.mxu1  ;;  %v8621_v34 = vpop.f32.mrf.mxu2 }
0x1018   : > { %v8622_v30 = vadd.f32 %v8621_v34, %v8592_v42  ;;  %v15122_v34 = vld [vmem:[%s20657_s5 + $0x620] sm:$0xff] }
0x101f   : > { %v8594_v37 = vpop.f32.mrf.mxu1  ;;  %v8623_v16 = vpop.f32.mrf.mxu2 }
0x1020   : > { %v8624_v39 = vadd.f32 %v8623_v16, %v8594_v37  ;;  %v15119_v37 = vld [vmem:[%s20657_s5 + $0x608] sm:$0xff] }
0x1022   : > { %v8629_v9 = vpack.c.bf16 %v8624_v39, %v8622_v30  ;;  %v15120_v30 = vld [vmem:[%s20657_s5 + $0x610] sm:$0xff]  ;;  %v15118_v39 = vld [vmem:[%s20657_s5 + $0x600] sm:$0xff] }
0x1024   : > { %8718 = vmatmul.bf16.gmra.mxu3 %v8629_v9  ;;  %8812 = vmatmul.bf16.gmra.mxu0 %v13879_v24 }
0x1031   : > { %v8483_v2 = vpop.f32.mrf.mxu0 }
0x1032   : > { %v8503_v52 = vadd.f32 %v8483_v2, %v20312_v60  ;;  %v15123_v60 = vld [vmem:[%s20657_s5 + $0x628] sm:$0xff] }
0x1033   : > { %8918 = vmatpush.bf16.msrb.mxu2 %v15123_v60 }
0x1037   : > { %8919 = vmatpush.bf16.msrb.mxu2 %v15122_v34 }
0x1039   : > { %v20405_v29 = vpop.f32.mrf.mxu0 }
0x103a   : > { %20891 = vst [vmem:[#allocation58_spill] sm:$0xff] %v20405_v29 }
0x1041   : > { %v8488_v45 = vpop.f32.mrf.mxu0 }
0x1042   : > { %v20411_v26 = vadd.f32 %v8488_v45, %v20319_v38  ;;  %v15121_v38 = vld [vmem:[%s20657_s5 + $0x618] sm:$0xff] }
0x1043   : > { %8920 = vmatpush.bf16.msrb.mxu2 %v15121_v38 }
0x1047   : > { %8921 = vmatpush.bf16.msrb.mxu2 %v15120_v30  ;;  %v8827_v9 = vpop.f32.mrf.mxu1 }
0x1049   : > { %v20419_v42 = vpop.f32.mrf.mxu0 }
0x104b   : > { %8922 = vmatpush.bf16.msrb.mxu2 %v15119_v37 }
0x104f   : > { %8923 = vmatpush.bf16.msrb.mxu2 %v15118_v39  ;;  %v8829_v51 = vpop.f32.mrf.mxu1 }
0x1051   : > { %v8493_v35 = vpop.f32.mrf.mxu0 }
0x1052   : > { %v20428_v12 = vadd.f32 %v8493_v35, %v20335_v50 }
0x1054   : > { %20892 = vst [vmem:[#allocation59_spill] sm:$0xff] %v20428_v12 }
0x1057   : > { %v8832_v60 = vpop.f32.mrf.mxu1 }
0x1059   : > { %v20436_v16 = vpop.f32.mrf.mxu0 }
0x105a   : > { %20893 = vst [vmem:[#allocation60_spill] sm:$0xff] %v20436_v16 }
0x105f   : > { %v8834_v12 = vpop.f32.mrf.mxu1 }
0x1061   : > { %v8498_v24 = vpop.f32.mrf.mxu0 }
0x1062   : > { %v20442_v50 = vadd.f32 %v8498_v24, %v20355_v14 }
0x1064   : > { %20894 = vst [vmem:[#allocation61_spill] sm:$0xff] %v20442_v50 }
0x1067   : > { %v8837_v14 = vpop.f32.mrf.mxu1 }
0x1069   : > { %v20444_v2 = vpop.f32.mrf.mxu0 }
0x106a   : > { %20895 = vst [vmem:[#allocation62_spill] sm:$0xff] %v20444_v2 }
0x106f   : > { %v8839_v2 = vpop.f32.mrf.mxu1 }
0x1071   : > { %v8798_v45 = vpop.f32.mrf.mxu0 }
0x1072   : > { %v8828_v35 = vadd.f32 %v8827_v9, %v8798_v45 }
0x1077   : > { %v8704_v56 = vpop.f32.mrf.mxu3 }
0x1078   : > { %v8724_v34 = vadd.f32 %v8704_v56, %v8503_v52  ;;  %v8842_v52 = vpop.f32.mrf.mxu1 }
0x1079   : > { %v8800_v38 = vpop.f32.mrf.mxu0 }
0x107a   : > { %v8830_v30 = vadd.f32 %v8829_v51, %v8800_v38 }
0x107c   : > { %v8847_v37 = vpack.c.bf16 %v8830_v30, %v8828_v35 }
0x107e   : > { %8924 = vmatmul.bf16.vlgmr.msrb.gmra.mxu2 %v8847_v37 }
0x1080   : > { %v8844_v45 = vpop.f32.mrf.mxu1 }
0x1081   : > { %v8803_v29 = vpop.f32.mrf.mxu0 }
0x1082   : > { %v8833_v16 = vadd.f32 %v8832_v60, %v8803_v29 }
0x1089   : > { %v8805_v39 = vpop.f32.mrf.mxu0 }
0x108a   : > { %v8835_v21 = vadd.f32 %v8834_v12, %v8805_v39 }
0x108c   : > { %v8848_v24 = vpack.c.bf16 %v8835_v21, %v8833_v16  ;;  %v15333_v21 = vld [vmem:[%s20658_s6] ss:$0 sm:$0xff] }
0x108d   : > { %v3644_v29 = vadd.f32 %v15333_v21, %v18354_v23  ;;  %v3646_v60 = vadd.f32 %v15333_v21, %v18376_v27 }
0x108e   : > { %8929 = vmatmul.bf16.gmra.mxu2 %v8848_v24 }
0x108f   : > { %v3865_v12 = vadd.f32 %v18404_v53, %v3644_v29  ;;  %v3867_v53 = vadd.f32 %v18410_v1, %v3646_v60 }
0x1091   : > { %v8808_v50 = vpop.f32.mrf.mxu0 }
0x1092   : > { %v8838_v63 = vadd.f32 %v8837_v14, %v8808_v50 }
0x1099   : > { %v8810_v8 = vpop.f32.mrf.mxu0 }
0x109a   : > { %v8840_v25 = vadd.f32 %v8839_v2, %v8810_v8  ;;  %v4086_v8 = vadd.f32 %v18541_v13, %v3865_v12  ;;  %v20457_v2 = vpop.f32.mrf.mxu3 }
0x109c   : > { %v8849_v10 = vpack.c.bf16 %v8840_v25, %v8838_v63 }
0x109e   : > { %8934 = vmatmul.bf16.gmra.mxu2 %v8849_v10  ;;  %v4307_v10 = vadd.f32 %v18609_v32, %v4086_v8  ;;  %v4088_v32 = vadd.f32 %v18568_v0, %v3867_v53  ;;  %v20907_v53 = vld [vmem:[#allocation35_spill] sm:$0xff] }
0x10a0   : > { %v4528_v25 = vadd.f32 %v18750_v54, %v4307_v10  ;;  %v20904_v10 = vld [vmem:[#allocation9_spill] sm:$0xff] }
0x10a1   : > { %v8813_v9 = vpop.f32.mrf.mxu0 }
0x10a2   : > { %v8843_v56 = vadd.f32 %v8842_v52, %v8813_v9  ;;  %v4749_v63 = vadd.f32 %v18809_v17, %v4528_v25  ;;  %v4309_v17 = vadd.f32 %v18614_v59, %v4088_v32  ;;  %v20896_v52 = vld [vmem:[#allocation18_spill] sm:$0xff]  ;;  %v20897_v9 = vld [vmem:[#allocation16_spill] sm:$0xff]  ;;  %v20908_v32 = vld [vmem:[#allocation29_spill] sm:$0xff] }
0x10a4   : > { %v4970_v16 = vadd.f32 %v18946_v57, %v4749_v63 }
0x10a6   : > { %v5191_v50 = vadd.f32 %v19014_v48, %v4970_v16  ;;  %v4530_v48 = vadd.f32 %v18776_v11, %v4309_v17  ;;  %v3648_v11 = vadd.f32 %v15333_v21, %v18388_v15  ;;  %v20909_v17 = vld [vmem:[#allocation46_spill] sm:$0xff] }
0x10a8   : > { %v5412_v23 = vadd.f32 %v19155_v62, %v5191_v50  ;;  %v8709_v62 = vpop.f32.mrf.mxu3  ;;  %v4751_v1 = vadd.f32 %v18815_v36, %v4530_v48  ;;  %v3869_v36 = vadd.f32 %v18414_v28, %v3648_v11 }
0x10a9   : > { %v8815_v51 = vpop.f32.mrf.mxu0  ;;  %v8726_v60 = vadd.f32 %v8709_v62, %v20411_v26  ;;  %v20914_v62 = vld [vmem:[#allocation32_spill] sm:$0xff] }
0x10aa   : > { %v8845_v38 = vadd.f32 %v8844_v45, %v8815_v51  ;;  %v5633_v13 = vadd.f32 %v19214_v4, %v5412_v23  ;;  %v4972_v0 = vadd.f32 %v18973_v47, %v4751_v1  ;;  %v20898_v51 = vld [vmem:[#allocation33_spill] sm:$0xff]  ;;  %v20911_v1 = vld [vmem:[#allocation12_spill] sm:$0xff] }
0x10ab   : > { %v3642_v45 = vadd.f32 %v15333_v21, %v20898_v51  ;;  %v20906_v21 = vld [vmem:[#allocation44_spill] sm:$0xff]  ;;  %v20923_v51 = vld [vmem:[#allocation27_spill] sm:$0xff] }
0x10ac   : > { %v8850_v35 = vpack.c.bf16 %v8845_v38, %v8843_v56  ;;  %v5854_v54 = vadd.f32 %v19351_v61, %v5633_v13  ;;  %v5193_v59 = vadd.f32 %v19019_v22, %v4972_v0  ;;  %v20912_v0 = vld [vmem:[#allocation28_spill] sm:$0xff] }
0x10ae   : > { %8939 = vmatmul.bf16.gmra.mxu2 %v8850_v35  ;;  %v6075_v57 = vadd.f32 %v19419_v43, %v5854_v54 }
0x10b0   : > { %v6296_v37 = vadd.f32 %v19560_v46, %v6075_v57  ;;  %v5414_v46 = vadd.f32 %v19181_v18, %v5193_v59  ;;  %v8711_v14 = vpop.f32.mrf.mxu3 }
0x10b2   : > { %v6517_v4 = vadd.f32 %v19619_v3, %v6296_v37  ;;  %v5635_v3 = vadd.f32 %v19220_v55, %v5414_v46  ;;  %v20915_v46 = vld [vmem:[#allocation37_spill] sm:$0xff] }
0x10b4   : > { %v6738_v61 = vadd.f32 %v19756_v40, %v6517_v4  ;;  %v4090_v40 = vadd.f32 %v18584_v49, %v3869_v36  ;;  %v5856_v22 = vadd.f32 %v19378_v20, %v5635_v3  ;;  %v20899_v49 = vld [vmem:[#allocation36_spill] sm:$0xff]  ;;  %v20900_v20 = vld [vmem:[#allocation30_spill] sm:$0xff]  ;;  %v20916_v36 = vld [vmem:[#allocation41_spill] sm:$0xff] }
0x10b6   : > { %v6959_v43 = vadd.f32 %v19824_v44, %v6738_v61  ;;  %v4311_v24 = vadd.f32 %v18625_v5, %v4090_v40  ;;  %v6077_v15 = vadd.f32 %v19424_v19, %v5856_v22  ;;  %v20901_v5 = vld [vmem:[#allocation17_spill] sm:$0xff]  ;;  %v20902_v19 = vld [vmem:[#allocation20_spill] sm:$0xff] }
0x10b7   : > { %v3863_v35 = vadd.f32 %v20901_v5, %v3642_v45  ;;  %v20918_v40 = vld [vmem:[#allocation25_spill] sm:$0xff] }
0x10b8   : > { %v4532_v28 = vadd.f32 %v20896_v52, %v4311_v24  ;;  %v6298_v55 = vadd.f32 %v20897_v9, %v6077_v15  ;;  %v8714_v63 = vpop.f32.mrf.mxu3  ;;  %v20919_v15 = vld [vmem:[#allocation19_spill] sm:$0xff] }
0x10b9   : > { %v4084_v25 = vadd.f32 %v20904_v10, %v3863_v35  ;;  %v20927_v35 = vld [vmem:[#allocation60_spill] sm:$0xff]  ;;  %v20930_v10 = vld [vmem:[#allocation59_spill] sm:$0xff] }
0x10ba   : > { %v4753_v56 = vadd.f32 %v20899_v49, %v4532_v28  ;;  %v6519_v38 = vadd.f32 %v20900_v20, %v6298_v55  ;;  %v20921_v28 = vld [vmem:[#allocation53_spill] sm:$0xff]  ;;  %v20922_v55 = vld [vmem:[#allocation43_spill] sm:$0xff]  ;;  %v20924_v49 = vld [vmem:[#allocation56_spill] sm:$0xff] }
0x10bb   : > { %v20925_v20 = vld [vmem:[#allocation26_spill] sm:$0xff] }
0x10bc   : > { %v4974_v29 = vadd.f32 %v20902_v19, %v4753_v56 }
0x1101   : > { %v8925_v30 = vpop.f32.mrf.mxu2 }
0x1102   : > { %v20469_v27 = vadd.f32 %v8925_v30, %v8724_v34  ;;  %v7180_v34 = vadd.f32 %v19965_v41, %v6959_v43  ;;  %v20913_v43 = vld [vmem:[#allocation8_spill] sm:$0xff] }
0x1104   : > { %v7401_v47 = vadd.f32 %v20024_v31, %v7180_v34 }
0x1106   : > { %v7622_v44 = vadd.f32 %v20142_v6, %v7401_v47  ;;  %v20917_v47 = vld [vmem:[#allocation40_spill] sm:$0xff] }
0x1108   : > { %v7843_v18 = vadd.f32 %v20185_v33, %v7622_v44  ;;  %v20903_v33 = vld [vmem:[#allocation22_spill] sm:$0xff]  ;;  %v8716_v44 = vpop.f32.mrf.mxu3 }
0x1109   : > { %v20477_v39 = vpop.f32.mrf.mxu2  ;;  %v6740_v12 = vadd.f32 %v20903_v33, %v6519_v38 }
0x110a   : > { %v8064_v31 = vadd.f32 %v20284_v7, %v7843_v18  ;;  %v20905_v7 = vld [vmem:[#allocation38_spill] sm:$0xff] }
0x110b   : > { %v5195_v16 = vadd.f32 %v20905_v7, %v4974_v29  ;;  %v6961_v50 = vadd.f32 %v20906_v21, %v6740_v12  ;;  %v20928_v29 = vld [vmem:[#allocation21_spill] sm:$0xff]  ;;  %v20929_v12 = vld [vmem:[#allocation15_spill] sm:$0xff] }
0x110c   : > { %v8285_v6 = vadd.f32 %v20327_v58, %v8064_v31  ;;  %v4305_v58 = vadd.f32 %v20907_v53, %v4084_v25  ;;  %v8728_v25 = vadd.f32 %v8714_v63, %v20930_v10  ;;  %v20931_v21 = vld [vmem:[#allocation45_spill] sm:$0xff]  ;;  %v15161_v10 = vld [vmem:[#allocation2 + $0xf8] sm:$0xff] }
0x110d   : > { %v5416_v54 = vadd.f32 %v20908_v32, %v5195_v16  ;;  %v7182_v57 = vadd.f32 %v20909_v17, %v6961_v50  ;;  %v20933_v32 = vld [vmem:[#allocation13_spill] sm:$0xff]  ;;  %v20934_v17 = vld [vmem:[#allocation11_spill] sm:$0xff] }
0x110e   : > { %v8506_v8 = vadd.f32 %v20419_v42, %v8285_v6  ;;  %v20910_v42 = vld [vmem:[#allocation39_spill] sm:$0xff]  ;;  %v20926_v6 = vld [vmem:[#allocation34_spill] sm:$0xff] }
0x110f   : > { %v4526_v37 = vadd.f32 %v20910_v42, %v4305_v58  ;;  %v5637_v4 = vadd.f32 %v20911_v1, %v5416_v54  ;;  %v7403_v61 = vadd.f32 %v20912_v0, %v7182_v57  ;;  %v20938_v0 = vld [vmem:[#allocation51_spill] sm:$0xff] }
0x1110   : > { %v8727_v23 = vadd.f32 %v8711_v14, %v8506_v8 }
0x1111   : > { %v8930_v41 = vpop.f32.mrf.mxu2  ;;  %v4747_v26 = vadd.f32 %v20913_v43, %v4526_v37  ;;  %v5858_v11 = vadd.f32 %v20914_v62, %v5637_v4  ;;  %v7624_v34 = vadd.f32 %v20915_v46, %v7403_v61  ;;  %v20936_v37 = vld [vmem:[#allocation50_spill] sm:$0xff] }
0x1112   : > { %v8947_v30 = vadd.f32 %v8930_v41, %v8726_v60  ;;  %v20920_v41 = vld [vmem:[#allocation42_spill] sm:$0xff]  ;;  %v20932_v60 = vld [vmem:[#allocation49_spill] sm:$0xff] }
0x1113   : > { %v4968_v3 = vadd.f32 %v20916_v36, %v4747_v26  ;;  %v6079_v14 = vadd.f32 %v20917_v47, %v5858_v11  ;;  %v7845_v22 = vadd.f32 %v20918_v40, %v7624_v34  ;;  %v20937_v4 = vld [vmem:[#allocation14_spill] sm:$0xff]  ;;  %v20939_v26 = vld [vmem:[#allocation48_spill] sm:$0xff]  ;;  %v20941_v34 = vld [vmem:[#allocation23_spill] sm:$0xff] }
0x1114   : > { %v20940_v11 = vld [vmem:[#allocation54_spill] sm:$0xff]  ;;  %v20943_v40 = vld [vmem:[#allocation31_spill] sm:$0xff] }
0x1115   : > { %v5189_v18 = vadd.f32 %v20919_v15, %v4968_v3  ;;  %v6300_v52 = vadd.f32 %v20920_v41, %v6079_v14  ;;  %v8066_v9 = vadd.f32 %v20921_v28, %v7845_v22  ;;  %v20942_v3 = vld [vmem:[#allocation57_spill] sm:$0xff]  ;;  %v20945_v15 = vld [vmem:[#allocation24_spill] sm:$0xff] }
0x1116   : > { %v20946_v41 = vld [vmem:[#allocation61_spill] sm:$0xff] }
0x1117   : > { %v5410_v31 = vadd.f32 %v20922_v55, %v5189_v18  ;;  %v6521_v45 = vadd.f32 %v20923_v51, %v6300_v52  ;;  %v8287_v56 = vadd.f32 %v20924_v49, %v8066_v9  ;;  %v20947_v55 = vld [vmem:[#allocation10_spill] sm:$0xff]  ;;  %v20948_v49 = vld [vmem:[#allocation52_spill] sm:$0xff] }
0x1119   : > { %v8932_v13 = vpop.f32.mrf.mxu2  ;;  %v5631_v38 = vadd.f32 %v20925_v20, %v5410_v31  ;;  %v6742_v5 = vadd.f32 %v20926_v6, %v6521_v45  ;;  %v8508_v19 = vadd.f32 %v20927_v35, %v8287_v56 }
0x111a   : > { %v8948_v48 = vadd.f32 %v8932_v13, %v8727_v23  ;;  %v8719_v13 = vpop.f32.mrf.mxu3 }
0x111b   : > { %v5852_v33 = vadd.f32 %v20928_v29, %v5631_v38  ;;  %v6963_v8 = vadd.f32 %v20929_v12, %v6742_v5  ;;  %v8729_v7 = vadd.f32 %v8716_v44, %v8508_v19  ;;  %v20944_v44 = vld [vmem:[#allocation62_spill] sm:$0xff]  ;;  %v8730_v52 = vadd.f32 %v8719_v13, %v20946_v41  ;;  %v20949_v38 = vld [vmem:[#allocation55_spill] sm:$0xff]  ;;  %v15183_v41 = vld [vmem:[#allocation2 + $0x1a8] sm:$0xff] }
0x111c   : > { %v20512_v59 = vpack.c.bf16 %v8948_v48, %v8947_v30  ;;  %v20935_v48 = vld [vmem:[#allocation47_spill] sm:$0xff]  ;;  %v20950_v5 = vld [vmem:[#allocation58_spill] sm:$0xff] }
0x111d   : > { %v6073_v50 = vadd.f32 %v20931_v21, %v5852_v33  ;;  %v7184_v23 = vadd.f32 %v20932_v60, %v6963_v8  ;;  %v15126_v12 = vld [vmem:[%s20659_s7] sm:$0xff]  ;;  %v15137_v8 = vld [vmem:[#allocation2 + $0x38] sm:$0xff]  ;;  %v15128_v60 = vld [vmem:[%s20659_s7 + $0x10] sm:$0xff] }
0x111e   : > { %9132 = vmatpush.bf16.msrb.mxu1 %v15137_v8  ;;  %v15153_v21 = vld [vmem:[#allocation2 + $0xb8] sm:$0xff]  ;;  %v15134_v13 = vld [vmem:[#allocation2 + $0x20] sm:$0xff]  ;;  %v15187_v8 = vld [vmem:[#allocation2 + $0x1c8] sm:$0xff] }
0x111f   : > { %v6294_v54 = vadd.f32 %v20933_v32, %v6073_v50  ;;  %v7405_v57 = vadd.f32 %v20934_v17, %v7184_v23  ;;  %v15152_v50 = vld [vmem:[#allocation2 + $0xb0] sm:$0xff]  ;;  %v15151_v23 = vld [vmem:[#allocation2 + $0xa8] sm:$0xff]  ;;  %v15133_v32 = vld [vmem:[#allocation2 + $0x18] sm:$0xff] }
0x1120   : > { %v15150_v17 = vld [vmem:[#allocation2 + $0xa0] sm:$0xff] }
0x1121   : > { %v8935_v24 = vpop.f32.mrf.mxu2  ;;  %v6515_v42 = vadd.f32 %v20935_v48, %v6294_v54  ;;  %v7626_v1 = vadd.f32 %v20936_v37, %v7405_v57  ;;  %v15142_v54 = vld [vmem:[#allocation2 + $0x60] sm:$0xff]  ;;  %v15141_v57 = vld [vmem:[#allocation2 + $0x58] sm:$0xff] }
0x1122   : > { %v8949_v53 = vadd.f32 %v8935_v24, %v8728_v25  ;;  %v8721_v14 = vpop.f32.mrf.mxu3  ;;  %v15136_v25 = vld [vmem:[#allocation2 + $0x30] sm:$0xff]  ;;  %v15158_v48 = vld [vmem:[#allocation2 + $0xe0] sm:$0xff]  ;;  %v15157_v37 = vld [vmem:[#allocation2 + $0xd8] sm:$0xff] }
0x1123   : > { %v6736_v63 = vadd.f32 %v20937_v4, %v6515_v42  ;;  %v7847_v61 = vadd.f32 %v20938_v0, %v7626_v1  ;;  %9133 = vmatpush.bf16.msrb.mxu1 %v15136_v25  ;;  %v15132_v42 = vld [vmem:[#allocation2 + $0x10] sm:$0xff]  ;;  %v15131_v1 = vld [vmem:[#allocation2 + $0x8] sm:$0xff]  ;;  %v15186_v25 = vld [vmem:[#allocation2 + $0x1c0] sm:$0xff] }
0x1124   : > { %v15140_v4 = vld [vmem:[#allocation2 + $0x50] sm:$0xff]  ;;  %v15139_v0 = vld [vmem:[#allocation2 + $0x48] sm:$0xff] }
0x1125   : > { %v6957_v62 = vadd.f32 %v20939_v26, %v6736_v63  ;;  %v8068_v46 = vadd.f32 %v20940_v11, %v7847_v61  ;;  %v15148_v63 = vld [vmem:[#allocation2 + $0x90] sm:$0xff]  ;;  %v15147_v61 = vld [vmem:[#allocation2 + $0x88] sm:$0xff]  ;;  %v15130_v26 = vld [vmem:[#allocation2] sm:$0xff] }
0x1126   : > { %v15155_v11 = vld [vmem:[#allocation2 + $0xc8] sm:$0xff] }
0x1127   : > { %v7178_v36 = vadd.f32 %v20941_v34, %v6957_v62  ;;  %v8289_v47 = vadd.f32 %v20942_v3, %v8068_v46  ;;  %v15169_v62 = vld [vmem:[#allocation2 + $0x138] sm:$0xff]  ;;  %v15168_v46 = vld [vmem:[#allocation2 + $0x130] sm:$0xff]  ;;  %v15138_v34 = vld [vmem:[#allocation2 + $0x40] sm:$0xff] }
0x1128   : > { %v15146_v3 = vld [vmem:[#allocation2 + $0x80] sm:$0xff] }
0x1129   : > { %v8937_v16 = vpop.f32.mrf.mxu2  ;;  %v7399_v22 = vadd.f32 %v20943_v40, %v7178_v36  ;;  %v8510_v24 = vadd.f32 %v20944_v44, %v8289_v47  ;;  %v15177_v36 = vld [vmem:[#allocation2 + $0x178] sm:$0xff]  ;;  %v15176_v40 = vld [vmem:[#allocation2 + $0x170] sm:$0xff]  ;;  %v15167_v44 = vld [vmem:[#allocation2 + $0x128] sm:$0xff] }
0x112a   : > { %v8950_v58 = vadd.f32 %v8937_v16, %v8729_v7  ;;  %v15143_v7 = vld [vmem:[#allocation2 + $0x68] sm:$0xff]  ;;  %v15185_v47 = vld [vmem:[#allocation2 + $0x1b8] sm:$0xff] }
0x112b   : > { %v7620_v18 = vadd.f32 %v20945_v15, %v7399_v22  ;;  %v8731_v28 = vadd.f32 %v8721_v14, %v8510_v24  ;;  %v15127_v16 = vld [vmem:[%s20659_s7 + $0x8] sm:$0xff]  ;;  %v15154_v14 = vld [vmem:[#allocation2 + $0xc0] sm:$0xff]  ;;  %v15193_v22 = vld [vmem:[#allocation2 + $0x1f8] sm:$0xff] }
0x112c   : > { %v8955_v30 = vpack.c.bf16 %v8950_v58, %v8949_v53  ;;  %v15135_v53 = vld [vmem:[#allocation2 + $0x28] sm:$0xff]  ;;  %v15160_v58 = vld [vmem:[#allocation2 + $0xf0] sm:$0xff] }
0x112d   : > { %v7841_v31 = vadd.f32 %v20947_v55, %v7620_v18  ;;  %9134 = vmatpush.bf16.msrb.mxu1 %v15135_v53  ;;  %v15184_v24 = vld [vmem:[#allocation2 + $0x1b0] sm:$0xff]  ;;  %v15175_v18 = vld [vmem:[#allocation2 + $0x168] sm:$0xff]  ;;  %v15165_v55 = vld [vmem:[#allocation2 + $0x118] sm:$0xff] }
0x112e   : > { %v15192_v15 = vld [vmem:[#allocation2 + $0x1f0] sm:$0xff] }
0x112f   : > { %v8062_v56 = vadd.f32 %v20948_v49, %v7841_v31  ;;  %v15182_v31 = vld [vmem:[#allocation2 + $0x1a0] sm:$0xff]  ;;  %v15164_v49 = vld [vmem:[#allocation2 + $0x110] sm:$0xff] }
0x1131   : > { %v8940_v43 = vpop.f32.mrf.mxu2  ;;  %v8283_v6 = vadd.f32 %v20949_v38, %v8062_v56  ;;  %9135 = vmatpush.bf16.msrb.mxu1 %v15134_v13  ;;  %v15173_v56 = vld [vmem:[#allocation2 + $0x158] sm:$0xff] }
0x1132   : > { %v8951_v51 = vadd.f32 %v8940_v43, %v8730_v52  ;;  %v15156_v43 = vld [vmem:[#allocation2 + $0xd0] sm:$0xff]  ;;  %v15166_v52 = vld [vmem:[#allocation2 + $0x120] sm:$0xff]  ;;  %v15189_v38 = vld [vmem:[#allocation2 + $0x1d8] sm:$0xff] }
0x1133   : > { %v8504_v35 = vadd.f32 %v20950_v5, %v8283_v6  ;;  %v15163_v6 = vld [vmem:[#allocation2 + $0x108] sm:$0xff]  ;;  %v15172_v5 = vld [vmem:[#allocation2 + $0x150] sm:$0xff] }
0x1135   : > { %v8725_v19 = vadd.f32 %v20457_v2, %v8504_v35  ;;  %v15129_v2 = vld [vmem:[%s20659_s7 + $0x18] sm:$0xff]  ;;  %9136 = vmatpush.bf16.msrb.mxu1 %v15133_v32  ;;  %v15180_v35 = vld [vmem:[#allocation2 + $0x190] sm:$0xff] }
0x1136   : > { %v15200_v32 = vld [vmem:[#allocation2 + $0x230] sm:$0xff] }
0x1137   : > { %v8946_v29 = vadd.f32 %v20477_v39, %v8725_v19  ;;  %v15145_v39 = vld [vmem:[#allocation2 + $0x78] sm:$0xff] }
0x1138   : > { %9218 = vmatpush.bf16.msra.mxu2 %v15145_v39  ;;  %v15170_v39 = vld [vmem:[#allocation2 + $0x140] sm:$0xff] }
0x1139   : > { %v8942_v9 = vpop.f32.mrf.mxu2  ;;  %v8953_v33 = vpack.c.bf16 %v8946_v29, %v20469_v27  ;;  %v15144_v27 = vld [vmem:[#allocation2 + $0x70] sm:$0xff]  ;;  %9137 = vmatpush.bf16.msrb.mxu1 %v15132_v42  ;;  %v15225_v42 = vld [vmem:[#allocation2 + $0x2f8] sm:$0xff] }
0x113a   : > { %v8952_v45 = vadd.f32 %v8942_v9, %v8731_v28  ;;  %v15174_v28 = vld [vmem:[#allocation2 + $0x160] sm:$0xff]  ;;  %v15191_v9 = vld [vmem:[#allocation2 + $0x1e8] sm:$0xff]  ;;  %v15188_v29 = vld [vmem:[#allocation2 + $0x1d0] sm:$0xff] }
0x113c   : > { %v8956_v20 = vpack.c.bf16 %v8952_v45, %v8951_v51  ;;  %9219 = vmatpush.bf16.msra.mxu2 %v15144_v27  ;;  %v15190_v45 = vld [vmem:[#allocation2 + $0x1e0] sm:$0xff] }
0x113d   : > { %9138 = vmatpush.bf16.msrb.mxu1 %v15131_v1  ;;  %v15178_v27 = vld [vmem:[#allocation2 + $0x180] sm:$0xff] }
0x113e   : > { %8971 = vmatpush.bf16.msra.mxu3 %v8956_v20  ;;  %9046 = vmatpush.bf16.msra.mxu0 %v8956_v20 }
0x1140   : > { %9220 = vmatpush.bf16.msra.mxu2 %v15143_v7 }
0x1141   : > { %9139 = vmatpush.bf16.msrb.mxu1 %v15130_v26 }
0x1142   : > { %8972 = vmatpush.bf16.msra.mxu3 %v8955_v30  ;;  %9047 = vmatpush.bf16.msra.mxu0 %v8955_v30 }
0x1144   : > { %9221 = vmatpush.bf16.msra.mxu2 %v15142_v54 }
0x1145   : > { %9461 = vmatpush.bf16.msra.mxu1 %v15169_v62  ;;  %v15207_v62 = vld [vmem:[#allocation2 + $0x268] sm:$0xff] }
0x1146   : > { %8973 = vmatpush.bf16.msra.mxu3 %v20512_v59  ;;  %9048 = vmatpush.bf16.msra.mxu0 %v20512_v59 }
0x1148   : > { %9222 = vmatpush.bf16.msra.mxu2 %v15141_v57  ;;  %v15217_v57 = vld [vmem:[#allocation2 + $0x2b8] sm:$0xff] }
0x1149   : > { %9462 = vmatpush.bf16.msra.mxu1 %v15168_v46 }
0x114a   : > { %8974 = vmatpush.bf16.msra.mxu3 %v8953_v33  ;;  %9049 = vmatpush.bf16.msra.mxu0 %v8953_v33 }
0x114c   : > { %9223 = vmatpush.bf16.msra.mxu2 %v15140_v4  ;;  %v15208_v4 = vld [vmem:[#allocation2 + $0x270] sm:$0xff] }
0x114d   : > { %13940 = vmatmul.msk.bf16.vlgmr.msra.gmra.mxu3 %vm1314_vm1, %v15126_v12  ;;  %13961 = vmatmul.msk.bf16.vlgmr.msra.gmra.mxu0 %vm1314_vm1, %v15129_v2  ;;  %v15171_v12 = vld [vmem:[#allocation2 + $0x148] sm:$0xff] }
0x114e   : > { %8996 = vmatpush.bf16.msrb.mxu3 %v8956_v20  ;;  %9380 = vmatpush.bf16.msrb.mxu0 %v15161_v10  ;;  %v15179_v2 = vld [vmem:[#allocation2 + $0x188] sm:$0xff] }
0x114f   : > { %9463 = vmatpush.bf16.msra.mxu1 %v15167_v44  ;;  %v15222_v44 = vld [vmem:[#allocation2 + $0x2e0] sm:$0xff] }
0x1150   : > { %9224 = vmatpush.bf16.msra.mxu2 %v15139_v0 }
0x1152   : > { %8997 = vmatpush.bf16.msrb.mxu3 %v8955_v30  ;;  %9381 = vmatpush.bf16.msrb.mxu0 %v15160_v58  ;;  %v15201_v58 = vld [vmem:[#allocation2 + $0x238] sm:$0xff] }
0x1153   : > { %9464 = vmatpush.bf16.msra.mxu1 %v15166_v52 }
0x1154   : > { %9225 = vmatpush.bf16.msra.mxu2 %v15138_v34 }
0x1156   : > { %8998 = vmatpush.bf16.msrb.mxu3 %v20512_v59 }
0x1157   : > { %9465 = vmatpush.bf16.msra.mxu1 %v15165_v55  ;;  %v15195_v55 = vld [vmem:[#allocation2 + $0x208] sm:$0xff] }
0x1158   : > { %9542 = vmatpush.bf16.msrb.mxu2 %v15177_v36  ;;  %v15223_v36 = vld [vmem:[#allocation2 + $0x2e8] sm:$0xff] }
0x115a   : > { %8999 = vmatpush.bf16.msrb.mxu3 %v8953_v33 }
0x115b   : > { %9466 = vmatpush.bf16.msra.mxu1 %v15164_v49 }
0x115c   : > { %9543 = vmatpush.bf16.msrb.mxu2 %v15176_v40  ;;  %v15214_v40 = vld [vmem:[#allocation2 + $0x2a0] sm:$0xff] }
0x115d   : > { %13947 = vmatmul.msk.bf16.vlgmr.msrb.gmra.mxu3 %vm1314_vm1, %v15127_v16 }
0x115e   : > { %9021 = vmatpush.bf16.msra.mxu3 %v8956_v20  ;;  %v15181_v20 = vld [vmem:[#allocation2 + $0x198] sm:$0xff] }
0x115f   : > { %9467 = vmatpush.bf16.msra.mxu1 %v15163_v6  ;;  %v15203_v6 = vld [vmem:[#allocation2 + $0x248] sm:$0xff] }
0x1160   : > { %9544 = vmatpush.bf16.msrb.mxu2 %v15175_v18  ;;  %v15213_v18 = vld [vmem:[#allocation2 + $0x298] sm:$0xff] }
0x1162   : > { %9022 = vmatpush.bf16.msra.mxu3 %v8955_v30  ;;  %v15149_v30 = vld [vmem:[#allocation2 + $0x98] sm:$0xff] }
0x1164   : > { %9545 = vmatpush.bf16.msrb.mxu2 %v15174_v28 }
0x1166   : > { %9023 = vmatpush.bf16.msra.mxu3 %v20512_v59  ;;  %v15159_v59 = vld [vmem:[#allocation2 + $0xe8] sm:$0xff] }
0x1167   : > { %9382 = vmatpush.bf16.msrb.mxu0 %v15159_v59 }
0x1168   : > { %9546 = vmatpush.bf16.msrb.mxu2 %v15173_v56  ;;  %v15220_v56 = vld [vmem:[#allocation2 + $0x2d0] sm:$0xff] }
0x116a   : > { %9024 = vmatpush.bf16.msra.mxu3 %v8953_v33  ;;  %v15162_v33 = vld [vmem:[#allocation2 + $0x100] sm:$0xff] }
0x116b   : > { %9383 = vmatpush.bf16.msrb.mxu0 %v15158_v48  ;;  %9468 = vmatpush.bf16.msra.mxu1 %v15162_v33  ;;  %v15202_v33 = vld [vmem:[#allocation2 + $0x240] sm:$0xff] }
0x116c   : > { %9547 = vmatpush.bf16.msrb.mxu2 %v15172_v5  ;;  %v15211_v5 = vld [vmem:[#allocation2 + $0x288] sm:$0xff] }
0x116d   : > { %13954 = vmatmul.msk.bf16.vlgmr.msra.gmra.mxu3 %vm1314_vm1, %v15128_v60 }
0x116e   : > { %9299 = vmatpush.bf16.msrb.mxu3 %v15153_v21 }
0x116f   : > { %9384 = vmatpush.bf16.msrb.mxu0 %v15157_v37  ;;  %v15199_v37 = vld [vmem:[#allocation2 + $0x228] sm:$0xff] }
0x1170   : > { %9548 = vmatpush.bf16.msrb.mxu2 %v15171_v12 }
0x1172   : > { %9300 = vmatpush.bf16.msrb.mxu3 %v15152_v50 }
0x1173   : > { %9385 = vmatpush.bf16.msrb.mxu0 %v15156_v43  ;;  %v15198_v43 = vld [vmem:[#allocation2 + $0x220] sm:$0xff] }
0x1174   : > { %9549 = vmatpush.bf16.msrb.mxu2 %v15170_v39  ;;  %v15241_v39 = vld [vmem:[#allocation2 + $0x378] sm:$0xff] }
0x1176   : > { %9301 = vmatpush.bf16.msrb.mxu3 %v15151_v23 }
0x1177   : > { %9386 = vmatpush.bf16.msrb.mxu0 %v15155_v11  ;;  %v15215_v11 = vld [vmem:[#allocation2 + $0x2a8] sm:$0xff] }
0x117a   : > { %9302 = vmatpush.bf16.msrb.mxu3 %v15150_v17  ;;  %v15209_v17 = vld [vmem:[#allocation2 + $0x278] sm:$0xff] }
0x117b   : > { %9387 = vmatpush.bf16.msrb.mxu0 %v15154_v14  ;;  %v15206_v14 = vld [vmem:[#allocation2 + $0x260] sm:$0xff] }
0x117e   : > { %9303 = vmatpush.bf16.msrb.mxu3 %v15149_v30 }
0x117f   : > { %9704 = vmatpush.bf16.msra.mxu0 %v15193_v22 }
0x1182   : > { %9304 = vmatpush.bf16.msrb.mxu3 %v15148_v63  ;;  %v15216_v63 = vld [vmem:[#allocation2 + $0x2b0] sm:$0xff] }
0x1183   : > { %9705 = vmatpush.bf16.msra.mxu0 %v15192_v15  ;;  %v15205_v15 = vld [vmem:[#allocation2 + $0x258] sm:$0xff] }
0x1186   : > { %9305 = vmatpush.bf16.msrb.mxu3 %v15147_v61  ;;  %v15224_v61 = vld [vmem:[#allocation2 + $0x2f0] sm:$0xff] }
0x1187   : > { %9706 = vmatpush.bf16.msra.mxu0 %v15191_v9  ;;  %v15221_v9 = vld [vmem:[#allocation2 + $0x2d8] sm:$0xff] }
0x118a   : > { %9306 = vmatpush.bf16.msrb.mxu3 %v15146_v3  ;;  %v15197_v3 = vld [vmem:[#allocation2 + $0x218] sm:$0xff] }
0x118b   : > { %9707 = vmatpush.bf16.msra.mxu0 %v15190_v45  ;;  %v15212_v45 = vld [vmem:[#allocation2 + $0x290] sm:$0xff] }
0x118e   : > { %9623 = vmatpush.bf16.msra.mxu3 %v15185_v47 }
0x118f   : > { %9708 = vmatpush.bf16.msra.mxu0 %v15189_v38  ;;  %v15233_v38 = vld [vmem:[#allocation2 + $0x338] sm:$0xff] }
0x1192   : > { %9624 = vmatpush.bf16.msra.mxu3 %v15184_v24  ;;  %v15196_v24 = vld [vmem:[#allocation2 + $0x210] sm:$0xff] }
0x1193   : > { %9709 = vmatpush.bf16.msra.mxu0 %v15188_v29  ;;  %v15232_v29 = vld [vmem:[#allocation2 + $0x330] sm:$0xff] }
0x1196   : > { %9625 = vmatpush.bf16.msra.mxu3 %v15183_v41 }
0x1197   : > { %9710 = vmatpush.bf16.msra.mxu0 %v15187_v8  ;;  %v15249_v8 = vld [vmem:[#allocation2 + $0x3b8] sm:$0xff] }
0x119a   : > { %9626 = vmatpush.bf16.msra.mxu3 %v15182_v31 }
0x119b   : > { %9711 = vmatpush.bf16.msra.mxu0 %v15186_v25  ;;  %v15231_v25 = vld [vmem:[#allocation2 + $0x328] sm:$0xff] }
0x119e   : > { %9627 = vmatpush.bf16.msra.mxu3 %v15181_v20  ;;  %v15194_v20 = vld [vmem:[#allocation2 + $0x200] sm:$0xff] }
0x11a2   : > { %9628 = vmatpush.bf16.msra.mxu3 %v15180_v35 }
0x11a6   : > { %9629 = vmatpush.bf16.msra.mxu3 %v15179_v2  ;;  %v15210_v2 = vld [vmem:[#allocation2 + $0x280] sm:$0xff] }
0x11aa   : > { %9630 = vmatpush.bf16.msra.mxu3 %v15178_v27  ;;  %v15218_v27 = vld [vmem:[#allocation2 + $0x2c0] sm:$0xff] }
0x11ca   : > { %v9051_v21 = vpop.f32.mrf.mxu0 }
0x11d0   : > { %v8976_v51 = vpop.f32.mrf.mxu3 }
0x11d2   : > { %v9053_v26 = vpop.f32.mrf.mxu0 }
0x11d8   : > { %v20575_v19 = vpop.f32.mrf.mxu3 }
0x11e0   : > { %v9001_v10 = vpop.f32.mrf.mxu3 }
0x11e1   : > { %v9056_v50 = vmax.f32 %v8976_v51, %v9001_v10  ;;  %v15204_v51 = vld [vmem:[#allocation2 + $0x250] sm:$0xff]  ;;  %v15257_v10 = vld [vmem:[#allocation2 + $0x3f8] sm:$0xff] }
0x11e8   : > { %v9003_v7 = vpop.f32.mrf.mxu3 }
0x11e9   : > { %v9057_v34 = vmax.f32 %v20575_v19, %v9003_v7  ;;  %v15219_v19 = vld [vmem:[#allocation2 + $0x2c8] sm:$0xff] }
0x11f0   : > { %v9026_v16 = vpop.f32.mrf.mxu3 }
0x11f1   : > { %v9058_v60 = vmax.f32 %v9026_v16, %v9051_v21  ;;  %v15240_v16 = vld [vmem:[#allocation2 + $0x370] sm:$0xff] }
0x11f2   : > { %v15248_v21 = vld [vmem:[#allocation2 + $0x3b0] sm:$0xff] }
0x11f3   : > { %v9060_v23 = vmax.f32 %v9056_v50, %v9058_v60  ;;  %v15256_v60 = vld [vmem:[#allocation2 + $0x3f0] sm:$0xff] }
0x11f5   : > { %v9062_v53 = vmax.f32 %v9060_v23, 0.0  ;;  %v15230_v23 = vld [vmem:[#allocation2 + $0x320] sm:$0xff] }
0x11f7   : > { %v9064_v13 = vpack.c.bf16 %v9062_v53, %v9062_v53 }
0x11f8   : > { %v9028_v0 = vpop.f32.mrf.mxu3 }
0x11f9   : > { %v9164_v59 = vunpack.c.l.b16 %v9064_v13  ;;  %9140 = vmatmul.bf16.vlgmr.msrb.gmra.mxu1 %v9064_v13  ;;  %v9059_v46 = vmax.f32 %v9028_v0, %v9053_v26  ;;  %v15247_v13 = vld [vmem:[#allocation2 + $0x3a8] sm:$0xff]  ;;  %v15252_v0 = vld [vmem:[#allocation2 + $0x3d0] sm:$0xff] }
0x11fa   : > { %9783 = vmatpush.bf16.msrb.mxu1 %v15201_v58  ;;  %v15239_v58 = vld [vmem:[#allocation2 + $0x368] sm:$0xff] }
0x11fb   : > { %v9165_v54 = vpack.c.b16 %v9164_v59, %v9164_v59  ;;  %v9061_v22 = vmax.f32 %v9057_v34, %v9059_v46  ;;  %v15255_v59 = vld [vmem:[#allocation2 + $0x3e8] sm:$0xff]  ;;  %v15234_v46 = vld [vmem:[#allocation2 + $0x340] sm:$0xff] }
0x11fc   : > { %v15243_v26 = vld [vmem:[#allocation2 + $0x388] sm:$0xff]  ;;  %v15242_v34 = vld [vmem:[#allocation2 + $0x380] sm:$0xff] }
0x11fd   : > { %v9167_v30 = vshrl.u32 %v9165_v54, 16  ;;  %v9249_v48 = vrot.slane %v9165_v54, 1  ;;  %v9411_v47 = vrot.slane %v9165_v54, 2  ;;  %v9063_v41 = vmax.f32 %v9061_v22, 0.0  ;;  %v15265_v22 = vld [vmem:[%s20662_s10 + $0x38] sm:$0xff] }
0x11fe   : > { %9784 = vmatpush.bf16.msrb.mxu1 %v15200_v32  ;;  %v9573_v28 = vrot.slane %v9165_v54, 3  ;;  %v15229_v32 = vld [vmem:[#allocation2 + $0x318] sm:$0xff]  ;;  %v15238_v54 = vld [vmem:[#allocation2 + $0x360] sm:$0xff] }
0x11ff   : > { %9226 = vmatmul.bf16.vlgmr.msra.gmra.mxu2 %v9167_v30  ;;  %9307 = vmatmul.bf16.vlgmr.msrb.gmra.mxu3 %v9249_v48  ;;  %v9330_v1 = vrot.slane %v9167_v30, 1  ;;  %v9492_v52 = vrot.slane %v9167_v30, 2  ;;  %v9654_v31 = vrot.slane %v9167_v30, 3  ;;  %v9065_v49 = vpack.c.bf16 %v9063_v41, %v9063_v41  ;;  %v15228_v30 = vld [vmem:[#allocation2 + $0x310] sm:$0xff]  ;;  %v15237_v48 = vld [vmem:[#allocation2 + $0x358] sm:$0xff] }
0x1200   : > { %9869 = vmatpush.bf16.msra.mxu2 %v15209_v17  ;;  %9950 = vmatpush.bf16.msrb.mxu3 %v15217_v57  ;;  %v15246_v17 = vld [vmem:[#allocation2 + $0x3a0] sm:$0xff]  ;;  %v15264_v41 = vld [vmem:[%s20662_s10 + $0x30] sm:$0xff] }
0x1201   : > { %9388 = vmatmul.bf16.vlgmr.msrb.gmra.mxu0 %v9330_v1  ;;  %v9815_v35 = vunpack.c.l.b16 %v9065_v49  ;;  %v15254_v57 = vld [vmem:[#allocation2 + $0x3e0] sm:$0xff]  ;;  %v15227_v1 = vld [vmem:[#allocation2 + $0x308] sm:$0xff] }
0x1202   : > { %10031 = vmatpush.bf16.msrb.mxu0 %v15225_v42  ;;  %9785 = vmatpush.bf16.msrb.mxu1 %v15199_v37  ;;  %v15245_v42 = vld [vmem:[#allocation2 + $0x398] sm:$0xff] }
0x1203   : > { %v20578_v12 = vpack.c.b16 %v9815_v35, %v9815_v35  ;;  %v15253_v37 = vld [vmem:[#allocation2 + $0x3d8] sm:$0xff] }
0x1204   : > { %9870 = vmatpush.bf16.msra.mxu2 %v15208_v4  ;;  %9951 = vmatpush.bf16.msrb.mxu3 %v15216_v63  ;;  %v15236_v4 = vld [vmem:[#allocation2 + $0x350] sm:$0xff] }
0x1205   : > { %v20581_v7 = vshrl.u32 %v20578_v12, 16  ;;  %v9900_v50 = vrot.slane %v20578_v12, 1  ;;  %v15244_v63 = vld [vmem:[#allocation2 + $0x390] sm:$0xff] }
0x1206   : > { %10032 = vmatpush.bf16.msrb.mxu0 %v15224_v61  ;;  %9786 = vmatpush.bf16.msrb.mxu1 %v15198_v43  ;;  %v15226_v61 = vld [vmem:[#allocation2 + $0x300] sm:$0xff]  ;;  %v15235_v43 = vld [vmem:[#allocation2 + $0x348] sm:$0xff] }
0x1207   : > { %v9981_v53 = vrot.slane %v20581_v7, 1 }
0x1208   : > { %9871 = vmatpush.bf16.msra.mxu2 %v15207_v62  ;;  %9952 = vmatpush.bf16.msrb.mxu3 %v15215_v11  ;;  %v15251_v62 = vld [vmem:[#allocation2 + $0x3c8] sm:$0xff]  ;;  %v10062_v11 = vrot.slane %v20578_v12, 2 }
0x1209   : > { %9469 = vmatmul.bf16.vlgmr.msra.gmra.mxu1 %v9411_v47  ;;  %v10224_v47 = vrot.slane %v20578_v12, 3 }
0x120a   : > { %10033 = vmatpush.bf16.msrb.mxu0 %v15223_v36  ;;  %9787 = vmatpush.bf16.msrb.mxu1 %v15197_v3  ;;  %v15250_v36 = vld [vmem:[#allocation2 + $0x3c0] sm:$0xff]  ;;  %v10143_v3 = vrot.slane %v20581_v7, 2 }
0x120c   : > { %9872 = vmatpush.bf16.msra.mxu2 %v15206_v14  ;;  %9953 = vmatpush.bf16.msrb.mxu3 %v15214_v40  ;;  %v10305_v14 = vrot.slane %v20581_v7, 3 }
0x120e   : > { %10034 = vmatpush.bf16.msrb.mxu0 %v15222_v44  ;;  %9788 = vmatpush.bf16.msrb.mxu1 %v15196_v24 }
0x120f   : > { %9550 = vmatmul.bf16.vlgmr.msrb.gmra.mxu2 %v9492_v52  ;;  %9631 = vmatmul.bf16.vlgmr.msra.gmra.mxu3 %v9573_v28 }
0x1210   : > { %9873 = vmatpush.bf16.msra.mxu2 %v15205_v15  ;;  %9954 = vmatpush.bf16.msrb.mxu3 %v15213_v18 }
0x1211   : > { %9712 = vmatmul.bf16.vlgmr.msra.gmra.mxu0 %v9654_v31 }
0x1212   : > { %10035 = vmatpush.bf16.msrb.mxu0 %v15221_v9  ;;  %9789 = vmatpush.bf16.msrb.mxu1 %v15195_v55  ;;  %v15263_v9 = vld [vmem:[%s20662_s10 + $0x28] sm:$0xff] }
0x1214   : > { %9874 = vmatpush.bf16.msra.mxu2 %v15204_v51  ;;  %9955 = vmatpush.bf16.msrb.mxu3 %v15212_v45  ;;  %v15262_v51 = vld [vmem:[%s20662_s10 + $0x20] sm:$0xff] }
0x1216   : > { %10036 = vmatpush.bf16.msrb.mxu0 %v15220_v56  ;;  %9790 = vmatpush.bf16.msrb.mxu1 %v15194_v20  ;;  %v15261_v56 = vld [vmem:[%s20662_s10 + $0x18] sm:$0xff] }
0x1218   : > { %9875 = vmatpush.bf16.msra.mxu2 %v15203_v6  ;;  %9956 = vmatpush.bf16.msrb.mxu3 %v15211_v5  ;;  %v9066_v6 = vld [vmem:[%s20661_s9] sm:$0x1] }
0x1219   : > { %9791 = vmatmul.bf16.vlgmr.msrb.gmra.mxu1 %v9065_v49 }
0x121a   : > { %10112 = vmatpush.bf16.msra.mxu1 %v15233_v38  ;;  %10037 = vmatpush.bf16.msrb.mxu0 %v15219_v19 }
0x121c   : > { %9876 = vmatpush.bf16.msra.mxu2 %v15202_v33  ;;  %9957 = vmatpush.bf16.msrb.mxu3 %v15210_v2 }
0x121e   : > { %10113 = vmatpush.bf16.msra.mxu1 %v15232_v29  ;;  %10038 = vmatpush.bf16.msrb.mxu0 %v15218_v27 }
0x121f   : > { %9877 = vmatmul.bf16.vlgmr.msra.gmra.mxu2 %v20581_v7  ;;  %9958 = vmatmul.bf16.vlgmr.msrb.gmra.mxu3 %v9900_v50 }
0x1220   : > { %10193 = vmatpush.bf16.msrb.mxu2 %v15241_v39  ;;  %10274 = vmatpush.bf16.msra.mxu3 %v15249_v8  ;;  %v15260_v8 = vld [vmem:[%s20662_s10 + $0x10] sm:$0xff] }
0x1221   : > { %10039 = vmatmul.bf16.vlgmr.msrb.gmra.mxu0 %v9981_v53 }
0x1222   : > { %10355 = vmatpush.bf16.msra.mxu0 %v15257_v10  ;;  %10114 = vmatpush.bf16.msra.mxu1 %v15231_v25  ;;  %v15259_v25 = vld [vmem:[%s20662_s10 + $0x8] sm:$0xff] }
0x1224   : > { %10194 = vmatpush.bf16.msrb.mxu2 %v15240_v16  ;;  %10275 = vmatpush.bf16.msra.mxu3 %v15248_v21 }
0x1226   : > { %10356 = vmatpush.bf16.msra.mxu0 %v15256_v60  ;;  %10115 = vmatpush.bf16.msra.mxu1 %v15230_v23  ;;  %v15258_v60 = vld [vmem:[%s20662_s10] sm:$0xff] }
0x1228   : > { %10195 = vmatpush.bf16.msrb.mxu2 %v15239_v58  ;;  %10276 = vmatpush.bf16.msra.mxu3 %v15247_v13 }
0x122a   : > { %10357 = vmatpush.bf16.msra.mxu0 %v15255_v59  ;;  %10116 = vmatpush.bf16.msra.mxu1 %v15229_v32 }
0x122c   : > { %10196 = vmatpush.bf16.msrb.mxu2 %v15238_v54  ;;  %10277 = vmatpush.bf16.msra.mxu3 %v15246_v17 }
0x122e   : > { %10358 = vmatpush.bf16.msra.mxu0 %v15254_v57  ;;  %10117 = vmatpush.bf16.msra.mxu1 %v15228_v30 }
0x1230   : > { %10197 = vmatpush.bf16.msrb.mxu2 %v15237_v48  ;;  %10278 = vmatpush.bf16.msra.mxu3 %v15245_v42 }
0x1232   : > { %10359 = vmatpush.bf16.msra.mxu0 %v15253_v37  ;;  %10118 = vmatpush.bf16.msra.mxu1 %v15227_v1 }
0x1234   : > { %10198 = vmatpush.bf16.msrb.mxu2 %v15236_v4  ;;  %10279 = vmatpush.bf16.msra.mxu3 %v15244_v63 }
0x1236   : > { %10360 = vmatpush.bf16.msra.mxu0 %v15252_v0  ;;  %10119 = vmatpush.bf16.msra.mxu1 %v15226_v61 }
0x1238   : > { %10199 = vmatpush.bf16.msrb.mxu2 %v15235_v43  ;;  %10280 = vmatpush.bf16.msra.mxu3 %v15243_v26 }
0x1239   : > { %10120 = vmatmul.bf16.vlgmr.msra.gmra.mxu1 %v10062_v11 }
0x123a   : > { %10361 = vmatpush.bf16.msra.mxu0 %v15251_v62  ;;  %10436 = vmatpush.bf16.msrb.mxu1 %v15265_v22 }
0x123c   : > { %10200 = vmatpush.bf16.msrb.mxu2 %v15234_v46  ;;  %10281 = vmatpush.bf16.msra.mxu3 %v15242_v34  ;;  %v10449_v34 = vlaneseq }
0x123e   : > { %10362 = vmatpush.bf16.msra.mxu0 %v15250_v36  ;;  %10437 = vmatpush.bf16.msrb.mxu1 %v15264_v41  ;;  %v10450_v36 = vand.u32 127, %v10449_v34 }
0x123f   : > { %10201 = vmatmul.bf16.vlgmr.msrb.gmra.mxu2 %v10143_v3  ;;  %10282 = vmatmul.bf16.vlgmr.msra.gmra.mxu3 %v10224_v47  ;;  %v10387_v3 = vld [vmem:[%s20663_s11] sm:$0x1] }
0x1240   : > { %vm10451_vm3 = vcmp.lt.s32.totalorder %v10450_v36, 10 }
0x1241   : > { %10363 = vmatmul.bf16.vlgmr.msra.gmra.mxu0 %v10305_v14 }
0x1242   : > { %10438 = vmatpush.bf16.msrb.mxu1 %v15263_v9 }
0x1246   : > { %10439 = vmatpush.bf16.msrb.mxu1 %v15262_v51 }
0x124a   : > { %10440 = vmatpush.bf16.msrb.mxu1 %v15261_v56 }
0x124e   : > { %10441 = vmatpush.bf16.msrb.mxu1 %v15260_v8 }
0x1252   : > { %10442 = vmatpush.bf16.msrb.mxu1 %v15259_v25 }
0x1256   : > { %10443 = vmatpush.bf16.msrb.mxu1 %v15258_v60 }
0x1276   : > { %v9141_v40 = vpop.f32.mrf.mxu1 }
0x1277   : > { %v9145_v5 = vadd.f32 %v9141_v40, %v9066_v6 }
0x127e   : > { %v9389_v44 = vpop.f32.mrf.mxu0  ;;  %v9143_v24 = vpop.f32.mrf.mxu1 }
0x1282   : > { %v9227_v15 = vpop.f32.mrf.mxu2  ;;  %v9308_v18 = vpop.f32.mrf.mxu3 }
0x1283   : > { %v9231_v29 = vadd.f32 %v9227_v15, %v9145_v5 }
0x1285   : > { %v9312_v2 = vadd.f32 %v9308_v18, %v9231_v29 }
0x1286   : > { %v9391_v52 = vpop.f32.mrf.mxu0  ;;  %v9470_v28 = vpop.f32.mrf.mxu1 }
0x1287   : > { %v9393_v10 = vadd.f32 %v9389_v44, %v9312_v2 }
0x1289   : > { %v9474_v21 = vadd.f32 %v9470_v28, %v9393_v10 }
0x128a   : > { %v9229_v55 = vpop.f32.mrf.mxu2  ;;  %v9310_v31 = vpop.f32.mrf.mxu3 }
0x128e   : > { %v9713_v45 = vpop.f32.mrf.mxu0  ;;  %v9472_v49 = vpop.f32.mrf.mxu1 }
0x1292   : > { %v9551_v20 = vpop.f32.mrf.mxu2  ;;  %v9632_v38 = vpop.f32.mrf.mxu3 }
0x1293   : > { %v9555_v50 = vadd.f32 %v9551_v20, %v9474_v21 }
0x1295   : > { %v9636_v53 = vadd.f32 %v9632_v38, %v9555_v50 }
0x1296   : > { %v9715_v35 = vpop.f32.mrf.mxu0  ;;  %v9792_v19 = vpop.f32.mrf.mxu1 }
0x1297   : > { %v9717_v59 = vadd.f32 %v9713_v45, %v9636_v53 }
0x1299   : > { %v9796_v32 = vadd.f32 %v9792_v19, %v9717_v59 }
0x129a   : > { %v9553_v33 = vpop.f32.mrf.mxu2  ;;  %v9634_v12 = vpop.f32.mrf.mxu3 }
0x129e   : > { %v9794_v39 = vpop.f32.mrf.mxu1  ;;  %v10040_v27 = vpop.f32.mrf.mxu0 }
0x12a2   : > { %v9878_v7 = vpop.f32.mrf.mxu2  ;;  %v9959_v16 = vpop.f32.mrf.mxu3 }
0x12a3   : > { %v9882_v17 = vadd.f32 %v9878_v7, %v9796_v32 }
0x12a5   : > { %v9963_v57 = vadd.f32 %v9959_v16, %v9882_v17 }
0x12a6   : > { %v10042_v23 = vpop.f32.mrf.mxu0 }
0x12a7   : > { %v10044_v42 = vadd.f32 %v10040_v27, %v9963_v57 }
0x12aa   : > { %v9880_v58 = vpop.f32.mrf.mxu2  ;;  %v9961_v13 = vpop.f32.mrf.mxu3 }
0x12b6   : > { %v10121_v54 = vpop.f32.mrf.mxu1 }
0x12b7   : > { %v10125_v37 = vadd.f32 %v10121_v54, %v10044_v42 }
0x12be   : > { %v10364_v30 = vpop.f32.mrf.mxu0  ;;  %v10123_v48 = vpop.f32.mrf.mxu1 }
0x12c2   : > { %v10202_v1 = vpop.f32.mrf.mxu2  ;;  %v10283_v4 = vpop.f32.mrf.mxu3 }
0x12c3   : > { %v10206_v63 = vadd.f32 %v10202_v1, %v10125_v37 }
0x12c5   : > { %v10287_v0 = vadd.f32 %v10283_v4, %v10206_v63 }
0x12c6   : > { %v10366_v61 = vpop.f32.mrf.mxu0 }
0x12c7   : > { %v10368_v43 = vadd.f32 %v10364_v30, %v10287_v0 }
0x12c9   : > { %v10369_v26 = vmax.f32 %v10368_v43, 0.0 }
0x12ca   : > { %v10285_v62 = vpop.f32.mrf.mxu3  ;;  %v10204_v11 = vpop.f32.mrf.mxu2 }
0x12cb   : > { %v10370_v46 = vpack.c.bf16 %v10369_v26, %v10369_v26 }
0x12cd   : > { %10444 = vmatmul.bf16.vlgmr.msrb.gmra.mxu1 %v10370_v46 }
0x134a   : > { %v10445_v47 = vpop.f32.mrf.mxu1 }
0x134b   : > { %v10446_v14 = vadd.f32 %v10445_v47, %v10387_v3 }
0x134d   : > { %v10452_v40 = vsel %vm10451_vm3, %v10446_v14, -1e+30 }
0x134e   : > { %v10454_v22 = vsel %vm10453_vm4, %v10452_v40, -inf }
0x134f   : > { %10455 = vmax.xlane.f32.xlu0 %v10454_v22 }
0x1352   : > { %v10447_v44 = vpop.f32.mrf.mxu1 }
0x13c2   : > { %v10456_v24 = vpop.xlane.xlu0 %10455 }
0x13c3   : > { %v10457_v15 = vsub.f32 %v10452_v40, %v10456_v24 }
0x13c5   : > { %v10458_v18 = vmul.f32 1.442695, %v10457_v15 }
0x13c7   : > { %15329 = vpow2.f32 %v10458_v18 }
0x13cd   : > { %v15330_v41 = vpop.eup %15329 }
0x13ce   : > { %v10460_v52 = vsel %vm10453_vm4, %v15330_v41, 0.0 }
0x13cf   : > { %10461 = vadd.xlane.f32.xlu0 %v10460_v52 }
0x1442   : > { %v10462_v28 = vpop.xlane.xlu0 %10461 }
0x1443   : > { %15331 = vlog2.f32 %v10462_v28 }
0x1449   : > { %v15332_v9 = vpop.eup %15331 }
0x144a   : > { %v10464_v55 = vmul.f32 0.6931472, %v15332_v9 }
0x144c   : > { %v10465_v31 = vsub.f32 %v10457_v15, %v10464_v55 }
0x144e   : > { %10466 = vst [vmem:[%s422_s20] sm:$0x1] %v10465_v31 }
0x144f   : > { %15391 = shalt.err (!%p15388_p8)
}
0x1450   : > { %15279 = dma.vmem_to_hbm [thread:$0]  (%p15538_p5), %s10479_s17, 16, %s10481_s0, %s10468_s1  }
0x1451 PF: > { %p15291_p9 = scmp.ge.s32.totalorder %s15430_s24, 2  ;;  %s10492_s29 = sand.u32 1, %s15418_s21  }
0x1452   : > { %s10493_s18 = scalar_lea.sflag [#allocation4], %s10492_s29 }
0x1453   : > { %p15286_p10 = pnand %p15291_p9, %p15542_p6 }
0x1455   : > { %p15287_p11 = pneg %p15286_p10 }
0x1457   : > { %15413 = dma.done.wait (%p15287_p11), %s10493_s18, 16  }
0x1458   : > { %15415 = vsyncadd (%p15287_p11), %s10493_s18, 4294967280  ;;  %p23_p12 = scmp.ge.s32.totalorder %s15525_s27, 4   ;;  %s20951_s21 = smov %s15422_s22 }
0x1459   : > { %s20952_s22 = smov %s15426_s23  ;;  %s20953_s23 = smov %s15536_s30 }
0x145a   : > { %s20954_s24 = smov %s15525_s27  ;;  %25 = sbr.rel (!%p23_p12) target bundleno = 8 (0x8), region = 177 }
0x145f   :  { %10498 = vsyncpa [#allocation3], 1 }
0x1460   :  { %10500 = vsyncpa [#allocation3 + $0x1], 1 }
0x1461   :  { %10501 = vsyncpa [#allocation4], 1 }
0x1462   :  { %10503 = vsyncpa [#allocation4 + $0x1], 1 }

</bundles_post_ra>
